<compile_context>
chip_gen: v7x
topology: tpu7x:2x2x1
jax: 0.10.0
libtpu: 0.0.40
codegen_flags: <defaults>
</compile_context>

<pallas_src>
import functools

import numpy as np
import jax
import jax.numpy as jnp
from jax.experimental import pallas as pl
from jax.experimental.pallas import tpu as pltpu

# ----------------------------- config ----------------------------------------
IMG = 16            # image_size
PATCH = 4           # patch_size
GRID = IMG // PATCH             # 4 patches per side
NUM_PATCHES = GRID * GRID       # 16
PATCH_DIM = 3 * PATCH * PATCH   # 48
EMB = 32            # emb_dim
ENC_LAYERS = 2
ENC_HEADS = 2
DEC_LAYERS = 2
DEC_HEADS = 2
MASK_RATIO = 0.5
BATCH = 2
DTYPE = jnp.float32
LN_EPS = 1e-5       # torch nn.LayerNorm default (used for all norms)

BLOCK_KEYS = ('ln1_g', 'ln1_b', 'wqkv', 'bqkv', 'wo', 'bo',
              'ln2_g', 'ln2_b', 'w1', 'b1', 'w2', 'b2')
N_FLAT_INPUTS = 5 + len(BLOCK_KEYS) + 4 + len(BLOCK_KEYS) + 2   # = 35


# ----------------------------- kernel helpers ---------------------------------
def _layernorm(z, g, b):
    mu = jnp.mean(z, axis=-1, keepdims=True)
    var = jnp.mean((z - mu) ** 2, axis=-1, keepdims=True)
    return (z - mu) * jax.lax.rsqrt(var + LN_EPS) * g + b


def _vit_block(x, l, w):
    """Pre-norm ViT block on a single (T, C) sequence.

    Per-head projection weights are stacked on the leading (major) axis:
      wqkv row index = l*3*H + {q=0,k=1,v=2}*H + head   -> (C, head_dim)
      wo   row index = l*H + head                       -> (head_dim, C)
    so the kernel never slices or concatenates along the lane axis.
    """
    C = x.shape[-1]
    hd = w['wqkv'].shape[-1]
    num_heads = C // hd
    scale = hd ** -0.5

    h = _layernorm(x, w['ln1_g'][l], w['ln1_b'][l])
    attn = jnp.zeros_like(x)
    qkv_base = l * 3 * num_heads
    o_base = l * num_heads
    for hh in range(num_heads):                      # static unroll (2 heads)
        q = jnp.dot(h, w['wqkv'][qkv_base + hh],
                    preferred_element_type=jnp.float32) + w['bqkv'][qkv_base + hh]
        k = jnp.dot(h, w['wqkv'][qkv_base + num_heads + hh],
                    preferred_element_type=jnp.float32) + w['bqkv'][qkv_base + num_heads + hh]
        v = jnp.dot(h, w['wqkv'][qkv_base + 2 * num_heads + hh],
                    preferred_element_type=jnp.float32) + w['bqkv'][qkv_base + 2 * num_heads + hh]
        s = jnp.einsum('qd,kd->qk', q, k,
                       preferred_element_type=jnp.float32) * scale
        s = s - jnp.max(s, axis=-1, keepdims=True)
        e = jnp.exp(s)
        p = e * pl.reciprocal(jnp.sum(e, axis=-1, keepdims=True), approx=True)
        o = jnp.dot(p, v, preferred_element_type=jnp.float32)
        # concat(heads) @ Wo  ==  sum_h  o_h @ Wo_h   (no lane concat needed)
        attn = attn + jnp.dot(o, w['wo'][o_base + hh],
                              preferred_element_type=jnp.float32)
    x = x + attn + w['bo'][l]

    h2 = _layernorm(x, w['ln2_g'][l], w['ln2_b'][l])
    m = jnp.dot(h2, w['w1'][l], preferred_element_type=jnp.float32) + w['b1'][l]
    # TODO(synk): torch nn.GELU default is exact erf; tanh approximation used here.
    m = jax.nn.gelu(m, approximate=True)
    m = jnp.dot(m, w['w2'][l], preferred_element_type=jnp.float32) + w['b2'][l]
    return x + m


# ----------------------------- fused MAE kernel --------------------------------
def _mae_kernel(n_vis, fwd_ref, bwd_ref, *refs):
    in_refs = refs[:N_FLAT_INPUTS]
    out_ref = refs[N_FLAT_INPUTS]
    patch_sc, enc_tok_sc, feat_sc, dec_tok_sc = refs[N_FLAT_INPUTS + 1:]

    xp_ref, pw_ref, pb_ref, cls_ref, epos_ref = in_refs[:5]
    enc_w = dict(zip(BLOCK_KEYS, in_refs[5:5 + len(BLOCK_KEYS)]))
    off = 5 + len(BLOCK_KEYS)
    enc_lng_ref, enc_lnb_ref, mtok_ref, dpos_ref = in_refs[off:off + 4]
    dec_w = dict(zip(BLOCK_KEYS, in_refs[off + 4:off + 4 + len(BLOCK_KEYS)]))
    head_w_ref, head_b_ref = in_refs[off + 4 + len(BLOCK_KEYS):]

    b = pl.program_id(0)
    n_tok = patch_sc.shape[0]          # NUM_PATCHES
    emb = patch_sc.shape[1]            # EMB

    # --- patchify (Conv2d(3,EMB,P,P) as matmul) + positional embedding -------
    px = xp_ref[0].astype(jnp.float32)                                  # (T, 48)
    patches = jnp.dot(px, pw_ref[...],
                      preferred_element_type=jnp.float32) + pb_ref[...]
    patch_sc[...] = patches + epos_ref[...]                             # (T, C)

    # --- PatchShuffle: gather visible tokens, prepend cls token --------------
    enc_tok_sc[pl.ds(0, 1), :] = cls_ref[...]
    for t in range(n_vis):                                              # static unroll
        src = fwd_ref[t, b]                                             # SMEM scalar
        enc_tok_sc[pl.ds(t + 1, 1), :] = patch_sc[pl.ds(src, 1), :]

    # --- encoder transformer + final layer norm -------------------------------
    xe = enc_tok_sc[...]                                                # (n_vis+1, C)
    for l in range(enc_w['w1'].shape[0]):
        xe = _vit_block(xe, l, enc_w)
    xe = _layernorm(xe, enc_lng_ref[...], enc_lnb_ref[...])

    # --- decoder: append mask tokens, un-shuffle, add pos embedding -----------
    feat_sc[pl.ds(0, n_vis + 1), :] = xe
    feat_sc[pl.ds(n_vis + 1, n_tok - n_vis), :] = jnp.broadcast_to(
        mtok_ref[...], (n_tok - n_vis, emb))
    dec_tok_sc[pl.ds(0, 1), :] = feat_sc[pl.ds(0, 1), :]                # cls stays at 0
    for t in range(n_tok):
        src = bwd_ref[t, b] + 1
        dec_tok_sc[pl.ds(t + 1, 1), :] = feat_sc[pl.ds(src, 1), :]

    xd = dec_tok_sc[...] + dpos_ref[...]                                # (T+1, C)
    for l in range(dec_w['w1'].shape[0]):
        xd = _vit_block(xd, l, dec_w)

    # --- drop cls token and apply prediction head ------------------------------
    dec_tok_sc[...] = xd
    body = dec_tok_sc[pl.ds(1, n_tok), :]                               # (T, C)
    out = jnp.dot(body, head_w_ref[...],
                  preferred_element_type=jnp.float32) + head_b_ref[...]
    out_ref[0] = out.astype(out_ref.dtype)


def _const_spec(shape):
    zeros = (0,) * len(shape)
    return pl.BlockSpec(shape, lambda b, *_: zeros)     # resident across grid steps


def mae_fused_forward(params, x_patches, forward_indexes, backward_indexes):
    B, T, PD = x_patches.shape
    n_vis = forward_indexes.shape[0]

    flat_inputs = [x_patches,
                   params['patch_w'], params['patch_b'],
                   params['cls_token'], params['enc_pos']]
    flat_inputs += [params['enc'][k] for k in BLOCK_KEYS]
    flat_inputs += [params['enc_ln_g'], params['enc_ln_b'],
                    params['mask_token'], params['dec_pos']]
    flat_inputs += [params['dec'][k] for k in BLOCK_KEYS]
    flat_inputs += [params['head_w'], params['head_b']]

    in_specs = [pl.BlockSpec((1, T, PD), lambda b, *_: (b, 0, 0))]
    in_specs += [_const_spec(a.shape) for a in flat_inputs[1:]]
    out_spec = pl.BlockSpec((1, T, PD), lambda b, *_: (b, 0, 0))

    grid_spec = pltpu.PrefetchScalarGridSpec(
        num_scalar_prefetch=2,
        grid=(B,),
        in_specs=in_specs,
        out_specs=out_spec,
        scratch_shapes=[
            pltpu.VMEM((NUM_PATCHES, EMB), jnp.float32),      # patches + pos
            pltpu.VMEM((n_vis + 1, EMB), jnp.float32),        # encoder tokens
            pltpu.VMEM((NUM_PATCHES + 1, EMB), jnp.float32),  # enc feats + mask toks
            pltpu.VMEM((NUM_PATCHES + 1, EMB), jnp.float32),  # decoder tokens
        ])

    return pl.pallas_call(
        functools.partial(_mae_kernel, n_vis),
        out_shape=jax.ShapeDtypeStruct((B, T, PD), x_patches.dtype),
        grid_spec=grid_spec,
        compiler_params=pltpu.CompilerParams(
            dimension_semantics=("parallel",)),   # one image per TensorCore on v7x
    )(forward_indexes, backward_indexes, *flat_inputs)


# ----------------------------- JAX glue ----------------------------------------
def patch2img(patches_btf):
    """(B, T=(h w), F=(c p1 p2)) -> (B, 3, H, W)  (matches Rearrange in the module)."""
    B = patches_btf.shape[0]
    x = patches_btf.reshape(B, GRID, GRID, 3, PATCH, PATCH)
    x = x.transpose(0, 3, 1, 4, 2, 5)
    return x.reshape(B, 3, GRID * PATCH, GRID * PATCH)


@jax.jit
def mae_vit_forward(params, img, forward_indexes, backward_indexes):
    B = img.shape[0]
    # extract non-overlapping PATCHxPATCH patches -> (B, T, 3*P*P), feat order (c,p1,p2)
    x = img.reshape(B, 3, GRID, PATCH, GRID, PATCH)
    x = x.transpose(0, 2, 4, 1, 3, 5).reshape(B, NUM_PATCHES, PATCH_DIM)

    patches = mae_fused_forward(params, x, forward_indexes, backward_indexes)

    # mask is a pure function of the shuffle indices: original patch t is masked
    # iff its position in the shuffled order (backward_indexes) is >= n_visible.
    n_vis = forward_indexes.shape[0]
    mask_rows = (backward_indexes.T >= n_vis).astype(patches.dtype)      # (B, T)
    mask_patches = jnp.broadcast_to(mask_rows[:, :, None], patches.shape)

    return patch2img(patches), patch2img(mask_patches)


# ----------------------------- parameter init -----------------------------------
def _init_block_stack(key, num_layers, num_heads):
    hd = EMB // num_heads
    ks = jax.random.split(key, 4)
    s = 0.02
    rnd = lambda k, shape: (jax.random.normal(k, shape) * s).astype(DTYPE)
    return dict(
        ln1_g=jnp.ones((num_layers, 1, EMB), DTYPE),
        ln1_b=jnp.zeros((num_layers, 1, EMB), DTYPE),
        # qkv weights stacked [layer][q|k|v][head] on the leading axis (no lane splits)
        wqkv=rnd(ks[0], (num_layers * 3 * num_heads, EMB, hd)),
        bqkv=jnp.zeros((num_layers * 3 * num_heads, 1, hd), DTYPE),
        # output projection split per head: row l*H + head
        wo=rnd(ks[1], (num_layers * num_heads, hd, EMB)),
        bo=jnp.zeros((num_layers, 1, EMB), DTYPE),
        ln2_g=jnp.ones((num_layers, 1, EMB), DTYPE),
        ln2_b=jnp.zeros((num_layers, 1, EMB), DTYPE),
        w1=rnd(ks[2], (num_layers, EMB, 4 * EMB)),
        b1=jnp.zeros((num_layers, 1, 4 * EMB), DTYPE),
        w2=rnd(ks[3], (num_layers, 4 * EMB, EMB)),
        b2=jnp.zeros((num_layers, 1, EMB), DTYPE),
    )


def init_params(key):
    ks = jax.random.split(key, 8)
    s = 0.02
    rnd = lambda k, shape: (jax.random.normal(k, shape) * s).astype(DTYPE)
    return dict(
        patch_w=rnd(ks[0], (PATCH_DIM, EMB)),     # Conv2d(3, EMB, P, P) as (3*P*P, EMB)
        patch_b=jnp.zeros((1, EMB), DTYPE),
        cls_token=rnd(ks[1], (1, EMB)),
        enc_pos=rnd(ks[2], (NUM_PATCHES, EMB)),
        enc=_init_block_stack(ks[3], ENC_LAYERS, ENC_HEADS),
        enc_ln_g=jnp.ones((1, EMB), DTYPE),
        enc_ln_b=jnp.zeros((1, EMB), DTYPE),
        mask_token=rnd(ks[4], (1, EMB)),
        dec_pos=rnd(ks[5], (NUM_PATCHES + 1, EMB)),
        dec=_init_block_stack(ks[6], DEC_LAYERS, DEC_HEADS),
        head_w=rnd(ks[7], (EMB, PATCH_DIM)),
        head_b=jnp.zeros((1, PATCH_DIM), DTYPE),
    )


# host-side PatchShuffle block masking (numpy, deterministic via np.random.seed)
def block_indexes(num_patches_per_side, block_size):
    mask = np.zeros((num_patches_per_side, num_patches_per_side), dtype=np.float32)
    max_ij = num_patches_per_side - block_size
    i = np.random.randint(0, max_ij + 1)
    j = np.random.randint(0, max_ij + 1)
    mask[i:i + block_size, j:j + block_size] = 1
    mask = mask.flatten()
    fwd = np.where(mask == 0)[0]
    bwd = np.argsort(np.concatenate((fwd, np.where(mask == 1)[0])))
    return fwd, bwd


# ----------------------------- main ---------------------------------------------
if __name__ == "__main__":
    np.random.seed(0)
    key = jax.random.PRNGKey(0)
    k_img, k_param = jax.random.split(key)

    img = jax.random.normal(k_img, (BATCH, 3, IMG, IMG), dtype=DTYPE)   # NCHW like PyTorch
    params = init_params(k_param)

    bs = int((NUM_PATCHES * MASK_RATIO) ** 0.5)
    bs = max(1, min(bs, GRID))
    fwd_list, bwd_list = [], []
    for _ in range(BATCH):
        f, bk = block_indexes(GRID, bs)
        fwd_list.append(f)
        bwd_list.append(bk)
    forward_indexes = jnp.asarray(np.stack(fwd_list, axis=-1), dtype=jnp.int32)
    backward_indexes = jnp.asarray(np.stack(bwd_list, axis=-1), dtype=jnp.int32)

    pred_img, mask = mae_vit_forward(params, img, forward_indexes, backward_indexes)
    jax.block_until_ready((pred_img, mask))

    assert pred_img.shape == (BATCH, 3, IMG, IMG), pred_img.shape
    assert mask.shape == (BATCH, 3, IMG, IMG), mask.shape
    print("KERNEL_OK")
</pallas_src>

<mosaic_0001>
module attributes {stable_mosaic.version = 11 : i64} {
  func.func @_mae_kernel(%arg0: i32, %arg1: memref<12x2xi32, #tpu.memory_space<smem>>, %arg2: memref<16x2xi32, #tpu.memory_space<smem>>, %arg3: memref<1x16x48xf32, #tpu.memory_space<vmem>>, %arg4: memref<48x32xf32, #tpu.memory_space<vmem>>, %arg5: memref<1x32xf32, #tpu.memory_space<vmem>>, %arg6: memref<1x32xf32, #tpu.memory_space<vmem>>, %arg7: memref<16x32xf32, #tpu.memory_space<vmem>>, %arg8: memref<2x1x32xf32, #tpu.memory_space<vmem>>, %arg9: memref<2x1x32xf32, #tpu.memory_space<vmem>>, %arg10: memref<12x32x16xf32, #tpu.memory_space<vmem>>, %arg11: memref<12x1x16xf32, #tpu.memory_space<vmem>>, %arg12: memref<4x16x32xf32, #tpu.memory_space<vmem>>, %arg13: memref<2x1x32xf32, #tpu.memory_space<vmem>>, %arg14: memref<2x1x32xf32, #tpu.memory_space<vmem>>, %arg15: memref<2x1x32xf32, #tpu.memory_space<vmem>>, %arg16: memref<2x32x128xf32, #tpu.memory_space<vmem>>, %arg17: memref<2x1x128xf32, #tpu.memory_space<vmem>>, %arg18: memref<2x128x32xf32, #tpu.memory_space<vmem>>, %arg19: memref<2x1x32xf32, #tpu.memory_space<vmem>>, %arg20: memref<1x32xf32, #tpu.memory_space<vmem>>, %arg21: memref<1x32xf32, #tpu.memory_space<vmem>>, %arg22: memref<1x32xf32, #tpu.memory_space<vmem>>, %arg23: memref<17x32xf32, #tpu.memory_space<vmem>>, %arg24: memref<2x1x32xf32, #tpu.memory_space<vmem>>, %arg25: memref<2x1x32xf32, #tpu.memory_space<vmem>>, %arg26: memref<12x32x16xf32, #tpu.memory_space<vmem>>, %arg27: memref<12x1x16xf32, #tpu.memory_space<vmem>>, %arg28: memref<4x16x32xf32, #tpu.memory_space<vmem>>, %arg29: memref<2x1x32xf32, #tpu.memory_space<vmem>>, %arg30: memref<2x1x32xf32, #tpu.memory_space<vmem>>, %arg31: memref<2x1x32xf32, #tpu.memory_space<vmem>>, %arg32: memref<2x32x128xf32, #tpu.memory_space<vmem>>, %arg33: memref<2x1x128xf32, #tpu.memory_space<vmem>>, %arg34: memref<2x128x32xf32, #tpu.memory_space<vmem>>, %arg35: memref<2x1x32xf32, #tpu.memory_space<vmem>>, %arg36: memref<32x48xf32, #tpu.memory_space<vmem>>, %arg37: memref<1x48xf32, #tpu.memory_space<vmem>>, %arg38: memref<1x16x48xf32, #tpu.memory_space<vmem>>, %arg39: memref<16x32xf32, #tpu.memory_space<vmem>>, %arg40: memref<13x32xf32, #tpu.memory_space<vmem>>, %arg41: memref<17x32xf32, #tpu.memory_space<vmem>>, %arg42: memref<17x32xf32, #tpu.memory_space<vmem>>) attributes {dimension_semantics = [#tpu.dimension_semantics<parallel>], iteration_bounds = array<i64: 2>, scalar_prefetch = 2 : i64, scratch_operands = 4 : i64, tpu.core_type = #tpu.core_type<tc>, window_params = [{transform_indices = @transform_0, window_bounds = array<i64: 1, 16, 48>}, {pipeline_mode = #tpu.pipeline_mode<synchronous>, transform_indices = @transform_1, window_bounds = array<i64: 48, 32>}, {pipeline_mode = #tpu.pipeline_mode<synchronous>, transform_indices = @transform_2, window_bounds = array<i64: 1, 32>}, {pipeline_mode = #tpu.pipeline_mode<synchronous>, transform_indices = @transform_3, window_bounds = array<i64: 1, 32>}, {pipeline_mode = #tpu.pipeline_mode<synchronous>, transform_indices = @transform_4, window_bounds = array<i64: 16, 32>}, {pipeline_mode = #tpu.pipeline_mode<synchronous>, transform_indices = @transform_5, window_bounds = array<i64: 2, 1, 32>}, {pipeline_mode = #tpu.pipeline_mode<synchronous>, transform_indices = @transform_6, window_bounds = array<i64: 2, 1, 32>}, {pipeline_mode = #tpu.pipeline_mode<synchronous>, transform_indices = @transform_7, window_bounds = array<i64: 12, 32, 16>}, {pipeline_mode = #tpu.pipeline_mode<synchronous>, transform_indices = @transform_8, window_bounds = array<i64: 12, 1, 16>}, {pipeline_mode = #tpu.pipeline_mode<synchronous>, transform_indices = @transform_9, window_bounds = array<i64: 4, 16, 32>}, {pipeline_mode = #tpu.pipeline_mode<synchronous>, transform_indices = @transform_10, window_bounds = array<i64: 2, 1, 32>}, {pipeline_mode = #tpu.pipeline_mode<synchronous>, transform_indices = @transform_11, window_bounds = array<i64: 2, 1, 32>}, {pipeline_mode = #tpu.pipeline_mode<synchronous>, transform_indices = @transform_12, window_bounds = array<i64: 2, 1, 32>}, {pipeline_mode = #tpu.pipeline_mode<synchronous>, transform_indices = @transform_13, window_bounds = array<i64: 2, 32, 128>}, {pipeline_mode = #tpu.pipeline_mode<synchronous>, transform_indices = @transform_14, window_bounds = array<i64: 2, 1, 128>}, {pipeline_mode = #tpu.pipeline_mode<synchronous>, transform_indices = @transform_15, window_bounds = array<i64: 2, 128, 32>}, {pipeline_mode = #tpu.pipeline_mode<synchronous>, transform_indices = @transform_16, window_bounds = array<i64: 2, 1, 32>}, {pipeline_mode = #tpu.pipeline_mode<synchronous>, transform_indices = @transform_17, window_bounds = array<i64: 1, 32>}, {pipeline_mode = #tpu.pipeline_mode<synchronous>, transform_indices = @transform_18, window_bounds = array<i64: 1, 32>}, {pipeline_mode = #tpu.pipeline_mode<synchronous>, transform_indices = @transform_19, window_bounds = array<i64: 1, 32>}, {pipeline_mode = #tpu.pipeline_mode<synchronous>, transform_indices = @transform_20, window_bounds = array<i64: 17, 32>}, {pipeline_mode = #tpu.pipeline_mode<synchronous>, transform_indices = @transform_21, window_bounds = array<i64: 2, 1, 32>}, {pipeline_mode = #tpu.pipeline_mode<synchronous>, transform_indices = @transform_22, window_bounds = array<i64: 2, 1, 32>}, {pipeline_mode = #tpu.pipeline_mode<synchronous>, transform_indices = @transform_23, window_bounds = array<i64: 12, 32, 16>}, {pipeline_mode = #tpu.pipeline_mode<synchronous>, transform_indices = @transform_24, window_bounds = array<i64: 12, 1, 16>}, {pipeline_mode = #tpu.pipeline_mode<synchronous>, transform_indices = @transform_25, window_bounds = array<i64: 4, 16, 32>}, {pipeline_mode = #tpu.pipeline_mode<synchronous>, transform_indices = @transform_26, window_bounds = array<i64: 2, 1, 32>}, {pipeline_mode = #tpu.pipeline_mode<synchronous>, transform_indices = @transform_27, window_bounds = array<i64: 2, 1, 32>}, {pipeline_mode = #tpu.pipeline_mode<synchronous>, transform_indices = @transform_28, window_bounds = array<i64: 2, 1, 32>}, {pipeline_mode = #tpu.pipeline_mode<synchronous>, transform_indices = @transform_29, window_bounds = array<i64: 2, 32, 128>}, {pipeline_mode = #tpu.pipeline_mode<synchronous>, transform_indices = @transform_30, window_bounds = array<i64: 2, 1, 128>}, {pipeline_mode = #tpu.pipeline_mode<synchronous>, transform_indices = @transform_31, window_bounds = array<i64: 2, 128, 32>}, {pipeline_mode = #tpu.pipeline_mode<synchronous>, transform_indices = @transform_32, window_bounds = array<i64: 2, 1, 32>}, {pipeline_mode = #tpu.pipeline_mode<synchronous>, transform_indices = @transform_33, window_bounds = array<i64: 32, 48>}, {pipeline_mode = #tpu.pipeline_mode<synchronous>, transform_indices = @transform_34, window_bounds = array<i64: 1, 48>}, {transform_indices = @transform_35, window_bounds = array<i64: 1, 16, 48>}]} {
    %c0 = arith.constant 0 : index
    %c0_0 = arith.constant 0 : index
    %c0_1 = arith.constant 0 : index
    %0 = vector.load %arg3[%c0, %c0_0, %c0_1] : memref<1x16x48xf32, #tpu.memory_space<vmem>>, vector<1x16x48xf32>
    %1 = vector.shape_cast %0 : vector<1x16x48xf32> to vector<16x48xf32>
    %c0_2 = arith.constant 0 : index
    %c0_3 = arith.constant 0 : index
    %2 = vector.load %arg4[%c0_2, %c0_3] : memref<48x32xf32, #tpu.memory_space<vmem>>, vector<48x32xf32>
    %cst = arith.constant dense<0.000000e+00> : vector<16x32xf32>
    %3 = tpu.matmul %1, %2, %cst {dimension_numbers = #tpu.dot_dimension_numbers<[1], [0], [0], [1], [0, 0, 1, 1], [], []>} : vector<16x48xf32>, vector<48x32xf32>, vector<16x32xf32> -> vector<16x32xf32>
    %c0_4 = arith.constant 0 : index
    %c0_5 = arith.constant 0 : index
    %4 = vector.load %arg5[%c0_4, %c0_5] : memref<1x32xf32, #tpu.memory_space<vmem>>, vector<1x32xf32>
    %5 = vector.broadcast %4 : vector<1x32xf32> to vector<16x32xf32>
    %6 = arith.addf %3, %5 : vector<16x32xf32>
    %c0_6 = arith.constant 0 : index
    %c0_7 = arith.constant 0 : index
    %7 = vector.load %arg7[%c0_6, %c0_7] : memref<16x32xf32, #tpu.memory_space<vmem>>, vector<16x32xf32>
    %8 = arith.addf %6, %7 : vector<16x32xf32>
    %c0_8 = arith.constant 0 : index
    %c0_9 = arith.constant 0 : index
    %9 = vector.load %arg39[%c0_8, %c0_9] : memref<16x32xf32, #tpu.memory_space<vmem>>, vector<16x32xf32>
    tpu.vector_store %arg39[%c0_8, %c0_9], %8 {strides = array<i32>} : memref<16x32xf32, #tpu.memory_space<vmem>>, vector<16x32xf32>,
    %c0_10 = arith.constant 0 : index
    %c0_11 = arith.constant 0 : index
    %10 = vector.load %arg6[%c0_10, %c0_11] : memref<1x32xf32, #tpu.memory_space<vmem>>, vector<1x32xf32>
    %c0_12 = arith.constant 0 : index
    %c0_13 = arith.constant 0 : index
    %11 = vector.load %arg40[%c0_12, %c0_13] : memref<13x32xf32, #tpu.memory_space<vmem>>, vector<1x32xf32>
    tpu.vector_store %arg40[%c0_12, %c0_13], %10 {strides = array<i32>} : memref<13x32xf32, #tpu.memory_space<vmem>>, vector<1x32xf32>,
    %c0_14 = arith.constant 0 : index
    %12 = arith.index_cast %arg0 : i32 to index
    %13 = memref.load %arg1[%c0_14, %12] : memref<12x2xi32, #tpu.memory_space<smem>>
    %14 = arith.index_cast %13 : i32 to index
    %c0_15 = arith.constant 0 : index
    %15 = vector.load %arg39[%14, %c0_15] : memref<16x32xf32, #tpu.memory_space<vmem>>, vector<1x32xf32>
    %c1 = arith.constant 1 : index
    %c0_16 = arith.constant 0 : index
    %16 = vector.load %arg40[%c1, %c0_16] : memref<13x32xf32, #tpu.memory_space<vmem>>, vector<1x32xf32>
    tpu.vector_store %arg40[%c1, %c0_16], %15 {strides = array<i32>} : memref<13x32xf32, #tpu.memory_space<vmem>>, vector<1x32xf32>,
    %c1_17 = arith.constant 1 : index
    %17 = arith.index_cast %arg0 : i32 to index
    %18 = memref.load %arg1[%c1_17, %17] : memref<12x2xi32, #tpu.memory_space<smem>>
    %19 = arith.index_cast %18 : i32 to index
    %c0_18 = arith.constant 0 : index
    %20 = vector.load %arg39[%19, %c0_18] : memref<16x32xf32, #tpu.memory_space<vmem>>, vector<1x32xf32>
    %c2 = arith.constant 2 : index
    %c0_19 = arith.constant 0 : index
    %21 = vector.load %arg40[%c2, %c0_19] : memref<13x32xf32, #tpu.memory_space<vmem>>, vector<1x32xf32>
    tpu.vector_store %arg40[%c2, %c0_19], %20 {strides = array<i32>} : memref<13x32xf32, #tpu.memory_space<vmem>>, vector<1x32xf32>,
    %c2_20 = arith.constant 2 : index
    %22 = arith.index_cast %arg0 : i32 to index
    %23 = memref.load %arg1[%c2_20, %22] : memref<12x2xi32, #tpu.memory_space<smem>>
    %24 = arith.index_cast %23 : i32 to index
    %c0_21 = arith.constant 0 : index
    %25 = vector.load %arg39[%24, %c0_21] : memref<16x32xf32, #tpu.memory_space<vmem>>, vector<1x32xf32>
    %c3 = arith.constant 3 : index
    %c0_22 = arith.constant 0 : index
    %26 = vector.load %arg40[%c3, %c0_22] : memref<13x32xf32, #tpu.memory_space<vmem>>, vector<1x32xf32>
    tpu.vector_store %arg40[%c3, %c0_22], %25 {strides = array<i32>} : memref<13x32xf32, #tpu.memory_space<vmem>>, vector<1x32xf32>,
    %c3_23 = arith.constant 3 : index
    %27 = arith.index_cast %arg0 : i32 to index
    %28 = memref.load %arg1[%c3_23, %27] : memref<12x2xi32, #tpu.memory_space<smem>>
    %29 = arith.index_cast %28 : i32 to index
    %c0_24 = arith.constant 0 : index
    %30 = vector.load %arg39[%29, %c0_24] : memref<16x32xf32, #tpu.memory_space<vmem>>, vector<1x32xf32>
    %c4 = arith.constant 4 : index
    %c0_25 = arith.constant 0 : index
    %31 = vector.load %arg40[%c4, %c0_25] : memref<13x32xf32, #tpu.memory_space<vmem>>, vector<1x32xf32>
    tpu.vector_store %arg40[%c4, %c0_25], %30 {strides = array<i32>} : memref<13x32xf32, #tpu.memory_space<vmem>>, vector<1x32xf32>,
    %c4_26 = arith.constant 4 : index
    %32 = arith.index_cast %arg0 : i32 to index
    %33 = memref.load %arg1[%c4_26, %32] : memref<12x2xi32, #tpu.memory_space<smem>>
    %34 = arith.index_cast %33 : i32 to index
    %c0_27 = arith.constant 0 : index
    %35 = vector.load %arg39[%34, %c0_27] : memref<16x32xf32, #tpu.memory_space<vmem>>, vector<1x32xf32>
    %c5 = arith.constant 5 : index
    %c0_28 = arith.constant 0 : index
    %36 = vector.load %arg40[%c5, %c0_28] : memref<13x32xf32, #tpu.memory_space<vmem>>, vector<1x32xf32>
    tpu.vector_store %arg40[%c5, %c0_28], %35 {strides = array<i32>} : memref<13x32xf32, #tpu.memory_space<vmem>>, vector<1x32xf32>,
    %c5_29 = arith.constant 5 : index
    %37 = arith.index_cast %arg0 : i32 to index
    %38 = memref.load %arg1[%c5_29, %37] : memref<12x2xi32, #tpu.memory_space<smem>>
    %39 = arith.index_cast %38 : i32 to index
    %c0_30 = arith.constant 0 : index
    %40 = vector.load %arg39[%39, %c0_30] : memref<16x32xf32, #tpu.memory_space<vmem>>, vector<1x32xf32>
    %c6 = arith.constant 6 : index
    %c0_31 = arith.constant 0 : index
    %41 = vector.load %arg40[%c6, %c0_31] : memref<13x32xf32, #tpu.memory_space<vmem>>, vector<1x32xf32>
    tpu.vector_store %arg40[%c6, %c0_31], %40 {strides = array<i32>} : memref<13x32xf32, #tpu.memory_space<vmem>>, vector<1x32xf32>,
    %c6_32 = arith.constant 6 : index
    %42 = arith.index_cast %arg0 : i32 to index
    %43 = memref.load %arg1[%c6_32, %42] : memref<12x2xi32, #tpu.memory_space<smem>>
    %44 = arith.index_cast %43 : i32 to index
    %c0_33 = arith.constant 0 : index
    %45 = vector.load %arg39[%44, %c0_33] : memref<16x32xf32, #tpu.memory_space<vmem>>, vector<1x32xf32>
    %c7 = arith.constant 7 : index
    %c0_34 = arith.constant 0 : index
    %46 = vector.load %arg40[%c7, %c0_34] : memref<13x32xf32, #tpu.memory_space<vmem>>, vector<1x32xf32>
    tpu.vector_store %arg40[%c7, %c0_34], %45 {strides = array<i32>} : memref<13x32xf32, #tpu.memory_space<vmem>>, vector<1x32xf32>,
    %c7_35 = arith.constant 7 : index
    %47 = arith.index_cast %arg0 : i32 to index
    %48 = memref.load %arg1[%c7_35, %47] : memref<12x2xi32, #tpu.memory_space<smem>>
    %49 = arith.index_cast %48 : i32 to index
    %c0_36 = arith.constant 0 : index
    %50 = vector.load %arg39[%49, %c0_36] : memref<16x32xf32, #tpu.memory_space<vmem>>, vector<1x32xf32>
    %c8 = arith.constant 8 : index
    %c0_37 = arith.constant 0 : index
    %51 = vector.load %arg40[%c8, %c0_37] : memref<13x32xf32, #tpu.memory_space<vmem>>, vector<1x32xf32>
    tpu.vector_store %arg40[%c8, %c0_37], %50 {strides = array<i32>} : memref<13x32xf32, #tpu.memory_space<vmem>>, vector<1x32xf32>,
    %c8_38 = arith.constant 8 : index
    %52 = arith.index_cast %arg0 : i32 to index
    %53 = memref.load %arg1[%c8_38, %52] : memref<12x2xi32, #tpu.memory_space<smem>>
    %54 = arith.index_cast %53 : i32 to index
    %c0_39 = arith.constant 0 : index
    %55 = vector.load %arg39[%54, %c0_39] : memref<16x32xf32, #tpu.memory_space<vmem>>, vector<1x32xf32>
    %c9 = arith.constant 9 : index
    %c0_40 = arith.constant 0 : index
    %56 = vector.load %arg40[%c9, %c0_40] : memref<13x32xf32, #tpu.memory_space<vmem>>, vector<1x32xf32>
    tpu.vector_store %arg40[%c9, %c0_40], %55 {strides = array<i32>} : memref<13x32xf32, #tpu.memory_space<vmem>>, vector<1x32xf32>,
    %c9_41 = arith.constant 9 : index
    %57 = arith.index_cast %arg0 : i32 to index
    %58 = memref.load %arg1[%c9_41, %57] : memref<12x2xi32, #tpu.memory_space<smem>>
    %59 = arith.index_cast %58 : i32 to index
    %c0_42 = arith.constant 0 : index
    %60 = vector.load %arg39[%59, %c0_42] : memref<16x32xf32, #tpu.memory_space<vmem>>, vector<1x32xf32>
    %c10 = arith.constant 10 : index
    %c0_43 = arith.constant 0 : index
    %61 = vector.load %arg40[%c10, %c0_43] : memref<13x32xf32, #tpu.memory_space<vmem>>, vector<1x32xf32>
    tpu.vector_store %arg40[%c10, %c0_43], %60 {strides = array<i32>} : memref<13x32xf32, #tpu.memory_space<vmem>>, vector<1x32xf32>,
    %c10_44 = arith.constant 10 : index
    %62 = arith.index_cast %arg0 : i32 to index
    %63 = memref.load %arg1[%c10_44, %62] : memref<12x2xi32, #tpu.memory_space<smem>>
    %64 = arith.index_cast %63 : i32 to index
    %c0_45 = arith.constant 0 : index
    %65 = vector.load %arg39[%64, %c0_45] : memref<16x32xf32, #tpu.memory_space<vmem>>, vector<1x32xf32>
    %c11 = arith.constant 11 : index
    %c0_46 = arith.constant 0 : index
    %66 = vector.load %arg40[%c11, %c0_46] : memref<13x32xf32, #tpu.memory_space<vmem>>, vector<1x32xf32>
    tpu.vector_store %arg40[%c11, %c0_46], %65 {strides = array<i32>} : memref<13x32xf32, #tpu.memory_space<vmem>>, vector<1x32xf32>,
    %c11_47 = arith.constant 11 : index
    %67 = arith.index_cast %arg0 : i32 to index
    %68 = memref.load %arg1[%c11_47, %67] : memref<12x2xi32, #tpu.memory_space<smem>>
    %69 = arith.index_cast %68 : i32 to index
    %c0_48 = arith.constant 0 : index
    %70 = vector.load %arg39[%69, %c0_48] : memref<16x32xf32, #tpu.memory_space<vmem>>, vector<1x32xf32>
    %c12 = arith.constant 12 : index
    %c0_49 = arith.constant 0 : index
    %71 = vector.load %arg40[%c12, %c0_49] : memref<13x32xf32, #tpu.memory_space<vmem>>, vector<1x32xf32>
    tpu.vector_store %arg40[%c12, %c0_49], %70 {strides = array<i32>} : memref<13x32xf32, #tpu.memory_space<vmem>>, vector<1x32xf32>,
    %c0_50 = arith.constant 0 : index
    %c0_51 = arith.constant 0 : index
    %72 = vector.load %arg40[%c0_50, %c0_51] : memref<13x32xf32, #tpu.memory_space<vmem>>, vector<13x32xf32>
    %c0_52 = arith.constant 0 : index
    %c0_53 = arith.constant 0 : index
    %c0_54 = arith.constant 0 : index
    %73 = vector.load %arg8[%c0_52, %c0_53, %c0_54] : memref<2x1x32xf32, #tpu.memory_space<vmem>>, vector<1x1x32xf32>
    %74 = vector.shape_cast %73 : vector<1x1x32xf32> to vector<1x32xf32>
    %c0_55 = arith.constant 0 : index
    %c0_56 = arith.constant 0 : index
    %c0_57 = arith.constant 0 : index
    %75 = vector.load %arg9[%c0_55, %c0_56, %c0_57] : memref<2x1x32xf32, #tpu.memory_space<vmem>>, vector<1x1x32xf32>
    %76 = vector.shape_cast %75 : vector<1x1x32xf32> to vector<1x32xf32>
    %cst_58 = arith.constant dense<0.000000e+00> : vector<13xf32>
    %77 = vector.multi_reduction <add>, %72, %cst_58 [1] : vector<13x32xf32> to vector<13xf32>
    %78 = vector.shape_cast %77 : vector<13xf32> to vector<13x1xf32>
    %cst_59 = arith.constant 3.200000e+01 : f32
    %79 = vector.broadcast %cst_59 : f32 to vector<13x1xf32>
    %80 = arith.divf %78, %79 : vector<13x1xf32>
    %81 = vector.broadcast %80 : vector<13x1xf32> to vector<13x32xf32>
    %82 = arith.subf %72, %81 : vector<13x32xf32>
    %83 = arith.mulf %82, %82 : vector<13x32xf32>
    %cst_60 = arith.constant dense<0.000000e+00> : vector<13xf32>
    %84 = vector.multi_reduction <add>, %83, %cst_60 [1] : vector<13x32xf32> to vector<13xf32>
    %85 = vector.shape_cast %84 : vector<13xf32> to vector<13x1xf32>
    %cst_61 = arith.constant 3.200000e+01 : f32
    %86 = vector.broadcast %cst_61 : f32 to vector<13x1xf32>
    %87 = arith.divf %85, %86 : vector<13x1xf32>
    %88 = vector.broadcast %80 : vector<13x1xf32> to vector<13x32xf32>
    %89 = arith.subf %72, %88 : vector<13x32xf32>
    %cst_62 = arith.constant 9.99999974E-6 : f32
    %90 = vector.broadcast %cst_62 : f32 to vector<13x1xf32>
    %91 = arith.addf %87, %90 : vector<13x1xf32>
    %92 = math.rsqrt %91 : vector<13x1xf32>
    %93 = vector.broadcast %92 : vector<13x1xf32> to vector<13x32xf32>
    %94 = arith.mulf %89, %93 : vector<13x32xf32>
    %95 = vector.broadcast %74 : vector<1x32xf32> to vector<13x32xf32>
    %96 = arith.mulf %94, %95 : vector<13x32xf32>
    %97 = vector.broadcast %76 : vector<1x32xf32> to vector<13x32xf32>
    %98 = arith.addf %96, %97 : vector<13x32xf32>
    %cst_63 = arith.constant 0.000000e+00 : f32
    %99 = vector.broadcast %cst_63 : f32 to vector<13x32xf32>
    %c0_64 = arith.constant 0 : index
    %c0_65 = arith.constant 0 : index
    %c0_66 = arith.constant 0 : index
    %100 = vector.load %arg10[%c0_64, %c0_65, %c0_66] : memref<12x32x16xf32, #tpu.memory_space<vmem>>, vector<1x32x16xf32>
    %101 = vector.shape_cast %100 : vector<1x32x16xf32> to vector<32x16xf32>
    %cst_67 = arith.constant dense<0.000000e+00> : vector<13x16xf32>
    %102 = tpu.matmul %98, %101, %cst_67 {dimension_numbers = #tpu.dot_dimension_numbers<[1], [0], [0], [1], [0, 0, 1, 1], [], []>} : vector<13x32xf32>, vector<32x16xf32>, vector<13x16xf32> -> vector<13x16xf32>
    %c0_68 = arith.constant 0 : index
    %c0_69 = arith.constant 0 : index
    %c0_70 = arith.constant 0 : index
    %103 = vector.load %arg11[%c0_68, %c0_69, %c0_70] : memref<12x1x16xf32, #tpu.memory_space<vmem>>, vector<1x1x16xf32>
    %104 = vector.shape_cast %103 : vector<1x1x16xf32> to vector<1x16xf32>
    %105 = vector.broadcast %104 : vector<1x16xf32> to vector<13x16xf32>
    %106 = arith.addf %102, %105 : vector<13x16xf32>
    %c2_71 = arith.constant 2 : index
    %c0_72 = arith.constant 0 : index
    %c0_73 = arith.constant 0 : index
    %107 = vector.load %arg10[%c2_71, %c0_72, %c0_73] : memref<12x32x16xf32, #tpu.memory_space<vmem>>, vector<1x32x16xf32>
    %108 = vector.shape_cast %107 : vector<1x32x16xf32> to vector<32x16xf32>
    %cst_74 = arith.constant dense<0.000000e+00> : vector<13x16xf32>
    %109 = tpu.matmul %98, %108, %cst_74 {dimension_numbers = #tpu.dot_dimension_numbers<[1], [0], [0], [1], [0, 0, 1, 1], [], []>} : vector<13x32xf32>, vector<32x16xf32>, vector<13x16xf32> -> vector<13x16xf32>
    %c2_75 = arith.constant 2 : index
    %c0_76 = arith.constant 0 : index
    %c0_77 = arith.constant 0 : index
    %110 = vector.load %arg11[%c2_75, %c0_76, %c0_77] : memref<12x1x16xf32, #tpu.memory_space<vmem>>, vector<1x1x16xf32>
    %111 = vector.shape_cast %110 : vector<1x1x16xf32> to vector<1x16xf32>
    %112 = vector.broadcast %111 : vector<1x16xf32> to vector<13x16xf32>
    %113 = arith.addf %109, %112 : vector<13x16xf32>
    %c4_78 = arith.constant 4 : index
    %c0_79 = arith.constant 0 : index
    %c0_80 = arith.constant 0 : index
    %114 = vector.load %arg10[%c4_78, %c0_79, %c0_80] : memref<12x32x16xf32, #tpu.memory_space<vmem>>, vector<1x32x16xf32>
    %115 = vector.shape_cast %114 : vector<1x32x16xf32> to vector<32x16xf32>
    %cst_81 = arith.constant dense<0.000000e+00> : vector<13x16xf32>
    %116 = tpu.matmul %98, %115, %cst_81 {dimension_numbers = #tpu.dot_dimension_numbers<[1], [0], [0], [1], [0, 0, 1, 1], [], []>} : vector<13x32xf32>, vector<32x16xf32>, vector<13x16xf32> -> vector<13x16xf32>
    %c4_82 = arith.constant 4 : index
    %c0_83 = arith.constant 0 : index
    %c0_84 = arith.constant 0 : index
    %117 = vector.load %arg11[%c4_82, %c0_83, %c0_84] : memref<12x1x16xf32, #tpu.memory_space<vmem>>, vector<1x1x16xf32>
    %118 = vector.shape_cast %117 : vector<1x1x16xf32> to vector<1x16xf32>
    %119 = vector.broadcast %118 : vector<1x16xf32> to vector<13x16xf32>
    %120 = arith.addf %116, %119 : vector<13x16xf32>
    "tpu.trace_start"() <{level = 10 : i32, message = "qd,kd->qk"}> : () -> ()
    %cst_85 = arith.constant dense<0.000000e+00> : vector<13x13xf32>
    %121 = tpu.matmul %106, %113, %cst_85 {dimension_numbers = #tpu.dot_dimension_numbers<[1], [1], [0], [0], [0, 0, 1, 0], [], []>} : vector<13x16xf32>, vector<13x16xf32>, vector<13x13xf32> -> vector<13x13xf32>
    "tpu.trace_stop"() : () -> ()
    %cst_86 = arith.constant 2.500000e-01 : f32
    %122 = vector.broadcast %cst_86 : f32 to vector<13x13xf32>
    %123 = arith.mulf %121, %122 : vector<13x13xf32>
    %cst_87 = arith.constant dense<0xFF800000> : vector<13xf32>
    %124 = vector.multi_reduction <maximumf>, %123, %cst_87 [1] : vector<13x13xf32> to vector<13xf32>
    %125 = vector.shape_cast %124 : vector<13xf32> to vector<13x1xf32>
    %126 = vector.broadcast %125 : vector<13x1xf32> to vector<13x13xf32>
    %127 = arith.subf %123, %126 : vector<13x13xf32>
    %128 = math.exp %127 : vector<13x13xf32>
    %cst_88 = arith.constant dense<0.000000e+00> : vector<13xf32>
    %129 = vector.multi_reduction <add>, %128, %cst_88 [1] : vector<13x13xf32> to vector<13xf32>
    %130 = vector.shape_cast %129 : vector<13xf32> to vector<13x1xf32>
    %131 = tpu.reciprocal %130 {approx = true} : vector<13x1xf32> -> vector<13x1xf32>
    %132 = vector.broadcast %131 : vector<13x1xf32> to vector<13x13xf32>
    %133 = arith.mulf %128, %132 : vector<13x13xf32>
    %cst_89 = arith.constant dense<0.000000e+00> : vector<13x16xf32>
    %134 = tpu.matmul %133, %120, %cst_89 {dimension_numbers = #tpu.dot_dimension_numbers<[1], [0], [0], [1], [0, 0, 1, 1], [], []>} : vector<13x13xf32>, vector<13x16xf32>, vector<13x16xf32> -> vector<13x16xf32>
    %c0_90 = arith.constant 0 : index
    %c0_91 = arith.constant 0 : index
    %c0_92 = arith.constant 0 : index
    %135 = vector.load %arg12[%c0_90, %c0_91, %c0_92] : memref<4x16x32xf32, #tpu.memory_space<vmem>>, vector<1x16x32xf32>
    %136 = vector.shape_cast %135 : vector<1x16x32xf32> to vector<16x32xf32>
    %cst_93 = arith.constant dense<0.000000e+00> : vector<13x32xf32>
    %137 = tpu.matmul %134, %136, %cst_93 {dimension_numbers = #tpu.dot_dimension_numbers<[1], [0], [0], [1], [0, 0, 1, 1], [], []>} : vector<13x16xf32>, vector<16x32xf32>, vector<13x32xf32> -> vector<13x32xf32>
    %138 = arith.addf %99, %137 : vector<13x32xf32>
    %c1_94 = arith.constant 1 : index
    %c0_95 = arith.constant 0 : index
    %c0_96 = arith.constant 0 : index
    %139 = vector.load %arg10[%c1_94, %c0_95, %c0_96] : memref<12x32x16xf32, #tpu.memory_space<vmem>>, vector<1x32x16xf32>
    %140 = vector.shape_cast %139 : vector<1x32x16xf32> to vector<32x16xf32>
    %cst_97 = arith.constant dense<0.000000e+00> : vector<13x16xf32>
    %141 = tpu.matmul %98, %140, %cst_97 {dimension_numbers = #tpu.dot_dimension_numbers<[1], [0], [0], [1], [0, 0, 1, 1], [], []>} : vector<13x32xf32>, vector<32x16xf32>, vector<13x16xf32> -> vector<13x16xf32>
    %c1_98 = arith.constant 1 : index
    %c0_99 = arith.constant 0 : index
    %c0_100 = arith.constant 0 : index
    %142 = vector.load %arg11[%c1_98, %c0_99, %c0_100] : memref<12x1x16xf32, #tpu.memory_space<vmem>>, vector<1x1x16xf32>
    %143 = vector.shape_cast %142 : vector<1x1x16xf32> to vector<1x16xf32>
    %144 = vector.broadcast %143 : vector<1x16xf32> to vector<13x16xf32>
    %145 = arith.addf %141, %144 : vector<13x16xf32>
    %c3_101 = arith.constant 3 : index
    %c0_102 = arith.constant 0 : index
    %c0_103 = arith.constant 0 : index
    %146 = vector.load %arg10[%c3_101, %c0_102, %c0_103] : memref<12x32x16xf32, #tpu.memory_space<vmem>>, vector<1x32x16xf32>
    %147 = vector.shape_cast %146 : vector<1x32x16xf32> to vector<32x16xf32>
    %cst_104 = arith.constant dense<0.000000e+00> : vector<13x16xf32>
    %148 = tpu.matmul %98, %147, %cst_104 {dimension_numbers = #tpu.dot_dimension_numbers<[1], [0], [0], [1], [0, 0, 1, 1], [], []>} : vector<13x32xf32>, vector<32x16xf32>, vector<13x16xf32> -> vector<13x16xf32>
    %c3_105 = arith.constant 3 : index
    %c0_106 = arith.constant 0 : index
    %c0_107 = arith.constant 0 : index
    %149 = vector.load %arg11[%c3_105, %c0_106, %c0_107] : memref<12x1x16xf32, #tpu.memory_space<vmem>>, vector<1x1x16xf32>
    %150 = vector.shape_cast %149 : vector<1x1x16xf32> to vector<1x16xf32>
    %151 = vector.broadcast %150 : vector<1x16xf32> to vector<13x16xf32>
    %152 = arith.addf %148, %151 : vector<13x16xf32>
    %c5_108 = arith.constant 5 : index
    %c0_109 = arith.constant 0 : index
    %c0_110 = arith.constant 0 : index
    %153 = vector.load %arg10[%c5_108, %c0_109, %c0_110] : memref<12x32x16xf32, #tpu.memory_space<vmem>>, vector<1x32x16xf32>
    %154 = vector.shape_cast %153 : vector<1x32x16xf32> to vector<32x16xf32>
    %cst_111 = arith.constant dense<0.000000e+00> : vector<13x16xf32>
    %155 = tpu.matmul %98, %154, %cst_111 {dimension_numbers = #tpu.dot_dimension_numbers<[1], [0], [0], [1], [0, 0, 1, 1], [], []>} : vector<13x32xf32>, vector<32x16xf32>, vector<13x16xf32> -> vector<13x16xf32>
    %c5_112 = arith.constant 5 : index
    %c0_113 = arith.constant 0 : index
    %c0_114 = arith.constant 0 : index
    %156 = vector.load %arg11[%c5_112, %c0_113, %c0_114] : memref<12x1x16xf32, #tpu.memory_space<vmem>>, vector<1x1x16xf32>
    %157 = vector.shape_cast %156 : vector<1x1x16xf32> to vector<1x16xf32>
    %158 = vector.broadcast %157 : vector<1x16xf32> to vector<13x16xf32>
    %159 = arith.addf %155, %158 : vector<13x16xf32>
    "tpu.trace_start"() <{level = 10 : i32, message = "qd,kd->qk"}> : () -> ()
    %cst_115 = arith.constant dense<0.000000e+00> : vector<13x13xf32>
    %160 = tpu.matmul %145, %152, %cst_115 {dimension_numbers = #tpu.dot_dimension_numbers<[1], [1], [0], [0], [0, 0, 1, 0], [], []>} : vector<13x16xf32>, vector<13x16xf32>, vector<13x13xf32> -> vector<13x13xf32>
    "tpu.trace_stop"() : () -> ()
    %cst_116 = arith.constant 2.500000e-01 : f32
    %161 = vector.broadcast %cst_116 : f32 to vector<13x13xf32>
    %162 = arith.mulf %160, %161 : vector<13x13xf32>
    %cst_117 = arith.constant dense<0xFF800000> : vector<13xf32>
    %163 = vector.multi_reduction <maximumf>, %162, %cst_117 [1] : vector<13x13xf32> to vector<13xf32>
    %164 = vector.shape_cast %163 : vector<13xf32> to vector<13x1xf32>
    %165 = vector.broadcast %164 : vector<13x1xf32> to vector<13x13xf32>
    %166 = arith.subf %162, %165 : vector<13x13xf32>
    %167 = math.exp %166 : vector<13x13xf32>
    %cst_118 = arith.constant dense<0.000000e+00> : vector<13xf32>
    %168 = vector.multi_reduction <add>, %167, %cst_118 [1] : vector<13x13xf32> to vector<13xf32>
    %169 = vector.shape_cast %168 : vector<13xf32> to vector<13x1xf32>
    %170 = tpu.reciprocal %169 {approx = true} : vector<13x1xf32> -> vector<13x1xf32>
    %171 = vector.broadcast %170 : vector<13x1xf32> to vector<13x13xf32>
    %172 = arith.mulf %167, %171 : vector<13x13xf32>
    %cst_119 = arith.constant dense<0.000000e+00> : vector<13x16xf32>
    %173 = tpu.matmul %172, %159, %cst_119 {dimension_numbers = #tpu.dot_dimension_numbers<[1], [0], [0], [1], [0, 0, 1, 1], [], []>} : vector<13x13xf32>, vector<13x16xf32>, vector<13x16xf32> -> vector<13x16xf32>
    %c1_120 = arith.constant 1 : index
    %c0_121 = arith.constant 0 : index
    %c0_122 = arith.constant 0 : index
    %174 = vector.load %arg12[%c1_120, %c0_121, %c0_122] : memref<4x16x32xf32, #tpu.memory_space<vmem>>, vector<1x16x32xf32>
    %175 = vector.shape_cast %174 : vector<1x16x32xf32> to vector<16x32xf32>
    %cst_123 = arith.constant dense<0.000000e+00> : vector<13x32xf32>
    %176 = tpu.matmul %173, %175, %cst_123 {dimension_numbers = #tpu.dot_dimension_numbers<[1], [0], [0], [1], [0, 0, 1, 1], [], []>} : vector<13x16xf32>, vector<16x32xf32>, vector<13x32xf32> -> vector<13x32xf32>
    %177 = arith.addf %138, %176 : vector<13x32xf32>
    %178 = arith.addf %72, %177 : vector<13x32xf32>
    %c0_124 = arith.constant 0 : index
    %c0_125 = arith.constant 0 : index
    %c0_126 = arith.constant 0 : index
    %179 = vector.load %arg13[%c0_124, %c0_125, %c0_126] : memref<2x1x32xf32, #tpu.memory_space<vmem>>, vector<1x1x32xf32>
    %180 = vector.shape_cast %179 : vector<1x1x32xf32> to vector<1x32xf32>
    %181 = vector.broadcast %180 : vector<1x32xf32> to vector<13x32xf32>
    %182 = arith.addf %178, %181 : vector<13x32xf32>
    %c0_127 = arith.constant 0 : index
    %c0_128 = arith.constant 0 : index
    %c0_129 = arith.constant 0 : index
    %183 = vector.load %arg14[%c0_127, %c0_128, %c0_129] : memref<2x1x32xf32, #tpu.memory_space<vmem>>, vector<1x1x32xf32>
    %184 = vector.shape_cast %183 : vector<1x1x32xf32> to vector<1x32xf32>
    %c0_130 = arith.constant 0 : index
    %c0_131 = arith.constant 0 : index
    %c0_132 = arith.constant 0 : index
    %185 = vector.load %arg15[%c0_130, %c0_131, %c0_132] : memref<2x1x32xf32, #tpu.memory_space<vmem>>, vector<1x1x32xf32>
    %186 = vector.shape_cast %185 : vector<1x1x32xf32> to vector<1x32xf32>
    %cst_133 = arith.constant dense<0.000000e+00> : vector<13xf32>
    %187 = vector.multi_reduction <add>, %182, %cst_133 [1] : vector<13x32xf32> to vector<13xf32>
    %188 = vector.shape_cast %187 : vector<13xf32> to vector<13x1xf32>
    %cst_134 = arith.constant 3.200000e+01 : f32
    %189 = vector.broadcast %cst_134 : f32 to vector<13x1xf32>
    %190 = arith.divf %188, %189 : vector<13x1xf32>
    %191 = vector.broadcast %190 : vector<13x1xf32> to vector<13x32xf32>
    %192 = arith.subf %182, %191 : vector<13x32xf32>
    %193 = arith.mulf %192, %192 : vector<13x32xf32>
    %cst_135 = arith.constant dense<0.000000e+00> : vector<13xf32>
    %194 = vector.multi_reduction <add>, %193, %cst_135 [1] : vector<13x32xf32> to vector<13xf32>
    %195 = vector.shape_cast %194 : vector<13xf32> to vector<13x1xf32>
    %cst_136 = arith.constant 3.200000e+01 : f32
    %196 = vector.broadcast %cst_136 : f32 to vector<13x1xf32>
    %197 = arith.divf %195, %196 : vector<13x1xf32>
    %198 = vector.broadcast %190 : vector<13x1xf32> to vector<13x32xf32>
    %199 = arith.subf %182, %198 : vector<13x32xf32>
    %cst_137 = arith.constant 9.99999974E-6 : f32
    %200 = vector.broadcast %cst_137 : f32 to vector<13x1xf32>
    %201 = arith.addf %197, %200 : vector<13x1xf32>
    %202 = math.rsqrt %201 : vector<13x1xf32>
    %203 = vector.broadcast %202 : vector<13x1xf32> to vector<13x32xf32>
    %204 = arith.mulf %199, %203 : vector<13x32xf32>
    %205 = vector.broadcast %184 : vector<1x32xf32> to vector<13x32xf32>
    %206 = arith.mulf %204, %205 : vector<13x32xf32>
    %207 = vector.broadcast %186 : vector<1x32xf32> to vector<13x32xf32>
    %208 = arith.addf %206, %207 : vector<13x32xf32>
    %c0_138 = arith.constant 0 : index
    %c0_139 = arith.constant 0 : index
    %c0_140 = arith.constant 0 : index
    %209 = vector.load %arg16[%c0_138, %c0_139, %c0_140] : memref<2x32x128xf32, #tpu.memory_space<vmem>>, vector<1x32x128xf32>
    %210 = vector.shape_cast %209 : vector<1x32x128xf32> to vector<32x128xf32>
    %cst_141 = arith.constant dense<0.000000e+00> : vector<13x128xf32>
    %211 = tpu.matmul %208, %210, %cst_141 {dimension_numbers = #tpu.dot_dimension_numbers<[1], [0], [0], [1], [0, 0, 1, 1], [], []>} : vector<13x32xf32>, vector<32x128xf32>, vector<13x128xf32> -> vector<13x128xf32>
    %c0_142 = arith.constant 0 : index
    %c0_143 = arith.constant 0 : index
    %c0_144 = arith.constant 0 : index
    %212 = vector.load %arg17[%c0_142, %c0_143, %c0_144] : memref<2x1x128xf32, #tpu.memory_space<vmem>>, vector<1x1x128xf32>
    %213 = vector.shape_cast %212 : vector<1x1x128xf32> to vector<1x128xf32>
    %214 = vector.broadcast %213 : vector<1x128xf32> to vector<13x128xf32>
    %215 = arith.addf %211, %214 : vector<13x128xf32>
    %216 = arith.mulf %215, %215 : vector<13x128xf32>
    %217 = arith.mulf %215, %216 : vector<13x128xf32>
    %cst_145 = arith.constant 4.471500e-02 : f32
    %218 = vector.broadcast %cst_145 : f32 to vector<13x128xf32>
    %219 = arith.mulf %218, %217 : vector<13x128xf32>
    %220 = arith.addf %215, %219 : vector<13x128xf32>
    %cst_146 = arith.constant 0.797884583 : f32
    %221 = vector.broadcast %cst_146 : f32 to vector<13x128xf32>
    %222 = arith.mulf %221, %220 : vector<13x128xf32>
    %223 = math.tanh %222 : vector<13x128xf32>
    %cst_147 = arith.constant 1.000000e+00 : f32
    %224 = vector.broadcast %cst_147 : f32 to vector<13x128xf32>
    %225 = arith.addf %224, %223 : vector<13x128xf32>
    %cst_148 = arith.constant 5.000000e-01 : f32
    %226 = vector.broadcast %cst_148 : f32 to vector<13x128xf32>
    %227 = arith.mulf %226, %225 : vector<13x128xf32>
    %228 = arith.mulf %215, %227 : vector<13x128xf32>
    %c0_149 = arith.constant 0 : index
    %c0_150 = arith.constant 0 : index
    %c0_151 = arith.constant 0 : index
    %229 = vector.load %arg18[%c0_149, %c0_150, %c0_151] : memref<2x128x32xf32, #tpu.memory_space<vmem>>, vector<1x128x32xf32>
    %230 = vector.shape_cast %229 : vector<1x128x32xf32> to vector<128x32xf32>
    %cst_152 = arith.constant dense<0.000000e+00> : vector<13x32xf32>
    %231 = tpu.matmul %228, %230, %cst_152 {dimension_numbers = #tpu.dot_dimension_numbers<[1], [0], [0], [1], [0, 0, 1, 1], [], []>} : vector<13x128xf32>, vector<128x32xf32>, vector<13x32xf32> -> vector<13x32xf32>
    %c0_153 = arith.constant 0 : index
    %c0_154 = arith.constant 0 : index
    %c0_155 = arith.constant 0 : index
    %232 = vector.load %arg19[%c0_153, %c0_154, %c0_155] : memref<2x1x32xf32, #tpu.memory_space<vmem>>, vector<1x1x32xf32>
    %233 = vector.shape_cast %232 : vector<1x1x32xf32> to vector<1x32xf32>
    %234 = vector.broadcast %233 : vector<1x32xf32> to vector<13x32xf32>
    %235 = arith.addf %231, %234 : vector<13x32xf32>
    %236 = arith.addf %182, %235 : vector<13x32xf32>
    %c1_156 = arith.constant 1 : index
    %c0_157 = arith.constant 0 : index
    %c0_158 = arith.constant 0 : index
    %237 = vector.load %arg8[%c1_156, %c0_157, %c0_158] : memref<2x1x32xf32, #tpu.memory_space<vmem>>, vector<1x1x32xf32>
    %238 = vector.shape_cast %237 : vector<1x1x32xf32> to vector<1x32xf32>
    %c1_159 = arith.constant 1 : index
    %c0_160 = arith.constant 0 : index
    %c0_161 = arith.constant 0 : index
    %239 = vector.load %arg9[%c1_159, %c0_160, %c0_161] : memref<2x1x32xf32, #tpu.memory_space<vmem>>, vector<1x1x32xf32>
    %240 = vector.shape_cast %239 : vector<1x1x32xf32> to vector<1x32xf32>
    %cst_162 = arith.constant dense<0.000000e+00> : vector<13xf32>
    %241 = vector.multi_reduction <add>, %236, %cst_162 [1] : vector<13x32xf32> to vector<13xf32>
    %242 = vector.shape_cast %241 : vector<13xf32> to vector<13x1xf32>
    %cst_163 = arith.constant 3.200000e+01 : f32
    %243 = vector.broadcast %cst_163 : f32 to vector<13x1xf32>
    %244 = arith.divf %242, %243 : vector<13x1xf32>
    %245 = vector.broadcast %244 : vector<13x1xf32> to vector<13x32xf32>
    %246 = arith.subf %236, %245 : vector<13x32xf32>
    %247 = arith.mulf %246, %246 : vector<13x32xf32>
    %cst_164 = arith.constant dense<0.000000e+00> : vector<13xf32>
    %248 = vector.multi_reduction <add>, %247, %cst_164 [1] : vector<13x32xf32> to vector<13xf32>
    %249 = vector.shape_cast %248 : vector<13xf32> to vector<13x1xf32>
    %cst_165 = arith.constant 3.200000e+01 : f32
    %250 = vector.broadcast %cst_165 : f32 to vector<13x1xf32>
    %251 = arith.divf %249, %250 : vector<13x1xf32>
    %252 = vector.broadcast %244 : vector<13x1xf32> to vector<13x32xf32>
    %253 = arith.subf %236, %252 : vector<13x32xf32>
    %cst_166 = arith.constant 9.99999974E-6 : f32
    %254 = vector.broadcast %cst_166 : f32 to vector<13x1xf32>
    %255 = arith.addf %251, %254 : vector<13x1xf32>
    %256 = math.rsqrt %255 : vector<13x1xf32>
    %257 = vector.broadcast %256 : vector<13x1xf32> to vector<13x32xf32>
    %258 = arith.mulf %253, %257 : vector<13x32xf32>
    %259 = vector.broadcast %238 : vector<1x32xf32> to vector<13x32xf32>
    %260 = arith.mulf %258, %259 : vector<13x32xf32>
    %261 = vector.broadcast %240 : vector<1x32xf32> to vector<13x32xf32>
    %262 = arith.addf %260, %261 : vector<13x32xf32>
    %cst_167 = arith.constant 0.000000e+00 : f32
    %263 = vector.broadcast %cst_167 : f32 to vector<13x32xf32>
    %c6_168 = arith.constant 6 : index
    %c0_169 = arith.constant 0 : index
    %c0_170 = arith.constant 0 : index
    %264 = vector.load %arg10[%c6_168, %c0_169, %c0_170] : memref<12x32x16xf32, #tpu.memory_space<vmem>>, vector<1x32x16xf32>
    %265 = vector.shape_cast %264 : vector<1x32x16xf32> to vector<32x16xf32>
    %cst_171 = arith.constant dense<0.000000e+00> : vector<13x16xf32>
    %266 = tpu.matmul %262, %265, %cst_171 {dimension_numbers = #tpu.dot_dimension_numbers<[1], [0], [0], [1], [0, 0, 1, 1], [], []>} : vector<13x32xf32>, vector<32x16xf32>, vector<13x16xf32> -> vector<13x16xf32>
    %c6_172 = arith.constant 6 : index
    %c0_173 = arith.constant 0 : index
    %c0_174 = arith.constant 0 : index
    %267 = vector.load %arg11[%c6_172, %c0_173, %c0_174] : memref<12x1x16xf32, #tpu.memory_space<vmem>>, vector<1x1x16xf32>
    %268 = vector.shape_cast %267 : vector<1x1x16xf32> to vector<1x16xf32>
    %269 = vector.broadcast %268 : vector<1x16xf32> to vector<13x16xf32>
    %270 = arith.addf %266, %269 : vector<13x16xf32>
    %c8_175 = arith.constant 8 : index
    %c0_176 = arith.constant 0 : index
    %c0_177 = arith.constant 0 : index
    %271 = vector.load %arg10[%c8_175, %c0_176, %c0_177] : memref<12x32x16xf32, #tpu.memory_space<vmem>>, vector<1x32x16xf32>
    %272 = vector.shape_cast %271 : vector<1x32x16xf32> to vector<32x16xf32>
    %cst_178 = arith.constant dense<0.000000e+00> : vector<13x16xf32>
    %273 = tpu.matmul %262, %272, %cst_178 {dimension_numbers = #tpu.dot_dimension_numbers<[1], [0], [0], [1], [0, 0, 1, 1], [], []>} : vector<13x32xf32>, vector<32x16xf32>, vector<13x16xf32> -> vector<13x16xf32>
    %c8_179 = arith.constant 8 : index
    %c0_180 = arith.constant 0 : index
    %c0_181 = arith.constant 0 : index
    %274 = vector.load %arg11[%c8_179, %c0_180, %c0_181] : memref<12x1x16xf32, #tpu.memory_space<vmem>>, vector<1x1x16xf32>
    %275 = vector.shape_cast %274 : vector<1x1x16xf32> to vector<1x16xf32>
    %276 = vector.broadcast %275 : vector<1x16xf32> to vector<13x16xf32>
    %277 = arith.addf %273, %276 : vector<13x16xf32>
    %c10_182 = arith.constant 10 : index
    %c0_183 = arith.constant 0 : index
    %c0_184 = arith.constant 0 : index
    %278 = vector.load %arg10[%c10_182, %c0_183, %c0_184] : memref<12x32x16xf32, #tpu.memory_space<vmem>>, vector<1x32x16xf32>
    %279 = vector.shape_cast %278 : vector<1x32x16xf32> to vector<32x16xf32>
    %cst_185 = arith.constant dense<0.000000e+00> : vector<13x16xf32>
    %280 = tpu.matmul %262, %279, %cst_185 {dimension_numbers = #tpu.dot_dimension_numbers<[1], [0], [0], [1], [0, 0, 1, 1], [], []>} : vector<13x32xf32>, vector<32x16xf32>, vector<13x16xf32> -> vector<13x16xf32>
    %c10_186 = arith.constant 10 : index
    %c0_187 = arith.constant 0 : index
    %c0_188 = arith.constant 0 : index
    %281 = vector.load %arg11[%c10_186, %c0_187, %c0_188] : memref<12x1x16xf32, #tpu.memory_space<vmem>>, vector<1x1x16xf32>
    %282 = vector.shape_cast %281 : vector<1x1x16xf32> to vector<1x16xf32>
    %283 = vector.broadcast %282 : vector<1x16xf32> to vector<13x16xf32>
    %284 = arith.addf %280, %283 : vector<13x16xf32>
    "tpu.trace_start"() <{level = 10 : i32, message = "qd,kd->qk"}> : () -> ()
    %cst_189 = arith.constant dense<0.000000e+00> : vector<13x13xf32>
    %285 = tpu.matmul %270, %277, %cst_189 {dimension_numbers = #tpu.dot_dimension_numbers<[1], [1], [0], [0], [0, 0, 1, 0], [], []>} : vector<13x16xf32>, vector<13x16xf32>, vector<13x13xf32> -> vector<13x13xf32>
    "tpu.trace_stop"() : () -> ()
    %cst_190 = arith.constant 2.500000e-01 : f32
    %286 = vector.broadcast %cst_190 : f32 to vector<13x13xf32>
    %287 = arith.mulf %285, %286 : vector<13x13xf32>
    %cst_191 = arith.constant dense<0xFF800000> : vector<13xf32>
    %288 = vector.multi_reduction <maximumf>, %287, %cst_191 [1] : vector<13x13xf32> to vector<13xf32>
    %289 = vector.shape_cast %288 : vector<13xf32> to vector<13x1xf32>
    %290 = vector.broadcast %289 : vector<13x1xf32> to vector<13x13xf32>
    %291 = arith.subf %287, %290 : vector<13x13xf32>
    %292 = math.exp %291 : vector<13x13xf32>
    %cst_192 = arith.constant dense<0.000000e+00> : vector<13xf32>
    %293 = vector.multi_reduction <add>, %292, %cst_192 [1] : vector<13x13xf32> to vector<13xf32>
    %294 = vector.shape_cast %293 : vector<13xf32> to vector<13x1xf32>
    %295 = tpu.reciprocal %294 {approx = true} : vector<13x1xf32> -> vector<13x1xf32>
    %296 = vector.broadcast %295 : vector<13x1xf32> to vector<13x13xf32>
    %297 = arith.mulf %292, %296 : vector<13x13xf32>
    %cst_193 = arith.constant dense<0.000000e+00> : vector<13x16xf32>
    %298 = tpu.matmul %297, %284, %cst_193 {dimension_numbers = #tpu.dot_dimension_numbers<[1], [0], [0], [1], [0, 0, 1, 1], [], []>} : vector<13x13xf32>, vector<13x16xf32>, vector<13x16xf32> -> vector<13x16xf32>
    %c2_194 = arith.constant 2 : index
    %c0_195 = arith.constant 0 : index
    %c0_196 = arith.constant 0 : index
    %299 = vector.load %arg12[%c2_194, %c0_195, %c0_196] : memref<4x16x32xf32, #tpu.memory_space<vmem>>, vector<1x16x32xf32>
    %300 = vector.shape_cast %299 : vector<1x16x32xf32> to vector<16x32xf32>
    %cst_197 = arith.constant dense<0.000000e+00> : vector<13x32xf32>
    %301 = tpu.matmul %298, %300, %cst_197 {dimension_numbers = #tpu.dot_dimension_numbers<[1], [0], [0], [1], [0, 0, 1, 1], [], []>} : vector<13x16xf32>, vector<16x32xf32>, vector<13x32xf32> -> vector<13x32xf32>
    %302 = arith.addf %263, %301 : vector<13x32xf32>
    %c7_198 = arith.constant 7 : index
    %c0_199 = arith.constant 0 : index
    %c0_200 = arith.constant 0 : index
    %303 = vector.load %arg10[%c7_198, %c0_199, %c0_200] : memref<12x32x16xf32, #tpu.memory_space<vmem>>, vector<1x32x16xf32>
    %304 = vector.shape_cast %303 : vector<1x32x16xf32> to vector<32x16xf32>
    %cst_201 = arith.constant dense<0.000000e+00> : vector<13x16xf32>
    %305 = tpu.matmul %262, %304, %cst_201 {dimension_numbers = #tpu.dot_dimension_numbers<[1], [0], [0], [1], [0, 0, 1, 1], [], []>} : vector<13x32xf32>, vector<32x16xf32>, vector<13x16xf32> -> vector<13x16xf32>
    %c7_202 = arith.constant 7 : index
    %c0_203 = arith.constant 0 : index
    %c0_204 = arith.constant 0 : index
    %306 = vector.load %arg11[%c7_202, %c0_203, %c0_204] : memref<12x1x16xf32, #tpu.memory_space<vmem>>, vector<1x1x16xf32>
    %307 = vector.shape_cast %306 : vector<1x1x16xf32> to vector<1x16xf32>
    %308 = vector.broadcast %307 : vector<1x16xf32> to vector<13x16xf32>
    %309 = arith.addf %305, %308 : vector<13x16xf32>
    %c9_205 = arith.constant 9 : index
    %c0_206 = arith.constant 0 : index
    %c0_207 = arith.constant 0 : index
    %310 = vector.load %arg10[%c9_205, %c0_206, %c0_207] : memref<12x32x16xf32, #tpu.memory_space<vmem>>, vector<1x32x16xf32>
    %311 = vector.shape_cast %310 : vector<1x32x16xf32> to vector<32x16xf32>
    %cst_208 = arith.constant dense<0.000000e+00> : vector<13x16xf32>
    %312 = tpu.matmul %262, %311, %cst_208 {dimension_numbers = #tpu.dot_dimension_numbers<[1], [0], [0], [1], [0, 0, 1, 1], [], []>} : vector<13x32xf32>, vector<32x16xf32>, vector<13x16xf32> -> vector<13x16xf32>
    %c9_209 = arith.constant 9 : index
    %c0_210 = arith.constant 0 : index
    %c0_211 = arith.constant 0 : index
    %313 = vector.load %arg11[%c9_209, %c0_210, %c0_211] : memref<12x1x16xf32, #tpu.memory_space<vmem>>, vector<1x1x16xf32>
    %314 = vector.shape_cast %313 : vector<1x1x16xf32> to vector<1x16xf32>
    %315 = vector.broadcast %314 : vector<1x16xf32> to vector<13x16xf32>
    %316 = arith.addf %312, %315 : vector<13x16xf32>
    %c11_212 = arith.constant 11 : index
    %c0_213 = arith.constant 0 : index
    %c0_214 = arith.constant 0 : index
    %317 = vector.load %arg10[%c11_212, %c0_213, %c0_214] : memref<12x32x16xf32, #tpu.memory_space<vmem>>, vector<1x32x16xf32>
    %318 = vector.shape_cast %317 : vector<1x32x16xf32> to vector<32x16xf32>
    %cst_215 = arith.constant dense<0.000000e+00> : vector<13x16xf32>
    %319 = tpu.matmul %262, %318, %cst_215 {dimension_numbers = #tpu.dot_dimension_numbers<[1], [0], [0], [1], [0, 0, 1, 1], [], []>} : vector<13x32xf32>, vector<32x16xf32>, vector<13x16xf32> -> vector<13x16xf32>
    %c11_216 = arith.constant 11 : index
    %c0_217 = arith.constant 0 : index
    %c0_218 = arith.constant 0 : index
    %320 = vector.load %arg11[%c11_216, %c0_217, %c0_218] : memref<12x1x16xf32, #tpu.memory_space<vmem>>, vector<1x1x16xf32>
    %321 = vector.shape_cast %320 : vector<1x1x16xf32> to vector<1x16xf32>
    %322 = vector.broadcast %321 : vector<1x16xf32> to vector<13x16xf32>
    %323 = arith.addf %319, %322 : vector<13x16xf32>
    "tpu.trace_start"() <{level = 10 : i32, message = "qd,kd->qk"}> : () -> ()
    %cst_219 = arith.constant dense<0.000000e+00> : vector<13x13xf32>
    %324 = tpu.matmul %309, %316, %cst_219 {dimension_numbers = #tpu.dot_dimension_numbers<[1], [1], [0], [0], [0, 0, 1, 0], [], []>} : vector<13x16xf32>, vector<13x16xf32>, vector<13x13xf32> -> vector<13x13xf32>
    "tpu.trace_stop"() : () -> ()
    %cst_220 = arith.constant 2.500000e-01 : f32
    %325 = vector.broadcast %cst_220 : f32 to vector<13x13xf32>
    %326 = arith.mulf %324, %325 : vector<13x13xf32>
    %cst_221 = arith.constant dense<0xFF800000> : vector<13xf32>
    %327 = vector.multi_reduction <maximumf>, %326, %cst_221 [1] : vector<13x13xf32> to vector<13xf32>
    %328 = vector.shape_cast %327 : vector<13xf32> to vector<13x1xf32>
    %329 = vector.broadcast %328 : vector<13x1xf32> to vector<13x13xf32>
    %330 = arith.subf %326, %329 : vector<13x13xf32>
    %331 = math.exp %330 : vector<13x13xf32>
    %cst_222 = arith.constant dense<0.000000e+00> : vector<13xf32>
    %332 = vector.multi_reduction <add>, %331, %cst_222 [1] : vector<13x13xf32> to vector<13xf32>
    %333 = vector.shape_cast %332 : vector<13xf32> to vector<13x1xf32>
    %334 = tpu.reciprocal %333 {approx = true} : vector<13x1xf32> -> vector<13x1xf32>
    %335 = vector.broadcast %334 : vector<13x1xf32> to vector<13x13xf32>
    %336 = arith.mulf %331, %335 : vector<13x13xf32>
    %cst_223 = arith.constant dense<0.000000e+00> : vector<13x16xf32>
    %337 = tpu.matmul %336, %323, %cst_223 {dimension_numbers = #tpu.dot_dimension_numbers<[1], [0], [0], [1], [0, 0, 1, 1], [], []>} : vector<13x13xf32>, vector<13x16xf32>, vector<13x16xf32> -> vector<13x16xf32>
    %c3_224 = arith.constant 3 : index
    %c0_225 = arith.constant 0 : index
    %c0_226 = arith.constant 0 : index
    %338 = vector.load %arg12[%c3_224, %c0_225, %c0_226] : memref<4x16x32xf32, #tpu.memory_space<vmem>>, vector<1x16x32xf32>
    %339 = vector.shape_cast %338 : vector<1x16x32xf32> to vector<16x32xf32>
    %cst_227 = arith.constant dense<0.000000e+00> : vector<13x32xf32>
    %340 = tpu.matmul %337, %339, %cst_227 {dimension_numbers = #tpu.dot_dimension_numbers<[1], [0], [0], [1], [0, 0, 1, 1], [], []>} : vector<13x16xf32>, vector<16x32xf32>, vector<13x32xf32> -> vector<13x32xf32>
    %341 = arith.addf %302, %340 : vector<13x32xf32>
    %342 = arith.addf %236, %341 : vector<13x32xf32>
    %c1_228 = arith.constant 1 : index
    %c0_229 = arith.constant 0 : index
    %c0_230 = arith.constant 0 : index
    %343 = vector.load %arg13[%c1_228, %c0_229, %c0_230] : memref<2x1x32xf32, #tpu.memory_space<vmem>>, vector<1x1x32xf32>
    %344 = vector.shape_cast %343 : vector<1x1x32xf32> to vector<1x32xf32>
    %345 = vector.broadcast %344 : vector<1x32xf32> to vector<13x32xf32>
    %346 = arith.addf %342, %345 : vector<13x32xf32>
    %c1_231 = arith.constant 1 : index
    %c0_232 = arith.constant 0 : index
    %c0_233 = arith.constant 0 : index
    %347 = vector.load %arg14[%c1_231, %c0_232, %c0_233] : memref<2x1x32xf32, #tpu.memory_space<vmem>>, vector<1x1x32xf32>
    %348 = vector.shape_cast %347 : vector<1x1x32xf32> to vector<1x32xf32>
    %c1_234 = arith.constant 1 : index
    %c0_235 = arith.constant 0 : index
    %c0_236 = arith.constant 0 : index
    %349 = vector.load %arg15[%c1_234, %c0_235, %c0_236] : memref<2x1x32xf32, #tpu.memory_space<vmem>>, vector<1x1x32xf32>
    %350 = vector.shape_cast %349 : vector<1x1x32xf32> to vector<1x32xf32>
    %cst_237 = arith.constant dense<0.000000e+00> : vector<13xf32>
    %351 = vector.multi_reduction <add>, %346, %cst_237 [1] : vector<13x32xf32> to vector<13xf32>
    %352 = vector.shape_cast %351 : vector<13xf32> to vector<13x1xf32>
    %cst_238 = arith.constant 3.200000e+01 : f32
    %353 = vector.broadcast %cst_238 : f32 to vector<13x1xf32>
    %354 = arith.divf %352, %353 : vector<13x1xf32>
    %355 = vector.broadcast %354 : vector<13x1xf32> to vector<13x32xf32>
    %356 = arith.subf %346, %355 : vector<13x32xf32>
    %357 = arith.mulf %356, %356 : vector<13x32xf32>
    %cst_239 = arith.constant dense<0.000000e+00> : vector<13xf32>
    %358 = vector.multi_reduction <add>, %357, %cst_239 [1] : vector<13x32xf32> to vector<13xf32>
    %359 = vector.shape_cast %358 : vector<13xf32> to vector<13x1xf32>
    %cst_240 = arith.constant 3.200000e+01 : f32
    %360 = vector.broadcast %cst_240 : f32 to vector<13x1xf32>
    %361 = arith.divf %359, %360 : vector<13x1xf32>
    %362 = vector.broadcast %354 : vector<13x1xf32> to vector<13x32xf32>
    %363 = arith.subf %346, %362 : vector<13x32xf32>
    %cst_241 = arith.constant 9.99999974E-6 : f32
    %364 = vector.broadcast %cst_241 : f32 to vector<13x1xf32>
    %365 = arith.addf %361, %364 : vector<13x1xf32>
    %366 = math.rsqrt %365 : vector<13x1xf32>
    %367 = vector.broadcast %366 : vector<13x1xf32> to vector<13x32xf32>
    %368 = arith.mulf %363, %367 : vector<13x32xf32>
    %369 = vector.broadcast %348 : vector<1x32xf32> to vector<13x32xf32>
    %370 = arith.mulf %368, %369 : vector<13x32xf32>
    %371 = vector.broadcast %350 : vector<1x32xf32> to vector<13x32xf32>
    %372 = arith.addf %370, %371 : vector<13x32xf32>
    %c1_242 = arith.constant 1 : index
    %c0_243 = arith.constant 0 : index
    %c0_244 = arith.constant 0 : index
    %373 = vector.load %arg16[%c1_242, %c0_243, %c0_244] : memref<2x32x128xf32, #tpu.memory_space<vmem>>, vector<1x32x128xf32>
    %374 = vector.shape_cast %373 : vector<1x32x128xf32> to vector<32x128xf32>
    %cst_245 = arith.constant dense<0.000000e+00> : vector<13x128xf32>
    %375 = tpu.matmul %372, %374, %cst_245 {dimension_numbers = #tpu.dot_dimension_numbers<[1], [0], [0], [1], [0, 0, 1, 1], [], []>} : vector<13x32xf32>, vector<32x128xf32>, vector<13x128xf32> -> vector<13x128xf32>
    %c1_246 = arith.constant 1 : index
    %c0_247 = arith.constant 0 : index
    %c0_248 = arith.constant 0 : index
    %376 = vector.load %arg17[%c1_246, %c0_247, %c0_248] : memref<2x1x128xf32, #tpu.memory_space<vmem>>, vector<1x1x128xf32>
    %377 = vector.shape_cast %376 : vector<1x1x128xf32> to vector<1x128xf32>
    %378 = vector.broadcast %377 : vector<1x128xf32> to vector<13x128xf32>
    %379 = arith.addf %375, %378 : vector<13x128xf32>
    %380 = arith.mulf %379, %379 : vector<13x128xf32>
    %381 = arith.mulf %379, %380 : vector<13x128xf32>
    %cst_249 = arith.constant 4.471500e-02 : f32
    %382 = vector.broadcast %cst_249 : f32 to vector<13x128xf32>
    %383 = arith.mulf %382, %381 : vector<13x128xf32>
    %384 = arith.addf %379, %383 : vector<13x128xf32>
    %cst_250 = arith.constant 0.797884583 : f32
    %385 = vector.broadcast %cst_250 : f32 to vector<13x128xf32>
    %386 = arith.mulf %385, %384 : vector<13x128xf32>
    %387 = math.tanh %386 : vector<13x128xf32>
    %cst_251 = arith.constant 1.000000e+00 : f32
    %388 = vector.broadcast %cst_251 : f32 to vector<13x128xf32>
    %389 = arith.addf %388, %387 : vector<13x128xf32>
    %cst_252 = arith.constant 5.000000e-01 : f32
    %390 = vector.broadcast %cst_252 : f32 to vector<13x128xf32>
    %391 = arith.mulf %390, %389 : vector<13x128xf32>
    %392 = arith.mulf %379, %391 : vector<13x128xf32>
    %c1_253 = arith.constant 1 : index
    %c0_254 = arith.constant 0 : index
    %c0_255 = arith.constant 0 : index
    %393 = vector.load %arg18[%c1_253, %c0_254, %c0_255] : memref<2x128x32xf32, #tpu.memory_space<vmem>>, vector<1x128x32xf32>
    %394 = vector.shape_cast %393 : vector<1x128x32xf32> to vector<128x32xf32>
    %cst_256 = arith.constant dense<0.000000e+00> : vector<13x32xf32>
    %395 = tpu.matmul %392, %394, %cst_256 {dimension_numbers = #tpu.dot_dimension_numbers<[1], [0], [0], [1], [0, 0, 1, 1], [], []>} : vector<13x128xf32>, vector<128x32xf32>, vector<13x32xf32> -> vector<13x32xf32>
    %c1_257 = arith.constant 1 : index
    %c0_258 = arith.constant 0 : index
    %c0_259 = arith.constant 0 : index
    %396 = vector.load %arg19[%c1_257, %c0_258, %c0_259] : memref<2x1x32xf32, #tpu.memory_space<vmem>>, vector<1x1x32xf32>
    %397 = vector.shape_cast %396 : vector<1x1x32xf32> to vector<1x32xf32>
    %398 = vector.broadcast %397 : vector<1x32xf32> to vector<13x32xf32>
    %399 = arith.addf %395, %398 : vector<13x32xf32>
    %400 = arith.addf %346, %399 : vector<13x32xf32>
    %c0_260 = arith.constant 0 : index
    %c0_261 = arith.constant 0 : index
    %401 = vector.load %arg20[%c0_260, %c0_261] : memref<1x32xf32, #tpu.memory_space<vmem>>, vector<1x32xf32>
    %c0_262 = arith.constant 0 : index
    %c0_263 = arith.constant 0 : index
    %402 = vector.load %arg21[%c0_262, %c0_263] : memref<1x32xf32, #tpu.memory_space<vmem>>, vector<1x32xf32>
    %cst_264 = arith.constant dense<0.000000e+00> : vector<13xf32>
    %403 = vector.multi_reduction <add>, %400, %cst_264 [1] : vector<13x32xf32> to vector<13xf32>
    %404 = vector.shape_cast %403 : vector<13xf32> to vector<13x1xf32>
    %cst_265 = arith.constant 3.200000e+01 : f32
    %405 = vector.broadcast %cst_265 : f32 to vector<13x1xf32>
    %406 = arith.divf %404, %405 : vector<13x1xf32>
    %407 = vector.broadcast %406 : vector<13x1xf32> to vector<13x32xf32>
    %408 = arith.subf %400, %407 : vector<13x32xf32>
    %409 = arith.mulf %408, %408 : vector<13x32xf32>
    %cst_266 = arith.constant dense<0.000000e+00> : vector<13xf32>
    %410 = vector.multi_reduction <add>, %409, %cst_266 [1] : vector<13x32xf32> to vector<13xf32>
    %411 = vector.shape_cast %410 : vector<13xf32> to vector<13x1xf32>
    %cst_267 = arith.constant 3.200000e+01 : f32
    %412 = vector.broadcast %cst_267 : f32 to vector<13x1xf32>
    %413 = arith.divf %411, %412 : vector<13x1xf32>
    %414 = vector.broadcast %406 : vector<13x1xf32> to vector<13x32xf32>
    %415 = arith.subf %400, %414 : vector<13x32xf32>
    %cst_268 = arith.constant 9.99999974E-6 : f32
    %416 = vector.broadcast %cst_268 : f32 to vector<13x1xf32>
    %417 = arith.addf %413, %416 : vector<13x1xf32>
    %418 = math.rsqrt %417 : vector<13x1xf32>
    %419 = vector.broadcast %418 : vector<13x1xf32> to vector<13x32xf32>
    %420 = arith.mulf %415, %419 : vector<13x32xf32>
    %421 = vector.broadcast %401 : vector<1x32xf32> to vector<13x32xf32>
    %422 = arith.mulf %420, %421 : vector<13x32xf32>
    %423 = vector.broadcast %402 : vector<1x32xf32> to vector<13x32xf32>
    %424 = arith.addf %422, %423 : vector<13x32xf32>
    %c0_269 = arith.constant 0 : index
    %c0_270 = arith.constant 0 : index
    %425 = vector.load %arg41[%c0_269, %c0_270] : memref<17x32xf32, #tpu.memory_space<vmem>>, vector<13x32xf32>
    tpu.vector_store %arg41[%c0_269, %c0_270], %424 {strides = array<i32>} : memref<17x32xf32, #tpu.memory_space<vmem>>, vector<13x32xf32>,
    %c0_271 = arith.constant 0 : index
    %c0_272 = arith.constant 0 : index
    %426 = vector.load %arg22[%c0_271, %c0_272] : memref<1x32xf32, #tpu.memory_space<vmem>>, vector<1x32xf32>
    %427 = vector.shape_cast %426 : vector<1x32xf32> to vector<1x32xf32>
    %428 = vector.broadcast %427 : vector<1x32xf32> to vector<4x32xf32>
    %c13 = arith.constant 13 : index
    %c0_273 = arith.constant 0 : index
    %429 = vector.load %arg41[%c13, %c0_273] : memref<17x32xf32, #tpu.memory_space<vmem>>, vector<4x32xf32>
    tpu.vector_store %arg41[%c13, %c0_273], %428 {strides = array<i32>} : memref<17x32xf32, #tpu.memory_space<vmem>>, vector<4x32xf32>,
    %c0_274 = arith.constant 0 : index
    %c0_275 = arith.constant 0 : index
    %430 = vector.load %arg41[%c0_274, %c0_275] : memref<17x32xf32, #tpu.memory_space<vmem>>, vector<1x32xf32>
    %c0_276 = arith.constant 0 : index
    %c0_277 = arith.constant 0 : index
    %431 = vector.load %arg42[%c0_276, %c0_277] : memref<17x32xf32, #tpu.memory_space<vmem>>, vector<1x32xf32>
    tpu.vector_store %arg42[%c0_276, %c0_277], %430 {strides = array<i32>} : memref<17x32xf32, #tpu.memory_space<vmem>>, vector<1x32xf32>,
    %c0_278 = arith.constant 0 : index
    %432 = arith.index_cast %arg0 : i32 to index
    %433 = memref.load %arg2[%c0_278, %432] : memref<16x2xi32, #tpu.memory_space<smem>>
    %c1_i32 = arith.constant 1 : i32
    %434 = arith.addi %433, %c1_i32 : i32
    %435 = arith.index_cast %434 : i32 to index
    %c0_279 = arith.constant 0 : index
    %436 = vector.load %arg41[%435, %c0_279] : memref<17x32xf32, #tpu.memory_space<vmem>>, vector<1x32xf32>
    %c1_280 = arith.constant 1 : index
    %c0_281 = arith.constant 0 : index
    %437 = vector.load %arg42[%c1_280, %c0_281] : memref<17x32xf32, #tpu.memory_space<vmem>>, vector<1x32xf32>
    tpu.vector_store %arg42[%c1_280, %c0_281], %436 {strides = array<i32>} : memref<17x32xf32, #tpu.memory_space<vmem>>, vector<1x32xf32>,
    %c1_282 = arith.constant 1 : index
    %438 = arith.index_cast %arg0 : i32 to index
    %439 = memref.load %arg2[%c1_282, %438] : memref<16x2xi32, #tpu.memory_space<smem>>
    %c1_i32_283 = arith.constant 1 : i32
    %440 = arith.addi %439, %c1_i32_283 : i32
    %441 = arith.index_cast %440 : i32 to index
    %c0_284 = arith.constant 0 : index
    %442 = vector.load %arg41[%441, %c0_284] : memref<17x32xf32, #tpu.memory_space<vmem>>, vector<1x32xf32>
    %c2_285 = arith.constant 2 : index
    %c0_286 = arith.constant 0 : index
    %443 = vector.load %arg42[%c2_285, %c0_286] : memref<17x32xf32, #tpu.memory_space<vmem>>, vector<1x32xf32>
    tpu.vector_store %arg42[%c2_285, %c0_286], %442 {strides = array<i32>} : memref<17x32xf32, #tpu.memory_space<vmem>>, vector<1x32xf32>,
    %c2_287 = arith.constant 2 : index
    %444 = arith.index_cast %arg0 : i32 to index
    %445 = memref.load %arg2[%c2_287, %444] : memref<16x2xi32, #tpu.memory_space<smem>>
    %c1_i32_288 = arith.constant 1 : i32
    %446 = arith.addi %445, %c1_i32_288 : i32
    %447 = arith.index_cast %446 : i32 to index
    %c0_289 = arith.constant 0 : index
    %448 = vector.load %arg41[%447, %c0_289] : memref<17x32xf32, #tpu.memory_space<vmem>>, vector<1x32xf32>
    %c3_290 = arith.constant 3 : index
    %c0_291 = arith.constant 0 : index
    %449 = vector.load %arg42[%c3_290, %c0_291] : memref<17x32xf32, #tpu.memory_space<vmem>>, vector<1x32xf32>
    tpu.vector_store %arg42[%c3_290, %c0_291], %448 {strides = array<i32>} : memref<17x32xf32, #tpu.memory_space<vmem>>, vector<1x32xf32>,
    %c3_292 = arith.constant 3 : index
    %450 = arith.index_cast %arg0 : i32 to index
    %451 = memref.load %arg2[%c3_292, %450] : memref<16x2xi32, #tpu.memory_space<smem>>
    %c1_i32_293 = arith.constant 1 : i32
    %452 = arith.addi %451, %c1_i32_293 : i32
    %453 = arith.index_cast %452 : i32 to index
    %c0_294 = arith.constant 0 : index
    %454 = vector.load %arg41[%453, %c0_294] : memref<17x32xf32, #tpu.memory_space<vmem>>, vector<1x32xf32>
    %c4_295 = arith.constant 4 : index
    %c0_296 = arith.constant 0 : index
    %455 = vector.load %arg42[%c4_295, %c0_296] : memref<17x32xf32, #tpu.memory_space<vmem>>, vector<1x32xf32>
    tpu.vector_store %arg42[%c4_295, %c0_296], %454 {strides = array<i32>} : memref<17x32xf32, #tpu.memory_space<vmem>>, vector<1x32xf32>,
    %c4_297 = arith.constant 4 : index
    %456 = arith.index_cast %arg0 : i32 to index
    %457 = memref.load %arg2[%c4_297, %456] : memref<16x2xi32, #tpu.memory_space<smem>>
    %c1_i32_298 = arith.constant 1 : i32
    %458 = arith.addi %457, %c1_i32_298 : i32
    %459 = arith.index_cast %458 : i32 to index
    %c0_299 = arith.constant 0 : index
    %460 = vector.load %arg41[%459, %c0_299] : memref<17x32xf32, #tpu.memory_space<vmem>>, vector<1x32xf32>
    %c5_300 = arith.constant 5 : index
    %c0_301 = arith.constant 0 : index
    %461 = vector.load %arg42[%c5_300, %c0_301] : memref<17x32xf32, #tpu.memory_space<vmem>>, vector<1x32xf32>
    tpu.vector_store %arg42[%c5_300, %c0_301], %460 {strides = array<i32>} : memref<17x32xf32, #tpu.memory_space<vmem>>, vector<1x32xf32>,
    %c5_302 = arith.constant 5 : index
    %462 = arith.index_cast %arg0 : i32 to index
    %463 = memref.load %arg2[%c5_302, %462] : memref<16x2xi32, #tpu.memory_space<smem>>
    %c1_i32_303 = arith.constant 1 : i32
    %464 = arith.addi %463, %c1_i32_303 : i32
    %465 = arith.index_cast %464 : i32 to index
    %c0_304 = arith.constant 0 : index
    %466 = vector.load %arg41[%465, %c0_304] : memref<17x32xf32, #tpu.memory_space<vmem>>, vector<1x32xf32>
    %c6_305 = arith.constant 6 : index
    %c0_306 = arith.constant 0 : index
    %467 = vector.load %arg42[%c6_305, %c0_306] : memref<17x32xf32, #tpu.memory_space<vmem>>, vector<1x32xf32>
    tpu.vector_store %arg42[%c6_305, %c0_306], %466 {strides = array<i32>} : memref<17x32xf32, #tpu.memory_space<vmem>>, vector<1x32xf32>,
    %c6_307 = arith.constant 6 : index
    %468 = arith.index_cast %arg0 : i32 to index
    %469 = memref.load %arg2[%c6_307, %468] : memref<16x2xi32, #tpu.memory_space<smem>>
    %c1_i32_308 = arith.constant 1 : i32
    %470 = arith.addi %469, %c1_i32_308 : i32
    %471 = arith.index_cast %470 : i32 to index
    %c0_309 = arith.constant 0 : index
    %472 = vector.load %arg41[%471, %c0_309] : memref<17x32xf32, #tpu.memory_space<vmem>>, vector<1x32xf32>
    %c7_310 = arith.constant 7 : index
    %c0_311 = arith.constant 0 : index
    %473 = vector.load %arg42[%c7_310, %c0_311] : memref<17x32xf32, #tpu.memory_space<vmem>>, vector<1x32xf32>
    tpu.vector_store %arg42[%c7_310, %c0_311], %472 {strides = array<i32>} : memref<17x32xf32, #tpu.memory_space<vmem>>, vector<1x32xf32>,
    %c7_312 = arith.constant 7 : index
    %474 = arith.index_cast %arg0 : i32 to index
    %475 = memref.load %arg2[%c7_312, %474] : memref<16x2xi32, #tpu.memory_space<smem>>
    %c1_i32_313 = arith.constant 1 : i32
    %476 = arith.addi %475, %c1_i32_313 : i32
    %477 = arith.index_cast %476 : i32 to index
    %c0_314 = arith.constant 0 : index
    %478 = vector.load %arg41[%477, %c0_314] : memref<17x32xf32, #tpu.memory_space<vmem>>, vector<1x32xf32>
    %c8_315 = arith.constant 8 : index
    %c0_316 = arith.constant 0 : index
    %479 = vector.load %arg42[%c8_315, %c0_316] : memref<17x32xf32, #tpu.memory_space<vmem>>, vector<1x32xf32>
    tpu.vector_store %arg42[%c8_315, %c0_316], %478 {strides = array<i32>} : memref<17x32xf32, #tpu.memory_space<vmem>>, vector<1x32xf32>,
    %c8_317 = arith.constant 8 : index
    %480 = arith.index_cast %arg0 : i32 to index
    %481 = memref.load %arg2[%c8_317, %480] : memref<16x2xi32, #tpu.memory_space<smem>>
    %c1_i32_318 = arith.constant 1 : i32
    %482 = arith.addi %481, %c1_i32_318 : i32
    %483 = arith.index_cast %482 : i32 to index
    %c0_319 = arith.constant 0 : index
    %484 = vector.load %arg41[%483, %c0_319] : memref<17x32xf32, #tpu.memory_space<vmem>>, vector<1x32xf32>
    %c9_320 = arith.constant 9 : index
    %c0_321 = arith.constant 0 : index
    %485 = vector.load %arg42[%c9_320, %c0_321] : memref<17x32xf32, #tpu.memory_space<vmem>>, vector<1x32xf32>
    tpu.vector_store %arg42[%c9_320, %c0_321], %484 {strides = array<i32>} : memref<17x32xf32, #tpu.memory_space<vmem>>, vector<1x32xf32>,
    %c9_322 = arith.constant 9 : index
    %486 = arith.index_cast %arg0 : i32 to index
    %487 = memref.load %arg2[%c9_322, %486] : memref<16x2xi32, #tpu.memory_space<smem>>
    %c1_i32_323 = arith.constant 1 : i32
    %488 = arith.addi %487, %c1_i32_323 : i32
    %489 = arith.index_cast %488 : i32 to index
    %c0_324 = arith.constant 0 : index
    %490 = vector.load %arg41[%489, %c0_324] : memref<17x32xf32, #tpu.memory_space<vmem>>, vector<1x32xf32>
    %c10_325 = arith.constant 10 : index
    %c0_326 = arith.constant 0 : index
    %491 = vector.load %arg42[%c10_325, %c0_326] : memref<17x32xf32, #tpu.memory_space<vmem>>, vector<1x32xf32>
    tpu.vector_store %arg42[%c10_325, %c0_326], %490 {strides = array<i32>} : memref<17x32xf32, #tpu.memory_space<vmem>>, vector<1x32xf32>,
    %c10_327 = arith.constant 10 : index
    %492 = arith.index_cast %arg0 : i32 to index
    %493 = memref.load %arg2[%c10_327, %492] : memref<16x2xi32, #tpu.memory_space<smem>>
    %c1_i32_328 = arith.constant 1 : i32
    %494 = arith.addi %493, %c1_i32_328 : i32
    %495 = arith.index_cast %494 : i32 to index
    %c0_329 = arith.constant 0 : index
    %496 = vector.load %arg41[%495, %c0_329] : memref<17x32xf32, #tpu.memory_space<vmem>>, vector<1x32xf32>
    %c11_330 = arith.constant 11 : index
    %c0_331 = arith.constant 0 : index
    %497 = vector.load %arg42[%c11_330, %c0_331] : memref<17x32xf32, #tpu.memory_space<vmem>>, vector<1x32xf32>
    tpu.vector_store %arg42[%c11_330, %c0_331], %496 {strides = array<i32>} : memref<17x32xf32, #tpu.memory_space<vmem>>, vector<1x32xf32>,
    %c11_332 = arith.constant 11 : index
    %498 = arith.index_cast %arg0 : i32 to index
    %499 = memref.load %arg2[%c11_332, %498] : memref<16x2xi32, #tpu.memory_space<smem>>
    %c1_i32_333 = arith.constant 1 : i32
    %500 = arith.addi %499, %c1_i32_333 : i32
    %501 = arith.index_cast %500 : i32 to index
    %c0_334 = arith.constant 0 : index
    %502 = vector.load %arg41[%501, %c0_334] : memref<17x32xf32, #tpu.memory_space<vmem>>, vector<1x32xf32>
    %c12_335 = arith.constant 12 : index
    %c0_336 = arith.constant 0 : index
    %503 = vector.load %arg42[%c12_335, %c0_336] : memref<17x32xf32, #tpu.memory_space<vmem>>, vector<1x32xf32>
    tpu.vector_store %arg42[%c12_335, %c0_336], %502 {strides = array<i32>} : memref<17x32xf32, #tpu.memory_space<vmem>>, vector<1x32xf32>,
    %c12_337 = arith.constant 12 : index
    %504 = arith.index_cast %arg0 : i32 to index
    %505 = memref.load %arg2[%c12_337, %504] : memref<16x2xi32, #tpu.memory_space<smem>>
    %c1_i32_338 = arith.constant 1 : i32
    %506 = arith.addi %505, %c1_i32_338 : i32
    %507 = arith.index_cast %506 : i32 to index
    %c0_339 = arith.constant 0 : index
    %508 = vector.load %arg41[%507, %c0_339] : memref<17x32xf32, #tpu.memory_space<vmem>>, vector<1x32xf32>
    %c13_340 = arith.constant 13 : index
    %c0_341 = arith.constant 0 : index
    %509 = vector.load %arg42[%c13_340, %c0_341] : memref<17x32xf32, #tpu.memory_space<vmem>>, vector<1x32xf32>
    tpu.vector_store %arg42[%c13_340, %c0_341], %508 {strides = array<i32>} : memref<17x32xf32, #tpu.memory_space<vmem>>, vector<1x32xf32>,
    %c13_342 = arith.constant 13 : index
    %510 = arith.index_cast %arg0 : i32 to index
    %511 = memref.load %arg2[%c13_342, %510] : memref<16x2xi32, #tpu.memory_space<smem>>
    %c1_i32_343 = arith.constant 1 : i32
    %512 = arith.addi %511, %c1_i32_343 : i32
    %513 = arith.index_cast %512 : i32 to index
    %c0_344 = arith.constant 0 : index
    %514 = vector.load %arg41[%513, %c0_344] : memref<17x32xf32, #tpu.memory_space<vmem>>, vector<1x32xf32>
    %c14 = arith.constant 14 : index
    %c0_345 = arith.constant 0 : index
    %515 = vector.load %arg42[%c14, %c0_345] : memref<17x32xf32, #tpu.memory_space<vmem>>, vector<1x32xf32>
    tpu.vector_store %arg42[%c14, %c0_345], %514 {strides = array<i32>} : memref<17x32xf32, #tpu.memory_space<vmem>>, vector<1x32xf32>,
    %c14_346 = arith.constant 14 : index
    %516 = arith.index_cast %arg0 : i32 to index
    %517 = memref.load %arg2[%c14_346, %516] : memref<16x2xi32, #tpu.memory_space<smem>>
    %c1_i32_347 = arith.constant 1 : i32
    %518 = arith.addi %517, %c1_i32_347 : i32
    %519 = arith.index_cast %518 : i32 to index
    %c0_348 = arith.constant 0 : index
    %520 = vector.load %arg41[%519, %c0_348] : memref<17x32xf32, #tpu.memory_space<vmem>>, vector<1x32xf32>
    %c15 = arith.constant 15 : index
    %c0_349 = arith.constant 0 : index
    %521 = vector.load %arg42[%c15, %c0_349] : memref<17x32xf32, #tpu.memory_space<vmem>>, vector<1x32xf32>
    tpu.vector_store %arg42[%c15, %c0_349], %520 {strides = array<i32>} : memref<17x32xf32, #tpu.memory_space<vmem>>, vector<1x32xf32>,
    %c15_350 = arith.constant 15 : index
    %522 = arith.index_cast %arg0 : i32 to index
    %523 = memref.load %arg2[%c15_350, %522] : memref<16x2xi32, #tpu.memory_space<smem>>
    %c1_i32_351 = arith.constant 1 : i32
    %524 = arith.addi %523, %c1_i32_351 : i32
    %525 = arith.index_cast %524 : i32 to index
    %c0_352 = arith.constant 0 : index
    %526 = vector.load %arg41[%525, %c0_352] : memref<17x32xf32, #tpu.memory_space<vmem>>, vector<1x32xf32>
    %c16 = arith.constant 16 : index
    %c0_353 = arith.constant 0 : index
    %527 = vector.load %arg42[%c16, %c0_353] : memref<17x32xf32, #tpu.memory_space<vmem>>, vector<1x32xf32>
    tpu.vector_store %arg42[%c16, %c0_353], %526 {strides = array<i32>} : memref<17x32xf32, #tpu.memory_space<vmem>>, vector<1x32xf32>,
    %c0_354 = arith.constant 0 : index
    %c0_355 = arith.constant 0 : index
    %528 = vector.load %arg42[%c0_354, %c0_355] : memref<17x32xf32, #tpu.memory_space<vmem>>, vector<17x32xf32>
    %c0_356 = arith.constant 0 : index
    %c0_357 = arith.constant 0 : index
    %529 = vector.load %arg23[%c0_356, %c0_357] : memref<17x32xf32, #tpu.memory_space<vmem>>, vector<17x32xf32>
    %530 = arith.addf %528, %529 : vector<17x32xf32>
    %c0_358 = arith.constant 0 : index
    %c0_359 = arith.constant 0 : index
    %c0_360 = arith.constant 0 : index
    %531 = vector.load %arg24[%c0_358, %c0_359, %c0_360] : memref<2x1x32xf32, #tpu.memory_space<vmem>>, vector<1x1x32xf32>
    %532 = vector.shape_cast %531 : vector<1x1x32xf32> to vector<1x32xf32>
    %c0_361 = arith.constant 0 : index
    %c0_362 = arith.constant 0 : index
    %c0_363 = arith.constant 0 : index
    %533 = vector.load %arg25[%c0_361, %c0_362, %c0_363] : memref<2x1x32xf32, #tpu.memory_space<vmem>>, vector<1x1x32xf32>
    %534 = vector.shape_cast %533 : vector<1x1x32xf32> to vector<1x32xf32>
    %cst_364 = arith.constant dense<0.000000e+00> : vector<17xf32>
    %535 = vector.multi_reduction <add>, %530, %cst_364 [1] : vector<17x32xf32> to vector<17xf32>
    %536 = vector.shape_cast %535 : vector<17xf32> to vector<17x1xf32>
    %cst_365 = arith.constant 3.200000e+01 : f32
    %537 = vector.broadcast %cst_365 : f32 to vector<17x1xf32>
    %538 = arith.divf %536, %537 : vector<17x1xf32>
    %539 = vector.broadcast %538 : vector<17x1xf32> to vector<17x32xf32>
    %540 = arith.subf %530, %539 : vector<17x32xf32>
    %541 = arith.mulf %540, %540 : vector<17x32xf32>
    %cst_366 = arith.constant dense<0.000000e+00> : vector<17xf32>
    %542 = vector.multi_reduction <add>, %541, %cst_366 [1] : vector<17x32xf32> to vector<17xf32>
    %543 = vector.shape_cast %542 : vector<17xf32> to vector<17x1xf32>
    %cst_367 = arith.constant 3.200000e+01 : f32
    %544 = vector.broadcast %cst_367 : f32 to vector<17x1xf32>
    %545 = arith.divf %543, %544 : vector<17x1xf32>
    %546 = vector.broadcast %538 : vector<17x1xf32> to vector<17x32xf32>
    %547 = arith.subf %530, %546 : vector<17x32xf32>
    %cst_368 = arith.constant 9.99999974E-6 : f32
    %548 = vector.broadcast %cst_368 : f32 to vector<17x1xf32>
    %549 = arith.addf %545, %548 : vector<17x1xf32>
    %550 = math.rsqrt %549 : vector<17x1xf32>
    %551 = vector.broadcast %550 : vector<17x1xf32> to vector<17x32xf32>
    %552 = arith.mulf %547, %551 : vector<17x32xf32>
    %553 = vector.broadcast %532 : vector<1x32xf32> to vector<17x32xf32>
    %554 = arith.mulf %552, %553 : vector<17x32xf32>
    %555 = vector.broadcast %534 : vector<1x32xf32> to vector<17x32xf32>
    %556 = arith.addf %554, %555 : vector<17x32xf32>
    %cst_369 = arith.constant 0.000000e+00 : f32
    %557 = vector.broadcast %cst_369 : f32 to vector<17x32xf32>
    %c0_370 = arith.constant 0 : index
    %c0_371 = arith.constant 0 : index
    %c0_372 = arith.constant 0 : index
    %558 = vector.load %arg26[%c0_370, %c0_371, %c0_372] : memref<12x32x16xf32, #tpu.memory_space<vmem>>, vector<1x32x16xf32>
    %559 = vector.shape_cast %558 : vector<1x32x16xf32> to vector<32x16xf32>
    %cst_373 = arith.constant dense<0.000000e+00> : vector<17x16xf32>
    %560 = tpu.matmul %556, %559, %cst_373 {dimension_numbers = #tpu.dot_dimension_numbers<[1], [0], [0], [1], [0, 0, 1, 1], [], []>} : vector<17x32xf32>, vector<32x16xf32>, vector<17x16xf32> -> vector<17x16xf32>
    %c0_374 = arith.constant 0 : index
    %c0_375 = arith.constant 0 : index
    %c0_376 = arith.constant 0 : index
    %561 = vector.load %arg27[%c0_374, %c0_375, %c0_376] : memref<12x1x16xf32, #tpu.memory_space<vmem>>, vector<1x1x16xf32>
    %562 = vector.shape_cast %561 : vector<1x1x16xf32> to vector<1x16xf32>
    %563 = vector.broadcast %562 : vector<1x16xf32> to vector<17x16xf32>
    %564 = arith.addf %560, %563 : vector<17x16xf32>
    %c2_377 = arith.constant 2 : index
    %c0_378 = arith.constant 0 : index
    %c0_379 = arith.constant 0 : index
    %565 = vector.load %arg26[%c2_377, %c0_378, %c0_379] : memref<12x32x16xf32, #tpu.memory_space<vmem>>, vector<1x32x16xf32>
    %566 = vector.shape_cast %565 : vector<1x32x16xf32> to vector<32x16xf32>
    %cst_380 = arith.constant dense<0.000000e+00> : vector<17x16xf32>
    %567 = tpu.matmul %556, %566, %cst_380 {dimension_numbers = #tpu.dot_dimension_numbers<[1], [0], [0], [1], [0, 0, 1, 1], [], []>} : vector<17x32xf32>, vector<32x16xf32>, vector<17x16xf32> -> vector<17x16xf32>
    %c2_381 = arith.constant 2 : index
    %c0_382 = arith.constant 0 : index
    %c0_383 = arith.constant 0 : index
    %568 = vector.load %arg27[%c2_381, %c0_382, %c0_383] : memref<12x1x16xf32, #tpu.memory_space<vmem>>, vector<1x1x16xf32>
    %569 = vector.shape_cast %568 : vector<1x1x16xf32> to vector<1x16xf32>
    %570 = vector.broadcast %569 : vector<1x16xf32> to vector<17x16xf32>
    %571 = arith.addf %567, %570 : vector<17x16xf32>
    %c4_384 = arith.constant 4 : index
    %c0_385 = arith.constant 0 : index
    %c0_386 = arith.constant 0 : index
    %572 = vector.load %arg26[%c4_384, %c0_385, %c0_386] : memref<12x32x16xf32, #tpu.memory_space<vmem>>, vector<1x32x16xf32>
    %573 = vector.shape_cast %572 : vector<1x32x16xf32> to vector<32x16xf32>
    %cst_387 = arith.constant dense<0.000000e+00> : vector<17x16xf32>
    %574 = tpu.matmul %556, %573, %cst_387 {dimension_numbers = #tpu.dot_dimension_numbers<[1], [0], [0], [1], [0, 0, 1, 1], [], []>} : vector<17x32xf32>, vector<32x16xf32>, vector<17x16xf32> -> vector<17x16xf32>
    %c4_388 = arith.constant 4 : index
    %c0_389 = arith.constant 0 : index
    %c0_390 = arith.constant 0 : index
    %575 = vector.load %arg27[%c4_388, %c0_389, %c0_390] : memref<12x1x16xf32, #tpu.memory_space<vmem>>, vector<1x1x16xf32>
    %576 = vector.shape_cast %575 : vector<1x1x16xf32> to vector<1x16xf32>
    %577 = vector.broadcast %576 : vector<1x16xf32> to vector<17x16xf32>
    %578 = arith.addf %574, %577 : vector<17x16xf32>
    "tpu.trace_start"() <{level = 10 : i32, message = "qd,kd->qk"}> : () -> ()
    %cst_391 = arith.constant dense<0.000000e+00> : vector<17x17xf32>
    %579 = tpu.matmul %564, %571, %cst_391 {dimension_numbers = #tpu.dot_dimension_numbers<[1], [1], [0], [0], [0, 0, 1, 0], [], []>} : vector<17x16xf32>, vector<17x16xf32>, vector<17x17xf32> -> vector<17x17xf32>
    "tpu.trace_stop"() : () -> ()
    %cst_392 = arith.constant 2.500000e-01 : f32
    %580 = vector.broadcast %cst_392 : f32 to vector<17x17xf32>
    %581 = arith.mulf %579, %580 : vector<17x17xf32>
    %cst_393 = arith.constant dense<0xFF800000> : vector<17xf32>
    %582 = vector.multi_reduction <maximumf>, %581, %cst_393 [1] : vector<17x17xf32> to vector<17xf32>
    %583 = vector.shape_cast %582 : vector<17xf32> to vector<17x1xf32>
    %584 = vector.broadcast %583 : vector<17x1xf32> to vector<17x17xf32>
    %585 = arith.subf %581, %584 : vector<17x17xf32>
    %586 = math.exp %585 : vector<17x17xf32>
    %cst_394 = arith.constant dense<0.000000e+00> : vector<17xf32>
    %587 = vector.multi_reduction <add>, %586, %cst_394 [1] : vector<17x17xf32> to vector<17xf32>
    %588 = vector.shape_cast %587 : vector<17xf32> to vector<17x1xf32>
    %589 = tpu.reciprocal %588 {approx = true} : vector<17x1xf32> -> vector<17x1xf32>
    %590 = vector.broadcast %589 : vector<17x1xf32> to vector<17x17xf32>
    %591 = arith.mulf %586, %590 : vector<17x17xf32>
    %cst_395 = arith.constant dense<0.000000e+00> : vector<17x16xf32>
    %592 = tpu.matmul %591, %578, %cst_395 {dimension_numbers = #tpu.dot_dimension_numbers<[1], [0], [0], [1], [0, 0, 1, 1], [], []>} : vector<17x17xf32>, vector<17x16xf32>, vector<17x16xf32> -> vector<17x16xf32>
    %c0_396 = arith.constant 0 : index
    %c0_397 = arith.constant 0 : index
    %c0_398 = arith.constant 0 : index
    %593 = vector.load %arg28[%c0_396, %c0_397, %c0_398] : memref<4x16x32xf32, #tpu.memory_space<vmem>>, vector<1x16x32xf32>
    %594 = vector.shape_cast %593 : vector<1x16x32xf32> to vector<16x32xf32>
    %cst_399 = arith.constant dense<0.000000e+00> : vector<17x32xf32>
    %595 = tpu.matmul %592, %594, %cst_399 {dimension_numbers = #tpu.dot_dimension_numbers<[1], [0], [0], [1], [0, 0, 1, 1], [], []>} : vector<17x16xf32>, vector<16x32xf32>, vector<17x32xf32> -> vector<17x32xf32>
    %596 = arith.addf %557, %595 : vector<17x32xf32>
    %c1_400 = arith.constant 1 : index
    %c0_401 = arith.constant 0 : index
    %c0_402 = arith.constant 0 : index
    %597 = vector.load %arg26[%c1_400, %c0_401, %c0_402] : memref<12x32x16xf32, #tpu.memory_space<vmem>>, vector<1x32x16xf32>
    %598 = vector.shape_cast %597 : vector<1x32x16xf32> to vector<32x16xf32>
    %cst_403 = arith.constant dense<0.000000e+00> : vector<17x16xf32>
    %599 = tpu.matmul %556, %598, %cst_403 {dimension_numbers = #tpu.dot_dimension_numbers<[1], [0], [0], [1], [0, 0, 1, 1], [], []>} : vector<17x32xf32>, vector<32x16xf32>, vector<17x16xf32> -> vector<17x16xf32>
    %c1_404 = arith.constant 1 : index
    %c0_405 = arith.constant 0 : index
    %c0_406 = arith.constant 0 : index
    %600 = vector.load %arg27[%c1_404, %c0_405, %c0_406] : memref<12x1x16xf32, #tpu.memory_space<vmem>>, vector<1x1x16xf32>
    %601 = vector.shape_cast %600 : vector<1x1x16xf32> to vector<1x16xf32>
    %602 = vector.broadcast %601 : vector<1x16xf32> to vector<17x16xf32>
    %603 = arith.addf %599, %602 : vector<17x16xf32>
    %c3_407 = arith.constant 3 : index
    %c0_408 = arith.constant 0 : index
    %c0_409 = arith.constant 0 : index
    %604 = vector.load %arg26[%c3_407, %c0_408, %c0_409] : memref<12x32x16xf32, #tpu.memory_space<vmem>>, vector<1x32x16xf32>
    %605 = vector.shape_cast %604 : vector<1x32x16xf32> to vector<32x16xf32>
    %cst_410 = arith.constant dense<0.000000e+00> : vector<17x16xf32>
    %606 = tpu.matmul %556, %605, %cst_410 {dimension_numbers = #tpu.dot_dimension_numbers<[1], [0], [0], [1], [0, 0, 1, 1], [], []>} : vector<17x32xf32>, vector<32x16xf32>, vector<17x16xf32> -> vector<17x16xf32>
    %c3_411 = arith.constant 3 : index
    %c0_412 = arith.constant 0 : index
    %c0_413 = arith.constant 0 : index
    %607 = vector.load %arg27[%c3_411, %c0_412, %c0_413] : memref<12x1x16xf32, #tpu.memory_space<vmem>>, vector<1x1x16xf32>
    %608 = vector.shape_cast %607 : vector<1x1x16xf32> to vector<1x16xf32>
    %609 = vector.broadcast %608 : vector<1x16xf32> to vector<17x16xf32>
    %610 = arith.addf %606, %609 : vector<17x16xf32>
    %c5_414 = arith.constant 5 : index
    %c0_415 = arith.constant 0 : index
    %c0_416 = arith.constant 0 : index
    %611 = vector.load %arg26[%c5_414, %c0_415, %c0_416] : memref<12x32x16xf32, #tpu.memory_space<vmem>>, vector<1x32x16xf32>
    %612 = vector.shape_cast %611 : vector<1x32x16xf32> to vector<32x16xf32>
    %cst_417 = arith.constant dense<0.000000e+00> : vector<17x16xf32>
    %613 = tpu.matmul %556, %612, %cst_417 {dimension_numbers = #tpu.dot_dimension_numbers<[1], [0], [0], [1], [0, 0, 1, 1], [], []>} : vector<17x32xf32>, vector<32x16xf32>, vector<17x16xf32> -> vector<17x16xf32>
    %c5_418 = arith.constant 5 : index
    %c0_419 = arith.constant 0 : index
    %c0_420 = arith.constant 0 : index
    %614 = vector.load %arg27[%c5_418, %c0_419, %c0_420] : memref<12x1x16xf32, #tpu.memory_space<vmem>>, vector<1x1x16xf32>
    %615 = vector.shape_cast %614 : vector<1x1x16xf32> to vector<1x16xf32>
    %616 = vector.broadcast %615 : vector<1x16xf32> to vector<17x16xf32>
    %617 = arith.addf %613, %616 : vector<17x16xf32>
    "tpu.trace_start"() <{level = 10 : i32, message = "qd,kd->qk"}> : () -> ()
    %cst_421 = arith.constant dense<0.000000e+00> : vector<17x17xf32>
    %618 = tpu.matmul %603, %610, %cst_421 {dimension_numbers = #tpu.dot_dimension_numbers<[1], [1], [0], [0], [0, 0, 1, 0], [], []>} : vector<17x16xf32>, vector<17x16xf32>, vector<17x17xf32> -> vector<17x17xf32>
    "tpu.trace_stop"() : () -> ()
    %cst_422 = arith.constant 2.500000e-01 : f32
    %619 = vector.broadcast %cst_422 : f32 to vector<17x17xf32>
    %620 = arith.mulf %618, %619 : vector<17x17xf32>
    %cst_423 = arith.constant dense<0xFF800000> : vector<17xf32>
    %621 = vector.multi_reduction <maximumf>, %620, %cst_423 [1] : vector<17x17xf32> to vector<17xf32>
    %622 = vector.shape_cast %621 : vector<17xf32> to vector<17x1xf32>
    %623 = vector.broadcast %622 : vector<17x1xf32> to vector<17x17xf32>
    %624 = arith.subf %620, %623 : vector<17x17xf32>
    %625 = math.exp %624 : vector<17x17xf32>
    %cst_424 = arith.constant dense<0.000000e+00> : vector<17xf32>
    %626 = vector.multi_reduction <add>, %625, %cst_424 [1] : vector<17x17xf32> to vector<17xf32>
    %627 = vector.shape_cast %626 : vector<17xf32> to vector<17x1xf32>
    %628 = tpu.reciprocal %627 {approx = true} : vector<17x1xf32> -> vector<17x1xf32>
    %629 = vector.broadcast %628 : vector<17x1xf32> to vector<17x17xf32>
    %630 = arith.mulf %625, %629 : vector<17x17xf32>
    %cst_425 = arith.constant dense<0.000000e+00> : vector<17x16xf32>
    %631 = tpu.matmul %630, %617, %cst_425 {dimension_numbers = #tpu.dot_dimension_numbers<[1], [0], [0], [1], [0, 0, 1, 1], [], []>} : vector<17x17xf32>, vector<17x16xf32>, vector<17x16xf32> -> vector<17x16xf32>
    %c1_426 = arith.constant 1 : index
    %c0_427 = arith.constant 0 : index
    %c0_428 = arith.constant 0 : index
    %632 = vector.load %arg28[%c1_426, %c0_427, %c0_428] : memref<4x16x32xf32, #tpu.memory_space<vmem>>, vector<1x16x32xf32>
    %633 = vector.shape_cast %632 : vector<1x16x32xf32> to vector<16x32xf32>
    %cst_429 = arith.constant dense<0.000000e+00> : vector<17x32xf32>
    %634 = tpu.matmul %631, %633, %cst_429 {dimension_numbers = #tpu.dot_dimension_numbers<[1], [0], [0], [1], [0, 0, 1, 1], [], []>} : vector<17x16xf32>, vector<16x32xf32>, vector<17x32xf32> -> vector<17x32xf32>
    %635 = arith.addf %596, %634 : vector<17x32xf32>
    %636 = arith.addf %530, %635 : vector<17x32xf32>
    %c0_430 = arith.constant 0 : index
    %c0_431 = arith.constant 0 : index
    %c0_432 = arith.constant 0 : index
    %637 = vector.load %arg29[%c0_430, %c0_431, %c0_432] : memref<2x1x32xf32, #tpu.memory_space<vmem>>, vector<1x1x32xf32>
    %638 = vector.shape_cast %637 : vector<1x1x32xf32> to vector<1x32xf32>
    %639 = vector.broadcast %638 : vector<1x32xf32> to vector<17x32xf32>
    %640 = arith.addf %636, %639 : vector<17x32xf32>
    %c0_433 = arith.constant 0 : index
    %c0_434 = arith.constant 0 : index
    %c0_435 = arith.constant 0 : index
    %641 = vector.load %arg30[%c0_433, %c0_434, %c0_435] : memref<2x1x32xf32, #tpu.memory_space<vmem>>, vector<1x1x32xf32>
    %642 = vector.shape_cast %641 : vector<1x1x32xf32> to vector<1x32xf32>
    %c0_436 = arith.constant 0 : index
    %c0_437 = arith.constant 0 : index
    %c0_438 = arith.constant 0 : index
    %643 = vector.load %arg31[%c0_436, %c0_437, %c0_438] : memref<2x1x32xf32, #tpu.memory_space<vmem>>, vector<1x1x32xf32>
    %644 = vector.shape_cast %643 : vector<1x1x32xf32> to vector<1x32xf32>
    %cst_439 = arith.constant dense<0.000000e+00> : vector<17xf32>
    %645 = vector.multi_reduction <add>, %640, %cst_439 [1] : vector<17x32xf32> to vector<17xf32>
    %646 = vector.shape_cast %645 : vector<17xf32> to vector<17x1xf32>
    %cst_440 = arith.constant 3.200000e+01 : f32
    %647 = vector.broadcast %cst_440 : f32 to vector<17x1xf32>
    %648 = arith.divf %646, %647 : vector<17x1xf32>
    %649 = vector.broadcast %648 : vector<17x1xf32> to vector<17x32xf32>
    %650 = arith.subf %640, %649 : vector<17x32xf32>
    %651 = arith.mulf %650, %650 : vector<17x32xf32>
    %cst_441 = arith.constant dense<0.000000e+00> : vector<17xf32>
    %652 = vector.multi_reduction <add>, %651, %cst_441 [1] : vector<17x32xf32> to vector<17xf32>
    %653 = vector.shape_cast %652 : vector<17xf32> to vector<17x1xf32>
    %cst_442 = arith.constant 3.200000e+01 : f32
    %654 = vector.broadcast %cst_442 : f32 to vector<17x1xf32>
    %655 = arith.divf %653, %654 : vector<17x1xf32>
    %656 = vector.broadcast %648 : vector<17x1xf32> to vector<17x32xf32>
    %657 = arith.subf %640, %656 : vector<17x32xf32>
    %cst_443 = arith.constant 9.99999974E-6 : f32
    %658 = vector.broadcast %cst_443 : f32 to vector<17x1xf32>
    %659 = arith.addf %655, %658 : vector<17x1xf32>
    %660 = math.rsqrt %659 : vector<17x1xf32>
    %661 = vector.broadcast %660 : vector<17x1xf32> to vector<17x32xf32>
    %662 = arith.mulf %657, %661 : vector<17x32xf32>
    %663 = vector.broadcast %642 : vector<1x32xf32> to vector<17x32xf32>
    %664 = arith.mulf %662, %663 : vector<17x32xf32>
    %665 = vector.broadcast %644 : vector<1x32xf32> to vector<17x32xf32>
    %666 = arith.addf %664, %665 : vector<17x32xf32>
    %c0_444 = arith.constant 0 : index
    %c0_445 = arith.constant 0 : index
    %c0_446 = arith.constant 0 : index
    %667 = vector.load %arg32[%c0_444, %c0_445, %c0_446] : memref<2x32x128xf32, #tpu.memory_space<vmem>>, vector<1x32x128xf32>
    %668 = vector.shape_cast %667 : vector<1x32x128xf32> to vector<32x128xf32>
    %cst_447 = arith.constant dense<0.000000e+00> : vector<17x128xf32>
    %669 = tpu.matmul %666, %668, %cst_447 {dimension_numbers = #tpu.dot_dimension_numbers<[1], [0], [0], [1], [0, 0, 1, 1], [], []>} : vector<17x32xf32>, vector<32x128xf32>, vector<17x128xf32> -> vector<17x128xf32>
    %c0_448 = arith.constant 0 : index
    %c0_449 = arith.constant 0 : index
    %c0_450 = arith.constant 0 : index
    %670 = vector.load %arg33[%c0_448, %c0_449, %c0_450] : memref<2x1x128xf32, #tpu.memory_space<vmem>>, vector<1x1x128xf32>
    %671 = vector.shape_cast %670 : vector<1x1x128xf32> to vector<1x128xf32>
    %672 = vector.broadcast %671 : vector<1x128xf32> to vector<17x128xf32>
    %673 = arith.addf %669, %672 : vector<17x128xf32>
    %674 = arith.mulf %673, %673 : vector<17x128xf32>
    %675 = arith.mulf %673, %674 : vector<17x128xf32>
    %cst_451 = arith.constant 4.471500e-02 : f32
    %676 = vector.broadcast %cst_451 : f32 to vector<17x128xf32>
    %677 = arith.mulf %676, %675 : vector<17x128xf32>
    %678 = arith.addf %673, %677 : vector<17x128xf32>
    %cst_452 = arith.constant 0.797884583 : f32
    %679 = vector.broadcast %cst_452 : f32 to vector<17x128xf32>
    %680 = arith.mulf %679, %678 : vector<17x128xf32>
    %681 = math.tanh %680 : vector<17x128xf32>
    %cst_453 = arith.constant 1.000000e+00 : f32
    %682 = vector.broadcast %cst_453 : f32 to vector<17x128xf32>
    %683 = arith.addf %682, %681 : vector<17x128xf32>
    %cst_454 = arith.constant 5.000000e-01 : f32
    %684 = vector.broadcast %cst_454 : f32 to vector<17x128xf32>
    %685 = arith.mulf %684, %683 : vector<17x128xf32>
    %686 = arith.mulf %673, %685 : vector<17x128xf32>
    %c0_455 = arith.constant 0 : index
    %c0_456 = arith.constant 0 : index
    %c0_457 = arith.constant 0 : index
    %687 = vector.load %arg34[%c0_455, %c0_456, %c0_457] : memref<2x128x32xf32, #tpu.memory_space<vmem>>, vector<1x128x32xf32>
    %688 = vector.shape_cast %687 : vector<1x128x32xf32> to vector<128x32xf32>
    %cst_458 = arith.constant dense<0.000000e+00> : vector<17x32xf32>
    %689 = tpu.matmul %686, %688, %cst_458 {dimension_numbers = #tpu.dot_dimension_numbers<[1], [0], [0], [1], [0, 0, 1, 1], [], []>} : vector<17x128xf32>, vector<128x32xf32>, vector<17x32xf32> -> vector<17x32xf32>
    %c0_459 = arith.constant 0 : index
    %c0_460 = arith.constant 0 : index
    %c0_461 = arith.constant 0 : index
    %690 = vector.load %arg35[%c0_459, %c0_460, %c0_461] : memref<2x1x32xf32, #tpu.memory_space<vmem>>, vector<1x1x32xf32>
    %691 = vector.shape_cast %690 : vector<1x1x32xf32> to vector<1x32xf32>
    %692 = vector.broadcast %691 : vector<1x32xf32> to vector<17x32xf32>
    %693 = arith.addf %689, %692 : vector<17x32xf32>
    %694 = arith.addf %640, %693 : vector<17x32xf32>
    %c1_462 = arith.constant 1 : index
    %c0_463 = arith.constant 0 : index
    %c0_464 = arith.constant 0 : index
    %695 = vector.load %arg24[%c1_462, %c0_463, %c0_464] : memref<2x1x32xf32, #tpu.memory_space<vmem>>, vector<1x1x32xf32>
    %696 = vector.shape_cast %695 : vector<1x1x32xf32> to vector<1x32xf32>
    %c1_465 = arith.constant 1 : index
    %c0_466 = arith.constant 0 : index
    %c0_467 = arith.constant 0 : index
    %697 = vector.load %arg25[%c1_465, %c0_466, %c0_467] : memref<2x1x32xf32, #tpu.memory_space<vmem>>, vector<1x1x32xf32>
    %698 = vector.shape_cast %697 : vector<1x1x32xf32> to vector<1x32xf32>
    %cst_468 = arith.constant dense<0.000000e+00> : vector<17xf32>
    %699 = vector.multi_reduction <add>, %694, %cst_468 [1] : vector<17x32xf32> to vector<17xf32>
    %700 = vector.shape_cast %699 : vector<17xf32> to vector<17x1xf32>
    %cst_469 = arith.constant 3.200000e+01 : f32
    %701 = vector.broadcast %cst_469 : f32 to vector<17x1xf32>
    %702 = arith.divf %700, %701 : vector<17x1xf32>
    %703 = vector.broadcast %702 : vector<17x1xf32> to vector<17x32xf32>
    %704 = arith.subf %694, %703 : vector<17x32xf32>
    %705 = arith.mulf %704, %704 : vector<17x32xf32>
    %cst_470 = arith.constant dense<0.000000e+00> : vector<17xf32>
    %706 = vector.multi_reduction <add>, %705, %cst_470 [1] : vector<17x32xf32> to vector<17xf32>
    %707 = vector.shape_cast %706 : vector<17xf32> to vector<17x1xf32>
    %cst_471 = arith.constant 3.200000e+01 : f32
    %708 = vector.broadcast %cst_471 : f32 to vector<17x1xf32>
    %709 = arith.divf %707, %708 : vector<17x1xf32>
    %710 = vector.broadcast %702 : vector<17x1xf32> to vector<17x32xf32>
    %711 = arith.subf %694, %710 : vector<17x32xf32>
    %cst_472 = arith.constant 9.99999974E-6 : f32
    %712 = vector.broadcast %cst_472 : f32 to vector<17x1xf32>
    %713 = arith.addf %709, %712 : vector<17x1xf32>
    %714 = math.rsqrt %713 : vector<17x1xf32>
    %715 = vector.broadcast %714 : vector<17x1xf32> to vector<17x32xf32>
    %716 = arith.mulf %711, %715 : vector<17x32xf32>
    %717 = vector.broadcast %696 : vector<1x32xf32> to vector<17x32xf32>
    %718 = arith.mulf %716, %717 : vector<17x32xf32>
    %719 = vector.broadcast %698 : vector<1x32xf32> to vector<17x32xf32>
    %720 = arith.addf %718, %719 : vector<17x32xf32>
    %cst_473 = arith.constant 0.000000e+00 : f32
    %721 = vector.broadcast %cst_473 : f32 to vector<17x32xf32>
    %c6_474 = arith.constant 6 : index
    %c0_475 = arith.constant 0 : index
    %c0_476 = arith.constant 0 : index
    %722 = vector.load %arg26[%c6_474, %c0_475, %c0_476] : memref<12x32x16xf32, #tpu.memory_space<vmem>>, vector<1x32x16xf32>
    %723 = vector.shape_cast %722 : vector<1x32x16xf32> to vector<32x16xf32>
    %cst_477 = arith.constant dense<0.000000e+00> : vector<17x16xf32>
    %724 = tpu.matmul %720, %723, %cst_477 {dimension_numbers = #tpu.dot_dimension_numbers<[1], [0], [0], [1], [0, 0, 1, 1], [], []>} : vector<17x32xf32>, vector<32x16xf32>, vector<17x16xf32> -> vector<17x16xf32>
    %c6_478 = arith.constant 6 : index
    %c0_479 = arith.constant 0 : index
    %c0_480 = arith.constant 0 : index
    %725 = vector.load %arg27[%c6_478, %c0_479, %c0_480] : memref<12x1x16xf32, #tpu.memory_space<vmem>>, vector<1x1x16xf32>
    %726 = vector.shape_cast %725 : vector<1x1x16xf32> to vector<1x16xf32>
    %727 = vector.broadcast %726 : vector<1x16xf32> to vector<17x16xf32>
    %728 = arith.addf %724, %727 : vector<17x16xf32>
    %c8_481 = arith.constant 8 : index
    %c0_482 = arith.constant 0 : index
    %c0_483 = arith.constant 0 : index
    %729 = vector.load %arg26[%c8_481, %c0_482, %c0_483] : memref<12x32x16xf32, #tpu.memory_space<vmem>>, vector<1x32x16xf32>
    %730 = vector.shape_cast %729 : vector<1x32x16xf32> to vector<32x16xf32>
    %cst_484 = arith.constant dense<0.000000e+00> : vector<17x16xf32>
    %731 = tpu.matmul %720, %730, %cst_484 {dimension_numbers = #tpu.dot_dimension_numbers<[1], [0], [0], [1], [0, 0, 1, 1], [], []>} : vector<17x32xf32>, vector<32x16xf32>, vector<17x16xf32> -> vector<17x16xf32>
    %c8_485 = arith.constant 8 : index
    %c0_486 = arith.constant 0 : index
    %c0_487 = arith.constant 0 : index
    %732 = vector.load %arg27[%c8_485, %c0_486, %c0_487] : memref<12x1x16xf32, #tpu.memory_space<vmem>>, vector<1x1x16xf32>
    %733 = vector.shape_cast %732 : vector<1x1x16xf32> to vector<1x16xf32>
    %734 = vector.broadcast %733 : vector<1x16xf32> to vector<17x16xf32>
    %735 = arith.addf %731, %734 : vector<17x16xf32>
    %c10_488 = arith.constant 10 : index
    %c0_489 = arith.constant 0 : index
    %c0_490 = arith.constant 0 : index
    %736 = vector.load %arg26[%c10_488, %c0_489, %c0_490] : memref<12x32x16xf32, #tpu.memory_space<vmem>>, vector<1x32x16xf32>
    %737 = vector.shape_cast %736 : vector<1x32x16xf32> to vector<32x16xf32>
    %cst_491 = arith.constant dense<0.000000e+00> : vector<17x16xf32>
    %738 = tpu.matmul %720, %737, %cst_491 {dimension_numbers = #tpu.dot_dimension_numbers<[1], [0], [0], [1], [0, 0, 1, 1], [], []>} : vector<17x32xf32>, vector<32x16xf32>, vector<17x16xf32> -> vector<17x16xf32>
    %c10_492 = arith.constant 10 : index
    %c0_493 = arith.constant 0 : index
    %c0_494 = arith.constant 0 : index
    %739 = vector.load %arg27[%c10_492, %c0_493, %c0_494] : memref<12x1x16xf32, #tpu.memory_space<vmem>>, vector<1x1x16xf32>
    %740 = vector.shape_cast %739 : vector<1x1x16xf32> to vector<1x16xf32>
    %741 = vector.broadcast %740 : vector<1x16xf32> to vector<17x16xf32>
    %742 = arith.addf %738, %741 : vector<17x16xf32>
    "tpu.trace_start"() <{level = 10 : i32, message = "qd,kd->qk"}> : () -> ()
    %cst_495 = arith.constant dense<0.000000e+00> : vector<17x17xf32>
    %743 = tpu.matmul %728, %735, %cst_495 {dimension_numbers = #tpu.dot_dimension_numbers<[1], [1], [0], [0], [0, 0, 1, 0], [], []>} : vector<17x16xf32>, vector<17x16xf32>, vector<17x17xf32> -> vector<17x17xf32>
    "tpu.trace_stop"() : () -> ()
    %cst_496 = arith.constant 2.500000e-01 : f32
    %744 = vector.broadcast %cst_496 : f32 to vector<17x17xf32>
    %745 = arith.mulf %743, %744 : vector<17x17xf32>
    %cst_497 = arith.constant dense<0xFF800000> : vector<17xf32>
    %746 = vector.multi_reduction <maximumf>, %745, %cst_497 [1] : vector<17x17xf32> to vector<17xf32>
    %747 = vector.shape_cast %746 : vector<17xf32> to vector<17x1xf32>
    %748 = vector.broadcast %747 : vector<17x1xf32> to vector<17x17xf32>
    %749 = arith.subf %745, %748 : vector<17x17xf32>
    %750 = math.exp %749 : vector<17x17xf32>
    %cst_498 = arith.constant dense<0.000000e+00> : vector<17xf32>
    %751 = vector.multi_reduction <add>, %750, %cst_498 [1] : vector<17x17xf32> to vector<17xf32>
    %752 = vector.shape_cast %751 : vector<17xf32> to vector<17x1xf32>
    %753 = tpu.reciprocal %752 {approx = true} : vector<17x1xf32> -> vector<17x1xf32>
    %754 = vector.broadcast %753 : vector<17x1xf32> to vector<17x17xf32>
    %755 = arith.mulf %750, %754 : vector<17x17xf32>
    %cst_499 = arith.constant dense<0.000000e+00> : vector<17x16xf32>
    %756 = tpu.matmul %755, %742, %cst_499 {dimension_numbers = #tpu.dot_dimension_numbers<[1], [0], [0], [1], [0, 0, 1, 1], [], []>} : vector<17x17xf32>, vector<17x16xf32>, vector<17x16xf32> -> vector<17x16xf32>
    %c2_500 = arith.constant 2 : index
    %c0_501 = arith.constant 0 : index
    %c0_502 = arith.constant 0 : index
    %757 = vector.load %arg28[%c2_500, %c0_501, %c0_502] : memref<4x16x32xf32, #tpu.memory_space<vmem>>, vector<1x16x32xf32>
    %758 = vector.shape_cast %757 : vector<1x16x32xf32> to vector<16x32xf32>
    %cst_503 = arith.constant dense<0.000000e+00> : vector<17x32xf32>
    %759 = tpu.matmul %756, %758, %cst_503 {dimension_numbers = #tpu.dot_dimension_numbers<[1], [0], [0], [1], [0, 0, 1, 1], [], []>} : vector<17x16xf32>, vector<16x32xf32>, vector<17x32xf32> -> vector<17x32xf32>
    %760 = arith.addf %721, %759 : vector<17x32xf32>
    %c7_504 = arith.constant 7 : index
    %c0_505 = arith.constant 0 : index
    %c0_506 = arith.constant 0 : index
    %761 = vector.load %arg26[%c7_504, %c0_505, %c0_506] : memref<12x32x16xf32, #tpu.memory_space<vmem>>, vector<1x32x16xf32>
    %762 = vector.shape_cast %761 : vector<1x32x16xf32> to vector<32x16xf32>
    %cst_507 = arith.constant dense<0.000000e+00> : vector<17x16xf32>
    %763 = tpu.matmul %720, %762, %cst_507 {dimension_numbers = #tpu.dot_dimension_numbers<[1], [0], [0], [1], [0, 0, 1, 1], [], []>} : vector<17x32xf32>, vector<32x16xf32>, vector<17x16xf32> -> vector<17x16xf32>
    %c7_508 = arith.constant 7 : index
    %c0_509 = arith.constant 0 : index
    %c0_510 = arith.constant 0 : index
    %764 = vector.load %arg27[%c7_508, %c0_509, %c0_510] : memref<12x1x16xf32, #tpu.memory_space<vmem>>, vector<1x1x16xf32>
    %765 = vector.shape_cast %764 : vector<1x1x16xf32> to vector<1x16xf32>
    %766 = vector.broadcast %765 : vector<1x16xf32> to vector<17x16xf32>
    %767 = arith.addf %763, %766 : vector<17x16xf32>
    %c9_511 = arith.constant 9 : index
    %c0_512 = arith.constant 0 : index
    %c0_513 = arith.constant 0 : index
    %768 = vector.load %arg26[%c9_511, %c0_512, %c0_513] : memref<12x32x16xf32, #tpu.memory_space<vmem>>, vector<1x32x16xf32>
    %769 = vector.shape_cast %768 : vector<1x32x16xf32> to vector<32x16xf32>
    %cst_514 = arith.constant dense<0.000000e+00> : vector<17x16xf32>
    %770 = tpu.matmul %720, %769, %cst_514 {dimension_numbers = #tpu.dot_dimension_numbers<[1], [0], [0], [1], [0, 0, 1, 1], [], []>} : vector<17x32xf32>, vector<32x16xf32>, vector<17x16xf32> -> vector<17x16xf32>
    %c9_515 = arith.constant 9 : index
    %c0_516 = arith.constant 0 : index
    %c0_517 = arith.constant 0 : index
    %771 = vector.load %arg27[%c9_515, %c0_516, %c0_517] : memref<12x1x16xf32, #tpu.memory_space<vmem>>, vector<1x1x16xf32>
    %772 = vector.shape_cast %771 : vector<1x1x16xf32> to vector<1x16xf32>
    %773 = vector.broadcast %772 : vector<1x16xf32> to vector<17x16xf32>
    %774 = arith.addf %770, %773 : vector<17x16xf32>
    %c11_518 = arith.constant 11 : index
    %c0_519 = arith.constant 0 : index
    %c0_520 = arith.constant 0 : index
    %775 = vector.load %arg26[%c11_518, %c0_519, %c0_520] : memref<12x32x16xf32, #tpu.memory_space<vmem>>, vector<1x32x16xf32>
    %776 = vector.shape_cast %775 : vector<1x32x16xf32> to vector<32x16xf32>
    %cst_521 = arith.constant dense<0.000000e+00> : vector<17x16xf32>
    %777 = tpu.matmul %720, %776, %cst_521 {dimension_numbers = #tpu.dot_dimension_numbers<[1], [0], [0], [1], [0, 0, 1, 1], [], []>} : vector<17x32xf32>, vector<32x16xf32>, vector<17x16xf32> -> vector<17x16xf32>
    %c11_522 = arith.constant 11 : index
    %c0_523 = arith.constant 0 : index
    %c0_524 = arith.constant 0 : index
    %778 = vector.load %arg27[%c11_522, %c0_523, %c0_524] : memref<12x1x16xf32, #tpu.memory_space<vmem>>, vector<1x1x16xf32>
    %779 = vector.shape_cast %778 : vector<1x1x16xf32> to vector<1x16xf32>
    %780 = vector.broadcast %779 : vector<1x16xf32> to vector<17x16xf32>
    %781 = arith.addf %777, %780 : vector<17x16xf32>
    "tpu.trace_start"() <{level = 10 : i32, message = "qd,kd->qk"}> : () -> ()
    %cst_525 = arith.constant dense<0.000000e+00> : vector<17x17xf32>
    %782 = tpu.matmul %767, %774, %cst_525 {dimension_numbers = #tpu.dot_dimension_numbers<[1], [1], [0], [0], [0, 0, 1, 0], [], []>} : vector<17x16xf32>, vector<17x16xf32>, vector<17x17xf32> -> vector<17x17xf32>
    "tpu.trace_stop"() : () -> ()
    %cst_526 = arith.constant 2.500000e-01 : f32
    %783 = vector.broadcast %cst_526 : f32 to vector<17x17xf32>
    %784 = arith.mulf %782, %783 : vector<17x17xf32>
    %cst_527 = arith.constant dense<0xFF800000> : vector<17xf32>
    %785 = vector.multi_reduction <maximumf>, %784, %cst_527 [1] : vector<17x17xf32> to vector<17xf32>
    %786 = vector.shape_cast %785 : vector<17xf32> to vector<17x1xf32>
    %787 = vector.broadcast %786 : vector<17x1xf32> to vector<17x17xf32>
    %788 = arith.subf %784, %787 : vector<17x17xf32>
    %789 = math.exp %788 : vector<17x17xf32>
    %cst_528 = arith.constant dense<0.000000e+00> : vector<17xf32>
    %790 = vector.multi_reduction <add>, %789, %cst_528 [1] : vector<17x17xf32> to vector<17xf32>
    %791 = vector.shape_cast %790 : vector<17xf32> to vector<17x1xf32>
    %792 = tpu.reciprocal %791 {approx = true} : vector<17x1xf32> -> vector<17x1xf32>
    %793 = vector.broadcast %792 : vector<17x1xf32> to vector<17x17xf32>
    %794 = arith.mulf %789, %793 : vector<17x17xf32>
    %cst_529 = arith.constant dense<0.000000e+00> : vector<17x16xf32>
    %795 = tpu.matmul %794, %781, %cst_529 {dimension_numbers = #tpu.dot_dimension_numbers<[1], [0], [0], [1], [0, 0, 1, 1], [], []>} : vector<17x17xf32>, vector<17x16xf32>, vector<17x16xf32> -> vector<17x16xf32>
    %c3_530 = arith.constant 3 : index
    %c0_531 = arith.constant 0 : index
    %c0_532 = arith.constant 0 : index
    %796 = vector.load %arg28[%c3_530, %c0_531, %c0_532] : memref<4x16x32xf32, #tpu.memory_space<vmem>>, vector<1x16x32xf32>
    %797 = vector.shape_cast %796 : vector<1x16x32xf32> to vector<16x32xf32>
    %cst_533 = arith.constant dense<0.000000e+00> : vector<17x32xf32>
    %798 = tpu.matmul %795, %797, %cst_533 {dimension_numbers = #tpu.dot_dimension_numbers<[1], [0], [0], [1], [0, 0, 1, 1], [], []>} : vector<17x16xf32>, vector<16x32xf32>, vector<17x32xf32> -> vector<17x32xf32>
    %799 = arith.addf %760, %798 : vector<17x32xf32>
    %800 = arith.addf %694, %799 : vector<17x32xf32>
    %c1_534 = arith.constant 1 : index
    %c0_535 = arith.constant 0 : index
    %c0_536 = arith.constant 0 : index
    %801 = vector.load %arg29[%c1_534, %c0_535, %c0_536] : memref<2x1x32xf32, #tpu.memory_space<vmem>>, vector<1x1x32xf32>
    %802 = vector.shape_cast %801 : vector<1x1x32xf32> to vector<1x32xf32>
    %803 = vector.broadcast %802 : vector<1x32xf32> to vector<17x32xf32>
    %804 = arith.addf %800, %803 : vector<17x32xf32>
    %c1_537 = arith.constant 1 : index
    %c0_538 = arith.constant 0 : index
    %c0_539 = arith.constant 0 : index
    %805 = vector.load %arg30[%c1_537, %c0_538, %c0_539] : memref<2x1x32xf32, #tpu.memory_space<vmem>>, vector<1x1x32xf32>
    %806 = vector.shape_cast %805 : vector<1x1x32xf32> to vector<1x32xf32>
    %c1_540 = arith.constant 1 : index
    %c0_541 = arith.constant 0 : index
    %c0_542 = arith.constant 0 : index
    %807 = vector.load %arg31[%c1_540, %c0_541, %c0_542] : memref<2x1x32xf32, #tpu.memory_space<vmem>>, vector<1x1x32xf32>
    %808 = vector.shape_cast %807 : vector<1x1x32xf32> to vector<1x32xf32>
    %cst_543 = arith.constant dense<0.000000e+00> : vector<17xf32>
    %809 = vector.multi_reduction <add>, %804, %cst_543 [1] : vector<17x32xf32> to vector<17xf32>
    %810 = vector.shape_cast %809 : vector<17xf32> to vector<17x1xf32>
    %cst_544 = arith.constant 3.200000e+01 : f32
    %811 = vector.broadcast %cst_544 : f32 to vector<17x1xf32>
    %812 = arith.divf %810, %811 : vector<17x1xf32>
    %813 = vector.broadcast %812 : vector<17x1xf32> to vector<17x32xf32>
    %814 = arith.subf %804, %813 : vector<17x32xf32>
    %815 = arith.mulf %814, %814 : vector<17x32xf32>
    %cst_545 = arith.constant dense<0.000000e+00> : vector<17xf32>
    %816 = vector.multi_reduction <add>, %815, %cst_545 [1] : vector<17x32xf32> to vector<17xf32>
    %817 = vector.shape_cast %816 : vector<17xf32> to vector<17x1xf32>
    %cst_546 = arith.constant 3.200000e+01 : f32
    %818 = vector.broadcast %cst_546 : f32 to vector<17x1xf32>
    %819 = arith.divf %817, %818 : vector<17x1xf32>
    %820 = vector.broadcast %812 : vector<17x1xf32> to vector<17x32xf32>
    %821 = arith.subf %804, %820 : vector<17x32xf32>
    %cst_547 = arith.constant 9.99999974E-6 : f32
    %822 = vector.broadcast %cst_547 : f32 to vector<17x1xf32>
    %823 = arith.addf %819, %822 : vector<17x1xf32>
    %824 = math.rsqrt %823 : vector<17x1xf32>
    %825 = vector.broadcast %824 : vector<17x1xf32> to vector<17x32xf32>
    %826 = arith.mulf %821, %825 : vector<17x32xf32>
    %827 = vector.broadcast %806 : vector<1x32xf32> to vector<17x32xf32>
    %828 = arith.mulf %826, %827 : vector<17x32xf32>
    %829 = vector.broadcast %808 : vector<1x32xf32> to vector<17x32xf32>
    %830 = arith.addf %828, %829 : vector<17x32xf32>
    %c1_548 = arith.constant 1 : index
    %c0_549 = arith.constant 0 : index
    %c0_550 = arith.constant 0 : index
    %831 = vector.load %arg32[%c1_548, %c0_549, %c0_550] : memref<2x32x128xf32, #tpu.memory_space<vmem>>, vector<1x32x128xf32>
    %832 = vector.shape_cast %831 : vector<1x32x128xf32> to vector<32x128xf32>
    %cst_551 = arith.constant dense<0.000000e+00> : vector<17x128xf32>
    %833 = tpu.matmul %830, %832, %cst_551 {dimension_numbers = #tpu.dot_dimension_numbers<[1], [0], [0], [1], [0, 0, 1, 1], [], []>} : vector<17x32xf32>, vector<32x128xf32>, vector<17x128xf32> -> vector<17x128xf32>
    %c1_552 = arith.constant 1 : index
    %c0_553 = arith.constant 0 : index
    %c0_554 = arith.constant 0 : index
    %834 = vector.load %arg33[%c1_552, %c0_553, %c0_554] : memref<2x1x128xf32, #tpu.memory_space<vmem>>, vector<1x1x128xf32>
    %835 = vector.shape_cast %834 : vector<1x1x128xf32> to vector<1x128xf32>
    %836 = vector.broadcast %835 : vector<1x128xf32> to vector<17x128xf32>
    %837 = arith.addf %833, %836 : vector<17x128xf32>
    %838 = arith.mulf %837, %837 : vector<17x128xf32>
    %839 = arith.mulf %837, %838 : vector<17x128xf32>
    %cst_555 = arith.constant 4.471500e-02 : f32
    %840 = vector.broadcast %cst_555 : f32 to vector<17x128xf32>
    %841 = arith.mulf %840, %839 : vector<17x128xf32>
    %842 = arith.addf %837, %841 : vector<17x128xf32>
    %cst_556 = arith.constant 0.797884583 : f32
    %843 = vector.broadcast %cst_556 : f32 to vector<17x128xf32>
    %844 = arith.mulf %843, %842 : vector<17x128xf32>
    %845 = math.tanh %844 : vector<17x128xf32>
    %cst_557 = arith.constant 1.000000e+00 : f32
    %846 = vector.broadcast %cst_557 : f32 to vector<17x128xf32>
    %847 = arith.addf %846, %845 : vector<17x128xf32>
    %cst_558 = arith.constant 5.000000e-01 : f32
    %848 = vector.broadcast %cst_558 : f32 to vector<17x128xf32>
    %849 = arith.mulf %848, %847 : vector<17x128xf32>
    %850 = arith.mulf %837, %849 : vector<17x128xf32>
    %c1_559 = arith.constant 1 : index
    %c0_560 = arith.constant 0 : index
    %c0_561 = arith.constant 0 : index
    %851 = vector.load %arg34[%c1_559, %c0_560, %c0_561] : memref<2x128x32xf32, #tpu.memory_space<vmem>>, vector<1x128x32xf32>
    %852 = vector.shape_cast %851 : vector<1x128x32xf32> to vector<128x32xf32>
    %cst_562 = arith.constant dense<0.000000e+00> : vector<17x32xf32>
    %853 = tpu.matmul %850, %852, %cst_562 {dimension_numbers = #tpu.dot_dimension_numbers<[1], [0], [0], [1], [0, 0, 1, 1], [], []>} : vector<17x128xf32>, vector<128x32xf32>, vector<17x32xf32> -> vector<17x32xf32>
    %c1_563 = arith.constant 1 : index
    %c0_564 = arith.constant 0 : index
    %c0_565 = arith.constant 0 : index
    %854 = vector.load %arg35[%c1_563, %c0_564, %c0_565] : memref<2x1x32xf32, #tpu.memory_space<vmem>>, vector<1x1x32xf32>
    %855 = vector.shape_cast %854 : vector<1x1x32xf32> to vector<1x32xf32>
    %856 = vector.broadcast %855 : vector<1x32xf32> to vector<17x32xf32>
    %857 = arith.addf %853, %856 : vector<17x32xf32>
    %858 = arith.addf %804, %857 : vector<17x32xf32>
    %c0_566 = arith.constant 0 : index
    %c0_567 = arith.constant 0 : index
    %859 = vector.load %arg42[%c0_566, %c0_567] : memref<17x32xf32, #tpu.memory_space<vmem>>, vector<17x32xf32>
    tpu.vector_store %arg42[%c0_566, %c0_567], %858 {strides = array<i32>} : memref<17x32xf32, #tpu.memory_space<vmem>>, vector<17x32xf32>,
    %c1_568 = arith.constant 1 : index
    %c0_569 = arith.constant 0 : index
    %860 = vector.load %arg42[%c1_568, %c0_569] : memref<17x32xf32, #tpu.memory_space<vmem>>, vector<16x32xf32>
    %c0_570 = arith.constant 0 : index
    %c0_571 = arith.constant 0 : index
    %861 = vector.load %arg36[%c0_570, %c0_571] : memref<32x48xf32, #tpu.memory_space<vmem>>, vector<32x48xf32>
    %cst_572 = arith.constant dense<0.000000e+00> : vector<16x48xf32>
    %862 = tpu.matmul %860, %861, %cst_572 {dimension_numbers = #tpu.dot_dimension_numbers<[1], [0], [0], [1], [0, 0, 1, 1], [], []>} : vector<16x32xf32>, vector<32x48xf32>, vector<16x48xf32> -> vector<16x48xf32>
    %c0_573 = arith.constant 0 : index
    %c0_574 = arith.constant 0 : index
    %863 = vector.load %arg37[%c0_573, %c0_574] : memref<1x48xf32, #tpu.memory_space<vmem>>, vector<1x48xf32>
    %864 = vector.broadcast %863 : vector<1x48xf32> to vector<16x48xf32>
    %865 = arith.addf %862, %864 : vector<16x48xf32>
    %c0_575 = arith.constant 0 : index
    %c0_576 = arith.constant 0 : index
    %c0_577 = arith.constant 0 : index
    %866 = vector.load %arg38[%c0_575, %c0_576, %c0_577] : memref<1x16x48xf32, #tpu.memory_space<vmem>>, vector<1x16x48xf32>
    %867 = vector.shape_cast %866 : vector<1x16x48xf32> to vector<16x48xf32>
    %868 = vector.shape_cast %865 : vector<16x48xf32> to vector<1x16x48xf32>
    tpu.vector_store %arg38[%c0_575, %c0_576, %c0_577], %868 {strides = array<i32>} : memref<1x16x48xf32, #tpu.memory_space<vmem>>, vector<1x16x48xf32>,
    return
  }
  func.func @transform_0(%arg0: i32, %arg1: memref<12x2xi32, #tpu.memory_space<smem>>, %arg2: memref<16x2xi32, #tpu.memory_space<smem>>) -> (i32, i32, i32) {
    %c0_i32 = arith.constant 0 : i32
    %c0_i32_0 = arith.constant 0 : i32
    %c0_i32_1 = arith.constant 0 : i32
    return %arg0, %c0_i32, %c0_i32_0 : i32, i32, i32
  }
  func.func @transform_1(%arg0: i32, %arg1: memref<12x2xi32, #tpu.memory_space<smem>>, %arg2: memref<16x2xi32, #tpu.memory_space<smem>>) -> (i32, i32) {
    %c0_i32 = arith.constant 0 : i32
    %c0_i32_0 = arith.constant 0 : i32
    %c0_i32_1 = arith.constant 0 : i32
    return %c0_i32, %c0_i32_0 : i32, i32
  }
  func.func @transform_2(%arg0: i32, %arg1: memref<12x2xi32, #tpu.memory_space<smem>>, %arg2: memref<16x2xi32, #tpu.memory_space<smem>>) -> (i32, i32) {
    %c0_i32 = arith.constant 0 : i32
    %c0_i32_0 = arith.constant 0 : i32
    %c0_i32_1 = arith.constant 0 : i32
    return %c0_i32, %c0_i32_0 : i32, i32
  }
  func.func @transform_3(%arg0: i32, %arg1: memref<12x2xi32, #tpu.memory_space<smem>>, %arg2: memref<16x2xi32, #tpu.memory_space<smem>>) -> (i32, i32) {
    %c0_i32 = arith.constant 0 : i32
    %c0_i32_0 = arith.constant 0 : i32
    %c0_i32_1 = arith.constant 0 : i32
    return %c0_i32, %c0_i32_0 : i32, i32
  }
  func.func @transform_4(%arg0: i32, %arg1: memref<12x2xi32, #tpu.memory_space<smem>>, %arg2: memref<16x2xi32, #tpu.memory_space<smem>>) -> (i32, i32) {
    %c0_i32 = arith.constant 0 : i32
    %c0_i32_0 = arith.constant 0 : i32
    %c0_i32_1 = arith.constant 0 : i32
    return %c0_i32, %c0_i32_0 : i32, i32
  }
  func.func @transform_5(%arg0: i32, %arg1: memref<12x2xi32, #tpu.memory_space<smem>>, %arg2: memref<16x2xi32, #tpu.memory_space<smem>>) -> (i32, i32, i32) {
    %c0_i32 = arith.constant 0 : i32
    %c0_i32_0 = arith.constant 0 : i32
    %c0_i32_1 = arith.constant 0 : i32
    %c0_i32_2 = arith.constant 0 : i32
    return %c0_i32, %c0_i32_0, %c0_i32_1 : i32, i32, i32
  }
  func.func @transform_6(%arg0: i32, %arg1: memref<12x2xi32, #tpu.memory_space<smem>>, %arg2: memref<16x2xi32, #tpu.memory_space<smem>>) -> (i32, i32, i32) {
    %c0_i32 = arith.constant 0 : i32
    %c0_i32_0 = arith.constant 0 : i32
    %c0_i32_1 = arith.constant 0 : i32
    %c0_i32_2 = arith.constant 0 : i32
    return %c0_i32, %c0_i32_0, %c0_i32_1 : i32, i32, i32
  }
  func.func @transform_7(%arg0: i32, %arg1: memref<12x2xi32, #tpu.memory_space<smem>>, %arg2: memref<16x2xi32, #tpu.memory_space<smem>>) -> (i32, i32, i32) {
    %c0_i32 = arith.constant 0 : i32
    %c0_i32_0 = arith.constant 0 : i32
    %c0_i32_1 = arith.constant 0 : i32
    %c0_i32_2 = arith.constant 0 : i32
    return %c0_i32, %c0_i32_0, %c0_i32_1 : i32, i32, i32
  }
  func.func @transform_8(%arg0: i32, %arg1: memref<12x2xi32, #tpu.memory_space<smem>>, %arg2: memref<16x2xi32, #tpu.memory_space<smem>>) -> (i32, i32, i32) {
    %c0_i32 = arith.constant 0 : i32
    %c0_i32_0 = arith.constant 0 : i32
    %c0_i32_1 = arith.constant 0 : i32
    %c0_i32_2 = arith.constant 0 : i32
    return %c0_i32, %c0_i32_0, %c0_i32_1 : i32, i32, i32
  }
  func.func @transform_9(%arg0: i32, %arg1: memref<12x2xi32, #tpu.memory_space<smem>>, %arg2: memref<16x2xi32, #tpu.memory_space<smem>>) -> (i32, i32, i32) {
    %c0_i32 = arith.constant 0 : i32
    %c0_i32_0 = arith.constant 0 : i32
    %c0_i32_1 = arith.constant 0 : i32
    %c0_i32_2 = arith.constant 0 : i32
    return %c0_i32, %c0_i32_0, %c0_i32_1 : i32, i32, i32
  }
  func.func @transform_10(%arg0: i32, %arg1: memref<12x2xi32, #tpu.memory_space<smem>>, %arg2: memref<16x2xi32, #tpu.memory_space<smem>>) -> (i32, i32, i32) {
    %c0_i32 = arith.constant 0 : i32
    %c0_i32_0 = arith.constant 0 : i32
    %c0_i32_1 = arith.constant 0 : i32
    %c0_i32_2 = arith.constant 0 : i32
    return %c0_i32, %c0_i32_0, %c0_i32_1 : i32, i32, i32
  }
  func.func @transform_11(%arg0: i32, %arg1: memref<12x2xi32, #tpu.memory_space<smem>>, %arg2: memref<16x2xi32, #tpu.memory_space<smem>>) -> (i32, i32, i32) {
    %c0_i32 = arith.constant 0 : i32
    %c0_i32_0 = arith.constant 0 : i32
    %c0_i32_1 = arith.constant 0 : i32
    %c0_i32_2 = arith.constant 0 : i32
    return %c0_i32, %c0_i32_0, %c0_i32_1 : i32, i32, i32
  }
  func.func @transform_12(%arg0: i32, %arg1: memref<12x2xi32, #tpu.memory_space<smem>>, %arg2: memref<16x2xi32, #tpu.memory_space<smem>>) -> (i32, i32, i32) {
    %c0_i32 = arith.constant 0 : i32
    %c0_i32_0 = arith.constant 0 : i32
    %c0_i32_1 = arith.constant 0 : i32
    %c0_i32_2 = arith.constant 0 : i32
    return %c0_i32, %c0_i32_0, %c0_i32_1 : i32, i32, i32
  }
  func.func @transform_13(%arg0: i32, %arg1: memref<12x2xi32, #tpu.memory_space<smem>>, %arg2: memref<16x2xi32, #tpu.memory_space<smem>>) -> (i32, i32, i32) {
    %c0_i32 = arith.constant 0 : i32
    %c0_i32_0 = arith.constant 0 : i32
    %c0_i32_1 = arith.constant 0 : i32
    %c0_i32_2 = arith.constant 0 : i32
    return %c0_i32, %c0_i32_0, %c0_i32_1 : i32, i32, i32
  }
  func.func @transform_14(%arg0: i32, %arg1: memref<12x2xi32, #tpu.memory_space<smem>>, %arg2: memref<16x2xi32, #tpu.memory_space<smem>>) -> (i32, i32, i32) {
    %c0_i32 = arith.constant 0 : i32
    %c0_i32_0 = arith.constant 0 : i32
    %c0_i32_1 = arith.constant 0 : i32
    %c0_i32_2 = arith.constant 0 : i32
    return %c0_i32, %c0_i32_0, %c0_i32_1 : i32, i32, i32
  }
  func.func @transform_15(%arg0: i32, %arg1: memref<12x2xi32, #tpu.memory_space<smem>>, %arg2: memref<16x2xi32, #tpu.memory_space<smem>>) -> (i32, i32, i32) {
    %c0_i32 = arith.constant 0 : i32
    %c0_i32_0 = arith.constant 0 : i32
    %c0_i32_1 = arith.constant 0 : i32
    %c0_i32_2 = arith.constant 0 : i32
    return %c0_i32, %c0_i32_0, %c0_i32_1 : i32, i32, i32
  }
  func.func @transform_16(%arg0: i32, %arg1: memref<12x2xi32, #tpu.memory_space<smem>>, %arg2: memref<16x2xi32, #tpu.memory_space<smem>>) -> (i32, i32, i32) {
    %c0_i32 = arith.constant 0 : i32
    %c0_i32_0 = arith.constant 0 : i32
    %c0_i32_1 = arith.constant 0 : i32
    %c0_i32_2 = arith.constant 0 : i32
    return %c0_i32, %c0_i32_0, %c0_i32_1 : i32, i32, i32
  }
  func.func @transform_17(%arg0: i32, %arg1: memref<12x2xi32, #tpu.memory_space<smem>>, %arg2: memref<16x2xi32, #tpu.memory_space<smem>>) -> (i32, i32) {
    %c0_i32 = arith.constant 0 : i32
    %c0_i32_0 = arith.constant 0 : i32
    %c0_i32_1 = arith.constant 0 : i32
    return %c0_i32, %c0_i32_0 : i32, i32
  }
  func.func @transform_18(%arg0: i32, %arg1: memref<12x2xi32, #tpu.memory_space<smem>>, %arg2: memref<16x2xi32, #tpu.memory_space<smem>>) -> (i32, i32) {
    %c0_i32 = arith.constant 0 : i32
    %c0_i32_0 = arith.constant 0 : i32
    %c0_i32_1 = arith.constant 0 : i32
    return %c0_i32, %c0_i32_0 : i32, i32
  }
  func.func @transform_19(%arg0: i32, %arg1: memref<12x2xi32, #tpu.memory_space<smem>>, %arg2: memref<16x2xi32, #tpu.memory_space<smem>>) -> (i32, i32) {
    %c0_i32 = arith.constant 0 : i32
    %c0_i32_0 = arith.constant 0 : i32
    %c0_i32_1 = arith.constant 0 : i32
    return %c0_i32, %c0_i32_0 : i32, i32
  }
  func.func @transform_20(%arg0: i32, %arg1: memref<12x2xi32, #tpu.memory_space<smem>>, %arg2: memref<16x2xi32, #tpu.memory_space<smem>>) -> (i32, i32) {
    %c0_i32 = arith.constant 0 : i32
    %c0_i32_0 = arith.constant 0 : i32
    %c0_i32_1 = arith.constant 0 : i32
    return %c0_i32, %c0_i32_0 : i32, i32
  }
  func.func @transform_21(%arg0: i32, %arg1: memref<12x2xi32, #tpu.memory_space<smem>>, %arg2: memref<16x2xi32, #tpu.memory_space<smem>>) -> (i32, i32, i32) {
    %c0_i32 = arith.constant 0 : i32
    %c0_i32_0 = arith.constant 0 : i32
    %c0_i32_1 = arith.constant 0 : i32
    %c0_i32_2 = arith.constant 0 : i32
    return %c0_i32, %c0_i32_0, %c0_i32_1 : i32, i32, i32
  }
  func.func @transform_22(%arg0: i32, %arg1: memref<12x2xi32, #tpu.memory_space<smem>>, %arg2: memref<16x2xi32, #tpu.memory_space<smem>>) -> (i32, i32, i32) {
    %c0_i32 = arith.constant 0 : i32
    %c0_i32_0 = arith.constant 0 : i32
    %c0_i32_1 = arith.constant 0 : i32
    %c0_i32_2 = arith.constant 0 : i32
    return %c0_i32, %c0_i32_0, %c0_i32_1 : i32, i32, i32
  }
  func.func @transform_23(%arg0: i32, %arg1: memref<12x2xi32, #tpu.memory_space<smem>>, %arg2: memref<16x2xi32, #tpu.memory_space<smem>>) -> (i32, i32, i32) {
    %c0_i32 = arith.constant 0 : i32
    %c0_i32_0 = arith.constant 0 : i32
    %c0_i32_1 = arith.constant 0 : i32
    %c0_i32_2 = arith.constant 0 : i32
    return %c0_i32, %c0_i32_0, %c0_i32_1 : i32, i32, i32
  }
  func.func @transform_24(%arg0: i32, %arg1: memref<12x2xi32, #tpu.memory_space<smem>>, %arg2: memref<16x2xi32, #tpu.memory_space<smem>>) -> (i32, i32, i32) {
    %c0_i32 = arith.constant 0 : i32
    %c0_i32_0 = arith.constant 0 : i32
    %c0_i32_1 = arith.constant 0 : i32
    %c0_i32_2 = arith.constant 0 : i32
    return %c0_i32, %c0_i32_0, %c0_i32_1 : i32, i32, i32
  }
  func.func @transform_25(%arg0: i32, %arg1: memref<12x2xi32, #tpu.memory_space<smem>>, %arg2: memref<16x2xi32, #tpu.memory_space<smem>>) -> (i32, i32, i32) {
    %c0_i32 = arith.constant 0 : i32
    %c0_i32_0 = arith.constant 0 : i32
    %c0_i32_1 = arith.constant 0 : i32
    %c0_i32_2 = arith.constant 0 : i32
    return %c0_i32, %c0_i32_0, %c0_i32_1 : i32, i32, i32
  }
  func.func @transform_26(%arg0: i32, %arg1: memref<12x2xi32, #tpu.memory_space<smem>>, %arg2: memref<16x2xi32, #tpu.memory_space<smem>>) -> (i32, i32, i32) {
    %c0_i32 = arith.constant 0 : i32
    %c0_i32_0 = arith.constant 0 : i32
    %c0_i32_1 = arith.constant 0 : i32
    %c0_i32_2 = arith.constant 0 : i32
    return %c0_i32, %c0_i32_0, %c0_i32_1 : i32, i32, i32
  }
  func.func @transform_27(%arg0: i32, %arg1: memref<12x2xi32, #tpu.memory_space<smem>>, %arg2: memref<16x2xi32, #tpu.memory_space<smem>>) -> (i32, i32, i32) {
    %c0_i32 = arith.constant 0 : i32
    %c0_i32_0 = arith.constant 0 : i32
    %c0_i32_1 = arith.constant 0 : i32
    %c0_i32_2 = arith.constant 0 : i32
    return %c0_i32, %c0_i32_0, %c0_i32_1 : i32, i32, i32
  }
  func.func @transform_28(%arg0: i32, %arg1: memref<12x2xi32, #tpu.memory_space<smem>>, %arg2: memref<16x2xi32, #tpu.memory_space<smem>>) -> (i32, i32, i32) {
    %c0_i32 = arith.constant 0 : i32
    %c0_i32_0 = arith.constant 0 : i32
    %c0_i32_1 = arith.constant 0 : i32
    %c0_i32_2 = arith.constant 0 : i32
    return %c0_i32, %c0_i32_0, %c0_i32_1 : i32, i32, i32
  }
  func.func @transform_29(%arg0: i32, %arg1: memref<12x2xi32, #tpu.memory_space<smem>>, %arg2: memref<16x2xi32, #tpu.memory_space<smem>>) -> (i32, i32, i32) {
    %c0_i32 = arith.constant 0 : i32
    %c0_i32_0 = arith.constant 0 : i32
    %c0_i32_1 = arith.constant 0 : i32
    %c0_i32_2 = arith.constant 0 : i32
    return %c0_i32, %c0_i32_0, %c0_i32_1 : i32, i32, i32
  }
  func.func @transform_30(%arg0: i32, %arg1: memref<12x2xi32, #tpu.memory_space<smem>>, %arg2: memref<16x2xi32, #tpu.memory_space<smem>>) -> (i32, i32, i32) {
    %c0_i32 = arith.constant 0 : i32
    %c0_i32_0 = arith.constant 0 : i32
    %c0_i32_1 = arith.constant 0 : i32
    %c0_i32_2 = arith.constant 0 : i32
    return %c0_i32, %c0_i32_0, %c0_i32_1 : i32, i32, i32
  }
  func.func @transform_31(%arg0: i32, %arg1: memref<12x2xi32, #tpu.memory_space<smem>>, %arg2: memref<16x2xi32, #tpu.memory_space<smem>>) -> (i32, i32, i32) {
    %c0_i32 = arith.constant 0 : i32
    %c0_i32_0 = arith.constant 0 : i32
    %c0_i32_1 = arith.constant 0 : i32
    %c0_i32_2 = arith.constant 0 : i32
    return %c0_i32, %c0_i32_0, %c0_i32_1 : i32, i32, i32
  }
  func.func @transform_32(%arg0: i32, %arg1: memref<12x2xi32, #tpu.memory_space<smem>>, %arg2: memref<16x2xi32, #tpu.memory_space<smem>>) -> (i32, i32, i32) {
    %c0_i32 = arith.constant 0 : i32
    %c0_i32_0 = arith.constant 0 : i32
    %c0_i32_1 = arith.constant 0 : i32
    %c0_i32_2 = arith.constant 0 : i32
    return %c0_i32, %c0_i32_0, %c0_i32_1 : i32, i32, i32
  }
  func.func @transform_33(%arg0: i32, %arg1: memref<12x2xi32, #tpu.memory_space<smem>>, %arg2: memref<16x2xi32, #tpu.memory_space<smem>>) -> (i32, i32) {
    %c0_i32 = arith.constant 0 : i32
    %c0_i32_0 = arith.constant 0 : i32
    %c0_i32_1 = arith.constant 0 : i32
    return %c0_i32, %c0_i32_0 : i32, i32
  }
  func.func @transform_34(%arg0: i32, %arg1: memref<12x2xi32, #tpu.memory_space<smem>>, %arg2: memref<16x2xi32, #tpu.memory_space<smem>>) -> (i32, i32) {
    %c0_i32 = arith.constant 0 : i32
    %c0_i32_0 = arith.constant 0 : i32
    %c0_i32_1 = arith.constant 0 : i32
    return %c0_i32, %c0_i32_0 : i32, i32
  }
  func.func @transform_35(%arg0: i32, %arg1: memref<12x2xi32, #tpu.memory_space<smem>>, %arg2: memref<16x2xi32, #tpu.memory_space<smem>>) -> (i32, i32, i32) {
    %c0_i32 = arith.constant 0 : i32
    %c0_i32_0 = arith.constant 0 : i32
    %c0_i32_1 = arith.constant 0 : i32
    return %arg0, %c0_i32, %c0_i32_0 : i32, i32, i32
  }
}

</mosaic_0001>

<bundles_post_ra>
// kernel: mae_vit_forward.1
= control target key start
LH: loop header
LB: loop body
LE: loop exit
PB: predicated region body
PF: predicated region fallthrough
CT: control target
= control target key end

     0   :  { %s9975_s6 = smov 2   ;;  %s9976_s10 = smov 3   ;;  %s11415_s0 = inlined_call_operand.smem [shape: u32[38], index: -1, kind: input, shape index: {}] }
   0x1   :  { %s10026_s5 = sld [smem:[%s11415_s0]]   ;;  %s9977_s14 = smov 4  }
   0x2   :  { %s10031_s9 = sld [smem:[%s11415_s0 + %s9975_s6]]   ;;  %s9978_s18 = smov 5  }
   0x3   :  { %s10036_s13 = sld [smem:[%s11415_s0 + %s9976_s10]]   ;;  %s9979_s22 = smov 6  }
   0x4   :  { %s10041_s17 = sld [smem:[%s11415_s0 + %s9977_s14]]   ;;  %s9980_s26 = smov 7  }
   0x5   :  { %s10046_s21 = sld [smem:[%s11415_s0 + %s9978_s18]]   ;;  %s9981_s30 = smov 8  }
   0x6   :  { %s10051_s25 = sld [smem:[%s11415_s0 + %s9979_s22]]   ;;  %s9982_s4 = smov 9  }
   0x7   :  { %s10056_s29 = sld [smem:[%s11415_s0 + %s9980_s26]]   ;;  %s9983_s10 = smov 10  }
   0x8   :  { %11459 = sst [smem:[#allocation10_spill]] %s10031_s9  ;;  %s9984_s15 = smov 11  }
   0x9   :  { %11460 = sst [smem:[#allocation11_spill]] %s10036_s13  ;;  %s9985_s20 = smov 12  }
   0xa   :  { %11461 = sst [smem:[#allocation12_spill]] %s10041_s17  ;;  %s9986_s26 = smov 13  }
   0xb   :  { %11462 = sst [smem:[#allocation13_spill]] %s10046_s21  ;;  %s9987_s1 = smov 14  }
   0xc   :  { %11463 = sst [smem:[#allocation14_spill]] %s10051_s25  ;;  %s9988_s7 = smov 15  }
   0xd   :  { %s10061_s3 = sld [smem:[%s11415_s0 + %s9981_s30]]   ;;  %s9990_s22 = smov 17  }
   0xe   :  { %s10066_s8 = sld [smem:[%s11415_s0 + %s9982_s4]]   ;;  %s9991_s28 = smov 18  }
   0xf   :  { %s10071_s14 = sld [smem:[%s11415_s0 + %s9983_s10]]  }
  0x10   :  { %s10076_s19 = sld [smem:[%s11415_s0 + %s9984_s15]]   ;;  %s9989_s15 = smov 16  }
  0x11   :  { %s10081_s24 = sld [smem:[%s11415_s0 + %s9985_s20]]  }
  0x12   :  { %s10086_s30 = sld [smem:[%s11415_s0 + %s9986_s26]]  }
  0x13   :  { %11464 = sst [smem:[#allocation15_spill]] %s10061_s3 }
  0x14   :  { %11465 = sst [smem:[#allocation16_spill]] %s10066_s8 }
  0x15   :  { %11466 = sst [smem:[#allocation17_spill]] %s10071_s14 }
  0x16   :  { %11467 = sst [smem:[#allocation18_spill]] %s10076_s19 }
  0x17   :  { %11468 = sst [smem:[#allocation19_spill]] %s10081_s24 }
  0x18   :  { %s10091_s6 = sld [smem:[%s11415_s0 + %s9987_s1]]  }
  0x19   :  { %s10096_s12 = sld [smem:[%s11415_s0 + %s9988_s7]]   ;;  %s9992_s7 = smov 19  }
  0x1a   :  { %s10101_s20 = sld [smem:[%s11415_s0 + %s9989_s15]]   ;;  %s9993_s15 = smov 20  }
  0x1b   :  { %s10106_s27 = sld [smem:[%s11415_s0 + %s9990_s22]]   ;;  %s9994_s22 = smov 21  }
  0x1c   :  { %s10111_s4 = sld [smem:[%s11415_s0 + %s9991_s28]]   ;;  %s9995_s28 = smov 22  }
  0x1e   :  { %11469 = sst [smem:[#allocation20_spill]] %s10091_s6 }
  0x1f   :  { %11470 = sst [smem:[#allocation21_spill]] %s10096_s12 }
  0x20   :  { %11471 = sst [smem:[#allocation22_spill]] %s10101_s20 }
  0x21   :  { %11472 = sst [smem:[#allocation23_spill]] %s10106_s27 }
  0x22   :  { %11473 = sst [smem:[#allocation24_spill]] %s10111_s4 }
  0x23   :  { %s10116_s6 = sld [smem:[%s11415_s0 + %s9992_s7]]   ;;  %s9996_s7 = smov 23  }
  0x24   :  { %s10121_s20 = sld [smem:[%s11415_s0 + %s9993_s15]]   ;;  %s9997_s15 = smov 24  }
  0x25   :  { %s10126_s27 = sld [smem:[%s11415_s0 + %s9994_s22]]   ;;  %s9998_s22 = smov 25  }
  0x26   :  { %s10131_s4 = sld [smem:[%s11415_s0 + %s9995_s28]]   ;;  %s9999_s28 = smov 26  }
  0x29   :  { %11474 = sst [smem:[#allocation25_spill]] %s10116_s6 }
  0x2a   :  { %11475 = sst [smem:[#allocation26_spill]] %s10121_s20 }
  0x2b   :  { %11476 = sst [smem:[#allocation27_spill]] %s10126_s27 }
  0x2c   :  { %11477 = sst [smem:[#allocation28_spill]] %s10131_s4 }
  0x2d   :  { %s10136_s6 = sld [smem:[%s11415_s0 + %s9996_s7]]   ;;  %s10000_s7 = smov 27  }
  0x2e   :  { %s10141_s20 = sld [smem:[%s11415_s0 + %s9997_s15]]   ;;  %s10001_s15 = smov 28  }
  0x2f   :  { %s10146_s27 = sld [smem:[%s11415_s0 + %s9998_s22]]   ;;  %s10002_s22 = smov 29  }
  0x30   :  { %s10151_s4 = sld [smem:[%s11415_s0 + %s9999_s28]]   ;;  %s10003_s28 = smov 30  }
  0x31   :  { %s10171_s10 = sld [smem:[%s11415_s0 + %s10003_s28]]   ;;  %s10007_s28 = smov 34  }
  0x33   :  { %11478 = sst [smem:[#allocation29_spill]] %s10136_s6 }
  0x34   :  { %11479 = sst [smem:[#allocation30_spill]] %s10141_s20 }
  0x35   :  { %11480 = sst [smem:[#allocation31_spill]] %s10146_s27 }
  0x36   :  { %11481 = sst [smem:[#allocation32_spill]] %s10151_s4 }
  0x37   :  { %s10156_s6 = sld [smem:[%s11415_s0 + %s10000_s7]]   ;;  %s10004_s7 = smov 31  }
  0x38   :  { %s10161_s20 = sld [smem:[%s11415_s0 + %s10001_s15]]   ;;  %s10005_s15 = smov 32  }
  0x39   :  { %s10166_s27 = sld [smem:[%s11415_s0 + %s10002_s22]]   ;;  %s10006_s22 = smov 33  }
  0x3a   :  { %11485 = sst [smem:[#allocation36_spill]] %s10171_s10  ;;  %s80_s10 = sshll.u32 %s10026_s5, 4  ;;  %s81_s10 = int_to_ptr.vmem [resolvable:$true] %s80_s10 }
  0x3b   :  { %s10176_s16 = sld [smem:[%s11415_s0 + %s10004_s7]]   ;;  %p9946_p1 = scmp.lt.s32.totalorder %s81_s10, %s81_s10 }
  0x3c   :  { %s10181_s23 = sld [smem:[%s11415_s0 + %s10005_s15]]  }
  0x3d   :  { %11482 = sst [smem:[#allocation33_spill]] %s10156_s6  ;;  %s10008_s6 = smov 35  }
  0x3e   :  { %11483 = sst [smem:[#allocation34_spill]] %s10161_s20  ;;  %s10009_s20 = smov 36  }
  0x3f   :  { %11484 = sst [smem:[#allocation35_spill]] %s10166_s27  ;;  %s10010_s27 = smov 37  }
  0x40   :  { %s10186_s1 = sld [smem:[%s11415_s0 + %s10006_s22]]  }
  0x41   :  { %11486 = sst [smem:[#allocation37_spill]] %s10176_s16 }
  0x42   :  { %11487 = sst [smem:[#allocation38_spill]] %s10181_s23 }
  0x43   :  { %s10191_s4 = sld [smem:[%s11415_s0 + %s10007_s28]]   ;;  %s9941_s28 = scalar_lea.vmem %s81_s10, 256 }
  0x44   :  { %s10196_s16 = sld [smem:[%s11415_s0 + %s10008_s6]]   ;;  %p9942_p0 = scmp.ne.s32.totalorder %s81_s10, %s9941_s28 }
  0x45   :  { %s10201_s23 = sld [smem:[%s11415_s0 + %s10009_s20]]   ;;  %p9947_p2 = scmp.lt.s32.totalorder %s9941_s28, %s9941_s28 }
  0x46   :  { %11488 = sst [smem:[#allocation39_spill]] %s10186_s1 }
  0x47   :  { %s10206_s1 = sld [smem:[%s11415_s0 + %s10010_s27]]   ;;  %p9948_p3 = por %p9947_p2, %p9946_p1 }
  0x49   :  { %11489 = sst [smem:[#allocation40_spill]] %s10191_s4  ;;  %p9949_p4 = pnand %p9948_p3, %p9942_p0 }
  0x4a   :  { %11490 = sst [smem:[#allocation41_spill]] %s10196_s16 }
  0x4b   :  { %11491 = sst [smem:[#allocation42_spill]] %s10201_s23 }
  0x4d   :  { %11492 = sst [smem:[#allocation43_spill]] %s10206_s1 }
  0x4e   :  { %9952 = shalt.err (!%p9949_p4)  }
  0x4f   :  { %s10011_s2 = smov [#allocation7]   ;;  %s10012_s6 = smov 1  }
  0x50   :  { %83 = dma.vmem_to_smem %s81_s10, 256, %s10011_s2, [#allocation6] }
  0x51   :  { %s7592_s20 = sld [smem:[%s11415_s0 + %s10012_s6]]  }
  0x57   :  { %s84_s15 = sshll.u32 %s7592_s20, 4  ;;  %s85_s15 = int_to_ptr.vmem [resolvable:$true] %s84_s15 }
  0x58   :  { %s9953_s18 = scalar_lea.vmem %s85_s15, 256  ;;  %p9958_p6 = scmp.lt.s32.totalorder %s85_s15, %s85_s15 }
  0x59   :  { %p9954_p5 = scmp.ne.s32.totalorder %s85_s15, %s9953_s18  ;;  %p9959_p7 = scmp.lt.s32.totalorder %s9953_s18, %s9953_s18 }
  0x5b   :  { %p9960_p8 = por %p9959_p7, %p9958_p6 }
  0x5d   :  { %p9961_p9 = pnand %p9960_p8, %p9954_p5 }
  0x5f   :  { %9964 = shalt.err (!%p9961_p9)  }
  0x60   :  { %s10013_s5 = smov [#allocation8]  }
  0x61   :  { %87 = dma.vmem_to_smem %s85_s15, 256, %s10013_s5, [#allocation6] }
  0x62   :  { %9969 = dma.done.wait [#allocation6], 512 }
  0x63   :  { %9970 = vsyncadd [#allocation6], 4294966784 }
  0x64   :  { %89 = sfence }
  0x65   :  { %s10212_s27 = smov 0  }
  0x66 LB: > { %s11493_s24 = sld [smem:[#allocation19_spill]]  ;;  %s11494_s19 = sld [smem:[#allocation18_spill]]  ;;  %s9973_s27 = sphi %s10212_s27, %s95_s27  }
  0x67   : > { %s11495_s14 = sld [smem:[#allocation17_spill]]  ;;  %s11496_s12 = sld [smem:[#allocation21_spill]] }
  0x68   : > { %s11497_s8 = sld [smem:[#allocation16_spill]]  ;;  %s11498_s3 = sld [smem:[#allocation15_spill]] }
  0x69   : > { %s11499_s25 = sld [smem:[#allocation14_spill]]  ;;  %s11500_s13 = sld [smem:[#allocation11_spill]] }
  0x6a   : > { %11501 = sst [smem:[#allocation44_spill]] %s9973_s27  ;;  %s10218_s0 = sadd.s32 4294967295, %s9973_s27  }
  0x6b   : > { %11502 = sst [smem:[#allocation45_spill]] %s10218_s0  ;;  %p7633_p10 = scmp.ge.s32.totalorder %s9973_s27, 1 }
  0x6c   : > { %p987_p11 = scmp.lt.s32.totalorder %s9973_s27, 3 }
  0x6e   : > { %p988_p12 = pnand %p7633_p10, %p987_p11 }
  0x70   : > { %991 = sbr.rel (%p988_p12) target bundleno = 13153 (0x3361), region = 160 }
  0x77   : > { %v1087_v0 = vld [vmem:[%s11500_s13] sm:$0xff]  ;;  %s11503_s9 = sld [smem:[#allocation10_spill]]  ;;  %v1088_v1 = vld [vmem:[%s11500_s13 + $0x8] sm:$0xff]  ;;  %v1089_v2 = vld [vmem:[%s11500_s13 + $0x10] sm:$0xff]  ;;  %p1075_p13 = scmp.lt.s32.totalorder %s10218_s0, 1  ;;  %vm1100_vm0 = vcmask 392192  }
  0x78   : > { %v9310_v3 = vpack.c.bf16 %v1088_v1, %v1087_v0  ;;  %v1090_v4 = vld [vmem:[%s11500_s13 + $0x18] sm:$0xff]  ;;  %v1091_v6 = vld [vmem:[%s11500_s13 + $0x20] sm:$0xff]  ;;  %v1092_v7 = vld [vmem:[%s11500_s13 + $0x28] sm:$0xff]  ;;  %s11504_s21 = sld [smem:[#allocation13_spill]]  ;;  %vm1190_vm1 = vcmask 253952   ;;  %s1196_s28 = sshra.s32 %s10218_s0, 7 }
  0x79   : > { %v9314_v5 = vpack.c.bf16 %v1090_v4, %v1089_v2  ;;  %s10230_s22 = scalar_select %p1075_p13, %s10218_s0, 1  ;;  %v9318_v8 = vpack.c.bf16 %v1092_v7, %v1091_v6  ;;  %v1183_v14 = vld [vmem:[%s11499_s25 + $0x8] sm:$0xff]  ;;  %v1182_v17 = vld [vmem:[%s11499_s25] sm:$0xff]  ;;  %vm1186_vm2 = vcmask 261120   ;;  %vm1284_vm3 = vcmask 258048   ;;  %v1327_v53 = vld [vmem:[%s11497_s8 + $0x10] sm:$0xff] }
  0x7a   : > { %9311 = vmatprep.subr.bf16.mxu0 %v9310_v3  ;;  %s10241_s2 = sshll.u32 %s1196_s28, 7  ;;  %s10245_s7 = sand.u32 127, %s10218_s0  ;;  %v1325_v47 = vld [vmem:[%s11497_s8] sm:$0xff]  ;;  %v1326_v48 = vld [vmem:[%s11497_s8 + $0x8] sm:$0xff]  ;;  %v1328_v54 = vld [vmem:[%s11497_s8 + $0x18] sm:$0xff]  ;;  %vm1593_vm4 = vcmask 130048  }
  0x7b   : > { %11505 = sst [smem:[#allocation46_spill]] %s10230_s22  ;;  %9313 = vmatpush3.bf16.msra.mxu0 %v9310_v3  ;;  %s11432_s26 = sshll.u32 %s10230_s22, 4  ;;  %v9322_v49 = vpack.c.bf16 %v1326_v48, %v1325_v47  ;;  %v7657_v50 = vld [vmem:[%s11497_s8 + $0x40] sm:$0xff]  ;;  %v7658_v51 = vld [vmem:[%s11497_s8 + $0x48] sm:$0xff]  ;;  %v9326_v55 = vpack.c.bf16 %v1328_v54, %v1327_v53  ;;  %v7659_v56 = vld [vmem:[%s11497_s8 + $0x50] sm:$0xff]  ;;  %vm1713_vm6 = vcmask 1044480  }
  0x7c   : > { %9315 = vmatprep.subr.bf16.mxu0 %v9314_v5  ;;  %11506 = sst [smem:[#allocation47_spill]] %s10241_s2  ;;  %s8069_s6 = sadd.s32 128, %s10241_s2  ;;  %v9330_v52 = vpack.c.bf16 %v7658_v51, %v7657_v50  ;;  %v7660_v57 = vld [vmem:[%s11497_s8 + $0x58] sm:$0xff]  ;;  %v7665_v59 = vld [vmem:[%s11497_s8 + $0x80] sm:$0xff]  ;;  %v7666_v60 = vld [vmem:[%s11497_s8 + $0x88] sm:$0xff]  ;;  %vm10014_vm7 = vmmov 1  }
  0x7d   : > { %s1079_s10 = scalar_lea.vmem %s11503_s9, %s11432_s26  ;;  %11507 = sst [smem:[#allocation48_spill]] %s10245_s7  ;;  %v9334_v58 = vpack.c.bf16 %v7660_v57, %v7659_v56  ;;  %v9338_v61 = vpack.c.bf16 %v7666_v60, %v7665_v59  ;;  %v7653_v7 = vld [vmem:[%s11498_s3] ss:$0 sm:$0xff]  ;;  %vm10403_vm5 = vmpackc.low %vm1593_vm4, %vm1593_vm4  ;;  %vm1687_vm9 = vcmask 102400   ;;  %vm1683_vm10 = vcmask 105472  }
  0x7e   : > { %v1085_v9 = vld [vmem:[%s1079_s10] sm:$0xff]  ;;  %v1086_v10 = vld [vmem:[%s1079_s10 + $0x8] sm:$0xff]  ;;  %s8071_s11 = sadd.s32 256, %s10241_s2  ;;  %s8073_s20 = sadd.s32 384, %s10241_s2  ;;  %9331 = vmatprep.subr.bf16.mxu1 %v9330_v52  ;;  %vm10415_vm8 = vmpackc.low %vm1713_vm6, %vm10014_vm7  ;;  %vm4146_vm11 = vcmask 257024   ;;  %vm10016_vm12 = vmmov 0  }
  0x7f   : > { %8496 = vmatprep.mubr.msk.f32.mxu0 %vm1100_vm0, %v1085_v9  ;;  %9317 = vmatpush3.bf16.msra.mxu0 %v9314_v5  ;;  %v1189_v11 = vld [vmem:[%s11504_s21] sm:$0x1]  ;;  %s8075_s15 = sadd.s32 512, %s10241_s2  ;;  %s8077_s18 = sadd.s32 640, %s10241_s2  ;;  %v7693_v50 = vld [vmem:[%s11495_s14 + $0x3] ss:$0 sm:$0xff] }
  0x80   : > { %9319 = vmatprep.subr.bf16.mxu0 %v9318_v8  ;;  %1191 = vst.msk [vmem:[#allocation3] sm:$0x1] %vm1190_vm1, %v1189_v11  ;;  %s11508_s17 = sld [smem:[#allocation12_spill]]  ;;  %s10252_s5 = sadd.s32 %s8069_s6, %s10245_s7  ;;  %9333 = vmatpush3.bf16.msra.mxu1 %v9330_v52  ;;  %v7652_v5 = vld [vmem:[%s10056_s29] ss:$0 sm:$0xff]  ;;  %vm4741_vm13 = vcmask 1040384  }
  0x81   : > { %s10255_s10 = sadd.s32 %s8071_s11, %s10245_s7  ;;  %s10258_s28 = sadd.s32 %s8073_s20, %s10245_s7  ;;  %9335 = vmatprep.subr.bf16.mxu1 %v9334_v58  ;;  %vm4697_vm14 = vcmask 138240   ;;  %vm4704_vm15 = vcmask 131072  }
  0x82   : > { %s10261_s26 = sadd.s32 %s8075_s15, %s10245_s7  ;;  %s10264_s9 = sadd.s32 %s8077_s18, %s10245_s7 }
  0x83   : > { %9321 = vmatpush3.bf16.msra.mxu0 %v9318_v8  ;;  %11509 = sst [smem:[#allocation49_spill]] %s10261_s26  ;;  %s8079_s27 = sadd.s32 768, %s10241_s2 }
  0x84   : > { %11510 = sst [smem:[#allocation50_spill]] %s10264_s9  ;;  %s8081_s18 = sadd.s32 896, %s10241_s2  ;;  %9323 = vmatprep.subr.bf16.mxu0 %v9322_v49  ;;  %9337 = vmatpush3.bf16.msra.mxu1 %v9334_v58 }
  0x85   : > { %s10267_s13 = sld [smem:[#allocation7 + %s10218_s0]]  ;;  %s8083_s1 = sadd.s32 1024, %s10241_s2 }
  0x86   : > { %8497 = vmatmul.mubr.msk.f32.vlgmr.msra.gmra.mrb[0].mxu0 %vm1100_vm0, %v1086_v10  ;;  %s10270_s6 = sld [smem:[#allocation7 + %s10252_s5]]  ;;  %s8085_s22 = sadd.s32 1152, %s10241_s2  ;;  %v7638_v12 = vld [vmem:[%s11508_s17] ss:$0 sm:$0xff] }
  0x87   : > { %s10273_s11 = sld [smem:[#allocation7 + %s10255_s10]]  ;;  %s8087_s23 = sadd.s32 1280, %s10241_s2  ;;  %9325 = vmatpush3.bf16.msra.mxu0 %v9322_v49 }
  0x88   : > { %s10276_s20 = sld [smem:[#allocation7 + %s10258_s28]]  ;;  %s8089_s16 = sadd.s32 1408, %s10241_s2  ;;  %9327 = vmatprep.subr.bf16.mxu0 %v9326_v55 }
  0x89   : > { %s10279_s21 = sld [smem:[#allocation7 + %s10261_s26]]  ;;  %s10292_s4 = sadd.s32 %s8079_s27, %s10245_s7 }
  0x8a   : > { %s10282_s15 = sld [smem:[#allocation7 + %s10264_s9]]  ;;  %s10295_s0 = sadd.s32 %s8081_s18, %s10245_s7 }
  0x8b   : > { %s10299_s9 = sadd.s32 %s8083_s1, %s10245_s7  ;;  %s10302_s26 = sadd.s32 %s8085_s22, %s10245_s7  ;;  %9329 = vmatpush3.bf16.msra.mxu0 %v9326_v55 }
  0x8c   : > { %11511 = sst [smem:[#allocation51_spill]] %s10299_s9  ;;  %s10306_s17 = sadd.s32 %s8087_s23, %s10245_s7  ;;  %9339 = vmatprep.subr.bf16.mxu0 %v9338_v61 }
  0x8d   : > { %11512 = sst [smem:[#allocation52_spill]] %s10306_s17  ;;  %s10309_s27 = sadd.s32 %s8089_s16, %s10245_s7 }
  0x8e   : > { %11513 = sst [smem:[#allocation53_spill]] %s10309_s27  ;;  %s1193_s25 = scalar_lea.vmem [#allocation2], %s10267_s13 }
  0x8f   : > { %s10312_s1 = sld [smem:[#allocation7 + %s10292_s4]]  ;;  %s1204_s7 = scalar_lea.vmem [#allocation2], %s10270_s6 }
  0x90   : > { %s10315_s18 = sld [smem:[#allocation7 + %s10295_s0]]  ;;  %s1232_s13 = scalar_lea.vmem [#allocation2], %s10282_s15 }
  0x91   : > { %s10318_s22 = sld [smem:[#allocation7 + %s10299_s9]]  ;;  %s1211_s9 = scalar_lea.vmem [#allocation2], %s10273_s11 }
  0x92   : > { %s10321_s2 = sld [smem:[#allocation7 + %s10302_s26]] }
  0x93   : > { %s10324_s23 = sld [smem:[#allocation7 + %s10306_s17]]  ;;  %s1225_s17 = scalar_lea.vmem [#allocation2], %s10279_s21 }
  0x94   : > { %s10327_s16 = sld [smem:[#allocation7 + %s10309_s27]]  ;;  %s1218_s27 = scalar_lea.vmem [#allocation2], %s10276_s20 }
  0x95   : > { %s11519_s11 = sld [smem:[#allocation23_spill]]  ;;  %s11520_s20 = sld [smem:[#allocation22_spill]] }
  0x96   : > { %s11521_s15 = sld [smem:[#allocation24_spill]] }
  0x99   : > { %s1267_s21 = scalar_lea.vmem [#allocation2], %s10324_s23  ;;  %s11526_s23 = sld [smem:[#allocation51_spill]] }
  0x9a   : > { %s1274_s6 = scalar_lea.vmem [#allocation2], %s10327_s16  ;;  %s11527_s16 = sld [smem:[#allocation25_spill]] }
 0x159   : > { %v8498_v13 = vpop.f32.mrb[0].mxu0 }
 0x15a   : > { %v1179_v15 = vadd.f32 %v8498_v13, %v7638_v12  ;;  %v1173_v16 = vpop.f32.mrb[1].mxu0  ;;  %v7668_v13 = vld [vmem:[%s11497_s8 + $0x98] sm:$0xff] }
 0x15b   : > { %v1174_v18 = vadd.f32 %v7638_v12, %v1173_v16  ;;  %v7667_v12 = vld [vmem:[%s11497_s8 + $0x90] sm:$0xff] }
 0x15c   : > { %v1185_v19 = vadd.f32 %v1183_v14, %v1179_v15  ;;  %v9342_v16 = vpack.c.bf16 %v7668_v13, %v7667_v12 }
 0x15d   : > { %v1184_v20 = vadd.f32 %v1182_v17, %v1174_v18  ;;  %v7662_v17 = vld [vmem:[%s11495_s14 + $0x2] ss:$0 sm:$0xff]  ;;  %v7654_v18 = vld [vmem:[%s11495_s14] ss:$0 sm:$0xff] }
 0x15e   : > { %1188 = vst.msk [vmem:[#allocation2 + $0x8] sm:$0xff] %vm1186_vm2, %v1185_v19 }
 0x15f   : > { %1187 = vst.msk [vmem:[#allocation2] sm:$0xff] %vm1186_vm2, %v1184_v20 }
 0x166   : > { %v1194_v21 = vld [vmem:[%s1193_s25] sm:$0x1]  ;;  %s1246_s25 = scalar_lea.vmem [#allocation2], %s10315_s18  ;;  %s11524_s18 = sld [smem:[#allocation50_spill]] }
 0x167   : > { %v1205_v22 = vld [vmem:[%s1204_s7] sm:$0x1]  ;;  %1195 = vst.msk [vmem:[#allocation3 + $0x1] sm:$0x1] %vm1190_vm1, %v1194_v21  ;;  %s1253_s7 = scalar_lea.vmem [#allocation2], %s10318_s22  ;;  %s11525_s22 = sld [smem:[#allocation47_spill]] }
 0x168   : > { %v1212_v23 = vld [vmem:[%s1211_s9] sm:$0x1]  ;;  %1206 = vst.msk [vmem:[#allocation3 + $0x2] sm:$0x1] %vm1190_vm1, %v1205_v22  ;;  %s1239_s9 = scalar_lea.vmem [#allocation2], %s10312_s1  ;;  %s11523_s1 = sld [smem:[#allocation49_spill]] }
 0x169   : > { %1213 = vst.msk [vmem:[#allocation3 + $0x3] sm:$0x1] %vm1190_vm1, %v1212_v23  ;;  %v1219_v24 = vld [vmem:[%s1218_s27] sm:$0x1]  ;;  %s11522_s27 = sld [smem:[#allocation27_spill]] }
 0x16a   : > { %v1226_v25 = vld [vmem:[%s1225_s17] sm:$0x1]  ;;  %1220 = vst.msk [vmem:[#allocation3 + $0x4] sm:$0x1] %vm1190_vm1, %v1219_v24  ;;  %s1260_s17 = scalar_lea.vmem [#allocation2], %s10321_s2  ;;  %s11518_s2 = sld [smem:[#allocation20_spill]] }
 0x16b   : > { %v1233_v26 = vld [vmem:[%s1232_s13] sm:$0x1]  ;;  %1227 = vst.msk [vmem:[#allocation3 + $0x5] sm:$0x1] %vm1190_vm1, %v1226_v25  ;;  %v7689_v25 = vld [vmem:[%s11497_s8 + $0x68] sm:$0xff]  ;;  %s10684_s13 = sld [smem:[#allocation8 + %s10252_s5]] }
 0x16c   : > { %1234 = vst.msk [vmem:[#allocation3 + $0x6] sm:$0x1] %vm1190_vm1, %v1233_v26  ;;  %v1240_v27 = vld [vmem:[%s1239_s9] sm:$0x1]  ;;  %s10687_s9 = sld [smem:[#allocation8 + %s10255_s10]] }
 0x16d   : > { %v1247_v28 = vld [vmem:[%s1246_s25] sm:$0x1]  ;;  %1241 = vst.msk [vmem:[#allocation3 + $0x7] sm:$0x1] %vm1190_vm1, %v1240_v27  ;;  %s11528_s25 = sld [smem:[#allocation48_spill]]  ;;  %s8093_s10 = sadd.s32 1664, %s11525_s22 }
 0x16e   : > { %v1254_v29 = vld [vmem:[%s1253_s7] sm:$0x1]  ;;  %1248 = vst.msk [vmem:[#allocation3 + $0x8] sm:$0x1] %vm1190_vm1, %v1247_v28  ;;  %s10690_s7 = sld [smem:[#allocation8 + %s10258_s28]]  ;;  %s8095_s28 = sadd.s32 1792, %s11525_s22 }
 0x16f   : > { %1255 = vst.msk [vmem:[#allocation3 + $0x9] sm:$0x1] %vm1190_vm1, %v1254_v29  ;;  %v1261_v30 = vld [vmem:[%s1260_s17] sm:$0x1]  ;;  %s11529_s17 = sld [smem:[#allocation52_spill]] }
 0x170   : > { %v1268_v31 = vld [vmem:[%s1267_s21] sm:$0x1]  ;;  %1262 = vst.msk [vmem:[#allocation3 + $0xa] sm:$0x1] %vm1190_vm1, %v1261_v30  ;;  %s10693_s21 = sld [smem:[#allocation8 + %s11523_s1]]  ;;  %s8097_s1 = sadd.s32 1920, %s11525_s22 }
 0x171   : > { %v1275_v32 = vld [vmem:[%s1274_s6] sm:$0x1]  ;;  %1269 = vst.msk [vmem:[#allocation3 + $0xb] sm:$0x1] %vm1190_vm1, %v1268_v31  ;;  %v7670_v31 = vld [vmem:[%s11495_s14 + $0x4] ss:$0 sm:$0xff] }
 0x172   : > { %1276 = vst.msk [vmem:[#allocation3 + $0xc] sm:$0x1] %vm1190_vm1, %v1275_v32  ;;  %v7688_v24 = vld [vmem:[%s11497_s8 + $0x60] sm:$0xff]  ;;  %s11530_s6 = sld [smem:[#allocation26_spill]] }
 0x173   : > { %v9366_v30 = vpack.c.bf16 %v7689_v25, %v7688_v24  ;;  %v7685_v24 = vld [vmem:[%s11495_s14 + $0x1] ss:$0 sm:$0xff]  ;;  %s10706_s5 = sld [smem:[#allocation8 + %s11526_s23]]  ;;  %s4228_s23 = sadd.s32 %s8095_s28, %s11528_s25 }
 0x174   : > { %v10355_v33 = vld [vmem:[#allocation3] sm:$0xff] }
 0x175   : > { %v1281_v34 = vsel %vm1186_vm2, %v10355_v33, 0.0 }
 0x176   : > { %1282 = vadd.xlane.f32.xlu0 %v1281_v34  ;;  %s7544_s28 = scalar_lea.vmem [#allocation4], %s10693_s21  ;;  %s11537_s21 = sld [smem:[#allocation32_spill]] }
 0x179   : > { %v10359_v35 = vld [vmem:[#allocation3 + $0x8] sm:$0x1f] }
 0x17a   : > { %v1285_v36 = vsel %vm1284_vm3, %v10359_v35, 0.0 }
 0x17b   : > { %1286 = vadd.xlane.f32.xlu0 %v1285_v36 }
 0x203   : > { %v1283_v37 = vpop.xlane.xlu0 %1282 }
 0x204   : > { %v1289_v38 = vmul.f32 0.03125, %v1283_v37  ;;  %v7690_v37 = vld [vmem:[%s11497_s8 + $0x70] sm:$0xff] }
 0x206   : > { %v1291_v39 = vsub.f32 %v10355_v33, %v1289_v38  ;;  %v7691_v38 = vld [vmem:[%s11497_s8 + $0x78] sm:$0xff] }
 0x208   : > { %v1287_v40 = vpop.xlane.xlu0 %1286  ;;  %v1293_v42 = vmul.f32 %v1291_v39, %v1291_v39 }
 0x209   : > { %v1290_v41 = vmul.f32 0.03125, %v1287_v40 }
 0x20a   : > { %v1295_v44 = vsel %vm1186_vm2, %v1293_v42, 0.0 }
 0x20b   : > { %v1292_v43 = vsub.f32 %v10359_v35, %v1290_v41  ;;  %1296 = vadd.xlane.f32.xlu1 %v1295_v44 }
 0x20d   : > { %v1294_v45 = vmul.f32 %v1292_v43, %v1292_v43 }
 0x20f   : > { %v1298_v46 = vsel %vm1284_vm3, %v1294_v45, 0.0 }
 0x210   : > { %1299 = vadd.xlane.f32.xlu1 %v1298_v46 }
 0x298   : > { %v1297_v62 = vpop.xlane.xlu1 %1296 }
 0x299   : > { %v1301_v63 = vmul.f32 0.03125, %v1297_v62 }
 0x29b   : > { %v1303_v0 = vadd.f32 1e-05, %v1301_v63 }
 0x29d   : > { %v1300_v1 = vpop.xlane.xlu1 %1299  ;;  %9797 = vrsqrt.f32 %v1303_v0 }
 0x29e   : > { %v1302_v2 = vmul.f32 0.03125, %v1300_v1 }
 0x2a0   : > { %v1304_v3 = vadd.f32 1e-05, %v1302_v2  ;;  %v7680_v2 = vld [vmem:[%s11497_s8 + $0x20] sm:$0xff] }
 0x2a2   : > { %9799 = vrsqrt.f32 %v1304_v3  ;;  %v7681_v3 = vld [vmem:[%s11497_s8 + $0x28] sm:$0xff] }
 0x2a7   : > { %v9798_v4 = vpop.eup %9797 }
 0x2a8   : > { %v1307_v6 = vmul.f32 %v9798_v4, %v1291_v39  ;;  %v9358_v4 = vpack.c.bf16 %v7681_v3, %v7680_v2 }
 0x2aa   : > { %v1315_v8 = vmul.f32 %v7652_v5, %v1307_v6 }
 0x2ac   : > { %v9800_v9 = vpop.eup %9799  ;;  %v10379_v10 = vadd.f32 %v7653_v7, %v1315_v8  ;;  %v7682_v8 = vld [vmem:[%s11497_s8 + $0x30] sm:$0xff] }
 0x2ad   : > { %v1308_v11 = vmul.f32 %v9800_v9, %v1292_v43  ;;  %v9370_v43 = vpack.c.bf16 %v7691_v38, %v7690_v37  ;;  %v7683_v9 = vld [vmem:[%s11497_s8 + $0x38] sm:$0xff] }
 0x2ae   : > { %8507 = vmatprep.mubr.msk.f32.mxu0 %vm1186_vm2, %v10379_v10  ;;  %8518 = vmatprep.mubr.msk.f32.mxu1 %vm1186_vm2, %v10379_v10 }
 0x2af   : > { %v1316_v14 = vmul.f32 %v7652_v5, %v1308_v11 }
 0x2b1   : > { %v10387_v15 = vadd.f32 %v7653_v7, %v1316_v14  ;;  %v9362_v14 = vpack.c.bf16 %v7683_v9, %v7682_v8 }
 0x2b3   : > { %8508 = vmatmul.mubr.msk.f32.vlgmr.msra.gmra.mrb[2].mxu0 %vm1186_vm2, %v10387_v15  ;;  %8519 = vmatmul.mubr.msk.f32.vlgmr.msra.gmra.mrb[0].mxu1 %vm1186_vm2, %v10387_v15 }
 0x2b4   : > { %9341 = vmatpush3.bf16.msra.mxu0 %v9338_v61  ;;  %8529 = vmatprep.mubr.msk.f32.mxu0 %vm1186_vm2, %v10379_v10 }
 0x2b5   : > { %9343 = vmatprep.subr.bf16.mxu0 %v9342_v16 }
 0x2b8   : > { %9345 = vmatpush3.bf16.msra.mxu0 %v9342_v16  ;;  %v7696_v16 = vld [vmem:[%s11497_s8 + $0xa0] sm:$0xff] }
 0x2bb   : > { %8530 = vmatmul.mubr.msk.f32.vlgmr.msra.gmra.mrb[4].mxu0 %vm1186_vm2, %v10387_v15 }
 0x386   : > { %v8509_v19 = vpop.f32.mrb[2].mxu0  ;;  %v8520_v20 = vpop.f32.mrb[0].mxu1 }
 0x387   : > { %v1502_v21 = vadd.f32 %v8520_v20, %v7662_v17  ;;  %v1408_v22 = vpop.f32.mrb[3].mxu0  ;;  %v1496_v23 = vpop.f32.mrb[1].mxu1  ;;  %v1414_v41 = vadd.f32 %v8509_v19, %v7654_v18  ;;  %v7698_v19 = vld [vmem:[%s11497_s8 + $0xb0] sm:$0xff]  ;;  %v7699_v20 = vld [vmem:[%s11497_s8 + $0xb8] sm:$0xff] }
 0x388   : > { %v1409_v26 = vadd.f32 %v7654_v18, %v1408_v22  ;;  %v1497_v27 = vadd.f32 %v7662_v17, %v1496_v23  ;;  %v7697_v17 = vld [vmem:[%s11497_s8 + $0xa8] sm:$0xff] }
 0x389   : > { %v9374_v18 = vpack.c.bf16 %v7697_v17, %v7696_v16 }
 0x38a   : > { %v9346_v29 = vpack.c.bf16 %v1502_v21, %v1497_v27  ;;  %8536 = vmatprep.mubr.msk.f32.mxu1 %vm1593_vm4, %v1409_v26  ;;  %v9378_v21 = vpack.c.bf16 %v7699_v20, %v7698_v19 }
 0x38c   : > { %9348 = vmatprep.subr.msk.bf16.mxu1 %vm10403_vm5, %v9346_v29 }
 0x38d   : > { %9351 = vmatpush3.bf16.xpose.msk.msra.mxu1 %vm10403_vm5, %v9346_v29 }
 0x38e   : > { %v8531_v32 = vpop.f32.mrb[4].mxu0  ;;  %9367 = vmatprep.subr.bf16.mxu1 %v9366_v30 }
 0x38f   : > { %v1590_v34 = vadd.f32 %v8531_v32, %v7670_v31  ;;  %v1584_v36 = vpop.f32.mrb[5].mxu0 }
 0x390   : > { %v1585_v39 = vadd.f32 %v7670_v31, %v1584_v36 }
 0x392   : > { %v9352_v42 = vpack.c.bf16 %v1590_v34, %v1585_v39 }
 0x394   : > { %9354 = vmatprep.subr.msk.bf16.mxu0 %vm10415_vm8, %v9352_v42  ;;  %8537 = vmatmul.mubr.msk.f32.vlgmr.msra.gmra.mrb[2].mxu1 %vm1593_vm4, %v1414_v41 }
 0x395   : > { %9357 = vmatpush3.bf16.msk.msra.mxu0 %vm10415_vm8, %v9352_v42  ;;  %9369 = vmatpush3.bf16.msra.mxu1 %v9366_v30  ;;  %v7701_v30 = vld [vmem:[%s11495_s14 + $0x5] ss:$0 sm:$0xff] }
 0x396   : > { %8565 = vmatprep.mubr.msk.f32.mxu1 %vm1186_vm2, %v10379_v10  ;;  %9371 = vmatprep.subr.bf16.mxu1 %v9370_v43 }
 0x397   : > { %9359 = vmatprep.subr.bf16.mxu0 %v9358_v4 }
 0x399   : > { %9373 = vmatpush3.bf16.msra.mxu1 %v9370_v43 }
 0x39c   : > { %8566 = vmatmul.mubr.msk.f32.vlgmr.msra.gmra.mrb[4].mxu1 %vm1186_vm2, %v10387_v15 }
 0x467   : > { %v8538_v44 = vpop.f32.mrb[2].mxu1 }
 0x468   : > { %v1682_v45 = vmul.f32 0.25, %v8538_v44  ;;  %v1672_v46 = vpop.f32.mrb[3].mxu1 }
 0x469   : > { %v1681_v47 = vmul.f32 0.25, %v1672_v46 }
 0x46a   : > { %v1688_v48 = vsel %vm1687_vm9, %v1682_v45, -inf }
 0x46b   : > { %1689 = vmax.xlane.f32.xlu1 %v1688_v48  ;;  %v1684_v49 = vsel %vm1683_vm10, %v1681_v47, -inf }
 0x46c   : > { %1685 = vmax.xlane.f32.xlu0 %v1684_v49 }
 0x46f   : > { %v8567_v51 = vpop.f32.mrb[4].mxu1 }
 0x470   : > { %v1967_v52 = vadd.f32 %v8567_v51, %v7693_v50  ;;  %v1961_v53 = vpop.f32.mrb[5].mxu1 }
 0x471   : > { %v1962_v54 = vadd.f32 %v7693_v50, %v1961_v53  ;;  %v7711_v53 = vld [vmem:[%s11494_s19 + $0x10] sm:$0xff] }
 0x473   : > { %v9382_v55 = vpack.c.bf16 %v1967_v52, %v1962_v54  ;;  %v7712_v54 = vld [vmem:[%s11494_s19 + $0x18] sm:$0xff] }
 0x475   : > { %9384 = vmatprep.subr.msk.bf16.mxu1 %vm10403_vm5, %v9382_v55 }
 0x476   : > { %9387 = vmatpush3.bf16.xpose.msk.msra.mxu1 %vm10403_vm5, %v9382_v55  ;;  %v9394_v55 = vpack.c.bf16 %v7712_v54, %v7711_v53  ;;  %v2588_v53 = vld [vmem:[%s11519_s11 + $0x28] sm:$0xff] }
 0x478   : > { %9395 = vmatprep.subr.bf16.mxu1 %v9394_v55 }
 0x4f8   : > { %v1690_v56 = vpop.xlane.xlu1 %1689 }
 0x4f9   : > { %v1692_v57 = vsub.f32 %v1682_v45, %v1690_v56  ;;  %v1686_v58 = vpop.xlane.xlu0 %1685 }
 0x4fa   : > { %v1691_v59 = vsub.f32 %v1681_v47, %v1686_v58 }
 0x4fb   : > { %v1695_v60 = vmul.f32 1.442695, %v1692_v57 }
 0x4fc   : > { %v1693_v61 = vmul.f32 1.442695, %v1691_v59 }
 0x4fd   : > { %9801 = vpow2.f32 %v1695_v60 }
 0x4fe   : > { %9803 = vpow2.f32 %v1693_v61 }
 0x507   : > { %v9802_v62 = vpop.eup %9801 }
 0x508   : > { %v9804_v63 = vpop.eup %9803  ;;  %v1700_v0 = vsel %vm1687_vm9, %v9802_v62, 0.0 }
 0x509   : > { %1701 = vadd.xlane.f32.xlu1 %v1700_v0  ;;  %v1697_v1 = vsel %vm1683_vm10, %v9804_v63, 0.0 }
 0x50a   : > { %1698 = vadd.xlane.f32.xlu0 %v1697_v1 }
 0x596   : > { %v1702_v5 = vpop.xlane.xlu1 %1701 }
 0x597   : > { %9805 = vrcp.f32 %v1702_v5  ;;  %v1699_v6 = vpop.xlane.xlu0 %1698 }
 0x598   : > { %9807 = vrcp.f32 %v1699_v6 }
 0x5a1   : > { %v9806_v7 = vpop.eup %9805 }
 0x5a2   : > { %v9808_v11 = vpop.eup %9807  ;;  %v1706_v13 = vmul.f32 %v9806_v7, %v9802_v62  ;;  %v1792_v62 = vld [vmem:[%s11494_s19] sm:$0xff] }
 0x5a3   : > { %v1705_v12 = vmul.f32 %v9808_v11, %v9804_v63  ;;  %v1793_v63 = vld [vmem:[%s11494_s19 + $0x8] sm:$0xff] }
 0x5a4   : > { %v9398_v0 = vpack.c.bf16 %v1793_v63, %v1792_v62  ;;  %v2594_v62 = vld [vmem:[%s11519_s11 + $0x58] sm:$0xff] }
 0x5a5   : > { %8543 = vmatprep.mubr.msk.f32.mxu0 %vm1683_vm10, %v1705_v12 }
 0x5a6   : > { %8544 = vmatmul.mubr.msk.f32.vlgmr.msra.gmra.mrb[6].mxu0 %vm1683_vm10, %v1706_v13 }
 0x5a7   : > { %9361 = vmatpush3.bf16.msra.mxu0 %v9358_v4  ;;  %8554 = vmatprep.mubr.msk.f32.mxu0 %vm1186_vm2, %v10379_v10  ;;  %v7717_v4 = vld [vmem:[%s11493_s24] ss:$0 sm:$0xff] }
 0x5a8   : > { %9363 = vmatprep.subr.bf16.mxu0 %v9362_v14 }
 0x5ab   : > { %9365 = vmatpush3.bf16.msra.mxu0 %v9362_v14 }
 0x5ac   : > { %9375 = vmatprep.subr.bf16.mxu0 %v9374_v18 }
 0x5ae   : > { %8555 = vmatmul.mubr.msk.f32.vlgmr.msra.gmra.mrb[8].mxu0 %vm1186_vm2, %v10387_v15 }
 0x5af   : > { %9377 = vmatpush3.bf16.msra.mxu0 %v9374_v18  ;;  %8576 = vmatprep.mubr.msk.f32.mxu0 %vm1186_vm2, %v10379_v10 }
 0x5b0   : > { %9379 = vmatprep.subr.bf16.mxu0 %v9378_v21 }
 0x5b3   : > { %9381 = vmatpush3.bf16.msra.mxu0 %v9378_v21 }
 0x5b6   : > { %8577 = vmatmul.mubr.msk.f32.vlgmr.msra.gmra.mrb[10].mxu0 %vm1186_vm2, %v10387_v15 }
 0x679   : > { %v10455_v22 = vpop.f32.mrb[6].mxu0 }
 0x67a   : > { %v1783_v23 = vpop.f32.mrb[7].mxu0 }
 0x681   : > { %v8556_v25 = vpop.f32.mrb[8].mxu0 }
 0x682   : > { %v1873_v26 = vpop.f32.mrb[9].mxu0  ;;  %v1879_v29 = vadd.f32 %v8556_v25, %v7685_v24  ;;  %v2475_v25 = vld [vmem:[%s11496_s12 + $0x10] sm:$0xff] }
 0x683   : > { %v1874_v27 = vadd.f32 %v7685_v24, %v1873_v26  ;;  %v2476_v26 = vld [vmem:[%s11496_s12 + $0x18] sm:$0xff] }
 0x685   : > { %8583 = vmatprep.mubr.msk.f32.mxu1 %vm1593_vm4, %v1874_v27  ;;  %v9406_v27 = vpack.c.bf16 %v2476_v26, %v2475_v25 }
 0x686   : > { %8584 = vmatmul.mubr.msk.f32.vlgmr.msra.gmra.mrb[6].mxu1 %vm1593_vm4, %v1879_v29 }
 0x687   : > { %9397 = vmatpush3.bf16.msra.mxu1 %v9394_v55  ;;  %v2589_v55 = vld [vmem:[%s11519_s11 + $0x30] sm:$0xff] }
 0x688   : > { %9399 = vmatprep.subr.bf16.mxu1 %v9398_v0 }
 0x689   : > { %v8578_v31 = vpop.f32.mrb[10].mxu0 }
 0x68a   : > { %v2055_v10 = vadd.f32 %v8578_v31, %v7701_v30  ;;  %v2049_v32 = vpop.f32.mrb[11].mxu0 }
 0x68b   : > { %v2050_v34 = vadd.f32 %v7701_v30, %v2049_v32 }
 0x68d   : > { %v9388_v36 = vpack.c.bf16 %v2055_v10, %v2050_v34 }
 0x68f   : > { %9390 = vmatprep.subr.msk.bf16.mxu0 %vm10415_vm8, %v9388_v36 }
 0x690   : > { %9393 = vmatpush3.bf16.msk.msra.mxu0 %vm10415_vm8, %v9388_v36 }
 0x759   : > { %v8585_v15 = vpop.f32.mrb[6].mxu1 }
 0x75a   : > { %v2146_v37 = vmul.f32 0.25, %v8585_v15  ;;  %v2136_v38 = vpop.f32.mrb[7].mxu1  ;;  %v7718_v15 = vld [vmem:[%s10086_s30] ss:$0 sm:$0xff] }
 0x75b   : > { %v2145_v39 = vmul.f32 0.25, %v2136_v38 }
 0x75c   : > { %v2150_v41 = vsel %vm1687_vm9, %v2146_v37, -inf }
 0x75d   : > { %2151 = vmax.xlane.f32.xlu1 %v2150_v41  ;;  %v2147_v42 = vsel %vm1683_vm10, %v2145_v39, -inf  ;;  %v7719_v41 = vld [vmem:[%s11518_s2] ss:$0 sm:$0xff] }
 0x75e   : > { %2148 = vmax.xlane.f32.xlu0 %v2147_v42 }
 0x7ea   : > { %v2152_v43 = vpop.xlane.xlu1 %2151 }
 0x7eb   : > { %v2154_v44 = vsub.f32 %v2146_v37, %v2152_v43  ;;  %v2149_v45 = vpop.xlane.xlu0 %2148 }
 0x7ec   : > { %v2153_v46 = vsub.f32 %v2145_v39, %v2149_v45 }
 0x7ed   : > { %v2157_v47 = vmul.f32 1.442695, %v2154_v44 }
 0x7ee   : > { %v2155_v48 = vmul.f32 1.442695, %v2153_v46  ;;  %v2583_v46 = vld [vmem:[%s11519_s11] sm:$0xff] }
 0x7ef   : > { %9809 = vpow2.f32 %v2157_v47  ;;  %v2584_v47 = vld [vmem:[%s11519_s11 + $0x8] sm:$0xff] }
 0x7f0   : > { %9811 = vpow2.f32 %v2155_v48  ;;  %v9410_v48 = vpack.c.bf16 %v2584_v47, %v2583_v46 }
 0x7f9   : > { %v9810_v49 = vpop.eup %9809 }
 0x7fa   : > { %v9812_v50 = vpop.eup %9811  ;;  %v2162_v51 = vsel %vm1687_vm9, %v9810_v49, 0.0 }
 0x7fb   : > { %2163 = vadd.xlane.f32.xlu1 %v2162_v51  ;;  %v2159_v52 = vsel %vm1683_vm10, %v9812_v50, 0.0 }
 0x7fc   : > { %2160 = vadd.xlane.f32.xlu0 %v2159_v52  ;;  %v2587_v52 = vld [vmem:[%s11519_s11 + $0x20] sm:$0xff] }
 0x7fd   : > { %v9418_v54 = vpack.c.bf16 %v2588_v53, %v2587_v52  ;;  %v7730_v53 = vld [vmem:[%s11497_s8 + $0xd0] sm:$0xff] }
 0x888   : > { %v2164_v56 = vpop.xlane.xlu1 %2163 }
 0x889   : > { %9813 = vrcp.f32 %v2164_v56  ;;  %v2161_v57 = vpop.xlane.xlu0 %2160  ;;  %v2590_v56 = vld [vmem:[%s11519_s11 + $0x38] sm:$0xff] }
 0x88a   : > { %9815 = vrcp.f32 %v2161_v57  ;;  %v9422_v57 = vpack.c.bf16 %v2590_v56, %v2589_v55  ;;  %v7736_v56 = vld [vmem:[%s11497_s8 + $0x100] sm:$0xff] }
 0x893   : > { %v9814_v58 = vpop.eup %9813 }
 0x894   : > { %v9816_v59 = vpop.eup %9815  ;;  %v2168_v61 = vmul.f32 %v9814_v58, %v9810_v49  ;;  %v2585_v49 = vld [vmem:[%s11519_s11 + $0x10] sm:$0xff]  ;;  %v2591_v58 = vld [vmem:[%s11519_s11 + $0x40] sm:$0xff] }
 0x895   : > { %v2167_v60 = vmul.f32 %v9816_v59, %v9812_v50  ;;  %v2586_v50 = vld [vmem:[%s11519_s11 + $0x18] sm:$0xff]  ;;  %v2592_v59 = vld [vmem:[%s11519_s11 + $0x48] sm:$0xff] }
 0x896   : > { %v9414_v51 = vpack.c.bf16 %v2586_v50, %v2585_v49  ;;  %v7728_v50 = vld [vmem:[%s11497_s8 + $0xc0] sm:$0xff] }
 0x897   : > { %8590 = vmatprep.mubr.msk.f32.mxu0 %vm1683_vm10, %v2167_v60  ;;  %v2593_v60 = vld [vmem:[%s11519_s11 + $0x50] sm:$0xff] }
 0x898   : > { %8591 = vmatmul.mubr.msk.f32.vlgmr.msra.gmra.mrb[12].mxu0 %vm1683_vm10, %v2168_v61  ;;  %v9426_v61 = vpack.c.bf16 %v2592_v59, %v2591_v58  ;;  %v9430_v63 = vpack.c.bf16 %v2594_v62, %v2593_v60 }
 0x96b   : > { %v8592_v1 = vpop.f32.mrb[12].mxu0 }
 0x96c   : > { %v2244_v2 = vpop.f32.mrb[13].mxu0 }
 0x96d   : > { %8597 = vmatprep.mubr.msk.f32.mxu1 %vm1593_vm4, %v2244_v2 }
 0x96e   : > { %8598 = vmatmul.mubr.msk.f32.vlgmr.msra.gmra.mrb[8].mxu1 %vm1593_vm4, %v8592_v1  ;;  %v2596_v1 = vld [vmem:[%s11519_s11 + $0x68] sm:$0xff] }
 0x96f   : > { %8604 = vmatprep.mubr.msk.f32.mxu1 %vm1593_vm4, %v1783_v23  ;;  %9401 = vmatpush3.bf16.msra.mxu1 %v9398_v0  ;;  %v2474_v23 = vld [vmem:[%s11496_s12 + $0x8] sm:$0xff]  ;;  %v2595_v0 = vld [vmem:[%s11519_s11 + $0x60] sm:$0xff] }
 0x970   : > { %9411 = vmatprep.subr.bf16.mxu1 %v9410_v48  ;;  %v9434_v2 = vpack.c.bf16 %v2596_v1, %v2595_v0 }
 0x976   : > { %8605 = vmatmul.mubr.msk.f32.vlgmr.msra.gmra.mrb[8].mxu1 %vm1593_vm4, %v10455_v22  ;;  %v2473_v22 = vld [vmem:[%s11496_s12] sm:$0xff] }
 0x977   : > { %v9402_v24 = vpack.c.bf16 %v2474_v23, %v2473_v22  ;;  %9413 = vmatpush3.bf16.msra.mxu1 %v9410_v48 }
 0x978   : > { %9415 = vmatprep.subr.bf16.mxu1 %v9414_v51 }
 0x979   : > { %9403 = vmatprep.subr.bf16.mxu0 %v9402_v24 }
 0x97a   : > { %9405 = vmatpush3.bf16.msra.mxu0 %v9402_v24 }
 0x97b   : > { %9407 = vmatprep.subr.bf16.mxu0 %v9406_v27  ;;  %9417 = vmatpush3.bf16.msra.mxu1 %v9414_v51  ;;  %v7729_v51 = vld [vmem:[%s11497_s8 + $0xc8] sm:$0xff] }
 0x97c   : > { %9419 = vmatprep.subr.bf16.mxu1 %v9418_v54  ;;  %v9442_v52 = vpack.c.bf16 %v7729_v51, %v7728_v50  ;;  %v7779_v50 = vld [vmem:[%s11497_s8 + $0x170] sm:$0xff]  ;;  %v7780_v51 = vld [vmem:[%s11497_s8 + $0x178] sm:$0xff] }
 0x97e   : > { %9409 = vmatpush3.bf16.msra.mxu0 %v9406_v27 }
 0x97f   : > { %9421 = vmatpush3.bf16.msra.mxu1 %v9418_v54  ;;  %9443 = vmatprep.subr.bf16.mxu0 %v9442_v52  ;;  %v7731_v54 = vld [vmem:[%s11497_s8 + $0xd8] sm:$0xff] }
 0x980   : > { %9423 = vmatprep.subr.bf16.mxu1 %v9422_v57  ;;  %v9446_v55 = vpack.c.bf16 %v7731_v54, %v7730_v53 }
 0x983   : > { %9425 = vmatpush3.bf16.msra.mxu1 %v9422_v57  ;;  %v7737_v57 = vld [vmem:[%s11497_s8 + $0x108] sm:$0xff] }
 0x984   : > { %9427 = vmatprep.subr.bf16.mxu1 %v9426_v61  ;;  %v9450_v58 = vpack.c.bf16 %v7737_v57, %v7736_v56 }
 0x987   : > { %9429 = vmatpush3.bf16.msra.mxu1 %v9426_v61 }
 0x988   : > { %9431 = vmatprep.subr.bf16.mxu1 %v9430_v63 }
 0x98b   : > { %9433 = vmatpush3.bf16.msra.mxu1 %v9430_v63 }
 0x98c   : > { %9435 = vmatprep.subr.bf16.mxu1 %v9434_v2 }
 0x98f   : > { %9437 = vmatpush3.bf16.msra.mxu1 %v9434_v2  ;;  %v7726_v2 = vld [vmem:[%s10056_s29 + $0x1] ss:$0 sm:$0xff] }
 0xa49   : > { %v8606_v3 = vpop.f32.mrb[8].mxu1 }
 0xa4a   : > { %v2419_v5 = vadd.f32 %v8606_v3, %v10359_v35  ;;  %v2409_v6 = vpop.f32.mrb[9].mxu1  ;;  %v2597_v3 = vld [vmem:[%s11519_s11 + $0x70] sm:$0xff] }
 0xa4b   : > { %v2418_v7 = vadd.f32 %v2409_v6, %v10355_v33  ;;  %v7720_v6 = vld [vmem:[%s11520_s20] ss:$0 sm:$0xff] }
 0xa4c   : > { %v10483_v8 = vadd.f32 %v7717_v4, %v2419_v5 }
 0xa4d   : > { %v10485_v9 = vadd.f32 %v7717_v4, %v2418_v7  ;;  %v2598_v4 = vld [vmem:[%s11519_s11 + $0x78] sm:$0xff] }
 0xa4e   : > { %v2434_v11 = vsel %vm1284_vm3, %v10483_v8, 0.0  ;;  %v9438_v5 = vpack.c.bf16 %v2598_v4, %v2597_v3 }
 0xa4f   : > { %2435 = vadd.xlane.f32.xlu1 %v2434_v11  ;;  %v2431_v12 = vsel %vm1186_vm2, %v10485_v9, 0.0 }
 0xa50   : > { %2432 = vadd.xlane.f32.xlu0 %v2431_v12  ;;  %9439 = vmatprep.subr.bf16.mxu1 %v9438_v5 }
 0xa51   : > { %9441 = vmatpush3.bf16.msra.mxu1 %v9438_v5 }
 0xadc   : > { %v2436_v13 = vpop.xlane.xlu1 %2435 }
 0xadd   : > { %v2438_v35 = vmul.f32 0.03125, %v2436_v13  ;;  %v2433_v14 = vpop.xlane.xlu0 %2432 }
 0xade   : > { %v2437_v33 = vmul.f32 0.03125, %v2433_v14 }
 0xadf   : > { %v2440_v16 = vsub.f32 %v10483_v8, %v2438_v35 }
 0xae0   : > { %v2439_v17 = vsub.f32 %v10485_v9, %v2437_v33 }
 0xae1   : > { %v2442_v18 = vmul.f32 %v2440_v16, %v2440_v16 }
 0xae2   : > { %v2441_v19 = vmul.f32 %v2439_v17, %v2439_v17 }
 0xae3   : > { %v2446_v20 = vsel %vm1284_vm3, %v2442_v18, 0.0 }
 0xae4   : > { %2447 = vadd.xlane.f32.xlu1 %v2446_v20  ;;  %v2443_v21 = vsel %vm1186_vm2, %v2441_v19, 0.0 }
 0xae5   : > { %2444 = vadd.xlane.f32.xlu0 %v2443_v21 }
 0xb71   : > { %v2448_v29 = vpop.xlane.xlu1 %2447 }
 0xb72   : > { %v2450_v30 = vmul.f32 0.03125, %v2448_v29  ;;  %v2445_v31 = vpop.xlane.xlu0 %2444 }
 0xb73   : > { %v2449_v10 = vmul.f32 0.03125, %v2445_v31 }
 0xb74   : > { %v2452_v32 = vadd.f32 1e-05, %v2450_v30 }
 0xb75   : > { %v2451_v34 = vadd.f32 1e-05, %v2449_v10  ;;  %v7723_v10 = vld [vmem:[%s11521_s15] ss:$0 sm:$0xff] }
 0xb76   : > { %9817 = vrsqrt.f32 %v2452_v32 }
 0xb77   : > { %9819 = vrsqrt.f32 %v2451_v34 }
 0xb80   : > { %v9818_v36 = vpop.eup %9817 }
 0xb81   : > { %v9820_v37 = vpop.eup %9819  ;;  %v2456_v38 = vmul.f32 %v9818_v36, %v2440_v16 }
 0xb82   : > { %v2455_v39 = vmul.f32 %v9820_v37, %v2439_v17 }
 0xb83   : > { %v2464_v42 = vmul.f32 %v7718_v15, %v2456_v38 }
 0xb84   : > { %v2463_v43 = vmul.f32 %v7718_v15, %v2455_v39 }
 0xb85   : > { %v2472_v45 = vadd.f32 %v7719_v41, %v2464_v42 }
 0xb86   : > { %v2471_v44 = vadd.f32 %v7719_v41, %v2463_v43 }
 0xb88   : > { %8615 = vmatprep.mubr.msk.f32.mxu0 %vm1186_vm2, %v2471_v44 }
 0xb89   : > { %8616 = vmatmul.mubr.msk.f32.vlgmr.msra.gmra.mrb[14].mxu0 %vm1186_vm2, %v2472_v45 }
 0xb8a   : > { %9445 = vmatpush3.bf16.msra.mxu0 %v9442_v52  ;;  %v9498_v52 = vpack.c.bf16 %v7780_v51, %v7779_v50 }
 0xb8b   : > { %9447 = vmatprep.subr.bf16.mxu0 %v9446_v55 }
 0xb8e   : > { %9449 = vmatpush3.bf16.msra.mxu0 %v9446_v55 }
 0xb8f   : > { %9451 = vmatprep.subr.bf16.mxu0 %v9450_v58 }
 0xc5c   : > { %v8617_v7 = vpop.f32.mrb[14].mxu0 }
 0xc5d   : > { %v2562_v11 = vadd.f32 %v8617_v7, %v7720_v6  ;;  %v2556_v12 = vpop.f32.mrb[15].mxu0 }
 0xc5e   : > { %v2557_v13 = vadd.f32 %v7720_v6, %v2556_v12  ;;  %v7727_v6 = vld [vmem:[%s11498_s3 + $0x1] ss:$0 sm:$0xff]  ;;  %v7738_v12 = vld [vmem:[%s11497_s8 + $0x110] sm:$0xff]  ;;  %s10702_s3 = sld [smem:[#allocation8 + %s10295_s0]]  ;;  %s4220_s0 = sadd.s32 %s8093_s10, %s11528_s25 }
 0xc5f   : > { %v2566_v35 = vmul.f32 %v2562_v11, %v2562_v11  ;;  %s7542_s10 = scalar_lea.vmem [#allocation4], %s10690_s7  ;;  %s11536_s7 = sld [smem:[#allocation30_spill]] }
 0xc60   : > { %v2565_v14 = vmul.f32 %v2557_v13, %v2557_v13 }
 0xc61   : > { %v2568_v33 = vmul.f32 %v2566_v35, %v2562_v11 }
 0xc62   : > { %v2567_v16 = vmul.f32 %v2565_v14, %v2557_v13 }
 0xc63   : > { %v2570_v17 = vmul.f32 0.044715, %v2568_v33 }
 0xc64   : > { %v2569_v18 = vmul.f32 0.044715, %v2567_v16  ;;  %v7744_v16 = vld [vmem:[%s11497_s8 + $0x140] sm:$0xff] }
 0xc65   : > { %v2572_v19 = vadd.f32 %v2570_v17, %v2562_v11  ;;  %v7745_v17 = vld [vmem:[%s11497_s8 + $0x148] sm:$0xff] }
 0xc66   : > { %v2571_v20 = vadd.f32 %v2569_v18, %v2557_v13  ;;  %v9458_v18 = vpack.c.bf16 %v7745_v17, %v7744_v16 }
 0xc67   : > { %v2574_v21 = vmul.f32 0.7978846, %v2572_v19  ;;  %v7746_v19 = vld [vmem:[%s11497_s8 + $0x150] sm:$0xff] }
 0xc68   : > { %v2573_v22 = vmul.f32 0.7978846, %v2571_v20  ;;  %v7747_v20 = vld [vmem:[%s11497_s8 + $0x158] sm:$0xff] }
 0xc69   : > { %9821 = vtanh.f32 %v2574_v21  ;;  %v9462_v21 = vpack.c.bf16 %v7747_v20, %v7746_v19  ;;  %v7770_v19 = vld [vmem:[%s11497_s8 + $0x128] sm:$0xff] }
 0xc6a   : > { %9823 = vtanh.f32 %v2573_v22  ;;  %v7733_v22 = vld [vmem:[%s11495_s14 + $0x6] ss:$0 sm:$0xff] }
 0xc73   : > { %v9822_v23 = vpop.eup %9821 }
 0xc74   : > { %v9824_v24 = vpop.eup %9823  ;;  %v2578_v25 = vadd.f32 1.0, %v9822_v23 }
 0xc75   : > { %v2577_v26 = vadd.f32 1.0, %v9824_v24 }
 0xc76   : > { %v2580_v27 = vmul.f32 0.5, %v2578_v25 }
 0xc77   : > { %v2579_v29 = vmul.f32 0.5, %v2577_v26  ;;  %v7741_v26 = vld [vmem:[%s11495_s14 + $0x8] ss:$0 sm:$0xff] }
 0xc78   : > { %v2582_v31 = vmul.f32 %v2580_v27, %v2562_v11 }
 0xc79   : > { %v2581_v30 = vmul.f32 %v2579_v29, %v2557_v13  ;;  %v7739_v13 = vld [vmem:[%s11497_s8 + $0x118] sm:$0xff] }
 0xc7a   : > { %v9454_v33 = vpack.c.bf16 %v7739_v13, %v7738_v12 }
 0xc7b   : > { %8650 = vmatprep.mubr.f32.mxu1 %v2581_v30 }
 0xc7c   : > { %8651 = vmatmul.mubr.f32.vlgmr.msra.gmra.mrb[10].mxu1 %v2582_v31  ;;  %v7761_v31 = vld [vmem:[%s11497_s8 + $0xe0] sm:$0xff] }
 0xd4f   : > { %v8652_v32 = vpop.f32.mrb[10].mxu1 }
 0xd50   : > { %v2678_v34 = vadd.f32 %v8652_v32, %v7723_v10  ;;  %v2672_v36 = vpop.f32.mrb[11].mxu1 }
 0xd51   : > { %v2673_v15 = vadd.f32 %v7723_v10, %v2672_v36  ;;  %v7762_v10 = vld [vmem:[%s11497_s8 + $0xe8] sm:$0xff] }
 0xd52   : > { %v10522_v37 = vadd.f32 %v2678_v34, %v10483_v8  ;;  %v9478_v36 = vpack.c.bf16 %v7762_v10, %v7761_v31 }
 0xd53   : > { %v10525_v38 = vadd.f32 %v2673_v15, %v10485_v9  ;;  %v7749_v15 = vld [vmem:[%s11495_s14 + $0xa] ss:$0 sm:$0xff] }
 0xd54   : > { %v2690_v39 = vsel %vm1284_vm3, %v10522_v37, 0.0 }
 0xd55   : > { %2691 = vadd.xlane.f32.xlu1 %v2690_v39  ;;  %v2687_v41 = vsel %vm1186_vm2, %v10525_v38, 0.0 }
 0xd56   : > { %2688 = vadd.xlane.f32.xlu0 %v2687_v41 }
 0xde2   : > { %v2692_v42 = vpop.xlane.xlu1 %2691 }
 0xde3   : > { %v2694_v43 = vmul.f32 0.03125, %v2692_v42  ;;  %v2689_v44 = vpop.xlane.xlu0 %2688 }
 0xde4   : > { %v2693_v8 = vmul.f32 0.03125, %v2689_v44  ;;  %v7764_v44 = vld [vmem:[%s11497_s8 + $0xf8] sm:$0xff] }
 0xde5   : > { %v2696_v45 = vsub.f32 %v10522_v37, %v2694_v43  ;;  %v7763_v43 = vld [vmem:[%s11497_s8 + $0xf0] sm:$0xff] }
 0xde6   : > { %v2695_v9 = vsub.f32 %v10525_v38, %v2693_v8 }
 0xde7   : > { %v2698_v46 = vmul.f32 %v2696_v45, %v2696_v45 }
 0xde8   : > { %v2697_v47 = vmul.f32 %v2695_v9, %v2695_v9 }
 0xde9   : > { %v2702_v48 = vsel %vm1284_vm3, %v2698_v46, 0.0  ;;  %v9482_v46 = vpack.c.bf16 %v7764_v44, %v7763_v43 }
 0xdea   : > { %2703 = vadd.xlane.f32.xlu1 %v2702_v48  ;;  %v2699_v49 = vsel %vm1186_vm2, %v2697_v47, 0.0  ;;  %v7777_v47 = vld [vmem:[%s11497_s8 + $0x160] sm:$0xff]  ;;  %v7778_v48 = vld [vmem:[%s11497_s8 + $0x168] sm:$0xff] }
 0xdeb   : > { %2700 = vadd.xlane.f32.xlu0 %v2699_v49  ;;  %v9494_v49 = vpack.c.bf16 %v7778_v48, %v7777_v47 }
 0xe77   : > { %v2704_v59 = vpop.xlane.xlu1 %2703 }
 0xe78   : > { %v2706_v60 = vmul.f32 0.03125, %v2704_v59  ;;  %v2701_v61 = vpop.xlane.xlu0 %2700  ;;  %v7766_v59 = vld [vmem:[%s11495_s14 + $0x7] ss:$0 sm:$0xff] }
 0xe79   : > { %v2705_v62 = vmul.f32 0.03125, %v2701_v61 }
 0xe7a   : > { %v2708_v63 = vadd.f32 1e-05, %v2706_v60 }
 0xe7b   : > { %v2707_v0 = vadd.f32 1e-05, %v2705_v62 }
 0xe7c   : > { %9825 = vrsqrt.f32 %v2708_v63  ;;  %v7782_v63 = vld [vmem:[%s11495_s14 + $0xb] ss:$0 sm:$0xff] }
 0xe7d   : > { %9827 = vrsqrt.f32 %v2707_v0 }
 0xe86   : > { %v9826_v1 = vpop.eup %9825 }
 0xe87   : > { %v9828_v3 = vpop.eup %9827  ;;  %v2712_v4 = vmul.f32 %v9826_v1, %v2696_v45 }
 0xe88   : > { %v2711_v5 = vmul.f32 %v9828_v3, %v2695_v9 }
 0xe89   : > { %v2720_v7 = vmul.f32 %v7726_v2, %v2712_v4 }
 0xe8a   : > { %v2719_v11 = vmul.f32 %v7726_v2, %v2711_v5 }
 0xe8b   : > { %v10547_v14 = vadd.f32 %v7727_v6, %v2720_v7 }
 0xe8c   : > { %v10545_v35 = vadd.f32 %v7727_v6, %v2719_v11 }
 0xe8e   : > { %8661 = vmatprep.mubr.msk.f32.mxu0 %vm1186_vm2, %v10545_v35 }
 0xe8f   : > { %8662 = vmatmul.mubr.msk.f32.vlgmr.msra.gmra.mrb[16].mxu0 %vm1186_vm2, %v10547_v14 }
 0xe90   : > { %9453 = vmatpush3.bf16.msra.mxu0 %v9450_v58  ;;  %8672 = vmatprep.mubr.msk.f32.mxu0 %vm1186_vm2, %v10545_v35 }
 0xe91   : > { %9455 = vmatprep.subr.bf16.mxu0 %v9454_v33 }
 0xe94   : > { %9457 = vmatpush3.bf16.msra.mxu0 %v9454_v33 }
 0xe95   : > { %9459 = vmatprep.subr.bf16.mxu0 %v9458_v18 }
 0xe97   : > { %8673 = vmatmul.mubr.msk.f32.vlgmr.msra.gmra.mrb[18].mxu0 %vm1186_vm2, %v10547_v14 }
 0xe98   : > { %9461 = vmatpush3.bf16.msra.mxu0 %v9458_v18  ;;  %8683 = vmatprep.mubr.msk.f32.mxu0 %vm1186_vm2, %v10545_v35  ;;  %v7769_v18 = vld [vmem:[%s11497_s8 + $0x120] sm:$0xff] }
 0xe99   : > { %9463 = vmatprep.subr.bf16.mxu0 %v9462_v21  ;;  %v9486_v20 = vpack.c.bf16 %v7770_v19, %v7769_v18 }
 0xe9c   : > { %9465 = vmatpush3.bf16.msra.mxu0 %v9462_v21 }
 0xe9f   : > { %8684 = vmatmul.mubr.msk.f32.vlgmr.msra.gmra.mrb[20].mxu0 %vm1186_vm2, %v10547_v14 }
 0xf62   : > { %v8663_v23 = vpop.f32.mrb[16].mxu0 }
 0xf63   : > { %v2814_v24 = vpop.f32.mrb[17].mxu0  ;;  %v2820_v45 = vadd.f32 %v8663_v23, %v7733_v22 }
 0xf64   : > { %v2815_v25 = vadd.f32 %v7733_v22, %v2814_v24  ;;  %v7771_v24 = vld [vmem:[%s11497_s8 + $0x130] sm:$0xff] }
 0xf66   : > { %8690 = vmatprep.mubr.msk.f32.mxu0 %vm1593_vm4, %v2815_v25  ;;  %v7772_v25 = vld [vmem:[%s11497_s8 + $0x138] sm:$0xff]  ;;  %s8091_s8 = sadd.s32 1536, %s11525_s22 }
 0xf6a   : > { %v8674_v27 = vpop.f32.mrb[18].mxu0 }
 0xf6b   : > { %v2908_v29 = vadd.f32 %v8674_v27, %v7741_v26  ;;  %v2902_v30 = vpop.f32.mrb[19].mxu0 }
 0xf6c   : > { %v2903_v32 = vadd.f32 %v7741_v26, %v2902_v30  ;;  %v9490_v30 = vpack.c.bf16 %v7772_v25, %v7771_v24  ;;  %v7804_v25 = vld [vmem:[%s11496_s12 + $0x20] sm:$0xff] }
 0xf6e   : > { %v9466_v34 = vpack.c.bf16 %v2908_v29, %v2903_v32 }
 0xf70   : > { %9468 = vmatprep.subr.msk.bf16.mxu0 %vm10403_vm5, %v9466_v34 }
 0xf71   : > { %9471 = vmatpush3.bf16.xpose.msk.msra.mxu0 %vm10403_vm5, %v9466_v34  ;;  %v7774_v34 = vld [vmem:[%s11495_s14 + $0x9] ss:$0 sm:$0xff]  ;;  %s4200_s14 = sld [smem:[#allocation8 + %s11529_s17]]  ;;  %s7552_s17 = scalar_lea.vmem [#allocation4], %s10706_s5 }
 0xf72   : > { %v8685_v39 = vpop.f32.mrb[20].mxu0  ;;  %9479 = vmatprep.subr.bf16.mxu0 %v9478_v36  ;;  %s11533_s5 = sld [smem:[#allocation28_spill]] }
 0xf73   : > { %v2996_v41 = vadd.f32 %v8685_v39, %v7749_v15  ;;  %v2990_v42 = vpop.f32.mrb[21].mxu0 }
 0xf74   : > { %v2991_v8 = vadd.f32 %v7749_v15, %v2990_v42 }
 0xf76   : > { %v9472_v9 = vpack.c.bf16 %v2996_v41, %v2991_v8 }
 0xf78   : > { %8691 = vmatmul.mubr.msk.f32.vlgmr.msra.gmra.mrb[22].mxu0 %vm1593_vm4, %v2820_v45  ;;  %9474 = vmatprep.subr.msk.bf16.mxu1 %vm10415_vm8, %v9472_v9 }
 0xf79   : > { %9477 = vmatpush3.bf16.msk.msra.mxu1 %vm10415_vm8, %v9472_v9  ;;  %9481 = vmatpush3.bf16.msra.mxu0 %v9478_v36 }
 0xf7a   : > { %8708 = vmatprep.mubr.msk.f32.mxu0 %vm1186_vm2, %v10545_v35  ;;  %9483 = vmatprep.subr.bf16.mxu0 %v9482_v46 }
 0xf7b   : > { %9487 = vmatprep.subr.bf16.mxu1 %v9486_v20 }
 0xf7d   : > { %9485 = vmatpush3.bf16.msra.mxu0 %v9482_v46 }
 0xf7e   : > { %9495 = vmatprep.subr.bf16.mxu0 %v9494_v49 }
 0xf80   : > { %8709 = vmatmul.mubr.msk.f32.vlgmr.msra.gmra.mrb[24].mxu0 %vm1186_vm2, %v10547_v14 }
 0xf81   : > { %9497 = vmatpush3.bf16.msra.mxu0 %v9494_v49  ;;  %8730 = vmatprep.mubr.msk.f32.mxu0 %vm1186_vm2, %v10545_v35 }
 0xf82   : > { %9499 = vmatprep.subr.bf16.mxu0 %v9498_v52 }
 0xf85   : > { %9501 = vmatpush3.bf16.msra.mxu0 %v9498_v52 }
 0xf88   : > { %8731 = vmatmul.mubr.msk.f32.vlgmr.msra.gmra.mrb[26].mxu0 %vm1186_vm2, %v10547_v14 }
0x104b   : > { %v8692_v53 = vpop.f32.mrb[22].mxu0 }
0x104c   : > { %v3087_v54 = vmul.f32 0.25, %v8692_v53  ;;  %v3077_v55 = vpop.f32.mrb[23].mxu0 }
0x104d   : > { %v3086_v56 = vmul.f32 0.25, %v3077_v55  ;;  %v7792_v55 = vld [vmem:[%s11494_s19 + $0x30] sm:$0xff] }
0x104e   : > { %v3091_v57 = vsel %vm1687_vm9, %v3087_v54, -inf }
0x104f   : > { %3092 = vmax.xlane.f32.xlu1 %v3091_v57  ;;  %v3088_v58 = vsel %vm1683_vm10, %v3086_v56, -inf }
0x1050   : > { %3089 = vmax.xlane.f32.xlu0 %v3088_v58 }
0x1053   : > { %v8710_v60 = vpop.f32.mrb[24].mxu0 }
0x1054   : > { %v3282_v61 = vadd.f32 %v8710_v60, %v7766_v59  ;;  %v3276_v62 = vpop.f32.mrb[25].mxu0 }
0x1055   : > { %v3277_v31 = vadd.f32 %v7766_v59, %v3276_v62 }
0x105b   : > { %v8732_v0 = vpop.f32.mrb[26].mxu0 }
0x105c   : > { %v3458_v1 = vadd.f32 %v8732_v0, %v7782_v63  ;;  %v3452_v2 = vpop.f32.mrb[27].mxu0  ;;  %v7759_v0 = vld [vmem:[%s11494_s19 + $0x20] sm:$0xff] }
0x105d   : > { %v3453_v3 = vadd.f32 %v7782_v63, %v3452_v2 }
0x105f   : > { %v9508_v4 = vpack.c.bf16 %v3458_v1, %v3453_v3  ;;  %v7760_v1 = vld [vmem:[%s11494_s19 + $0x28] sm:$0xff] }
0x1060   : > { %v9518_v2 = vpack.c.bf16 %v7760_v1, %v7759_v0  ;;  %v7824_v1 = vld [vmem:[%s11519_s11 + $0xe0] sm:$0xff] }
0x1061   : > { %9510 = vmatprep.subr.msk.bf16.mxu0 %vm10415_vm8, %v9508_v4 }
0x1062   : > { %9513 = vmatpush3.bf16.msk.msra.mxu0 %vm10415_vm8, %v9508_v4 }
0x10dc   : > { %v3093_v5 = vpop.xlane.xlu1 %3092 }
0x10dd   : > { %v3095_v6 = vsub.f32 %v3087_v54, %v3093_v5  ;;  %v3090_v7 = vpop.xlane.xlu0 %3089 }
0x10de   : > { %v3094_v11 = vsub.f32 %v3086_v56, %v3090_v7  ;;  %v7793_v56 = vld [vmem:[%s11494_s19 + $0x38] sm:$0xff] }
0x10df   : > { %v3098_v12 = vmul.f32 1.442695, %v3095_v6  ;;  %v9514_v57 = vpack.c.bf16 %v7793_v56, %v7792_v55  ;;  %v7799_v6 = vld [vmem:[%s11493_s24 + $0x1] ss:$0 sm:$0xff]  ;;  %v7818_v56 = vld [vmem:[%s11519_s11 + $0xb0] sm:$0xff] }
0x10e0   : > { %v3096_v13 = vmul.f32 1.442695, %v3094_v11 }
0x10e1   : > { %9829 = vpow2.f32 %v3098_v12 }
0x10e2   : > { %9831 = vpow2.f32 %v3096_v13 }
0x10eb   : > { %v9830_v33 = vpop.eup %9829 }
0x10ec   : > { %v9832_v16 = vpop.eup %9831  ;;  %v3103_v17 = vsel %vm1687_vm9, %v9830_v33, 0.0 }
0x10ed   : > { %3104 = vadd.xlane.f32.xlu1 %v3103_v17  ;;  %v3100_v40 = vsel %vm1683_vm10, %v9832_v16, 0.0 }
0x10ee   : > { %3101 = vadd.xlane.f32.xlu0 %v3100_v40 }
0x117a   : > { %v3105_v21 = vpop.xlane.xlu1 %3104 }
0x117b   : > { %9833 = vrcp.f32 %v3105_v21  ;;  %v3102_v22 = vpop.xlane.xlu0 %3101 }
0x117c   : > { %9835 = vrcp.f32 %v3102_v22 }
0x1185   : > { %v9834_v23 = vpop.eup %9833 }
0x1186   : > { %v9836_v26 = vpop.eup %9835  ;;  %v3109_v29 = vmul.f32 %v9834_v23, %v9830_v33 }
0x1187   : > { %v3108_v27 = vmul.f32 %v9836_v26, %v9832_v16  ;;  %v7805_v26 = vld [vmem:[%s11496_s12 + $0x28] sm:$0xff] }
0x1189   : > { %8697 = vmatprep.mubr.msk.f32.mxu1 %vm1683_vm10, %v3108_v27  ;;  %v9522_v27 = vpack.c.bf16 %v7805_v26, %v7804_v25 }
0x118a   : > { %8698 = vmatmul.mubr.msk.f32.vlgmr.msra.gmra.mrb[12].mxu1 %vm1683_vm10, %v3109_v29  ;;  %v7806_v29 = vld [vmem:[%s11496_s12 + $0x30] sm:$0xff] }
0x118b   : > { %9489 = vmatpush3.bf16.msra.mxu1 %v9486_v20  ;;  %8719 = vmatprep.mubr.msk.f32.mxu1 %vm1186_vm2, %v10545_v35 }
0x118c   : > { %9491 = vmatprep.subr.bf16.mxu1 %v9490_v30  ;;  %9523 = vmatprep.subr.bf16.mxu0 %v9522_v27 }
0x118f   : > { %9493 = vmatpush3.bf16.msra.mxu1 %v9490_v30  ;;  %v7807_v30 = vld [vmem:[%s11496_s12 + $0x38] sm:$0xff]  ;;  %s11532_s12 = sld [smem:[#allocation45_spill]] }
0x1192   : > { %8720 = vmatmul.mubr.msk.f32.vlgmr.msra.gmra.mrb[14].mxu1 %vm1186_vm2, %v10547_v14 }
0x1193   : > { %8737 = vmatprep.mubr.msk.f32.mxu1 %vm1593_vm4, %v3277_v31  ;;  %v9526_v31 = vpack.c.bf16 %v7807_v30, %v7806_v29 }
0x1195   : > { %s10721_s22 = sld [smem:[#allocation8 + %s11532_s12]]  ;;  %s7556_s12 = scalar_lea.vmem [#allocation4], %s4200_s14 }
0x119b   : > { %s7536_s14 = scalar_lea.vmem [#allocation4], %s10721_s22  ;;  %s11544_s22 = sld [smem:[#allocation36_spill]] }
0x125d   : > { %v8699_v10 = vpop.f32.mrb[12].mxu1 }
0x125e   : > { %v3185_v32 = vpop.f32.mrb[13].mxu1 }
0x1265   : > { %v8721_v36 = vpop.f32.mrb[14].mxu1 }
0x1266   : > { %v3370_v15 = vadd.f32 %v8721_v36, %v7774_v34  ;;  %v3364_v39 = vpop.f32.mrb[15].mxu1 }
0x1267   : > { %v3365_v41 = vadd.f32 %v7774_v34, %v3364_v39 }
0x1269   : > { %v9502_v42 = vpack.c.bf16 %v3370_v15, %v3365_v41 }
0x126b   : > { %9504 = vmatprep.subr.msk.bf16.mxu1 %vm10403_vm5, %v9502_v42 }
0x126c   : > { %9507 = vmatpush3.bf16.xpose.msk.msra.mxu1 %vm10403_vm5, %v9502_v42  ;;  %v7802_v42 = vld [vmem:[%s10086_s30 + $0x1] ss:$0 sm:$0xff] }
0x126d   : > { %9515 = vmatprep.subr.bf16.mxu1 %v9514_v57 }
0x1273   : > { %8738 = vmatmul.mubr.msk.f32.vlgmr.msra.gmra.mrb[16].mxu1 %vm1593_vm4, %v3282_v61 }
0x1274   : > { %9517 = vmatpush3.bf16.msra.mxu1 %v9514_v57  ;;  %v7819_v57 = vld [vmem:[%s11519_s11 + $0xb8] sm:$0xff] }
0x1275   : > { %9519 = vmatprep.subr.bf16.mxu1 %v9518_v2 }
0x1346   : > { %v8739_v35 = vpop.f32.mrb[16].mxu1 }
0x1347   : > { %v3549_v14 = vmul.f32 0.25, %v8739_v35  ;;  %v3539_v43 = vpop.f32.mrb[17].mxu1 }
0x1348   : > { %v3548_v44 = vmul.f32 0.25, %v3539_v43 }
0x1349   : > { %v3553_v8 = vsel %vm1687_vm9, %v3549_v14, -inf }
0x134a   : > { %3554 = vmax.xlane.f32.xlu1 %v3553_v8  ;;  %v3550_v45 = vsel %vm1683_vm10, %v3548_v44, -inf }
0x134b   : > { %3551 = vmax.xlane.f32.xlu0 %v3550_v45 }
0x13d7   : > { %v3555_v9 = vpop.xlane.xlu1 %3554 }
0x13d8   : > { %v3557_v46 = vsub.f32 %v3549_v14, %v3555_v9  ;;  %v3552_v47 = vpop.xlane.xlu0 %3551 }
0x13d9   : > { %v3556_v48 = vsub.f32 %v3548_v44, %v3552_v47  ;;  %v7803_v44 = vld [vmem:[%s11518_s2 + $0x1] ss:$0 sm:$0xff]  ;;  %s10699_s2 = sld [smem:[#allocation8 + %s10292_s4]]  ;;  %s4212_s4 = sadd.s32 %s8091_s8, %s11528_s25 }
0x13da   : > { %v3560_v49 = vmul.f32 1.442695, %v3557_v46  ;;  %v7812_v47 = vld [vmem:[%s11519_s11 + $0x80] sm:$0xff]  ;;  %s7550_s8 = scalar_lea.vmem [#allocation4], %s10702_s3 }
0x13db   : > { %v3558_v50 = vmul.f32 1.442695, %v3556_v48  ;;  %v7813_v48 = vld [vmem:[%s11519_s11 + $0x88] sm:$0xff] }
0x13dc   : > { %9837 = vpow2.f32 %v3560_v49  ;;  %v9530_v49 = vpack.c.bf16 %v7813_v48, %v7812_v47 }
0x13dd   : > { %9839 = vpow2.f32 %v3558_v50  ;;  %v7814_v50 = vld [vmem:[%s11519_s11 + $0x90] sm:$0xff] }
0x13e6   : > { %v9838_v51 = vpop.eup %9837 }
0x13e7   : > { %v9840_v52 = vpop.eup %9839  ;;  %v3565_v53 = vsel %vm1687_vm9, %v9838_v51, 0.0 }
0x13e8   : > { %3566 = vadd.xlane.f32.xlu1 %v3565_v53  ;;  %v3562_v54 = vsel %vm1683_vm10, %v9840_v52, 0.0  ;;  %v7816_v53 = vld [vmem:[%s11519_s11 + $0xa0] sm:$0xff] }
0x13e9   : > { %3563 = vadd.xlane.f32.xlu0 %v3562_v54  ;;  %v7817_v54 = vld [vmem:[%s11519_s11 + $0xa8] sm:$0xff] }
0x13ea   : > { %v9538_v55 = vpack.c.bf16 %v7817_v54, %v7816_v53 }
0x1475   : > { %v3567_v58 = vpop.xlane.xlu1 %3566 }
0x1476   : > { %9841 = vrcp.f32 %v3567_v58  ;;  %v3564_v59 = vpop.xlane.xlu0 %3563  ;;  %v9542_v58 = vpack.c.bf16 %v7819_v57, %v7818_v56 }
0x1477   : > { %9843 = vrcp.f32 %v3564_v59  ;;  %v7820_v59 = vld [vmem:[%s11519_s11 + $0xc0] sm:$0xff] }
0x1480   : > { %v9842_v60 = vpop.eup %9841 }
0x1481   : > { %v9844_v61 = vpop.eup %9843  ;;  %v3571_v63 = vmul.f32 %v9842_v60, %v9838_v51  ;;  %v7815_v51 = vld [vmem:[%s11519_s11 + $0x98] sm:$0xff]  ;;  %v7821_v60 = vld [vmem:[%s11519_s11 + $0xc8] sm:$0xff] }
0x1482   : > { %v3570_v62 = vmul.f32 %v9844_v61, %v9840_v52  ;;  %v9534_v52 = vpack.c.bf16 %v7815_v51, %v7814_v50  ;;  %v7822_v61 = vld [vmem:[%s11519_s11 + $0xd0] sm:$0xff]  ;;  %v7832_v50 = vld [vmem:[%s11522_s27] ss:$0 sm:$0xff]  ;;  %s10696_s27 = sld [smem:[#allocation8 + %s11524_s18]] }
0x1483   : > { %4147 = vst.msk [vmem:[#allocation4 + $0xd] sm:$0xf] %vm4146_vm11, %v7832_v50  ;;  %s4195_s18 = sld [smem:[#allocation8 + %s10302_s26]] }
0x1484   : > { %8744 = vmatprep.mubr.msk.f32.mxu0 %vm1683_vm10, %v3570_v62  ;;  %v9546_v62 = vpack.c.bf16 %v7821_v60, %v7820_v59  ;;  %s4229_s26 = sld [smem:[#allocation8 + %s4228_s23]] }
0x1485   : > { %8745 = vmatmul.mubr.msk.f32.vlgmr.msra.gmra.mrb[28].mxu0 %vm1683_vm10, %v3571_v63  ;;  %v7823_v63 = vld [vmem:[%s11519_s11 + $0xd8] sm:$0xff]  ;;  %s11542_s23 = sld [smem:[#allocation39_spill]] }
0x1486   : > { %9525 = vmatpush3.bf16.msra.mxu0 %v9522_v27  ;;  %v9550_v0 = vpack.c.bf16 %v7823_v63, %v7822_v61  ;;  %v7831_v61 = vld [vmem:[%s11530_s6] ss:$0 sm:$0xff] }
0x1487   : > { %9527 = vmatprep.subr.bf16.mxu0 %v9526_v31 }
0x148a   : > { %9529 = vmatpush3.bf16.msra.mxu0 %v9526_v31  ;;  %s7564_s6 = scalar_lea.vmem [#allocation4], %s4229_s26  ;;  %s11545_s26 = sld [smem:[#allocation38_spill]] }
0x1558   : > { %v8746_v3 = vpop.f32.mrb[28].mxu0 }
0x1559   : > { %v3647_v4 = vpop.f32.mrb[29].mxu0 }
0x155a   : > { %8751 = vmatprep.mubr.msk.f32.mxu1 %vm1593_vm4, %v3647_v4  ;;  %v7826_v4 = vld [vmem:[%s11519_s11 + $0xf0] sm:$0xff] }
0x155b   : > { %8752 = vmatmul.mubr.msk.f32.vlgmr.msra.gmra.mrb[18].mxu1 %vm1593_vm4, %v8746_v3 }
0x155c   : > { %8758 = vmatprep.mubr.msk.f32.mxu1 %vm1593_vm4, %v3185_v32  ;;  %9521 = vmatpush3.bf16.msra.mxu1 %v9518_v2  ;;  %v7825_v2 = vld [vmem:[%s11519_s11 + $0xe8] sm:$0xff] }
0x155d   : > { %9531 = vmatprep.subr.bf16.mxu1 %v9530_v49  ;;  %v9554_v3 = vpack.c.bf16 %v7825_v2, %v7824_v1 }
0x1563   : > { %8759 = vmatmul.mubr.msk.f32.vlgmr.msra.gmra.mrb[18].mxu1 %vm1593_vm4, %v8699_v10 }
0x1564   : > { %9533 = vmatpush3.bf16.msra.mxu1 %v9530_v49 }
0x1565   : > { %9535 = vmatprep.subr.bf16.mxu1 %v9534_v52 }
0x1568   : > { %9537 = vmatpush3.bf16.msra.mxu1 %v9534_v52 }
0x1569   : > { %9539 = vmatprep.subr.bf16.mxu1 %v9538_v55 }
0x156c   : > { %9541 = vmatpush3.bf16.msra.mxu1 %v9538_v55 }
0x156d   : > { %9543 = vmatprep.subr.bf16.mxu1 %v9542_v58 }
0x1570   : > { %9545 = vmatpush3.bf16.msra.mxu1 %v9542_v58  ;;  %v7830_v58 = vld [vmem:[%s11527_s16] ss:$0 sm:$0xff]  ;;  %s4221_s16 = sld [smem:[#allocation8 + %s4220_s0]] }
0x1571   : > { %9547 = vmatprep.subr.bf16.mxu1 %v9546_v62  ;;  %s11541_s0 = sld [smem:[#allocation37_spill]] }
0x1574   : > { %9549 = vmatpush3.bf16.msra.mxu1 %v9546_v62 }
0x1575   : > { %9551 = vmatprep.subr.bf16.mxu1 %v9550_v0 }
0x1576   : > { %s7562_s3 = scalar_lea.vmem [#allocation4], %s4221_s16  ;;  %s11543_s16 = sld [smem:[#allocation35_spill]] }
0x1578   : > { %9553 = vmatpush3.bf16.msra.mxu1 %v9550_v0 }
0x1579   : > { %9555 = vmatprep.subr.bf16.mxu1 %v9554_v3 }
0x157c   : > { %9557 = vmatpush3.bf16.msra.mxu1 %v9554_v3 }
0x1636   : > { %v8760_v5 = vpop.f32.mrb[18].mxu1 }
0x1637   : > { %v3822_v7 = vadd.f32 %v8760_v5, %v10522_v37  ;;  %v3812_v11 = vpop.f32.mrb[19].mxu1  ;;  %v7827_v5 = vld [vmem:[%s11519_s11 + $0xf8] sm:$0xff]  ;;  %s11531_s11 = sld [smem:[#allocation53_spill]] }
0x1638   : > { %v3821_v12 = vadd.f32 %v3812_v11, %v10525_v38 }
0x1639   : > { %v10638_v13 = vadd.f32 %v7799_v6, %v3822_v7  ;;  %v7809_v7 = vld [vmem:[%s11520_s20 + $0x1] ss:$0 sm:$0xff]  ;;  %s4213_s20 = sld [smem:[#allocation8 + %s4212_s4]] }
0x163a   : > { %v10640_v33 = vadd.f32 %v7799_v6, %v3821_v12  ;;  %v9558_v6 = vpack.c.bf16 %v7827_v5, %v7826_v4  ;;  %s11540_s4 = sld [smem:[#allocation34_spill]] }
0x163b   : > { %v3840_v16 = vsel %vm1284_vm3, %v10638_v13, 0.0 }
0x163c   : > { %3841 = vadd.xlane.f32.xlu1 %v3840_v16  ;;  %v3837_v17 = vsel %vm1186_vm2, %v10640_v33, 0.0  ;;  %9559 = vmatprep.subr.bf16.mxu1 %v9558_v6 }
0x163d   : > { %3838 = vadd.xlane.f32.xlu0 %v3837_v17  ;;  %9561 = vmatpush3.bf16.msra.mxu1 %v9558_v6  ;;  %s4205_s19 = sld [smem:[#allocation8 + %s11531_s11]] }
0x1643   : > { %s7558_s11 = scalar_lea.vmem [#allocation4], %s4205_s19  ;;  %s7538_s19 = scalar_lea.vmem [#allocation4], %s10684_s13 }
0x1644   : > { %s7548_s13 = scalar_lea.vmem [#allocation4], %s10699_s2  ;;  %s11535_s2 = sld [smem:[#allocation29_spill]] }
0x16c9   : > { %v3842_v40 = vpop.xlane.xlu1 %3841 }
0x16ca   : > { %v3844_v37 = vmul.f32 0.03125, %v3842_v40  ;;  %v3839_v18 = vpop.xlane.xlu0 %3838 }
0x16cb   : > { %v3843_v38 = vmul.f32 0.03125, %v3839_v18 }
0x16cc   : > { %v3846_v19 = vsub.f32 %v10638_v13, %v3844_v37 }
0x16cd   : > { %v3845_v20 = vsub.f32 %v10640_v33, %v3843_v38 }
0x16ce   : > { %v3848_v21 = vmul.f32 %v3846_v19, %v3846_v19 }
0x16cf   : > { %v3847_v22 = vmul.f32 %v3845_v20, %v3845_v20 }
0x16d0   : > { %v3852_v23 = vsel %vm1284_vm3, %v3848_v21, 0.0 }
0x16d1   : > { %3853 = vadd.xlane.f32.xlu1 %v3852_v23  ;;  %v3849_v24 = vsel %vm1186_vm2, %v3847_v22, 0.0 }
0x16d2   : > { %3850 = vadd.xlane.f32.xlu0 %v3849_v24 }
0x175e   : > { %v3854_v10 = vpop.xlane.xlu1 %3853 }
0x175f   : > { %v3856_v32 = vmul.f32 0.03125, %v3854_v10  ;;  %v3851_v34 = vpop.xlane.xlu0 %3850 }
0x1760   : > { %v3855_v36 = vmul.f32 0.03125, %v3851_v34  ;;  %v7829_v34 = vld [vmem:[%s11521_s15 + $0x1] ss:$0 sm:$0xff]  ;;  %s4236_s15 = sadd.s32 %s8097_s1, %s11528_s25  ;;  %s7554_s25 = scalar_lea.vmem [#allocation4], %s4195_s18 }
0x1761   : > { %v3858_v15 = vadd.f32 1e-05, %v3856_v32  ;;  %s10723_s24 = sld [smem:[#allocation8 + %s4236_s15]]  ;;  %s7560_s15 = scalar_lea.vmem [#allocation4], %s4213_s20 }
0x1762   : > { %v3857_v39 = vadd.f32 1e-05, %v3855_v36  ;;  %s7540_s20 = scalar_lea.vmem [#allocation4], %s10687_s9  ;;  %s7546_s1 = scalar_lea.vmem [#allocation4], %s10696_s27 }
0x1763   : > { %9845 = vrsqrt.f32 %v3858_v15  ;;  %s11538_s27 = sld [smem:[#allocation33_spill]] }
0x1764   : > { %9847 = vrsqrt.f32 %v3857_v39 }
0x1767   : > { %s7566_s9 = scalar_lea.vmem [#allocation4], %s10723_s24  ;;  %s11534_s24 = sld [smem:[#allocation31_spill]] }
0x1769   : > { %s11539_s18 = smov %s11538_s27 }
0x176d   : > { %v9846_v41 = vpop.eup %9845 }
0x176e   : > { %v9848_v35 = vpop.eup %9847  ;;  %v3862_v14 = vmul.f32 %v9846_v41, %v3846_v19 }
0x176f   : > { %v3861_v43 = vmul.f32 %v9848_v35, %v3845_v20 }
0x1770   : > { %v3870_v8 = vmul.f32 %v7802_v42, %v3862_v14 }
0x1771   : > { %v3869_v45 = vmul.f32 %v7802_v42, %v3861_v43 }
0x1772   : > { %v3878_v46 = vadd.f32 %v7803_v44, %v3870_v8 }
0x1773   : > { %v3877_v9 = vadd.f32 %v7803_v44, %v3869_v45 }
0x1775   : > { %8769 = vmatprep.mubr.msk.f32.mxu0 %vm1186_vm2, %v3877_v9 }
0x1776   : > { %8770 = vmatmul.mubr.msk.f32.vlgmr.msra.gmra.mrb[30].mxu0 %vm1186_vm2, %v3878_v46 }
0x1849   : > { %v8771_v11 = vpop.f32.mrb[30].mxu0 }
0x184a   : > { %v3970_v12 = vadd.f32 %v8771_v11, %v7809_v7  ;;  %v3964_v16 = vpop.f32.mrb[31].mxu0 }
0x184b   : > { %v3965_v17 = vadd.f32 %v7809_v7, %v3964_v16 }
0x184c   : > { %v3974_v40 = vmul.f32 %v3970_v12, %v3970_v12 }
0x184d   : > { %v3973_v37 = vmul.f32 %v3965_v17, %v3965_v17 }
0x184e   : > { %v3976_v18 = vmul.f32 %v3974_v40, %v3970_v12 }
0x184f   : > { %v3975_v38 = vmul.f32 %v3973_v37, %v3965_v17 }
0x1850   : > { %v3978_v19 = vmul.f32 0.044715, %v3976_v18 }
0x1851   : > { %v3977_v20 = vmul.f32 0.044715, %v3975_v38 }
0x1852   : > { %v3980_v21 = vadd.f32 %v3978_v19, %v3970_v12 }
0x1853   : > { %v3979_v22 = vadd.f32 %v3977_v20, %v3965_v17 }
0x1854   : > { %v3982_v23 = vmul.f32 0.7978846, %v3980_v21 }
0x1855   : > { %v3981_v24 = vmul.f32 0.7978846, %v3979_v22 }
0x1856   : > { %9849 = vtanh.f32 %v3982_v23  ;;  %v4246_v23 = vld [vmem:[%s11533_s5 + $0x8] sm:$0xff] }
0x1857   : > { %9851 = vtanh.f32 %v3981_v24 }
0x1860   : > { %v9850_v25 = vpop.eup %9849 }
0x1861   : > { %v9852_v26 = vpop.eup %9851  ;;  %v3986_v27 = vadd.f32 1.0, %v9850_v25 }
0x1862   : > { %v3985_v29 = vadd.f32 1.0, %v9852_v26  ;;  %v4245_v26 = vld [vmem:[%s11533_s5] sm:$0xff] }
0x1863   : > { %v3988_v30 = vmul.f32 0.5, %v3986_v27 }
0x1864   : > { %v3987_v31 = vmul.f32 0.5, %v3985_v29 }
0x1865   : > { %v3990_v32 = vmul.f32 %v3988_v30, %v3970_v12 }
0x1866   : > { %v3989_v10 = vmul.f32 %v3987_v31, %v3965_v17  ;;  %v4247_v31 = vld [vmem:[%s11533_s5 + $0x10] sm:$0x1] }
0x1868   : > { %8804 = vmatprep.mubr.f32.mxu1 %v3989_v10 }
0x1869   : > { %8805 = vmatmul.mubr.f32.vlgmr.msra.gmra.mrb[20].mxu1 %v3990_v32 }
0x193c   : > { %v8806_v36 = vpop.f32.mrb[20].mxu1 }
0x193d   : > { %v4088_v15 = vadd.f32 %v8806_v36, %v7829_v34  ;;  %v4082_v39 = vpop.f32.mrb[21].mxu1 }
0x193e   : > { %v4083_v41 = vadd.f32 %v7829_v34, %v4082_v39 }
0x193f   : > { %v4092_v42 = vadd.f32 %v4088_v15, %v10638_v13 }
0x1940   : > { %v4091_v35 = vadd.f32 %v4083_v41, %v10640_v33 }
0x1941   : > { %v4098_v14 = vsel %vm1284_vm3, %v4092_v42, 0.0 }
0x1942   : > { %4099 = vadd.xlane.f32.xlu1 %v4098_v14  ;;  %v4095_v43 = vsel %vm1186_vm2, %v4091_v35, 0.0 }
0x1943   : > { %4096 = vadd.xlane.f32.xlu0 %v4095_v43 }
0x19cf   : > { %v4100_v44 = vpop.xlane.xlu1 %4099 }
0x19d0   : > { %v4102_v8 = vmul.f32 0.03125, %v4100_v44  ;;  %v4097_v45 = vpop.xlane.xlu0 %4096 }
0x19d1   : > { %v4101_v9 = vmul.f32 0.03125, %v4097_v45 }
0x19d2   : > { %v4104_v46 = vsub.f32 %v4092_v42, %v4102_v8 }
0x19d3   : > { %v4103_v47 = vsub.f32 %v4091_v35, %v4101_v9 }
0x19d4   : > { %v4106_v48 = vmul.f32 %v4104_v46, %v4104_v46 }
0x19d5   : > { %v4105_v49 = vmul.f32 %v4103_v47, %v4103_v47 }
0x19d6   : > { %v4110_v13 = vsel %vm1284_vm3, %v4106_v48, 0.0 }
0x19d7   : > { %4111 = vadd.xlane.f32.xlu1 %v4110_v13  ;;  %v4107_v33 = vsel %vm1186_vm2, %v4105_v49, 0.0  ;;  %v4310_v13 = vld [vmem:[%s11534_s24] sm:$0xff] }
0x19d8   : > { %4108 = vadd.xlane.f32.xlu0 %v4107_v33  ;;  %v4311_v33 = vld [vmem:[%s11534_s24 + $0x8] sm:$0xff] }
0x19d9   : > { %v9563_v50 = vpack.c.bf16 %v4311_v33, %v4310_v13  ;;  %v7873_v33 = vld [vmem:[%s11537_s21 + $0x4] ss:$0 sm:$0xff] }
0x1a64   : > { %v4112_v51 = vpop.xlane.xlu1 %4111 }
0x1a65   : > { %v4114_v52 = vmul.f32 0.03125, %v4112_v51  ;;  %v4109_v53 = vpop.xlane.xlu0 %4108  ;;  %v10015_v51 = vmov 0.0|0.0  }
0x1a66   : > { %v4113_v54 = vmul.f32 0.03125, %v4109_v53  ;;  %9562 = vmatprep.subr.bf16.mxu0 %v10015_v51  ;;  %9580 = vmatprep.subr.bf16.mxu1 %v10015_v51  ;;  %v4313_v53 = vld [vmem:[%s11534_s24 + $0x18] sm:$0xff] }
0x1a67   : > { %v4116_v55 = vadd.f32 1e-05, %v4114_v52  ;;  %9564 = vmatpush3.bf16.msra.mxu0 %v9563_v50  ;;  %v4312_v52 = vld [vmem:[%s11534_s24 + $0x10] sm:$0xff]  ;;  %v7855_v50 = vld [vmem:[%s11537_s21] ss:$0 sm:$0xff] }
0x1a68   : > { %v4115_v56 = vadd.f32 1e-05, %v4113_v54  ;;  %9565 = vmatprep.subr.bf16.mxu0 %v10015_v51  ;;  %v9566_v54 = vpack.c.bf16 %v4313_v53, %v4312_v52  ;;  %v7887_v53 = vld [vmem:[%s11534_s24 + $0x20] sm:$0xff] }
0x1a69   : > { %9853 = vrsqrt.f32 %v4116_v55  ;;  %v10017_v55 = vmov 0.0  }
0x1a6a   : > { %9855 = vrsqrt.f32 %v4115_v56  ;;  %8815 = vmatprep.mubr.msk.f32.mxu0 %vm10016_vm12, %v10017_v55  ;;  %8864 = vmatprep.mubr.msk.f32.mxu1 %vm10016_vm12, %v10017_v55 }
0x1a6b   : > { %9567 = vmatpush3.bf16.msra.mxu0 %v9566_v54  ;;  %v7888_v54 = vld [vmem:[%s11534_s24 + $0x28] sm:$0xff] }
0x1a6c   : > { %9568 = vmatprep.subr.bf16.mxu0 %v10015_v51 }
0x1a73   : > { %v9854_v57 = vpop.eup %9853 }
0x1a74   : > { %v9856_v59 = vpop.eup %9855  ;;  %v4120_v60 = vmul.f32 %v9854_v57, %v4104_v46 }
0x1a75   : > { %v4119_v62 = vmul.f32 %v9856_v59, %v4103_v47 }
0x1a76   : > { %v4128_v63 = vmul.f32 %v7830_v58, %v4120_v60 }
0x1a77   : > { %v4127_v0 = vmul.f32 %v7830_v58, %v4119_v62 }
0x1a78   : > { %v4136_v1 = vadd.f32 %v7831_v61, %v4128_v63 }
0x1a79   : > { %v4135_v2 = vadd.f32 %v7831_v61, %v4127_v0 }
0x1a7a   : > { %4138 = vst.msk [vmem:[#allocation4 + $0x8] sm:$0x1f] %vm1284_vm3, %v4136_v1 }
0x1a7b   : > { %4137 = vst.msk [vmem:[#allocation4] sm:$0xff] %vm1186_vm2, %v4135_v2 }
0x1a82   : > { %v7840_v3 = vld [vmem:[%s7550_s8 + $0x1] sm:$0x1]  ;;  %v4148_v17 = vld [vmem:[#allocation4] sm:$0x1]  ;;  %s11546_s8 = sld [smem:[#allocation40_spill]] }
0x1a83   : > { %v7841_v4 = vld [vmem:[%s7552_s17 + $0x1] sm:$0x1]  ;;  %4189 = vst.msk [vmem:[#allocation5 + $0x8] sm:$0x1] %vm1190_vm1, %v7840_v3  ;;  %4149 = vst.msk [vmem:[#allocation5] sm:$0x1] %vm1190_vm1, %v4148_v17 }
0x1a84   : > { %v7842_v5 = vld [vmem:[%s7554_s25 + $0x1] sm:$0x1]  ;;  %4194 = vst.msk [vmem:[#allocation5 + $0x9] sm:$0x1] %vm1190_vm1, %v7841_v4  ;;  %v7853_v3 = vld [vmem:[%s11535_s2] ss:$0 sm:$0xff] }
0x1a85   : > { %4199 = vst.msk [vmem:[#allocation5 + $0xa] sm:$0x1] %vm1190_vm1, %v7842_v5  ;;  %v7843_v6 = vld [vmem:[%s7556_s12 + $0x1] sm:$0x1]  ;;  %s11547_s17 = sld [smem:[#allocation41_spill]]  ;;  %s11548_s25 = sld [smem:[#allocation42_spill]] }
0x1a86   : > { %v7844_v7 = vld [vmem:[%s7558_s11 + $0x1] sm:$0x1]  ;;  %4204 = vst.msk [vmem:[#allocation5 + $0xb] sm:$0x1] %vm1190_vm1, %v7843_v6  ;;  %s11549_s12 = sld [smem:[#allocation46_spill]]  ;;  %s11550_s11 = sld [smem:[#allocation43_spill]] }
0x1a87   : > { %v7846_v11 = vld [vmem:[%s7560_s15 + $0x1] sm:$0x1]  ;;  %4209 = vst.msk [vmem:[#allocation5 + $0xc] sm:$0x1] %vm1190_vm1, %v7844_v7  ;;  %v7860_v7 = vld [vmem:[%s11534_s24 + $0x48] sm:$0xff] }
0x1a88   : > { %4217 = vst.msk [vmem:[#allocation5 + $0xd] sm:$0x1] %vm1190_vm1, %v7846_v11  ;;  %v7848_v12 = vld [vmem:[%s7562_s3 + $0x1] sm:$0x1]  ;;  %v7854_v11 = vld [vmem:[%s11536_s7] ss:$0 sm:$0xff] }
0x1a89   : > { %v7850_v16 = vld [vmem:[%s7564_s6 + $0x1] sm:$0x1]  ;;  %4225 = vst.msk [vmem:[#allocation5 + $0xe] sm:$0x1] %vm1190_vm1, %v7848_v12 }
0x1a8a   : > { %4233 = vst.msk [vmem:[#allocation5 + $0xf] sm:$0x1] %vm1190_vm1, %v7850_v16  ;;  %v7833_v40 = vld [vmem:[%s7536_s14 + $0x1] sm:$0x1] }
0x1a8b   : > { %v7834_v37 = vld [vmem:[%s7538_s19 + $0x1] sm:$0x1]  ;;  %4154 = vst.msk [vmem:[#allocation5 + $0x1] sm:$0x1] %vm1190_vm1, %v7833_v40 }
0x1a8c   : > { %v7835_v18 = vld [vmem:[%s7540_s20 + $0x1] sm:$0x1]  ;;  %4159 = vst.msk [vmem:[#allocation5 + $0x2] sm:$0x1] %vm1190_vm1, %v7834_v37  ;;  %s11551_s15 = sshll.u32 %s11549_s12, 4 }
0x1a8d   : > { %4164 = vst.msk [vmem:[#allocation5 + $0x3] sm:$0x1] %vm1190_vm1, %v7835_v18  ;;  %v7836_v38 = vld [vmem:[%s7542_s10 + $0x1] sm:$0x1]  ;;  %s1084_s3 = scalar_lea.vmem %s11550_s11, %s11551_s15 }
0x1a8e   : > { %v7837_v19 = vld [vmem:[%s7544_s28 + $0x1] sm:$0x1]  ;;  %4169 = vst.msk [vmem:[#allocation5 + $0x4] sm:$0x1] %vm1190_vm1, %v7836_v38  ;;  %v7861_v38 = vld [vmem:[%s11534_s24 + $0x50] sm:$0xff] }
0x1a8f   : > { %v7838_v20 = vld [vmem:[%s7546_s1 + $0x1] sm:$0x1]  ;;  %4174 = vst.msk [vmem:[#allocation5 + $0x5] sm:$0x1] %vm1190_vm1, %v7837_v19  ;;  %v7862_v19 = vld [vmem:[%s11534_s24 + $0x58] sm:$0xff] }
0x1a90   : > { %4179 = vst.msk [vmem:[#allocation5 + $0x6] sm:$0x1] %vm1190_vm1, %v7838_v20  ;;  %v7839_v21 = vld [vmem:[%s7548_s13 + $0x1] sm:$0x1]  ;;  %v9572_v20 = vpack.c.bf16 %v7862_v19, %v7861_v38 }
0x1a91   : > { %v7852_v22 = vld [vmem:[%s7566_s9 + $0x1] sm:$0x1]  ;;  %4184 = vst.msk [vmem:[#allocation5 + $0x7] sm:$0x1] %vm1190_vm1, %v7839_v21 }
0x1a92   : > { %4241 = vst.msk [vmem:[#allocation5 + $0x10] sm:$0x1] %vm1190_vm1, %v7852_v22  ;;  %v4243_v24 = vld [vmem:[#allocation5 + $0x8] sm:$0xff] }
0x1a93   : > { %v10755_v25 = vadd.f32 %v4246_v23, %v4243_v24  ;;  %v7859_v6 = vld [vmem:[%s11534_s24 + $0x40] sm:$0xff] }
0x1a94   : > { %v9569_v17 = vpack.c.bf16 %v7860_v7, %v7859_v6  ;;  %v7868_v24 = vld [vmem:[%s11534_s24 + $0x80] sm:$0xff] }
0x1a95   : > { %v4256_v27 = vsel %vm1186_vm2, %v10755_v25, 0.0  ;;  %v7905_v7 = vld [vmem:[%s11534_s24 + $0xa0] sm:$0xff] }
0x1a96   : > { %4257 = vadd.xlane.f32.xlu1 %v4256_v27 }
0x1a98   : > { %v4242_v29 = vld [vmem:[#allocation5] sm:$0xff] }
0x1a99   : > { %v4244_v30 = vld [vmem:[#allocation5 + $0x10] sm:$0x1]  ;;  %v10761_v10 = vadd.f32 %v4245_v26, %v4242_v29  ;;  %v7870_v29 = vld [vmem:[%s11534_s24 + $0x90] sm:$0xff] }
0x1a9a   : > { %v10765_v34 = vadd.f32 %v4247_v31, %v4244_v30  ;;  %v7869_v26 = vld [vmem:[%s11534_s24 + $0x88] sm:$0xff]  ;;  %v7871_v30 = vld [vmem:[%s11534_s24 + $0x98] sm:$0xff] }
0x1a9b   : > { %v4253_v32 = vsel %vm1186_vm2, %v10761_v10, 0.0  ;;  %v9575_v27 = vpack.c.bf16 %v7869_v26, %v7868_v24  ;;  %v9578_v31 = vpack.c.bf16 %v7871_v30, %v7870_v29 }
0x1a9c   : > { %4254 = vadd.xlane.f32.xlu0 %v4253_v32  ;;  %v4259_v36 = vsel %vm1190_vm1, %v10765_v34, 0.0 }
0x1aa0   : > { %4260 = vadd.xlane.f32.xlu0 %v4259_v36 }
0x1b23   : > { %v4258_v15 = vpop.xlane.xlu1 %4257 }
0x1b24   : > { %v4263_v39 = vmul.f32 0.03125, %v4258_v15 }
0x1b26   : > { %v4266_v41 = vsub.f32 %v10755_v25, %v4263_v39 }
0x1b28   : > { %v4269_v14 = vmul.f32 %v4266_v41, %v4266_v41 }
0x1b29   : > { %v4255_v42 = vpop.xlane.xlu0 %4254 }
0x1b2a   : > { %v4262_v35 = vmul.f32 0.03125, %v4255_v42  ;;  %v4274_v8 = vsel %vm1186_vm2, %v4269_v14, 0.0 }
0x1b2b   : > { %4275 = vadd.xlane.f32.xlu0 %v4274_v8 }
0x1b2c   : > { %v4265_v43 = vsub.f32 %v10761_v10, %v4262_v35 }
0x1b2d   : > { %v4261_v44 = vpop.xlane.xlu0 %4260 }
0x1b2e   : > { %v4264_v45 = vmul.f32 0.03125, %v4261_v44  ;;  %v4268_v9 = vmul.f32 %v4265_v43, %v4265_v43 }
0x1b30   : > { %v4267_v46 = vsub.f32 %v10765_v34, %v4264_v45  ;;  %v4271_v47 = vsel %vm1186_vm2, %v4268_v9, 0.0 }
0x1b31   : > { %4272 = vadd.xlane.f32.xlu1 %v4271_v47 }
0x1b32   : > { %v4270_v48 = vmul.f32 %v4267_v46, %v4267_v46 }
0x1b34   : > { %v4277_v49 = vsel %vm1190_vm1, %v4270_v48, 0.0 }
0x1b35   : > { %4278 = vadd.xlane.f32.xlu1 %v4277_v49 }
0x1bb8   : > { %v4276_v56 = vpop.xlane.xlu0 %4275 }
0x1bb9   : > { %v4281_v57 = vmul.f32 0.03125, %v4276_v56 }
0x1bbb   : > { %v4284_v59 = vadd.f32 1e-05, %v4281_v57 }
0x1bbd   : > { %9857 = vrsqrt.f32 %v4284_v59 }
0x1bbe   : > { %v4273_v58 = vpop.xlane.xlu1 %4272 }
0x1bbf   : > { %v4280_v60 = vmul.f32 0.03125, %v4273_v58 }
0x1bc1   : > { %v4283_v61 = vadd.f32 1e-05, %v4280_v60 }
0x1bc2   : > { %v4279_v62 = vpop.xlane.xlu1 %4278 }
0x1bc3   : > { %9859 = vrsqrt.f32 %v4283_v61  ;;  %v4282_v63 = vmul.f32 0.03125, %v4279_v62  ;;  %v9588_v61 = vpack.c.bf16 %v7888_v54, %v7887_v53 }
0x1bc5   : > { %v4285_v0 = vadd.f32 1e-05, %v4282_v63  ;;  %v7889_v63 = vld [vmem:[%s11534_s24 + $0x30] sm:$0xff] }
0x1bc7   : > { %9861 = vrsqrt.f32 %v4285_v0  ;;  %v9858_v1 = vpop.eup %9857  ;;  %v7890_v0 = vld [vmem:[%s11534_s24 + $0x38] sm:$0xff] }
0x1bc8   : > { %v4290_v5 = vmul.f32 %v9858_v1, %v4266_v41 }
0x1bca   : > { %v4299_v37 = vmul.f32 %v7853_v3, %v4290_v5 }
0x1bcc   : > { %v10799_v21 = vadd.f32 %v7854_v11, %v4299_v37 }
0x1bcd   : > { %v9860_v2 = vpop.eup %9859 }
0x1bce   : > { %v4289_v4 = vmul.f32 %v9860_v2, %v4265_v43  ;;  %v7864_v43 = vld [vmem:[%s11537_s21 + $0x2] ss:$0 sm:$0xff] }
0x1bd0   : > { %v4298_v12 = vmul.f32 %v7853_v3, %v4289_v4  ;;  %v9591_v4 = vpack.c.bf16 %v7890_v0, %v7889_v63 }
0x1bd1   : > { %v9862_v16 = vpop.eup %9861 }
0x1bd2   : > { %v10791_v40 = vadd.f32 %v7854_v11, %v4298_v12  ;;  %v4291_v18 = vmul.f32 %v9862_v16, %v4267_v46  ;;  %v7907_v16 = vld [vmem:[%s11534_s24 + $0xb0] sm:$0xff] }
0x1bd4   : > { %8816 = vmatmul.mubr.msk.f32.vlgmr.msra.gmra.mrb[32].mxu0 %vm1186_vm2, %v10791_v40  ;;  %v4300_v22 = vmul.f32 %v7853_v3, %v4291_v18 }
0x1bd5   : > { %8818 = vmatprep.mubr.msk.f32.mxu0 %vm10016_vm12, %v10017_v55  ;;  %9570 = vmatpush3.bf16.msra.mxu0 %v9569_v17  ;;  %v7908_v17 = vld [vmem:[%s11534_s24 + $0xb8] sm:$0xff] }
0x1bd6   : > { %9571 = vmatprep.subr.bf16.mxu0 %v10015_v51  ;;  %v10806_v23 = vadd.f32 %v7854_v11, %v4300_v22  ;;  %v7906_v11 = vld [vmem:[%s11534_s24 + $0xa8] sm:$0xff]  ;;  %v9603_v37 = vpack.c.bf16 %v7908_v17, %v7907_v16  ;;  %v7898_v16 = vld [vmem:[%s11534_s24 + $0x70] sm:$0xff]  ;;  %v7899_v17 = vld [vmem:[%s11534_s24 + $0x78] sm:$0xff] }
0x1bd7   : > { %v9600_v12 = vpack.c.bf16 %v7906_v11, %v7905_v7 }
0x1bd8   : > { %8819 = vmatmul.mubr.msk.f32.gmra.mrb[34].mxu0 %vm1186_vm2, %v10799_v21 }
0x1bd9   : > { %8821 = vmatprep.mubr.msk.f32.mxu0 %vm10016_vm12, %v10017_v55  ;;  %9573 = vmatpush3.bf16.msra.mxu0 %v9572_v20 }
0x1bda   : > { %9574 = vmatprep.subr.bf16.mxu0 %v10015_v51 }
0x1bdc   : > { %8822 = vmatmul.mubr.msk.f32.gmra.mrb[36].mxu0 %vm1186_vm2, %v10806_v23 }
0x1bdd   : > { %8832 = vmatprep.mubr.msk.f32.mxu0 %vm10016_vm12, %v10017_v55 }
0x1be0   : > { %8833 = vmatmul.mubr.msk.f32.vlgmr.msra.gmra.mrb[38].mxu0 %vm1186_vm2, %v10791_v40 }
0x1be1   : > { %8835 = vmatprep.mubr.msk.f32.mxu0 %vm10016_vm12, %v10017_v55  ;;  %9576 = vmatpush3.bf16.msra.mxu0 %v9575_v27 }
0x1be2   : > { %9577 = vmatprep.subr.bf16.mxu0 %v10015_v51 }
0x1be4   : > { %8836 = vmatmul.mubr.msk.f32.gmra.mrb[40].mxu0 %vm1186_vm2, %v10799_v21 }
0x1be5   : > { %8838 = vmatprep.mubr.msk.f32.mxu0 %vm10016_vm12, %v10017_v55  ;;  %9579 = vmatpush3.bf16.msra.mxu0 %v9578_v31 }
0x1be6   : > { %9584 = vmatprep.subr.bf16.mxu0 %v10015_v51 }
0x1be8   : > { %8839 = vmatmul.mubr.msk.f32.gmra.mrb[42].mxu0 %vm1186_vm2, %v10806_v23 }
0x1be9   : > { %8849 = vmatprep.mubr.msk.f32.mxu0 %vm10016_vm12, %v10017_v55 }
0x1bec   : > { %8850 = vmatmul.mubr.msk.f32.vlgmr.msra.gmra.mrb[44].mxu0 %vm1186_vm2, %v10791_v40 }
0x1bed   : > { %8852 = vmatprep.mubr.msk.f32.mxu0 %vm10016_vm12, %v10017_v55 }
0x1bf0   : > { %8853 = vmatmul.mubr.msk.f32.gmra.mrb[46].mxu0 %vm1186_vm2, %v10799_v21 }
0x1bf1   : > { %8855 = vmatprep.mubr.msk.f32.mxu0 %vm10016_vm12, %v10017_v55 }
0x1bf4   : > { %8856 = vmatmul.mubr.msk.f32.gmra.mrb[48].mxu0 %vm1186_vm2, %v10806_v23 }
0x1bf5   : > { %8879 = vmatprep.mubr.msk.f32.mxu0 %vm10016_vm12, %v10017_v55 }
0x1ca7   : > { %v4396_v32 = vpop.f32.mrb[32].mxu0 }
0x1ca8   : > { %v8817_v36 = vpop.f32.mrb[33].mxu0  ;;  %v4397_v60 = vadd.f32 %v7855_v50, %v4396_v32 }
0x1cab   : > { %v4401_v15 = vpop.f32.mrb[34].mxu0 }
0x1cac   : > { %v8820_v39 = vpop.f32.mrb[35].mxu0  ;;  %v4402_v3 = vadd.f32 %v7855_v50, %v4401_v15 }
0x1caf   : > { %v4406_v41 = vpop.f32.mrb[36].mxu0 }
0x1cb0   : > { %v8823_v42 = vpop.f32.mrb[37].mxu0  ;;  %v4407_v6 = vadd.f32 %v7855_v50, %v4406_v41 }
0x1cb3   : > { %v4489_v35 = vpop.f32.mrb[38].mxu0 }
0x1cb4   : > { %v8834_v14 = vpop.f32.mrb[39].mxu0  ;;  %v4490_v8 = vadd.f32 %v7864_v43, %v4489_v35 }
0x1cb7   : > { %v4494_v44 = vpop.f32.mrb[40].mxu0 }
0x1cb8   : > { %v4495_v45 = vadd.f32 %v7864_v43, %v4494_v44  ;;  %v8837_v9 = vpop.f32.mrb[41].mxu0  ;;  %v7910_v44 = vld [vmem:[%s11537_s21 + $0x5] ss:$0 sm:$0xff] }
0x1cba   : > { %v9581_v46 = vpack.c.bf16 %v4495_v45, %v4490_v8 }
0x1cbb   : > { %v4499_v47 = vpop.f32.mrb[42].mxu0 }
0x1cbc   : > { %v8840_v48 = vpop.f32.mrb[43].mxu0  ;;  %9583 = vmatpush3.bf16.xpose.msk.msra.mxu1 %vm10403_vm5, %v9581_v46  ;;  %v4500_v52 = vadd.f32 %v7864_v43, %v4499_v47 }
0x1cbd   : > { %8862 = vmatprep.subr.mxu1 %v10017_v55 }
0x1cbf   : > { %v4582_v49 = vpop.f32.mrb[44].mxu0 }
0x1cc0   : > { %v8851_v13 = vpop.f32.mrb[45].mxu0  ;;  %v4583_v57 = vadd.f32 %v7873_v33, %v4582_v49 }
0x1cc3   : > { %v4587_v56 = vpop.f32.mrb[46].mxu0 }
0x1cc4   : > { %v4588_v58 = vadd.f32 %v7873_v33, %v4587_v56  ;;  %v8854_v59 = vpop.f32.mrb[47].mxu0  ;;  %8863 = vmatpush3.xpose.msk.msra.mxu1 %vm1593_vm4, %v4500_v52 }
0x1cc5   : > { %9587 = vmatprep.subr.bf16.mxu1 %v10015_v51 }
0x1cc6   : > { %v9585_v62 = vpack.c.bf16 %v4588_v58, %v4583_v57 }
0x1cc7   : > { %v4592_v1 = vpop.f32.mrb[48].mxu0  ;;  %8865 = vmatmul.mubr.msk.f32.vlgmr.msra.gmra.mrb[22].mxu1 %vm1593_vm4, %v4397_v60 }
0x1cc8   : > { %v8857_v2 = vpop.f32.mrb[49].mxu0  ;;  %9586 = vmatpush3.bf16.msra.mxu0 %v9585_v62  ;;  %8867 = vmatprep.mubr.msk.f32.mxu1 %vm10016_vm12, %v10017_v55  ;;  %v4593_v5 = vadd.f32 %v7873_v33, %v4592_v1 }
0x1cc9   : > { %8877 = vmatprep.subr.mxu0 %v10017_v55  ;;  %9589 = vmatpush3.bf16.msra.mxu1 %v9588_v61 }
0x1cca   : > { %9590 = vmatprep.subr.bf16.mxu1 %v10015_v51 }
0x1ccb   : > { %8868 = vmatmul.mubr.msk.f32.gmra.mrb[24].mxu1 %vm1593_vm4, %v4402_v3 }
0x1ccc   : > { %8878 = vmatpush3.msk.msra.mxu0 %vm4741_vm13, %v4593_v5  ;;  %8870 = vmatprep.mubr.msk.f32.mxu1 %vm10016_vm12, %v10017_v55  ;;  %v7896_v5 = vld [vmem:[%s11534_s24 + $0x60] sm:$0xff] }
0x1ccd   : > { %9592 = vmatpush3.bf16.msra.mxu1 %v9591_v4  ;;  %9593 = vmatprep.subr.bf16.mxu0 %v10015_v51 }
0x1cce   : > { %9599 = vmatprep.subr.bf16.mxu1 %v10015_v51 }
0x1ccf   : > { %8871 = vmatmul.mubr.msk.f32.gmra.mrb[26].mxu1 %vm1593_vm4, %v4407_v6  ;;  %v7897_v6 = vld [vmem:[%s11534_s24 + $0x68] sm:$0xff] }
0x1cd0   : > { %8896 = vmatprep.mubr.msk.f32.mxu1 %vm10016_vm12, %v10017_v55  ;;  %v9594_v11 = vpack.c.bf16 %v7897_v6, %v7896_v5 }
0x1cd3   : > { %8897 = vmatmul.mubr.msk.f32.vlgmr.msra.gmra.mrb[28].mxu1 %vm1186_vm2, %v10791_v40 }
0x1cd4   : > { %8899 = vmatprep.mubr.msk.f32.mxu1 %vm10016_vm12, %v10017_v55  ;;  %9601 = vmatpush3.bf16.msra.mxu1 %v9600_v12 }
0x1cd5   : > { %9602 = vmatprep.subr.bf16.mxu1 %v10015_v51 }
0x1cd7   : > { %8900 = vmatmul.mubr.msk.f32.gmra.mrb[30].mxu1 %vm1186_vm2, %v10799_v21 }
0x1cd8   : > { %8902 = vmatprep.mubr.msk.f32.mxu1 %vm10016_vm12, %v10017_v55  ;;  %9604 = vmatpush3.bf16.msra.mxu1 %v9603_v37 }
0x1cd9   : > { %9609 = vmatprep.subr.bf16.mxu1 %v10015_v51 }
0x1cdb   : > { %8903 = vmatmul.mubr.msk.f32.gmra.mrb[32].mxu1 %vm1186_vm2, %v10806_v23 }
0x1cdc   : > { %8930 = vmatprep.mubr.msk.f32.mxu1 %vm10016_vm12, %v10017_v55 }
0x1cdf   : > { %8931 = vmatmul.mubr.msk.f32.vlgmr.msra.gmra.mrb[34].mxu1 %vm1186_vm2, %v10791_v40 }
0x1ce0   : > { %8933 = vmatprep.mubr.msk.f32.mxu1 %vm10016_vm12, %v10017_v55 }
0x1ce3   : > { %8934 = vmatmul.mubr.msk.f32.gmra.mrb[36].mxu1 %vm1186_vm2, %v10799_v21 }
0x1ce4   : > { %8936 = vmatprep.mubr.msk.f32.mxu1 %vm10016_vm12, %v10017_v55 }
0x1ce7   : > { %8937 = vmatmul.mubr.msk.f32.gmra.mrb[38].mxu1 %vm1186_vm2, %v10806_v23 }
0x1ce8   : > { %8960 = vmatprep.mubr.msk.f32.mxu1 %vm10016_vm12, %v10017_v55 }
0x1d9a   : > { %v4680_v18 = vpop.f32.mrb[22].mxu1 }
0x1d9b   : > { %v4694_v38 = vmul.f32 0.25, %v4680_v18  ;;  %v8866_v19 = vpop.f32.mrb[23].mxu1  ;;  %v9597_v18 = vpack.c.bf16 %v7899_v17, %v7898_v16 }
0x1d9d   : > { %v4698_v20 = vsel %vm4697_vm14, %v4694_v38, -inf }
0x1d9e   : > { %4699 = vmax.xlane.f32.xlu0 %v4698_v20  ;;  %v4685_v22 = vpop.f32.mrb[24].mxu1 }
0x1d9f   : > { %v4695_v24 = vmul.f32 0.25, %v4685_v22  ;;  %v8869_v26 = vpop.f32.mrb[25].mxu1 }
0x1da1   : > { %v4701_v27 = vsel %vm4697_vm14, %v4695_v24, -inf }
0x1da2   : > { %4702 = vmax.xlane.f32.xlu1 %v4701_v27  ;;  %v4690_v29 = vpop.f32.mrb[26].mxu1 }
0x1da3   : > { %v4696_v30 = vmul.f32 0.25, %v4690_v29  ;;  %v8872_v31 = vpop.f32.mrb[27].mxu1 }
0x1da4   : > { %v7901_v31 = vld [vmem:[%s11537_s21 + $0x3] ss:$0 sm:$0xff] }
0x1da5   : > { %v4705_v32 = vsel %vm4704_vm15, %v4696_v30, -inf }
0x1da6   : > { %4706 = vmax.xlane.f32.xlu0 %v4705_v32  ;;  %v10902_v36 = vpop.f32.mrb[28].mxu1 }
0x1da7   : > { %v8898_v15 = vpop.f32.mrb[29].mxu1 }
0x1daa   : > { %v10904_v39 = vpop.f32.mrb[30].mxu1 }
0x1dab   : > { %v8901_v41 = vpop.f32.mrb[31].mxu1 }
0x1dae   : > { %v10906_v42 = vpop.f32.mrb[32].mxu1 }
0x1daf   : > { %v8904_v35 = vpop.f32.mrb[33].mxu1 }
0x1db2   : > { %v5092_v14 = vpop.f32.mrb[34].mxu1 }
0x1db3   : > { %v8932_v43 = vpop.f32.mrb[35].mxu1  ;;  %v5093_v45 = vadd.f32 %v7910_v44, %v5092_v14 }
0x1db6   : > { %v5097_v8 = vpop.f32.mrb[36].mxu1 }
0x1db7   : > { %v5098_v9 = vadd.f32 %v7910_v44, %v5097_v8  ;;  %v8935_v46 = vpop.f32.mrb[37].mxu1 }
0x1db9   : > { %v9610_v47 = vpack.c.bf16 %v5098_v9, %v5093_v45 }
0x1dba   : > { %v5102_v48 = vpop.f32.mrb[38].mxu1 }
0x1dbb   : > { %v8938_v49 = vpop.f32.mrb[39].mxu1  ;;  %9611 = vmatpush3.bf16.msra.mxu1 %v9610_v47  ;;  %v5103_v13 = vadd.f32 %v7910_v44, %v5102_v48  ;;  %v7892_v44 = vld [vmem:[%s11537_s21 + $0x1] ss:$0 sm:$0xff] }
0x1dbc   : > { %8958 = vmatprep.subr.mxu1 %v10017_v55  ;;  %v4907_v45 = vadd.f32 %v7892_v44, %v10902_v36  ;;  %v4912_v9 = vadd.f32 %v7892_v44, %v10904_v39  ;;  %v4917_v46 = vadd.f32 %v7892_v44, %v10906_v42 }
0x1dbf   : > { %8959 = vmatpush3.msk.msra.mxu1 %vm4741_vm13, %v5103_v13 }
0x1dc0   : > { %9615 = vmatprep.subr.bf16.mxu1 %v10015_v51 }
0x1e2b   : > { %v4700_v33 = vpop.xlane.xlu0 %4699 }
0x1e2c   : > { %v4708_v50 = vsub.f32 %v4694_v38, %v4700_v33 }
0x1e2e   : > { %v4711_v52 = vmul.f32 1.442695, %v4708_v50 }
0x1e2f   : > { %v4703_v53 = vpop.xlane.xlu1 %4702 }
0x1e30   : > { %9863 = vpow2.f32 %v4711_v52  ;;  %v4709_v54 = vsub.f32 %v4695_v24, %v4703_v53 }
0x1e32   : > { %v4713_v56 = vmul.f32 1.442695, %v4709_v54 }
0x1e33   : > { %v4707_v57 = vpop.xlane.xlu0 %4706 }
0x1e34   : > { %9865 = vpow2.f32 %v4713_v56  ;;  %v4710_v58 = vsub.f32 %v4696_v30, %v4707_v57 }
0x1e36   : > { %v4715_v59 = vmul.f32 1.442695, %v4710_v58 }
0x1e38   : > { %9867 = vpow2.f32 %v4715_v59 }
0x1e3a   : > { %v9864_v60 = vpop.eup %9863 }
0x1e3b   : > { %v4717_v61 = vsel %vm4697_vm14, %v9864_v60, 0.0 }
0x1e3c   : > { %4718 = vadd.xlane.f32.xlu1 %v4717_v61 }
0x1e3e   : > { %v9866_v62 = vpop.eup %9865 }
0x1e3f   : > { %v4720_v63 = vsel %vm4697_vm14, %v9866_v62, 0.0 }
0x1e40   : > { %4721 = vadd.xlane.f32.xlu0 %v4720_v63 }
0x1e42   : > { %v9868_v0 = vpop.eup %9867 }
0x1e43   : > { %v4723_v1 = vsel %vm4704_vm15, %v9868_v0, 0.0 }
0x1e44   : > { %4724 = vadd.xlane.f32.xlu1 %v4723_v1 }
0x1ec9   : > { %v4719_v2 = vpop.xlane.xlu1 %4718 }
0x1eca   : > { %9869 = vrcp.f32 %v4719_v2 }
0x1ecd   : > { %v4722_v3 = vpop.xlane.xlu0 %4721 }
0x1ece   : > { %9871 = vrcp.f32 %v4722_v3 }
0x1ed1   : > { %v4725_v4 = vpop.xlane.xlu1 %4724 }
0x1ed2   : > { %9873 = vrcp.f32 %v4725_v4 }
0x1ed4   : > { %v9870_v7 = vpop.eup %9869 }
0x1ed5   : > { %v4729_v12 = vmul.f32 %v9870_v7, %v9864_v60  ;;  %v7924_v7 = vld [vmem:[%s11538_s27 + $0x10] sm:$0xff] }
0x1ed7   : > { %8880 = vmatmul.mubr.msk.f32.vlgmr.msra.gmra.mrb[50].mxu0 %vm4697_vm14, %v4729_v12 }
0x1ed8   : > { %v9872_v37 = vpop.eup %9871  ;;  %8882 = vmatprep.mubr.msk.f32.mxu0 %vm10016_vm12, %v10017_v55  ;;  %9595 = vmatpush3.bf16.msra.mxu0 %v9594_v11  ;;  %v7925_v11 = vld [vmem:[%s11539_s18 + $0x18] sm:$0xff] }
0x1ed9   : > { %v4730_v38 = vmul.f32 %v9872_v37, %v9866_v62  ;;  %9596 = vmatprep.subr.bf16.mxu0 %v10015_v51  ;;  %v9613_v12 = vpack.c.bf16 %v7925_v11, %v7924_v7  ;;  %v5585_v7 = vld [vmem:[%s11541_s0] sm:$0xff]  ;;  %v5586_v11 = vld [vmem:[%s11541_s0 + $0x8] sm:$0xff] }
0x1edb   : > { %8883 = vmatmul.mubr.msk.f32.gmra.mrb[52].mxu0 %vm4697_vm14, %v4730_v38  ;;  %v4826_v38 = vld [vmem:[%s11539_s18 + $0x8] sm:$0xff] }
0x1edc   : > { %v9874_v19 = vpop.eup %9873  ;;  %8885 = vmatprep.mubr.msk.f32.mxu0 %vm10016_vm12, %v10017_v55  ;;  %9598 = vmatpush3.bf16.msra.mxu0 %v9597_v18  ;;  %v4825_v18 = vld [vmem:[%s11539_s18] sm:$0xff] }
0x1edd   : > { %v4731_v20 = vmul.f32 %v9874_v19, %v9868_v0  ;;  %9605 = vmatprep.subr.bf16.mxu0 %v10015_v51 }
0x1edf   : > { %8886 = vmatmul.mubr.msk.f32.gmra.mrb[54].mxu0 %vm4697_vm14, %v4731_v20  ;;  %v9616_v20 = vpack.c.bf16 %v4826_v38, %v4825_v18  ;;  %v5712_v18 = vld [vmem:[%s11542_s23] sm:$0xff]  ;;  %v5713_v38 = vld [vmem:[%s11542_s23 + $0x8] sm:$0xff] }
0x1ee0   : > { %8913 = vmatprep.mubr.msk.f32.mxu0 %vm10016_vm12, %v10017_v55 }
0x1ee3   : > { %8914 = vmatmul.mubr.msk.f32.vlgmr.msra.gmra.mrb[56].mxu0 %vm1186_vm2, %v10791_v40 }
0x1ee4   : > { %8916 = vmatprep.mubr.msk.f32.mxu0 %vm10016_vm12, %v10017_v55 }
0x1ee7   : > { %8917 = vmatmul.mubr.msk.f32.gmra.mrb[58].mxu0 %vm1186_vm2, %v10799_v21 }
0x1ee8   : > { %8919 = vmatprep.mubr.msk.f32.mxu0 %vm10016_vm12, %v10017_v55 }
0x1eeb   : > { %8920 = vmatmul.mubr.msk.f32.gmra.mrb[60].mxu0 %vm1186_vm2, %v10806_v23 }
0x1eec   : > { %8945 = vmatprep.mubr.msk.f32.mxu0 %vm10016_vm12, %v10017_v55 }
0x1faa   : > { %v10942_v22 = vpop.f32.mrb[50].mxu0 }
0x1fab   : > { %v8881_v24 = vpop.f32.mrb[51].mxu0 }
0x1fae   : > { %v10944_v26 = vpop.f32.mrb[52].mxu0 }
0x1faf   : > { %v8884_v40 = vpop.f32.mrb[53].mxu0 }
0x1fb2   : > { %v10946_v27 = vpop.f32.mrb[54].mxu0 }
0x1fb3   : > { %v8887_v29 = vpop.f32.mrb[55].mxu0 }
0x1fb6   : > { %v4999_v21 = vpop.f32.mrb[56].mxu0 }
0x1fb7   : > { %v8915_v30 = vpop.f32.mrb[57].mxu0  ;;  %v5000_v15 = vadd.f32 %v7901_v31, %v4999_v21 }
0x1fba   : > { %v5004_v32 = vpop.f32.mrb[58].mxu0 }
0x1fbb   : > { %v5005_v41 = vadd.f32 %v7901_v31, %v5004_v32  ;;  %v8918_v23 = vpop.f32.mrb[59].mxu0 }
0x1fbd   : > { %v9606_v35 = vpack.c.bf16 %v5005_v41, %v5000_v15 }
0x1fbe   : > { %v5009_v14 = vpop.f32.mrb[60].mxu0 }
0x1fbf   : > { %v8921_v43 = vpop.f32.mrb[61].mxu0  ;;  %9608 = vmatpush3.bf16.xpose.msk.msra.mxu0 %vm10403_vm5, %v9606_v35  ;;  %v5010_v8 = vadd.f32 %v7901_v31, %v5009_v14 }
0x1fc0   : > { %8943 = vmatprep.subr.mxu0 %v10017_v55 }
0x1fc7   : > { %8944 = vmatpush3.xpose.msk.msra.mxu0 %vm1593_vm4, %v5010_v8 }
0x1fc8   : > { %9612 = vmatprep.subr.bf16.mxu0 %v10015_v51 }
0x1fca   : > { %8946 = vmatmul.mubr.msk.f32.vlgmr.msra.gmra.mrb[62].mxu0 %vm1593_vm4, %v4907_v45 }
0x1fcb   : > { %8948 = vmatprep.mubr.msk.f32.mxu0 %vm10016_vm12, %v10017_v55  ;;  %9614 = vmatpush3.bf16.msra.mxu0 %v9613_v12  ;;  %v9619_v12 = vpack.c.bf16 %v5586_v11, %v5585_v7 }
0x1fcc   : > { %9618 = vmatprep.subr.bf16.mxu0 %v10015_v51 }
0x1fce   : > { %8949 = vmatmul.mubr.msk.f32.gmra.mrb[64].mxu0 %vm1593_vm4, %v4912_v9 }
0x1fcf   : > { %8951 = vmatprep.mubr.msk.f32.mxu0 %vm10016_vm12, %v10017_v55 }
0x1fd2   : > { %8952 = vmatmul.mubr.msk.f32.gmra.mrb[66].mxu0 %vm1593_vm4, %v4917_v46  ;;  %v7932_v46 = vld [vmem:[%s11540_s4] ss:$0 sm:$0xff] }
0x1fd3   : > { %8973 = vmatprep.mubr.msk.f32.mxu0 %vm10016_vm12, %v10017_v55 }
0x209d   : > { %v5190_v36 = vpop.f32.mrb[62].mxu0 }
0x209e   : > { %v5204_v47 = vmul.f32 0.25, %v5190_v36  ;;  %v8947_v48 = vpop.f32.mrb[63].mxu0 }
0x20a0   : > { %v5207_v49 = vsel %vm4697_vm14, %v5204_v47, -inf }
0x20a1   : > { %5208 = vmax.xlane.f32.xlu0 %v5207_v49  ;;  %v5195_v13 = vpop.f32.mrb[64].mxu0 }
0x20a2   : > { %v5205_v39 = vmul.f32 0.25, %v5195_v13  ;;  %v8950_v33 = vpop.f32.mrb[65].mxu0 }
0x20a4   : > { %v5210_v50 = vsel %vm4697_vm14, %v5205_v39, -inf }
0x20a5   : > { %5211 = vmax.xlane.f32.xlu1 %v5210_v50  ;;  %v5200_v52 = vpop.f32.mrb[66].mxu0 }
0x20a6   : > { %v5206_v53 = vmul.f32 0.25, %v5200_v52  ;;  %v8953_v42 = vpop.f32.mrb[67].mxu0 }
0x20a8   : > { %v5213_v54 = vsel %vm4704_vm15, %v5206_v53, -inf }
0x20a9   : > { %5214 = vmax.xlane.f32.xlu0 %v5213_v54 }
0x212e   : > { %v5209_v56 = vpop.xlane.xlu0 %5208 }
0x212f   : > { %v5216_v57 = vsub.f32 %v5204_v47, %v5209_v56 }
0x2131   : > { %v5219_v58 = vmul.f32 1.442695, %v5216_v57 }
0x2132   : > { %v5212_v59 = vpop.xlane.xlu1 %5211 }
0x2133   : > { %9875 = vpow2.f32 %v5219_v58  ;;  %v5217_v60 = vsub.f32 %v5205_v39, %v5212_v59 }
0x2135   : > { %v5221_v61 = vmul.f32 1.442695, %v5217_v60 }
0x2136   : > { %v5215_v62 = vpop.xlane.xlu0 %5214 }
0x2137   : > { %9877 = vpow2.f32 %v5221_v61  ;;  %v5218_v63 = vsub.f32 %v5206_v53, %v5215_v62 }
0x2139   : > { %v5223_v0 = vmul.f32 1.442695, %v5218_v63 }
0x213b   : > { %9879 = vpow2.f32 %v5223_v0 }
0x213d   : > { %v9876_v1 = vpop.eup %9875 }
0x213e   : > { %v5225_v2 = vsel %vm4697_vm14, %v9876_v1, 0.0 }
0x213f   : > { %5226 = vadd.xlane.f32.xlu1 %v5225_v2 }
0x2141   : > { %v9878_v3 = vpop.eup %9877 }
0x2142   : > { %v5228_v4 = vsel %vm4697_vm14, %v9878_v3, 0.0 }
0x2143   : > { %5229 = vadd.xlane.f32.xlu0 %v5228_v4 }
0x2145   : > { %v9880_v5 = vpop.eup %9879 }
0x2146   : > { %v5231_v6 = vsel %vm4704_vm15, %v9880_v5, 0.0 }
0x2147   : > { %5232 = vadd.xlane.f32.xlu1 %v5231_v6 }
0x21cc   : > { %v5227_v16 = vpop.xlane.xlu1 %5226 }
0x21cd   : > { %9881 = vrcp.f32 %v5227_v16  ;;  %v5587_v16 = vld [vmem:[%s11541_s0 + $0x10] sm:$0xff] }
0x21d0   : > { %v5230_v17 = vpop.xlane.xlu0 %5229 }
0x21d1   : > { %9883 = vrcp.f32 %v5230_v17  ;;  %v5588_v17 = vld [vmem:[%s11541_s0 + $0x18] sm:$0xff] }
0x21d4   : > { %v5233_v37 = vpop.xlane.xlu1 %5232 }
0x21d5   : > { %9885 = vrcp.f32 %v5233_v37  ;;  %v9622_v37 = vpack.c.bf16 %v5588_v17, %v5587_v16 }
0x21d7   : > { %v9882_v19 = vpop.eup %9881 }
0x21d8   : > { %v5237_v24 = vmul.f32 %v9882_v19, %v9876_v1  ;;  %v9625_v19 = vpack.c.bf16 %v5713_v38, %v5712_v18 }
0x21da   : > { %8961 = vmatmul.mubr.msk.f32.vlgmr.msra.gmra.mrb[40].mxu1 %vm4697_vm14, %v5237_v24 }
0x21db   : > { %v9884_v40 = vpop.eup %9883  ;;  %8963 = vmatprep.mubr.msk.f32.mxu1 %vm10016_vm12, %v10017_v55  ;;  %9617 = vmatpush3.bf16.msra.mxu1 %v9616_v20 }
0x21dc   : > { %v5238_v29 = vmul.f32 %v9884_v40, %v9878_v3  ;;  %9624 = vmatprep.subr.bf16.mxu1 %v10015_v51 }
0x21de   : > { %8964 = vmatmul.mubr.msk.f32.gmra.mrb[42].mxu1 %vm4697_vm14, %v5238_v29 }
0x21df   : > { %v9886_v21 = vpop.eup %9885  ;;  %8966 = vmatprep.mubr.msk.f32.mxu1 %vm10016_vm12, %v10017_v55 }
0x21e0   : > { %v5239_v30 = vmul.f32 %v9886_v21, %v9880_v5 }
0x21e2   : > { %8967 = vmatmul.mubr.msk.f32.gmra.mrb[44].mxu1 %vm4697_vm14, %v5239_v30 }
0x21e3   : > { %8986 = vmatprep.mubr.msk.f32.mxu1 %vm10016_vm12, %v10017_v55 }
0x21e6   : > { %8987 = vmatmul.mubr.msk.f32.vlgmr.msra.gmra.mrb[46].mxu1 %vm1593_vm4, %v10942_v22 }
0x21e7   : > { %8989 = vmatprep.mubr.msk.f32.mxu1 %vm10016_vm12, %v10017_v55  ;;  %9626 = vmatpush3.bf16.msra.mxu1 %v9625_v19 }
0x21e8   : > { %9627 = vmatprep.subr.bf16.mxu1 %v10015_v51 }
0x21ea   : > { %8990 = vmatmul.mubr.msk.f32.gmra.mrb[48].mxu1 %vm1593_vm4, %v10944_v26 }
0x21eb   : > { %8992 = vmatprep.mubr.msk.f32.mxu1 %vm10016_vm12, %v10017_v55 }
0x21ee   : > { %8993 = vmatmul.mubr.msk.f32.gmra.mrb[50].mxu1 %vm1593_vm4, %v10946_v27 }
0x21ef   : > { %9044 = vmatprep.mubr.msk.f32.mxu1 %vm10016_vm12, %v10017_v55 }
0x22ad   : > { %v5318_v31 = vpop.f32.mrb[40].mxu1 }
0x22ae   : > { %v8962_v32 = vpop.f32.mrb[41].mxu1  ;;  %8974 = vmatmul.mubr.msk.f32.vlgmr.msra.gmra.mrb[68].mxu0 %vm1593_vm4, %v5318_v31 }
0x22af   : > { %8976 = vmatprep.mubr.msk.f32.mxu0 %vm10016_vm12, %v10017_v55  ;;  %9620 = vmatpush3.bf16.msra.mxu0 %v9619_v12 }
0x22b0   : > { %9621 = vmatprep.subr.bf16.mxu0 %v10015_v51 }
0x22b1   : > { %v5323_v22 = vpop.f32.mrb[42].mxu1 }
0x22b2   : > { %v8965_v15 = vpop.f32.mrb[43].mxu1  ;;  %8977 = vmatmul.mubr.msk.f32.gmra.mrb[70].mxu0 %vm1593_vm4, %v5323_v22 }
0x22b3   : > { %8979 = vmatprep.mubr.msk.f32.mxu0 %vm10016_vm12, %v10017_v55  ;;  %9623 = vmatpush3.bf16.msra.mxu0 %v9622_v37 }
0x22b4   : > { %9648 = vmatprep.subr.bf16.mxu0 %v10015_v51 }
0x22b5   : > { %v5328_v26 = vpop.f32.mrb[44].mxu1 }
0x22b6   : > { %v8968_v27 = vpop.f32.mrb[45].mxu1  ;;  %8980 = vmatmul.mubr.msk.f32.gmra.mrb[72].mxu0 %vm1593_vm4, %v5328_v26  ;;  %v7933_v26 = vld [vmem:[%s11543_s16] ss:$0 sm:$0xff] }
0x22b7   : > { %9003 = vmatprep.mubr.msk.f32.mxu0 %vm10016_vm12, %v10017_v55 }
0x22b9   : > { %v5499_v41 = vpop.f32.mrb[46].mxu1 }
0x22ba   : > { %v8988_v23 = vpop.f32.mrb[47].mxu1 }
0x22bd   : > { %v5504_v35 = vpop.f32.mrb[48].mxu1 }
0x22be   : > { %v8991_v14 = vpop.f32.mrb[49].mxu1 }
0x22c1   : > { %v5509_v43 = vpop.f32.mrb[50].mxu1 }
0x22c2   : > { %v8994_v44 = vpop.f32.mrb[51].mxu1 }
0x2381   : > { %v5410_v8 = vpop.f32.mrb[68].mxu0 }
0x2382   : > { %v5500_v45 = vadd.f32 %v5499_v41, %v5410_v8  ;;  %v8975_v9 = vpop.f32.mrb[69].mxu0  ;;  %v7934_v41 = vld [vmem:[%s11544_s22] ss:$0 sm:$0xff] }
0x2384   : > { %v5513_v36 = vadd.f32 %v5500_v45, %v10761_v10 }
0x2385   : > { %v5415_v47 = vpop.f32.mrb[70].mxu0 }
0x2386   : > { %v11011_v48 = vadd.f32 %v7932_v46, %v5513_v36  ;;  %v5505_v49 = vadd.f32 %v5504_v35, %v5415_v47  ;;  %v8978_v13 = vpop.f32.mrb[71].mxu0  ;;  %v5714_v47 = vld [vmem:[%s11542_s23 + $0x10] sm:$0xff] }
0x2388   : > { %v5514_v39 = vadd.f32 %v5505_v49, %v10755_v25  ;;  %v5528_v33 = vsel %vm1186_vm2, %v11011_v48, 0.0  ;;  %v5715_v49 = vld [vmem:[%s11542_s23 + $0x18] sm:$0xff] }
0x2389   : > { %5529 = vadd.xlane.f32.xlu0 %v5528_v33  ;;  %v5420_v50 = vpop.f32.mrb[72].mxu0  ;;  %v9628_v13 = vpack.c.bf16 %v5715_v49, %v5714_v47  ;;  %v5717_v33 = vld [vmem:[%s11542_s23 + $0x28] sm:$0xff]  ;;  %v7939_v47 = vld [vmem:[%s11546_s8] ss:$0 sm:$0xff] }
0x238a   : > { %v11016_v52 = vadd.f32 %v7932_v46, %v5514_v39  ;;  %v5510_v53 = vadd.f32 %v5509_v43, %v5420_v50  ;;  %v8981_v42 = vpop.f32.mrb[73].mxu0  ;;  %v5716_v39 = vld [vmem:[%s11542_s23 + $0x20] sm:$0xff] }
0x238b   : > { %9629 = vmatpush3.bf16.msra.mxu1 %v9628_v13  ;;  %v9631_v50 = vpack.c.bf16 %v5717_v33, %v5716_v39  ;;  %v5719_v42 = vld [vmem:[%s11542_s23 + $0x38] sm:$0xff] }
0x238c   : > { %v5515_v54 = vadd.f32 %v5510_v53, %v10765_v34  ;;  %v5531_v10 = vsel %vm1186_vm2, %v11016_v52, 0.0  ;;  %9630 = vmatprep.subr.bf16.mxu1 %v10015_v51  ;;  %v5718_v53 = vld [vmem:[%s11542_s23 + $0x30] sm:$0xff] }
0x238d   : > { %5532 = vadd.xlane.f32.xlu1 %v5531_v10  ;;  %v5720_v10 = vld [vmem:[%s11542_s23 + $0x40] sm:$0xff] }
0x238e   : > { %v11021_v56 = vadd.f32 %v7932_v46, %v5515_v54  ;;  %v9634_v54 = vpack.c.bf16 %v5719_v42, %v5718_v53 }
0x238f   : > { %9632 = vmatpush3.bf16.msra.mxu1 %v9631_v50 }
0x2390   : > { %v5534_v25 = vsel %vm1190_vm1, %v11021_v56, 0.0  ;;  %9633 = vmatprep.subr.bf16.mxu1 %v10015_v51 }
0x2391   : > { %5535 = vadd.xlane.f32.xlu0 %v5534_v25  ;;  %v5721_v25 = vld [vmem:[%s11542_s23 + $0x48] sm:$0xff] }
0x2393   : > { %9635 = vmatpush3.bf16.msra.mxu1 %v9634_v54 }
0x2394   : > { %9636 = vmatprep.subr.bf16.mxu1 %v10015_v51 }
0x2416   : > { %v5530_v57 = vpop.xlane.xlu0 %5529 }
0x2417   : > { %v5537_v58 = vmul.f32 0.03125, %v5530_v57  ;;  %v9637_v57 = vpack.c.bf16 %v5721_v25, %v5720_v10 }
0x2419   : > { %v5540_v59 = vsub.f32 %v11011_v48, %v5537_v58  ;;  %9638 = vmatpush3.bf16.msra.mxu1 %v9637_v57  ;;  %v5722_v58 = vld [vmem:[%s11542_s23 + $0x50] sm:$0xff] }
0x241a   : > { %v5533_v60 = vpop.xlane.xlu1 %5532  ;;  %9639 = vmatprep.subr.bf16.mxu1 %v10015_v51 }
0x241b   : > { %v5538_v61 = vmul.f32 0.03125, %v5533_v60  ;;  %v5543_v62 = vmul.f32 %v5540_v59, %v5540_v59 }
0x241d   : > { %v5541_v34 = vsub.f32 %v11016_v52, %v5538_v61  ;;  %v5546_v63 = vsel %vm1186_vm2, %v5543_v62, 0.0  ;;  %v5724_v61 = vld [vmem:[%s11542_s23 + $0x60] sm:$0xff]  ;;  %v5725_v62 = vld [vmem:[%s11542_s23 + $0x68] sm:$0xff] }
0x241e   : > { %5547 = vadd.xlane.f32.xlu1 %v5546_v63  ;;  %v5536_v0 = vpop.xlane.xlu0 %5535  ;;  %v5726_v63 = vld [vmem:[%s11542_s23 + $0x70] sm:$0xff] }
0x241f   : > { %v5539_v1 = vmul.f32 0.03125, %v5536_v0  ;;  %v5544_v2 = vmul.f32 %v5541_v34, %v5541_v34  ;;  %v5727_v0 = vld [vmem:[%s11542_s23 + $0x78] sm:$0xff] }
0x2421   : > { %v5542_v3 = vsub.f32 %v11021_v56, %v5539_v1  ;;  %v5549_v4 = vsel %vm1186_vm2, %v5544_v2, 0.0  ;;  %v9646_v1 = vpack.c.bf16 %v5727_v0, %v5726_v63  ;;  %v7935_v2 = vld [vmem:[%s11545_s26] ss:$0 sm:$0xff] }
0x2422   : > { %5550 = vadd.xlane.f32.xlu0 %v5549_v4 }
0x2423   : > { %v5545_v5 = vmul.f32 %v5542_v3, %v5542_v3 }
0x2425   : > { %v5552_v6 = vsel %vm1190_vm1, %v5545_v5, 0.0 }
0x2426   : > { %5553 = vadd.xlane.f32.xlu1 %v5552_v6 }
0x24ab   : > { %v5548_v20 = vpop.xlane.xlu1 %5547 }
0x24ac   : > { %v5555_v24 = vmul.f32 0.03125, %v5548_v20 }
0x24ae   : > { %v5558_v40 = vadd.f32 1e-05, %v5555_v24 }
0x24af   : > { %v5551_v29 = vpop.xlane.xlu0 %5550 }
0x24b0   : > { %9887 = vrsqrt.f32 %v5558_v40  ;;  %v5556_v21 = vmul.f32 0.03125, %v5551_v29 }
0x24b2   : > { %v5559_v30 = vadd.f32 1e-05, %v5556_v21 }
0x24b3   : > { %v5554_v31 = vpop.xlane.xlu1 %5553 }
0x24b4   : > { %9889 = vrsqrt.f32 %v5559_v30  ;;  %v5557_v32 = vmul.f32 0.03125, %v5554_v31 }
0x24b6   : > { %v5560_v22 = vadd.f32 1e-05, %v5557_v32 }
0x24b8   : > { %9891 = vrsqrt.f32 %v5560_v22 }
0x24ba   : > { %v9888_v15 = vpop.eup %9887 }
0x24bb   : > { %v5564_v27 = vmul.f32 %v9888_v15, %v5540_v59  ;;  %v5723_v59 = vld [vmem:[%s11542_s23 + $0x58] sm:$0xff] }
0x24bc   : > { %v9640_v60 = vpack.c.bf16 %v5723_v59, %v5722_v58 }
0x24bd   : > { %v5573_v23 = vmul.f32 %v7933_v26, %v5564_v27 }
0x24be   : > { %v9890_v35 = vpop.eup %9889  ;;  %9641 = vmatpush3.bf16.msra.mxu1 %v9640_v60 }
0x24bf   : > { %v5582_v14 = vadd.f32 %v7934_v41, %v5573_v23  ;;  %v5565_v43 = vmul.f32 %v9890_v35, %v5541_v34  ;;  %9642 = vmatprep.subr.bf16.mxu1 %v10015_v51  ;;  %v9643_v34 = vpack.c.bf16 %v5725_v62, %v5724_v61 }
0x24c1   : > { %9004 = vmatmul.mubr.msk.f32.vlgmr.msra.gmra.mrb[74].mxu0 %vm1186_vm2, %v5582_v14  ;;  %v5574_v44 = vmul.f32 %v7933_v26, %v5565_v43 }
0x24c2   : > { %v9892_v8 = vpop.eup %9891  ;;  %9006 = vmatprep.mubr.msk.f32.mxu0 %vm10016_vm12, %v10017_v55  ;;  %9644 = vmatpush3.bf16.msra.mxu1 %v9643_v34 }
0x24c3   : > { %v5583_v45 = vadd.f32 %v7934_v41, %v5574_v44  ;;  %v5566_v9 = vmul.f32 %v9892_v8, %v5542_v3  ;;  %9645 = vmatprep.subr.bf16.mxu1 %v10015_v51 }
0x24c5   : > { %9007 = vmatmul.mubr.msk.f32.gmra.mrb[76].mxu0 %vm1186_vm2, %v5583_v45  ;;  %v5575_v46 = vmul.f32 %v7933_v26, %v5566_v9 }
0x24c6   : > { %9009 = vmatprep.mubr.msk.f32.mxu0 %vm10016_vm12, %v10017_v55  ;;  %9647 = vmatpush3.bf16.msra.mxu1 %v9646_v1 }
0x24c7   : > { %v5584_v36 = vadd.f32 %v7934_v41, %v5575_v46  ;;  %9666 = vmatprep.subr.bf16.mxu1 %v10015_v51 }
0x24c9   : > { %9010 = vmatmul.mubr.msk.f32.gmra.mrb[78].mxu0 %vm1186_vm2, %v5584_v36 }
0x24ca   : > { %9061 = vmatprep.mubr.msk.f32.mxu0 %vm10016_vm12, %v10017_v55 }
0x2594   : > { %v5671_v3 = vpop.f32.mrb[74].mxu0 }
0x2595   : > { %v5672_v4 = vadd.f32 %v7935_v2, %v5671_v3  ;;  %v9005_v5 = vpop.f32.mrb[75].mxu0 }
0x2597   : > { %v5685_v6 = vmul.f32 %v5672_v4, %v5672_v4 }
0x2598   : > { %v5676_v7 = vpop.f32.mrb[76].mxu0 }
0x2599   : > { %v5688_v11 = vmul.f32 %v5685_v6, %v5672_v4  ;;  %v5677_v12 = vadd.f32 %v7935_v2, %v5676_v7  ;;  %v9008_v16 = vpop.f32.mrb[77].mxu0 }
0x259a   : > { %v7945_v16 = vld [vmem:[%s11534_s24 + $0xc8] sm:$0xff] }
0x259b   : > { %v5691_v17 = vmul.f32 0.044715, %v5688_v11  ;;  %v5686_v37 = vmul.f32 %v5677_v12, %v5677_v12 }
0x259c   : > { %v5681_v18 = vpop.f32.mrb[78].mxu0 }
0x259d   : > { %v5694_v38 = vadd.f32 %v5691_v17, %v5672_v4  ;;  %v5689_v19 = vmul.f32 %v5686_v37, %v5677_v12  ;;  %v5682_v20 = vadd.f32 %v7935_v2, %v5681_v18  ;;  %v9011_v24 = vpop.f32.mrb[79].mxu0  ;;  %v7946_v37 = vld [vmem:[%s11534_s24 + $0xd0] sm:$0xff]  ;;  %v7947_v18 = vld [vmem:[%s11534_s24 + $0xd8] sm:$0xff] }
0x259f   : > { %v5697_v40 = vmul.f32 0.7978846, %v5694_v38  ;;  %v5692_v29 = vmul.f32 0.044715, %v5689_v19  ;;  %v5687_v21 = vmul.f32 %v5682_v20, %v5682_v20  ;;  %v9652_v38 = vpack.c.bf16 %v7947_v18, %v7946_v37  ;;  %v7983_v18 = vld [vmem:[%s11534_s24 + $0xe0] sm:$0xff] }
0x25a1   : > { %9893 = vtanh.f32 %v5697_v40  ;;  %v5695_v30 = vadd.f32 %v5692_v29, %v5677_v12  ;;  %v5690_v31 = vmul.f32 %v5687_v21, %v5682_v20 }
0x25a3   : > { %v5698_v32 = vmul.f32 0.7978846, %v5695_v30  ;;  %v5693_v22 = vmul.f32 0.044715, %v5690_v31 }
0x25a5   : > { %v5696_v15 = vadd.f32 %v5693_v22, %v5682_v20  ;;  %9895 = vtanh.f32 %v5698_v32 }
0x25a7   : > { %v5699_v26 = vmul.f32 0.7978846, %v5696_v15  ;;  %v7942_v15 = vld [vmem:[%s11535_s2 + $0x1] ss:$0 sm:$0xff] }
0x25a9   : > { %9897 = vtanh.f32 %v5699_v26 }
0x25ab   : > { %v9894_v27 = vpop.eup %9893 }
0x25ac   : > { %v5703_v41 = vadd.f32 1.0, %v9894_v27  ;;  %v7953_v27 = vld [vmem:[%s11534_s24 + $0x100] sm:$0xff] }
0x25ae   : > { %v5706_v23 = vmul.f32 0.5, %v5703_v41  ;;  %v7954_v41 = vld [vmem:[%s11534_s24 + $0x108] sm:$0xff] }
0x25af   : > { %v9896_v35 = vpop.eup %9895 }
0x25b0   : > { %v5709_v14 = vmul.f32 %v5706_v23, %v5672_v4  ;;  %v5704_v43 = vadd.f32 1.0, %v9896_v35  ;;  %v7943_v23 = vld [vmem:[%s11536_s7 + $0x1] ss:$0 sm:$0xff] }
0x25b2   : > { %9045 = vmatmul.mubr.f32.vlgmr.msra.gmra.mrb[52].mxu1 %v5709_v14  ;;  %v5707_v44 = vmul.f32 0.5, %v5704_v43  ;;  %v9655_v43 = vpack.c.bf16 %v7954_v41, %v7953_v27 }
0x25b3   : > { %v9898_v8 = vpop.eup %9897  ;;  %9047 = vmatprep.mubr.msk.f32.mxu1 %vm10016_vm12, %v10017_v55 }
0x25b4   : > { %v5710_v45 = vmul.f32 %v5707_v44, %v5677_v12  ;;  %v5705_v9 = vadd.f32 1.0, %v9898_v8  ;;  %v7944_v12 = vld [vmem:[%s11534_s24 + $0xc0] sm:$0xff] }
0x25b5   : > { %v9649_v17 = vpack.c.bf16 %v7945_v16, %v7944_v12  ;;  %v7967_v16 = vld [vmem:[%s11537_s21 + $0xa] ss:$0 sm:$0xff] }
0x25b6   : > { %9048 = vmatmul.mubr.f32.gmra.mrb[54].mxu1 %v5710_v45  ;;  %v5708_v46 = vmul.f32 0.5, %v5705_v9  ;;  %v7955_v45 = vld [vmem:[%s11534_s24 + $0x110] sm:$0xff]  ;;  %v7956_v9 = vld [vmem:[%s11534_s24 + $0x118] sm:$0xff] }
0x25b7   : > { %9050 = vmatprep.mubr.msk.f32.mxu1 %vm10016_vm12, %v10017_v55  ;;  %9650 = vmatpush3.bf16.msra.mxu0 %v9649_v17  ;;  %v7949_v17 = vld [vmem:[%s11537_s21 + $0x6] ss:$0 sm:$0xff] }
0x25b8   : > { %v5711_v36 = vmul.f32 %v5708_v46, %v5682_v20  ;;  %9651 = vmatprep.subr.bf16.mxu0 %v10015_v51 }
0x25ba   : > { %9051 = vmatmul.mubr.f32.gmra.mrb[56].mxu1 %v5711_v36 }
0x25bb   : > { %9110 = vmatprep.mubr.msk.f32.mxu1 %vm10016_vm12, %v10017_v55  ;;  %9653 = vmatpush3.bf16.msra.mxu0 %v9652_v38  ;;  %v7984_v38 = vld [vmem:[%s11534_s24 + $0xe8] sm:$0xff] }
0x25bc   : > { %9654 = vmatprep.subr.bf16.mxu0 %v10015_v51 }
0x2685   : > { %v5801_v49 = vpop.f32.mrb[52].mxu1 }
0x2686   : > { %v5802_v13 = vadd.f32 %v7939_v47, %v5801_v49  ;;  %v9046_v39 = vpop.f32.mrb[53].mxu1 }
0x2688   : > { %v11081_v33 = vadd.f32 %v5802_v13, %v11011_v48 }
0x2689   : > { %v5806_v50 = vpop.f32.mrb[54].mxu1 }
0x268a   : > { %v5807_v53 = vadd.f32 %v7939_v47, %v5806_v50  ;;  %v9049_v42 = vpop.f32.mrb[55].mxu1  ;;  %v5822_v54 = vsel %vm1186_vm2, %v11081_v33, 0.0 }
0x268b   : > { %5823 = vadd.xlane.f32.xlu0 %v5822_v54  ;;  %v7963_v42 = vld [vmem:[%s11534_s24 + $0x148] sm:$0xff] }
0x268c   : > { %v11086_v10 = vadd.f32 %v5807_v53, %v11016_v52  ;;  %v7962_v53 = vld [vmem:[%s11534_s24 + $0x140] sm:$0xff] }
0x268d   : > { %v5811_v25 = vpop.f32.mrb[56].mxu1  ;;  %v9661_v54 = vpack.c.bf16 %v7963_v42, %v7962_v53 }
0x268e   : > { %v5812_v57 = vadd.f32 %v7939_v47, %v5811_v25  ;;  %v9052_v58 = vpop.f32.mrb[57].mxu1  ;;  %v5825_v59 = vsel %vm1186_vm2, %v11086_v10, 0.0  ;;  %v9658_v47 = vpack.c.bf16 %v7956_v9, %v7955_v45  ;;  %v7964_v25 = vld [vmem:[%s11534_s24 + $0x150] sm:$0xff]  ;;  %v8004_v45 = vld [vmem:[%s11534_s24 + $0x178] sm:$0xff] }
0x268f   : > { %5826 = vadd.xlane.f32.xlu1 %v5825_v59 }
0x2690   : > { %v11091_v48 = vadd.f32 %v5812_v57, %v11021_v56  ;;  %v7965_v57 = vld [vmem:[%s11534_s24 + $0x158] sm:$0xff] }
0x2691   : > { %v9664_v58 = vpack.c.bf16 %v7965_v57, %v7964_v25 }
0x2692   : > { %v5828_v60 = vsel %vm1190_vm1, %v11091_v48, 0.0 }
0x2693   : > { %5829 = vadd.xlane.f32.xlu0 %v5828_v60 }
0x2718   : > { %v5824_v61 = vpop.xlane.xlu0 %5823 }
0x2719   : > { %v5831_v62 = vmul.f32 0.03125, %v5824_v61 }
0x271b   : > { %v5834_v34 = vsub.f32 %v11081_v33, %v5831_v62 }
0x271c   : > { %v5827_v52 = vpop.xlane.xlu1 %5826 }
0x271d   : > { %v5832_v63 = vmul.f32 0.03125, %v5827_v52  ;;  %v5837_v0 = vmul.f32 %v5834_v34, %v5834_v34 }
0x271f   : > { %v5835_v1 = vsub.f32 %v11086_v10, %v5832_v63  ;;  %v5840_v2 = vsel %vm1186_vm2, %v5837_v0, 0.0 }
0x2720   : > { %5841 = vadd.xlane.f32.xlu1 %v5840_v2  ;;  %v5830_v56 = vpop.xlane.xlu0 %5829 }
0x2721   : > { %v5833_v3 = vmul.f32 0.03125, %v5830_v56  ;;  %v5838_v4 = vmul.f32 %v5835_v1, %v5835_v1 }
0x2723   : > { %v5836_v5 = vsub.f32 %v11091_v48, %v5833_v3  ;;  %v5843_v6 = vsel %vm1186_vm2, %v5838_v4, 0.0 }
0x2724   : > { %5844 = vadd.xlane.f32.xlu0 %v5843_v6 }
0x2725   : > { %v5839_v7 = vmul.f32 %v5836_v5, %v5836_v5 }
0x2727   : > { %v5846_v11 = vsel %vm1190_vm1, %v5839_v7, 0.0 }
0x2728   : > { %5847 = vadd.xlane.f32.xlu1 %v5846_v11 }
0x27ad   : > { %v5842_v19 = vpop.xlane.xlu1 %5841 }
0x27ae   : > { %v5849_v20 = vmul.f32 0.03125, %v5842_v19 }
0x27b0   : > { %v5852_v24 = vadd.f32 1e-05, %v5849_v20 }
0x27b1   : > { %v5845_v40 = vpop.xlane.xlu0 %5844 }
0x27b2   : > { %9899 = vrsqrt.f32 %v5852_v24  ;;  %v5850_v29 = vmul.f32 0.03125, %v5845_v40 }
0x27b4   : > { %v5853_v21 = vadd.f32 1e-05, %v5850_v29 }
0x27b5   : > { %v5848_v30 = vpop.xlane.xlu1 %5847 }
0x27b6   : > { %9901 = vrsqrt.f32 %v5853_v21  ;;  %v5851_v31 = vmul.f32 0.03125, %v5848_v30  ;;  %v9674_v21 = vpack.c.bf16 %v7984_v38, %v7983_v18 }
0x27b8   : > { %v5854_v32 = vadd.f32 1e-05, %v5851_v31  ;;  %v7985_v31 = vld [vmem:[%s11534_s24 + $0xf0] sm:$0xff] }
0x27ba   : > { %9903 = vrsqrt.f32 %v5854_v32  ;;  %v7986_v32 = vld [vmem:[%s11534_s24 + $0xf8] sm:$0xff] }
0x27bb   : > { %v9677_v27 = vpack.c.bf16 %v7986_v32, %v7985_v31 }
0x27bc   : > { %v9900_v22 = vpop.eup %9899 }
0x27bd   : > { %v5858_v26 = vmul.f32 %v9900_v22, %v5834_v34 }
0x27bf   : > { %v5867_v35 = vmul.f32 %v7942_v15, %v5858_v26 }
0x27c0   : > { %v9902_v14 = vpop.eup %9901 }
0x27c1   : > { %v11111_v44 = vadd.f32 %v7943_v23, %v5867_v35  ;;  %v5859_v8 = vmul.f32 %v9902_v14, %v5835_v1  ;;  %v7958_v1 = vld [vmem:[%s11537_s21 + $0x8] ss:$0 sm:$0xff]  ;;  %v8001_v35 = vld [vmem:[%s11534_s24 + $0x160] sm:$0xff] }
0x27c2   : > { %v8002_v14 = vld [vmem:[%s11534_s24 + $0x168] sm:$0xff] }
0x27c3   : > { %v5868_v46 = vmul.f32 %v7942_v15, %v5859_v8  ;;  %9062 = vmatmul.mubr.msk.f32.vlgmr.msra.gmra.mrb[80].mxu0 %vm1186_vm2, %v11111_v44  ;;  %v8003_v8 = vld [vmem:[%s11534_s24 + $0x170] sm:$0xff] }
0x27c4   : > { %v9904_v36 = vpop.eup %9903  ;;  %9064 = vmatprep.mubr.msk.f32.mxu0 %vm10016_vm12, %v10017_v55  ;;  %9656 = vmatpush3.bf16.msra.mxu0 %v9655_v43  ;;  %v9686_v43 = vpack.c.bf16 %v8002_v14, %v8001_v35  ;;  %v9689_v9 = vpack.c.bf16 %v8004_v45, %v8003_v8  ;;  %v7994_v8 = vld [vmem:[%s11534_s24 + $0x130] sm:$0xff]  ;;  %v7995_v45 = vld [vmem:[%s11534_s24 + $0x138] sm:$0xff] }
0x27c5   : > { %v11119_v49 = vadd.f32 %v7943_v23, %v5868_v46  ;;  %v5860_v13 = vmul.f32 %v9904_v36, %v5836_v5  ;;  %9657 = vmatprep.subr.bf16.mxu0 %v10015_v51 }
0x27c7   : > { %v5869_v39 = vmul.f32 %v7942_v15, %v5860_v13  ;;  %9065 = vmatmul.mubr.msk.f32.gmra.mrb[82].mxu0 %vm1186_vm2, %v11119_v49 }
0x27c8   : > { %9067 = vmatprep.mubr.msk.f32.mxu0 %vm10016_vm12, %v10017_v55  ;;  %9659 = vmatpush3.bf16.msra.mxu0 %v9658_v47 }
0x27c9   : > { %v11126_v50 = vadd.f32 %v7943_v23, %v5869_v39  ;;  %9660 = vmatprep.subr.bf16.mxu0 %v10015_v51 }
0x27cb   : > { %9068 = vmatmul.mubr.msk.f32.gmra.mrb[84].mxu0 %vm1186_vm2, %v11126_v50 }
0x27cc   : > { %9078 = vmatprep.mubr.msk.f32.mxu0 %vm10016_vm12, %v10017_v55 }
0x27cf   : > { %9079 = vmatmul.mubr.msk.f32.vlgmr.msra.gmra.mrb[86].mxu0 %vm1186_vm2, %v11111_v44 }
0x27d0   : > { %9081 = vmatprep.mubr.msk.f32.mxu0 %vm10016_vm12, %v10017_v55  ;;  %9662 = vmatpush3.bf16.msra.mxu0 %v9661_v54 }
0x27d1   : > { %9663 = vmatprep.subr.bf16.mxu0 %v10015_v51 }
0x27d3   : > { %9082 = vmatmul.mubr.msk.f32.gmra.mrb[88].mxu0 %vm1186_vm2, %v11119_v49 }
0x27d4   : > { %9084 = vmatprep.mubr.msk.f32.mxu0 %vm10016_vm12, %v10017_v55  ;;  %9665 = vmatpush3.bf16.msra.mxu0 %v9664_v58 }
0x27d5   : > { %9670 = vmatprep.subr.bf16.mxu0 %v10015_v51 }
0x27d7   : > { %9085 = vmatmul.mubr.msk.f32.gmra.mrb[90].mxu0 %vm1186_vm2, %v11126_v50 }
0x27d8   : > { %9095 = vmatprep.mubr.msk.f32.mxu0 %vm10016_vm12, %v10017_v55 }
0x27db   : > { %9096 = vmatmul.mubr.msk.f32.vlgmr.msra.gmra.mrb[92].mxu0 %vm1186_vm2, %v11111_v44 }
0x27dc   : > { %9098 = vmatprep.mubr.msk.f32.mxu0 %vm10016_vm12, %v10017_v55 }
0x27df   : > { %9099 = vmatmul.mubr.msk.f32.gmra.mrb[94].mxu0 %vm1186_vm2, %v11119_v49 }
0x27e0   : > { %9101 = vmatprep.mubr.msk.f32.mxu0 %vm10016_vm12, %v10017_v55 }
0x27e3   : > { %9102 = vmatmul.mubr.msk.f32.gmra.mrb[96].mxu0 %vm1186_vm2, %v11126_v50 }
0x27e4   : > { %9125 = vmatprep.mubr.msk.f32.mxu0 %vm10016_vm12, %v10017_v55 }
0x2896   : > { %v5967_v59 = vpop.f32.mrb[80].mxu0 }
0x2897   : > { %v9063_v60 = vpop.f32.mrb[81].mxu0  ;;  %v5968_v29 = vadd.f32 %v7949_v17, %v5967_v59 }
0x289a   : > { %v5972_v61 = vpop.f32.mrb[82].mxu0 }
0x289b   : > { %v9066_v62 = vpop.f32.mrb[83].mxu0  ;;  %v5973_v26 = vadd.f32 %v7949_v17, %v5972_v61 }
0x289e   : > { %v5977_v34 = vpop.f32.mrb[84].mxu0 }
0x289f   : > { %v9069_v52 = vpop.f32.mrb[85].mxu0  ;;  %v5978_v23 = vadd.f32 %v7949_v17, %v5977_v34 }
0x28a2   : > { %v6060_v63 = vpop.f32.mrb[86].mxu0 }
0x28a3   : > { %v9080_v0 = vpop.f32.mrb[87].mxu0  ;;  %v6061_v56 = vadd.f32 %v7958_v1, %v6060_v63 }
0x28a6   : > { %v6065_v2 = vpop.f32.mrb[88].mxu0 }
0x28a7   : > { %v6066_v3 = vadd.f32 %v7958_v1, %v6065_v2  ;;  %v9083_v4 = vpop.f32.mrb[89].mxu0  ;;  %v8006_v2 = vld [vmem:[%s11537_s21 + $0xb] ss:$0 sm:$0xff] }
0x28a9   : > { %v9667_v5 = vpack.c.bf16 %v6066_v3, %v6061_v56 }
0x28aa   : > { %v6070_v6 = vpop.f32.mrb[90].mxu0 }
0x28ab   : > { %v9086_v7 = vpop.f32.mrb[91].mxu0  ;;  %9669 = vmatpush3.bf16.xpose.msk.msra.mxu1 %vm10403_vm5, %v9667_v5  ;;  %v6071_v37 = vadd.f32 %v7958_v1, %v6070_v6 }
0x28ac   : > { %9108 = vmatprep.subr.mxu1 %v10017_v55 }
0x28ae   : > { %v6153_v11 = vpop.f32.mrb[92].mxu0 }
0x28af   : > { %v9097_v12 = vpop.f32.mrb[93].mxu0  ;;  %v6154_v20 = vadd.f32 %v7967_v16, %v6153_v11 }
0x28b2   : > { %v6158_v19 = vpop.f32.mrb[94].mxu0 }
0x28b3   : > { %v6159_v24 = vadd.f32 %v7967_v16, %v6158_v19  ;;  %v9100_v40 = vpop.f32.mrb[95].mxu0  ;;  %9109 = vmatpush3.xpose.msk.msra.mxu1 %vm1593_vm4, %v6071_v37 }
0x28b4   : > { %9673 = vmatprep.subr.bf16.mxu1 %v10015_v51 }
0x28b5   : > { %v9671_v30 = vpack.c.bf16 %v6159_v24, %v6154_v20 }
0x28b6   : > { %v6163_v22 = vpop.f32.mrb[96].mxu0  ;;  %9111 = vmatmul.mubr.msk.f32.vlgmr.msra.gmra.mrb[58].mxu1 %vm1593_vm4, %v5968_v29 }
0x28b7   : > { %v9103_v15 = vpop.f32.mrb[97].mxu0  ;;  %9672 = vmatpush3.bf16.msra.mxu0 %v9671_v30  ;;  %9113 = vmatprep.mubr.msk.f32.mxu1 %vm10016_vm12, %v10017_v55  ;;  %v6164_v41 = vadd.f32 %v7967_v16, %v6163_v22 }
0x28b8   : > { %9123 = vmatprep.subr.mxu0 %v10017_v55  ;;  %9675 = vmatpush3.bf16.msra.mxu1 %v9674_v21 }
0x28b9   : > { %9676 = vmatprep.subr.bf16.mxu1 %v10015_v51 }
0x28ba   : > { %9114 = vmatmul.mubr.msk.f32.gmra.mrb[60].mxu1 %vm1593_vm4, %v5973_v26 }
0x28bb   : > { %9124 = vmatpush3.msk.msra.mxu0 %vm4741_vm13, %v6164_v41  ;;  %9116 = vmatprep.mubr.msk.f32.mxu1 %vm10016_vm12, %v10017_v55  ;;  %v7992_v41 = vld [vmem:[%s11534_s24 + $0x120] sm:$0xff] }
0x28bc   : > { %9678 = vmatpush3.bf16.msra.mxu1 %v9677_v27  ;;  %9679 = vmatprep.subr.bf16.mxu0 %v10015_v51 }
0x28bd   : > { %9685 = vmatprep.subr.bf16.mxu1 %v10015_v51 }
0x28be   : > { %9117 = vmatmul.mubr.msk.f32.gmra.mrb[62].mxu1 %vm1593_vm4, %v5978_v23  ;;  %v7993_v23 = vld [vmem:[%s11534_s24 + $0x128] sm:$0xff] }
0x28bf   : > { %9142 = vmatprep.mubr.msk.f32.mxu1 %vm10016_vm12, %v10017_v55  ;;  %v9680_v14 = vpack.c.bf16 %v7993_v23, %v7992_v41  ;;  %v8020_v23 = vld [vmem:[%s11539_s18 + $0x30] sm:$0xff] }
0x28c2   : > { %9143 = vmatmul.mubr.msk.f32.vlgmr.msra.gmra.mrb[64].mxu1 %vm1186_vm2, %v11111_v44 }
0x28c3   : > { %9145 = vmatprep.mubr.msk.f32.mxu1 %vm10016_vm12, %v10017_v55  ;;  %9687 = vmatpush3.bf16.msra.mxu1 %v9686_v43 }
0x28c4   : > { %9688 = vmatprep.subr.bf16.mxu1 %v10015_v51 }
0x28c6   : > { %9146 = vmatmul.mubr.msk.f32.gmra.mrb[66].mxu1 %vm1186_vm2, %v11119_v49 }
0x28c7   : > { %9148 = vmatprep.mubr.msk.f32.mxu1 %vm10016_vm12, %v10017_v55  ;;  %9690 = vmatpush3.bf16.msra.mxu1 %v9689_v9 }
0x28c8   : > { %9695 = vmatprep.subr.bf16.mxu1 %v10015_v51 }
0x28ca   : > { %9149 = vmatmul.mubr.msk.f32.gmra.mrb[68].mxu1 %vm1186_vm2, %v11126_v50 }
0x28cb   : > { %9176 = vmatprep.mubr.msk.f32.mxu1 %vm10016_vm12, %v10017_v55 }
0x28ce   : > { %9177 = vmatmul.mubr.msk.f32.vlgmr.msra.gmra.mrb[70].mxu1 %vm1186_vm2, %v11111_v44 }
0x28cf   : > { %9179 = vmatprep.mubr.msk.f32.mxu1 %vm10016_vm12, %v10017_v55 }
0x28d2   : > { %9180 = vmatmul.mubr.msk.f32.gmra.mrb[72].mxu1 %vm1186_vm2, %v11119_v49 }
0x28d3   : > { %9182 = vmatprep.mubr.msk.f32.mxu1 %vm10016_vm12, %v10017_v55 }
0x28d6   : > { %9183 = vmatmul.mubr.msk.f32.gmra.mrb[74].mxu1 %vm1186_vm2, %v11126_v50 }
0x28d7   : > { %9206 = vmatprep.mubr.msk.f32.mxu1 %vm10016_vm12, %v10017_v55 }
0x2989   : > { %v6251_v46 = vpop.f32.mrb[58].mxu1 }
0x298a   : > { %v6265_v36 = vmul.f32 0.25, %v6251_v46  ;;  %v9112_v47 = vpop.f32.mrb[59].mxu1  ;;  %v9683_v46 = vpack.c.bf16 %v7995_v45, %v7994_v8 }
0x298c   : > { %v6268_v13 = vsel %vm4697_vm14, %v6265_v36, -inf }
0x298d   : > { %6269 = vmax.xlane.f32.xlu0 %v6268_v13  ;;  %v6256_v39 = vpop.f32.mrb[60].mxu1 }
0x298e   : > { %v6266_v53 = vmul.f32 0.25, %v6256_v39  ;;  %v9115_v42 = vpop.f32.mrb[61].mxu1 }
0x2990   : > { %v6271_v54 = vsel %vm4697_vm14, %v6266_v53, -inf }
0x2991   : > { %6272 = vmax.xlane.f32.xlu1 %v6271_v54  ;;  %v6261_v25 = vpop.f32.mrb[62].mxu1 }
0x2992   : > { %v6267_v57 = vmul.f32 0.25, %v6261_v25  ;;  %v9118_v58 = vpop.f32.mrb[63].mxu1 }
0x2993   : > { %v7997_v58 = vld [vmem:[%s11537_s21 + $0x9] ss:$0 sm:$0xff] }
0x2994   : > { %v6274_v59 = vsel %vm4704_vm15, %v6267_v57, -inf }
0x2995   : > { %6275 = vmax.xlane.f32.xlu0 %v6274_v59  ;;  %v11222_v60 = vpop.f32.mrb[64].mxu1 }
0x2996   : > { %v9144_v61 = vpop.f32.mrb[65].mxu1 }
0x2999   : > { %v11224_v62 = vpop.f32.mrb[66].mxu1 }
0x299a   : > { %v9147_v34 = vpop.f32.mrb[67].mxu1 }
0x299d   : > { %v11226_v52 = vpop.f32.mrb[68].mxu1 }
0x299e   : > { %v9150_v63 = vpop.f32.mrb[69].mxu1 }
0x29a1   : > { %v6661_v0 = vpop.f32.mrb[70].mxu1 }
0x29a2   : > { %v9178_v1 = vpop.f32.mrb[71].mxu1  ;;  %v6662_v3 = vadd.f32 %v8006_v2, %v6661_v0 }
0x29a5   : > { %v6666_v56 = vpop.f32.mrb[72].mxu1 }
0x29a6   : > { %v6667_v4 = vadd.f32 %v8006_v2, %v6666_v56  ;;  %v9181_v5 = vpop.f32.mrb[73].mxu1 }
0x29a8   : > { %v9696_v6 = vpack.c.bf16 %v6667_v4, %v6662_v3 }
0x29a9   : > { %v6671_v7 = vpop.f32.mrb[74].mxu1 }
0x29aa   : > { %v9184_v11 = vpop.f32.mrb[75].mxu1  ;;  %9697 = vmatpush3.bf16.msra.mxu1 %v9696_v6  ;;  %v6672_v12 = vadd.f32 %v8006_v2, %v6671_v7  ;;  %v7988_v2 = vld [vmem:[%s11537_s21 + $0x7] ss:$0 sm:$0xff] }
0x29ab   : > { %9204 = vmatprep.subr.mxu1 %v10017_v55  ;;  %v6476_v3 = vadd.f32 %v7988_v2, %v11222_v60  ;;  %v6481_v4 = vadd.f32 %v7988_v2, %v11224_v62  ;;  %v6486_v28 = vadd.f32 %v7988_v2, %v11226_v52 }
0x29ae   : > { %9205 = vmatpush3.msk.msra.mxu1 %vm4741_vm13, %v6672_v12 }
0x29af   : > { %9701 = vmatprep.subr.bf16.mxu1 %v10015_v51 }
0x2a1a   : > { %v6270_v16 = vpop.xlane.xlu0 %6269 }
0x2a1b   : > { %v6277_v17 = vsub.f32 %v6265_v36, %v6270_v16 }
0x2a1d   : > { %v6280_v37 = vmul.f32 1.442695, %v6277_v17 }
0x2a1e   : > { %v6273_v18 = vpop.xlane.xlu1 %6272 }
0x2a1f   : > { %9905 = vpow2.f32 %v6280_v37  ;;  %v6278_v38 = vsub.f32 %v6266_v53, %v6273_v18 }
0x2a21   : > { %v6282_v19 = vmul.f32 1.442695, %v6278_v38 }
0x2a22   : > { %v6276_v20 = vpop.xlane.xlu0 %6275 }
0x2a23   : > { %9907 = vpow2.f32 %v6282_v19  ;;  %v6279_v24 = vsub.f32 %v6267_v57, %v6276_v20 }
0x2a25   : > { %v6284_v40 = vmul.f32 1.442695, %v6279_v24 }
0x2a27   : > { %9909 = vpow2.f32 %v6284_v40 }
0x2a29   : > { %v9906_v29 = vpop.eup %9905 }
0x2a2a   : > { %v6286_v21 = vsel %vm4697_vm14, %v9906_v29, 0.0 }
0x2a2b   : > { %6287 = vadd.xlane.f32.xlu1 %v6286_v21 }
0x2a2d   : > { %v9908_v30 = vpop.eup %9907 }
0x2a2e   : > { %v6289_v31 = vsel %vm4697_vm14, %v9908_v30, 0.0 }
0x2a2f   : > { %6290 = vadd.xlane.f32.xlu0 %v6289_v31 }
0x2a31   : > { %v9910_v32 = vpop.eup %9909 }
0x2a32   : > { %v6292_v22 = vsel %vm4704_vm15, %v9910_v32, 0.0 }
0x2a33   : > { %6293 = vadd.xlane.f32.xlu1 %v6292_v22 }
0x2ab8   : > { %v6288_v15 = vpop.xlane.xlu1 %6287 }
0x2ab9   : > { %9911 = vrcp.f32 %v6288_v15 }
0x2abc   : > { %v6291_v26 = vpop.xlane.xlu0 %6290 }
0x2abd   : > { %9913 = vrcp.f32 %v6291_v26 }
0x2ac0   : > { %v6294_v27 = vpop.xlane.xlu1 %6293 }
0x2ac1   : > { %9915 = vrcp.f32 %v6294_v27 }
0x2ac3   : > { %v9912_v35 = vpop.eup %9911 }
0x2ac4   : > { %v6298_v43 = vmul.f32 %v9912_v35, %v9906_v29  ;;  %v8021_v35 = vld [vmem:[%s11539_s18 + $0x38] sm:$0xff] }
0x2ac6   : > { %9126 = vmatmul.mubr.msk.f32.vlgmr.msra.gmra.mrb[98].mxu0 %vm4697_vm14, %v6298_v43 }
0x2ac7   : > { %v9914_v9 = vpop.eup %9913  ;;  %9128 = vmatprep.mubr.msk.f32.mxu0 %vm10016_vm12, %v10017_v55  ;;  %9681 = vmatpush3.bf16.msra.mxu0 %v9680_v14  ;;  %v9699_v14 = vpack.c.bf16 %v8021_v35, %v8020_v23  ;;  %v8035_v23 = vld [vmem:[%s11541_s0 + $0x28] sm:$0xff] }
0x2ac8   : > { %v6299_v36 = vmul.f32 %v9914_v9, %v9908_v30  ;;  %9682 = vmatprep.subr.bf16.mxu0 %v10015_v51  ;;  %v7981_v9 = vld [vmem:[%s11539_s18 + $0x20] sm:$0xff] }
0x2aca   : > { %9129 = vmatmul.mubr.msk.f32.gmra.mrb[100].mxu0 %vm4697_vm14, %v6299_v36 }
0x2acb   : > { %v9916_v47 = vpop.eup %9915  ;;  %9131 = vmatprep.mubr.msk.f32.mxu0 %vm10016_vm12, %v10017_v55  ;;  %9684 = vmatpush3.bf16.msra.mxu0 %v9683_v46  ;;  %v7982_v46 = vld [vmem:[%s11539_s18 + $0x28] sm:$0xff] }
0x2acc   : > { %v6300_v13 = vmul.f32 %v9916_v47, %v9910_v32  ;;  %9691 = vmatprep.subr.bf16.mxu0 %v10015_v51  ;;  %v9702_v47 = vpack.c.bf16 %v7982_v46, %v7981_v9  ;;  %v8044_v9 = vld [vmem:[%s11542_s23 + $0x88] sm:$0xff] }
0x2ace   : > { %9132 = vmatmul.mubr.msk.f32.gmra.mrb[102].mxu0 %vm4697_vm14, %v6300_v13 }
0x2acf   : > { %9159 = vmatprep.mubr.msk.f32.mxu0 %vm10016_vm12, %v10017_v55 }
0x2ad2   : > { %9160 = vmatmul.mubr.msk.f32.vlgmr.msra.gmra.mrb[104].mxu0 %vm1186_vm2, %v11111_v44 }
0x2ad3   : > { %9162 = vmatprep.mubr.msk.f32.mxu0 %vm10016_vm12, %v10017_v55 }
0x2ad6   : > { %9163 = vmatmul.mubr.msk.f32.gmra.mrb[106].mxu0 %vm1186_vm2, %v11119_v49 }
0x2ad7   : > { %9165 = vmatprep.mubr.msk.f32.mxu0 %vm10016_vm12, %v10017_v55 }
0x2ada   : > { %9166 = vmatmul.mubr.msk.f32.gmra.mrb[108].mxu0 %vm1186_vm2, %v11126_v50 }
0x2adb   : > { %9191 = vmatprep.mubr.msk.f32.mxu0 %vm10016_vm12, %v10017_v55 }
0x2b99   : > { %v11262_v39 = vpop.f32.mrb[98].mxu0 }
0x2b9a   : > { %v9127_v53 = vpop.f32.mrb[99].mxu0 }
0x2b9d   : > { %v11264_v42 = vpop.f32.mrb[100].mxu0 }
0x2b9e   : > { %v9130_v44 = vpop.f32.mrb[101].mxu0 }
0x2ba1   : > { %v11266_v54 = vpop.f32.mrb[102].mxu0 }
0x2ba2   : > { %v9133_v25 = vpop.f32.mrb[103].mxu0 }
0x2ba5   : > { %v6568_v49 = vpop.f32.mrb[104].mxu0 }
0x2ba6   : > { %v9161_v57 = vpop.f32.mrb[105].mxu0  ;;  %v6569_v61 = vadd.f32 %v7997_v58, %v6568_v49 }
0x2ba9   : > { %v6573_v59 = vpop.f32.mrb[106].mxu0 }
0x2baa   : > { %v6574_v34 = vadd.f32 %v7997_v58, %v6573_v59  ;;  %v9164_v50 = vpop.f32.mrb[107].mxu0 }
0x2bac   : > { %v9692_v63 = vpack.c.bf16 %v6574_v34, %v6569_v61 }
0x2bad   : > { %v6578_v0 = vpop.f32.mrb[108].mxu0 }
0x2bae   : > { %v9167_v1 = vpop.f32.mrb[109].mxu0  ;;  %9694 = vmatpush3.bf16.xpose.msk.msra.mxu0 %vm10403_vm5, %v9692_v63  ;;  %v6579_v56 = vadd.f32 %v7997_v58, %v6578_v0 }
0x2baf   : > { %9189 = vmatprep.subr.mxu0 %v10017_v55 }
0x2bb6   : > { %9190 = vmatpush3.xpose.msk.msra.mxu0 %vm1593_vm4, %v6579_v56 }
0x2bb7   : > { %9698 = vmatprep.subr.bf16.mxu0 %v10015_v51 }
0x2bb9   : > { %9192 = vmatmul.mubr.msk.f32.vlgmr.msra.gmra.mrb[110].mxu0 %vm1593_vm4, %v6476_v3 }
0x2bba   : > { %9194 = vmatprep.mubr.msk.f32.mxu0 %vm10016_vm12, %v10017_v55  ;;  %9700 = vmatpush3.bf16.msra.mxu0 %v9699_v14  ;;  %v8036_v14 = vld [vmem:[%s11541_s0 + $0x30] sm:$0xff] }
0x2bbb   : > { %9704 = vmatprep.subr.bf16.mxu0 %v10015_v51 }
0x2bbd   : > { %9195 = vmatmul.mubr.msk.f32.gmra.mrb[112].mxu0 %vm1593_vm4, %v6481_v4  ;;  %v8029_v4 = vld [vmem:[%s11540_s4 + $0x1] ss:$0 sm:$0xff] }
0x2bbe   : > { %9197 = vmatprep.mubr.msk.f32.mxu0 %vm10016_vm12, %v10017_v55 }
0x2bc1   : > { %9198 = vmatmul.mubr.msk.f32.gmra.mrb[114].mxu0 %vm1593_vm4, %v6486_v28 }
0x2bc2   : > { %9219 = vmatprep.mubr.msk.f32.mxu0 %vm10016_vm12, %v10017_v55 }
0x2c8c   : > { %v6759_v60 = vpop.f32.mrb[110].mxu0 }
0x2c8d   : > { %v6773_v5 = vmul.f32 0.25, %v6759_v60  ;;  %v9193_v6 = vpop.f32.mrb[111].mxu0 }
0x2c8f   : > { %v6776_v7 = vsel %vm4697_vm14, %v6773_v5, -inf }
0x2c90   : > { %6777 = vmax.xlane.f32.xlu0 %v6776_v7  ;;  %v6764_v11 = vpop.f32.mrb[112].mxu0 }
0x2c91   : > { %v6774_v62 = vmul.f32 0.25, %v6764_v11  ;;  %v9196_v12 = vpop.f32.mrb[113].mxu0 }
0x2c93   : > { %v6779_v16 = vsel %vm4697_vm14, %v6774_v62, -inf }
0x2c94   : > { %6780 = vmax.xlane.f32.xlu1 %v6779_v16  ;;  %v6769_v17 = vpop.f32.mrb[114].mxu0 }
0x2c95   : > { %v6775_v37 = vmul.f32 0.25, %v6769_v17  ;;  %v9199_v52 = vpop.f32.mrb[115].mxu0 }
0x2c97   : > { %v6782_v18 = vsel %vm4704_vm15, %v6775_v37, -inf }
0x2c98   : > { %6783 = vmax.xlane.f32.xlu0 %v6782_v18 }
0x2d1d   : > { %v6778_v38 = vpop.xlane.xlu0 %6777 }
0x2d1e   : > { %v6785_v19 = vsub.f32 %v6773_v5, %v6778_v38 }
0x2d20   : > { %v6788_v20 = vmul.f32 1.442695, %v6785_v19 }
0x2d21   : > { %v6781_v24 = vpop.xlane.xlu1 %6780 }
0x2d22   : > { %9917 = vpow2.f32 %v6788_v20  ;;  %v6786_v40 = vsub.f32 %v6774_v62, %v6781_v24 }
0x2d24   : > { %v6790_v29 = vmul.f32 1.442695, %v6786_v40 }
0x2d25   : > { %v6784_v21 = vpop.xlane.xlu0 %6783 }
0x2d26   : > { %9919 = vpow2.f32 %v6790_v29  ;;  %v6787_v30 = vsub.f32 %v6775_v37, %v6784_v21 }
0x2d28   : > { %v6792_v31 = vmul.f32 1.442695, %v6787_v30 }
0x2d2a   : > { %9921 = vpow2.f32 %v6792_v31 }
0x2d2c   : > { %v9918_v32 = vpop.eup %9917 }
0x2d2d   : > { %v6794_v22 = vsel %vm4697_vm14, %v9918_v32, 0.0 }
0x2d2e   : > { %6795 = vadd.xlane.f32.xlu1 %v6794_v22 }
0x2d30   : > { %v9920_v15 = vpop.eup %9919 }
0x2d31   : > { %v6797_v26 = vsel %vm4697_vm14, %v9920_v15, 0.0 }
0x2d32   : > { %6798 = vadd.xlane.f32.xlu0 %v6797_v26 }
0x2d34   : > { %v9922_v27 = vpop.eup %9921 }
0x2d35   : > { %v6800_v41 = vsel %vm4704_vm15, %v9922_v27, 0.0 }
0x2d36   : > { %6801 = vadd.xlane.f32.xlu1 %v6800_v41  ;;  %v8034_v41 = vld [vmem:[%s11541_s0 + $0x20] sm:$0xff] }
0x2d37   : > { %v9705_v35 = vpack.c.bf16 %v8035_v23, %v8034_v41 }
0x2dbb   : > { %v6796_v43 = vpop.xlane.xlu1 %6795 }
0x2dbc   : > { %9923 = vrcp.f32 %v6796_v43  ;;  %v8037_v43 = vld [vmem:[%s11541_s0 + $0x38] sm:$0xff] }
0x2dbf   : > { %v6799_v8 = vpop.xlane.xlu0 %6798 }
0x2dc0   : > { %9925 = vrcp.f32 %v6799_v8  ;;  %v9708_v8 = vpack.c.bf16 %v8037_v43, %v8036_v14 }
0x2dc3   : > { %v6802_v45 = vpop.xlane.xlu1 %6801 }
0x2dc4   : > { %9927 = vrcp.f32 %v6802_v45  ;;  %v8043_v45 = vld [vmem:[%s11542_s23 + $0x80] sm:$0xff] }
0x2dc5   : > { %v9711_v46 = vpack.c.bf16 %v8044_v9, %v8043_v45 }
0x2dc6   : > { %v9924_v36 = vpop.eup %9923 }
0x2dc7   : > { %v6806_v13 = vmul.f32 %v9924_v36, %v9918_v32 }
0x2dc9   : > { %9207 = vmatmul.mubr.msk.f32.vlgmr.msra.gmra.mrb[76].mxu1 %vm4697_vm14, %v6806_v13 }
0x2dca   : > { %v9926_v53 = vpop.eup %9925  ;;  %9209 = vmatprep.mubr.msk.f32.mxu1 %vm10016_vm12, %v10017_v55  ;;  %9703 = vmatpush3.bf16.msra.mxu1 %v9702_v47 }
0x2dcb   : > { %v6807_v44 = vmul.f32 %v9926_v53, %v9920_v15  ;;  %9710 = vmatprep.subr.bf16.mxu1 %v10015_v51 }
0x2dcd   : > { %9210 = vmatmul.mubr.msk.f32.gmra.mrb[78].mxu1 %vm4697_vm14, %v6807_v44 }
0x2dce   : > { %v9928_v25 = vpop.eup %9927  ;;  %9212 = vmatprep.mubr.msk.f32.mxu1 %vm10016_vm12, %v10017_v55 }
0x2dcf   : > { %v6808_v49 = vmul.f32 %v9928_v25, %v9922_v27 }
0x2dd1   : > { %9213 = vmatmul.mubr.msk.f32.gmra.mrb[80].mxu1 %vm4697_vm14, %v6808_v49 }
0x2dd2   : > { %9232 = vmatprep.mubr.msk.f32.mxu1 %vm10016_vm12, %v10017_v55 }
0x2dd5   : > { %9233 = vmatmul.mubr.msk.f32.vlgmr.msra.gmra.mrb[82].mxu1 %vm1593_vm4, %v11262_v39 }
0x2dd6   : > { %9235 = vmatprep.mubr.msk.f32.mxu1 %vm10016_vm12, %v10017_v55  ;;  %9712 = vmatpush3.bf16.msra.mxu1 %v9711_v46 }
0x2dd7   : > { %9713 = vmatprep.subr.bf16.mxu1 %v10015_v51 }
0x2dd9   : > { %9236 = vmatmul.mubr.msk.f32.gmra.mrb[84].mxu1 %vm1593_vm4, %v11264_v42 }
0x2dda   : > { %9238 = vmatprep.mubr.msk.f32.mxu1 %vm10016_vm12, %v10017_v55 }
0x2ddd   : > { %9239 = vmatmul.mubr.msk.f32.gmra.mrb[86].mxu1 %vm1593_vm4, %v11266_v54 }
0x2dde   : > { %9290 = vmatprep.mubr.msk.f32.mxu1 %vm10016_vm12, %v10017_v55 }
0x2e9c   : > { %v6887_v57 = vpop.f32.mrb[76].mxu1 }
0x2e9d   : > { %v9208_v58 = vpop.f32.mrb[77].mxu1  ;;  %9220 = vmatmul.mubr.msk.f32.vlgmr.msra.gmra.mrb[116].mxu0 %vm1593_vm4, %v6887_v57 }
0x2e9e   : > { %9222 = vmatprep.mubr.msk.f32.mxu0 %vm10016_vm12, %v10017_v55  ;;  %9706 = vmatpush3.bf16.msra.mxu0 %v9705_v35 }
0x2e9f   : > { %9707 = vmatprep.subr.bf16.mxu0 %v10015_v51 }
0x2ea0   : > { %v6892_v39 = vpop.f32.mrb[78].mxu1 }
0x2ea1   : > { %v9211_v59 = vpop.f32.mrb[79].mxu1  ;;  %9223 = vmatmul.mubr.msk.f32.gmra.mrb[118].mxu0 %vm1593_vm4, %v6892_v39 }
0x2ea2   : > { %9225 = vmatprep.mubr.msk.f32.mxu0 %vm10016_vm12, %v10017_v55  ;;  %9709 = vmatpush3.bf16.msra.mxu0 %v9708_v8  ;;  %v8032_v59 = vld [vmem:[%s11543_s16 + $0x1] ss:$0 sm:$0xff] }
0x2ea4   : > { %v6897_v42 = vpop.f32.mrb[80].mxu1 }
0x2ea5   : > { %v9214_v54 = vpop.f32.mrb[81].mxu1  ;;  %9226 = vmatmul.mubr.msk.f32.gmra.mrb[120].mxu0 %vm1593_vm4, %v6897_v42 }
0x2ea6   : > { %9249 = vmatprep.mubr.msk.f32.mxu0 %vm10016_vm12, %v10017_v55  ;;  %v8033_v54 = vld [vmem:[%s11544_s22 + $0x1] ss:$0 sm:$0xff] }
0x2ea8   : > { %v7068_v61 = vpop.f32.mrb[82].mxu1 }
0x2ea9   : > { %v9234_v34 = vpop.f32.mrb[83].mxu1 }
0x2eac   : > { %v7073_v50 = vpop.f32.mrb[84].mxu1 }
0x2ead   : > { %v9237_v63 = vpop.f32.mrb[85].mxu1 }
0x2eb0   : > { %v7078_v0 = vpop.f32.mrb[86].mxu1 }
0x2eb1   : > { %v9240_v1 = vpop.f32.mrb[87].mxu1 }
0x2f70   : > { %v6979_v2 = vpop.f32.mrb[116].mxu0 }
0x2f71   : > { %v7069_v56 = vadd.f32 %v7068_v61, %v6979_v2  ;;  %v9221_v3 = vpop.f32.mrb[117].mxu0 }
0x2f73   : > { %v7082_v28 = vadd.f32 %v7069_v56, %v11081_v33 }
0x2f74   : > { %v6984_v60 = vpop.f32.mrb[118].mxu0 }
0x2f75   : > { %v11331_v5 = vadd.f32 %v8029_v4, %v7082_v28  ;;  %v7074_v6 = vadd.f32 %v7073_v50, %v6984_v60  ;;  %v9224_v7 = vpop.f32.mrb[119].mxu0  ;;  %v8045_v28 = vld [vmem:[%s11542_s23 + $0x90] sm:$0xff]  ;;  %v8046_v60 = vld [vmem:[%s11542_s23 + $0x98] sm:$0xff] }
0x2f76   : > { %v8047_v7 = vld [vmem:[%s11542_s23 + $0xa0] sm:$0xff] }
0x2f77   : > { %v7083_v11 = vadd.f32 %v7074_v6, %v11086_v10  ;;  %v7100_v62 = vsel %vm1186_vm2, %v11331_v5, 0.0  ;;  %v9714_v6 = vpack.c.bf16 %v8046_v60, %v8045_v28  ;;  %v7401_v60 = vld [vmem:[%s11547_s17 + $0x10] sm:$0xff] }
0x2f78   : > { %7101 = vadd.xlane.f32.xlu0 %v7100_v62  ;;  %v6989_v12 = vpop.f32.mrb[120].mxu0 }
0x2f79   : > { %v11336_v16 = vadd.f32 %v8029_v4, %v7083_v11  ;;  %v7079_v17 = vadd.f32 %v7078_v0, %v6989_v12  ;;  %v9227_v37 = vpop.f32.mrb[121].mxu0  ;;  %9715 = vmatpush3.bf16.msra.mxu1 %v9714_v6  ;;  %v8048_v11 = vld [vmem:[%s11542_s23 + $0xa8] sm:$0xff]  ;;  %v8049_v12 = vld [vmem:[%s11542_s23 + $0xb0] sm:$0xff]  ;;  %v7402_v6 = vld [vmem:[%s11547_s17 + $0x18] sm:$0xff] }
0x2f7a   : > { %9716 = vmatprep.subr.bf16.mxu1 %v10015_v51  ;;  %v9717_v62 = vpack.c.bf16 %v8048_v11, %v8047_v7  ;;  %v9738_v7 = vpack.c.bf16 %v7402_v6, %v7401_v60  ;;  %v8060_v11 = vld [vmem:[%s11546_s8 + $0x1] ss:$0 sm:$0xff] }
0x2f7b   : > { %v7084_v52 = vadd.f32 %v7079_v17, %v11091_v48  ;;  %v7103_v33 = vsel %vm1186_vm2, %v11336_v16, 0.0  ;;  %v8050_v17 = vld [vmem:[%s11542_s23 + $0xb8] sm:$0xff] }
0x2f7c   : > { %7104 = vadd.xlane.f32.xlu1 %v7103_v33  ;;  %v9720_v37 = vpack.c.bf16 %v8050_v17, %v8049_v12  ;;  %v8052_v33 = vld [vmem:[%s11542_s23 + $0xc8] sm:$0xff] }
0x2f7d   : > { %v11341_v18 = vadd.f32 %v8029_v4, %v7084_v52  ;;  %9718 = vmatpush3.bf16.msra.mxu1 %v9717_v62  ;;  %v8051_v52 = vld [vmem:[%s11542_s23 + $0xc0] sm:$0xff] }
0x2f7e   : > { %9719 = vmatprep.subr.bf16.mxu1 %v10015_v51 }
0x2f7f   : > { %v7106_v10 = vsel %vm1190_vm1, %v11341_v18, 0.0 }
0x2f80   : > { %7107 = vadd.xlane.f32.xlu0 %v7106_v10  ;;  %v9723_v10 = vpack.c.bf16 %v8052_v33, %v8051_v52 }
0x2f81   : > { %9721 = vmatpush3.bf16.msra.mxu1 %v9720_v37 }
0x2f82   : > { %9722 = vmatprep.subr.bf16.mxu1 %v10015_v51 }
0x2f85   : > { %9724 = vmatpush3.bf16.msra.mxu1 %v9723_v10 }
0x2f86   : > { %9725 = vmatprep.subr.bf16.mxu1 %v10015_v51 }
0x3005   : > { %v7102_v38 = vpop.xlane.xlu0 %7101 }
0x3006   : > { %v7109_v19 = vmul.f32 0.03125, %v7102_v38  ;;  %v8053_v38 = vld [vmem:[%s11542_s23 + $0xd0] sm:$0xff] }
0x3008   : > { %v7112_v20 = vsub.f32 %v11331_v5, %v7109_v19  ;;  %v8054_v19 = vld [vmem:[%s11542_s23 + $0xd8] sm:$0xff] }
0x3009   : > { %v7105_v24 = vpop.xlane.xlu1 %7104 }
0x300a   : > { %v7110_v40 = vmul.f32 0.03125, %v7105_v24  ;;  %v7115_v29 = vmul.f32 %v7112_v20, %v7112_v20  ;;  %v8055_v24 = vld [vmem:[%s11542_s23 + $0xe0] sm:$0xff] }
0x300c   : > { %v7113_v48 = vsub.f32 %v11336_v16, %v7110_v40  ;;  %v7118_v21 = vsel %vm1186_vm2, %v7115_v29, 0.0  ;;  %v8056_v40 = vld [vmem:[%s11542_s23 + $0xe8] sm:$0xff] }
0x300d   : > { %7119 = vadd.xlane.f32.xlu1 %v7118_v21  ;;  %v7108_v30 = vpop.xlane.xlu0 %7107  ;;  %v9729_v29 = vpack.c.bf16 %v8056_v40, %v8055_v24  ;;  %v8058_v21 = vld [vmem:[%s11542_s23 + $0xf8] sm:$0xff] }
0x300e   : > { %v7111_v31 = vmul.f32 0.03125, %v7108_v30  ;;  %v7116_v32 = vmul.f32 %v7113_v48, %v7113_v48 }
0x3010   : > { %v7114_v22 = vsub.f32 %v11341_v18, %v7111_v31  ;;  %v7121_v15 = vsel %vm1186_vm2, %v7116_v32, 0.0  ;;  %v8039_v31 = vld [vmem:[%s11545_s26 + $0x1] ss:$0 sm:$0xff] }
0x3011   : > { %7122 = vadd.xlane.f32.xlu0 %v7121_v15 }
0x3012   : > { %v7117_v26 = vmul.f32 %v7114_v22, %v7114_v22 }
0x3014   : > { %v7124_v27 = vsel %vm1190_vm1, %v7117_v26, 0.0 }
0x3015   : > { %7125 = vadd.xlane.f32.xlu1 %v7124_v27 }
0x309a   : > { %v7120_v36 = vpop.xlane.xlu1 %7119 }
0x309b   : > { %v7127_v47 = vmul.f32 0.03125, %v7120_v36 }
0x309d   : > { %v7130_v13 = vadd.f32 1e-05, %v7127_v47 }
0x309e   : > { %v7123_v53 = vpop.xlane.xlu0 %7122 }
0x309f   : > { %9929 = vrsqrt.f32 %v7130_v13  ;;  %v7128_v44 = vmul.f32 0.03125, %v7123_v53 }
0x30a1   : > { %v7131_v25 = vadd.f32 1e-05, %v7128_v44 }
0x30a2   : > { %v7126_v49 = vpop.xlane.xlu1 %7125 }
0x30a3   : > { %9931 = vrsqrt.f32 %v7131_v25  ;;  %v7129_v57 = vmul.f32 0.03125, %v7126_v49 }
0x30a5   : > { %v7132_v58 = vadd.f32 1e-05, %v7129_v57 }
0x30a7   : > { %9933 = vrsqrt.f32 %v7132_v58 }
0x30a9   : > { %v9930_v39 = vpop.eup %9929 }
0x30aa   : > { %v7136_v42 = vmul.f32 %v9930_v39, %v7112_v20  ;;  %v9726_v20 = vpack.c.bf16 %v8054_v19, %v8053_v38 }
0x30ac   : > { %v7145_v61 = vmul.f32 %v8032_v59, %v7136_v42  ;;  %9727 = vmatpush3.bf16.msra.mxu1 %v9726_v20 }
0x30ad   : > { %v9932_v34 = vpop.eup %9931  ;;  %9728 = vmatprep.subr.bf16.mxu1 %v10015_v51 }
0x30ae   : > { %v7154_v50 = vadd.f32 %v8033_v54, %v7145_v61  ;;  %v7137_v63 = vmul.f32 %v9932_v34, %v7113_v48  ;;  %v8057_v48 = vld [vmem:[%s11542_s23 + $0xf0] sm:$0xff] }
0x30af   : > { %v9732_v30 = vpack.c.bf16 %v8058_v21, %v8057_v48 }
0x30b0   : > { %9250 = vmatmul.mubr.msk.f32.vlgmr.msra.gmra.mrb[122].mxu0 %vm1186_vm2, %v7154_v50  ;;  %v7146_v0 = vmul.f32 %v8032_v59, %v7137_v63  ;;  %9730 = vmatpush3.bf16.msra.mxu1 %v9729_v29  ;;  %v8061_v29 = vld [vmem:[%s11548_s25] ss:$0 sm:$0xff] }
0x30b1   : > { %v9934_v1 = vpop.eup %9933  ;;  %9252 = vmatprep.mubr.msk.f32.mxu0 %vm10016_vm12, %v10017_v55  ;;  %9731 = vmatprep.subr.bf16.mxu1 %v10015_v51 }
0x30b2   : > { %v7155_v2 = vadd.f32 %v8033_v54, %v7146_v0  ;;  %v7138_v56 = vmul.f32 %v9934_v1, %v7114_v22 }
0x30b4   : > { %9253 = vmatmul.mubr.msk.f32.gmra.mrb[124].mxu0 %vm1186_vm2, %v7155_v2  ;;  %v7147_v3 = vmul.f32 %v8032_v59, %v7138_v56  ;;  %9733 = vmatpush3.bf16.msra.mxu1 %v9732_v30 }
0x30b5   : > { %9255 = vmatprep.mubr.msk.f32.mxu0 %vm10016_vm12, %v10017_v55 }
0x30b6   : > { %v7156_v4 = vadd.f32 %v8033_v54, %v7147_v3  ;;  %v7399_v3 = vld [vmem:[%s11547_s17] sm:$0xff] }
0x30b8   : > { %9256 = vmatmul.mubr.msk.f32.gmra.mrb[126].mxu0 %vm1186_vm2, %v7156_v4  ;;  %v7400_v4 = vld [vmem:[%s11547_s17 + $0x8] sm:$0xff] }
0x30b9   : > { %v9734_v28 = vpack.c.bf16 %v7400_v4, %v7399_v3 }
0x30bb   : > { %9735 = vmatprep.subr.bf16.mxu0 %v9734_v28 }
0x30bc   : > { %9737 = vmatpush3.bf16.msra.mxu0 %v9734_v28 }
0x30bd   : > { %9739 = vmatprep.subr.bf16.mxu0 %v9738_v7 }
0x30c0   : > { %9741 = vmatpush3.bf16.msra.mxu0 %v9738_v7 }
0x3183   : > { %v7245_v32 = vpop.f32.mrb[122].mxu0 }
0x3184   : > { %v7246_v22 = vadd.f32 %v8039_v31, %v7245_v32  ;;  %v9251_v15 = vpop.f32.mrb[123].mxu0 }
0x3186   : > { %v7259_v26 = vmul.f32 %v7246_v22, %v7246_v22 }
0x3187   : > { %v7250_v27 = vpop.f32.mrb[124].mxu0 }
0x3188   : > { %v7262_v41 = vmul.f32 %v7259_v26, %v7246_v22  ;;  %v7251_v23 = vadd.f32 %v8039_v31, %v7250_v27  ;;  %v9254_v35 = vpop.f32.mrb[125].mxu0 }
0x318a   : > { %v7265_v14 = vmul.f32 0.044715, %v7262_v41  ;;  %v7260_v43 = vmul.f32 %v7251_v23, %v7251_v23 }
0x318b   : > { %v7255_v8 = vpop.f32.mrb[126].mxu0 }
0x318c   : > { %v7268_v45 = vadd.f32 %v7265_v14, %v7246_v22  ;;  %v7263_v9 = vmul.f32 %v7260_v43, %v7251_v23  ;;  %v7256_v46 = vadd.f32 %v8039_v31, %v7255_v8  ;;  %v9257_v51 = vpop.f32.mrb[127].mxu0 }
0x318e   : > { %v7271_v36 = vmul.f32 0.7978846, %v7268_v45  ;;  %v7266_v47 = vmul.f32 0.044715, %v7263_v9  ;;  %v7261_v13 = vmul.f32 %v7256_v46, %v7256_v46 }
0x3190   : > { %9935 = vtanh.f32 %v7271_v36  ;;  %v7269_v53 = vadd.f32 %v7266_v47, %v7251_v23  ;;  %v7264_v44 = vmul.f32 %v7261_v13, %v7256_v46 }
0x3192   : > { %v7272_v25 = vmul.f32 0.7978846, %v7269_v53  ;;  %v7267_v49 = vmul.f32 0.044715, %v7264_v44 }
0x3194   : > { %v7270_v57 = vadd.f32 %v7267_v49, %v7256_v46  ;;  %9937 = vtanh.f32 %v7272_v25 }
0x3196   : > { %v7273_v58 = vmul.f32 0.7978846, %v7270_v57 }
0x3198   : > { %9939 = vtanh.f32 %v7273_v58 }
0x319a   : > { %v9936_v39 = vpop.eup %9935 }
0x319b   : > { %v7277_v59 = vadd.f32 1.0, %v9936_v39 }
0x319d   : > { %v7280_v42 = vmul.f32 0.5, %v7277_v59 }
0x319e   : > { %v9938_v54 = vpop.eup %9937 }
0x319f   : > { %v7283_v61 = vmul.f32 %v7280_v42, %v7246_v22  ;;  %v7278_v34 = vadd.f32 1.0, %v9938_v54 }
0x31a1   : > { %9291 = vmatmul.mubr.f32.vlgmr.msra.gmra.mrb[88].mxu1 %v7283_v61  ;;  %v7281_v50 = vmul.f32 0.5, %v7278_v34 }
0x31a2   : > { %v9940_v63 = vpop.eup %9939  ;;  %9293 = vmatprep.mubr.msk.f32.mxu1 %vm10016_vm12, %v10017_v55 }
0x31a3   : > { %v7284_v0 = vmul.f32 %v7281_v50, %v7251_v23  ;;  %v7279_v1 = vadd.f32 1.0, %v9940_v63 }
0x31a5   : > { %9294 = vmatmul.mubr.f32.gmra.mrb[90].mxu1 %v7284_v0  ;;  %v7282_v2 = vmul.f32 0.5, %v7279_v1 }
0x31a6   : > { %9296 = vmatprep.mubr.msk.f32.mxu1 %vm10016_vm12, %v10017_v55 }
0x31a7   : > { %v7285_v56 = vmul.f32 %v7282_v2, %v7256_v46 }
0x31a9   : > { %9297 = vmatmul.mubr.f32.gmra.mrb[92].mxu1 %v7285_v56 }
0x3274   : > { %v7377_v62 = vpop.f32.mrb[88].mxu1 }
0x3275   : > { %v7378_v12 = vadd.f32 %v8060_v11, %v7377_v62  ;;  %v9292_v17 = vpop.f32.mrb[89].mxu1 }
0x3277   : > { %v7391_v37 = vadd.f32 %v7378_v12, %v11331_v5 }
0x3278   : > { %v7382_v55 = vpop.f32.mrb[90].mxu1 }
0x3279   : > { %7394 = vst.msk [vmem:[#allocation5] sm:$0xff] %vm1186_vm2, %v7391_v37  ;;  %v7383_v52 = vadd.f32 %v8060_v11, %v7382_v55  ;;  %v9295_v33 = vpop.f32.mrb[91].mxu1 }
0x327b   : > { %v7392_v10 = vadd.f32 %v7383_v52, %v11336_v16 }
0x327c   : > { %v7387_v38 = vpop.f32.mrb[92].mxu1 }
0x327d   : > { %7395 = vst.msk [vmem:[#allocation5 + $0x8] sm:$0xff] %vm1186_vm2, %v7392_v10  ;;  %v7388_v19 = vadd.f32 %v8060_v11, %v7387_v38  ;;  %v9298_v20 = vpop.f32.mrb[93].mxu1 }
0x327f   : > { %v7393_v24 = vadd.f32 %v7388_v19, %v11341_v18 }
0x3281   : > { %7396 = vst.msk [vmem:[#allocation5 + $0x10] sm:$0x1] %vm1190_vm1, %v7393_v24 }
0x3284   : > { %v7397_v5 = vld [vmem:[#allocation5 + $0x1] sm:$0xff] }
0x3285   : > { %9307 = vmatprep.mubr.msk.f32.mxu0 %vm1186_vm2, %v7397_v5 }
0x3288   : > { %v7398_v40 = vld [vmem:[#allocation5 + $0x9] sm:$0xff] }
0x3289   : > { %9308 = vmatmul.mubr.msk.f32.vlgmr.msra.gmra.mrb[128].mxu0 %vm1186_vm2, %v7398_v40 }
0x335c   : > { %v9309_v48 = vpop.f32.mrb[128].mxu0 }
0x335d   : > { %v7488_v16 = vadd.f32 %v9309_v48, %v8061_v29  ;;  %v7482_v21 = vpop.f32.mrb[129].mxu0 }
0x335e   : > { %v7483_v30 = vadd.f32 %v8061_v29, %v7482_v21 }
0x335f   : > { %7492 = vst.msk [vmem:[%s1084_s3 + $0x8] sm:$0xff] %vm1100_vm0, %v7488_v16 }
0x3360   : > { %7491 = vst.msk [vmem:[%s1084_s3] sm:$0xff] %vm1100_vm0, %v7483_v30 }
0x3361 PF: > { %s11552_s6 = sld [smem:[#allocation44_spill]] }
0x3367   : > { %s95_s27 = sadd.s32 1, %s11552_s6  }
0x3368   : > { %p92_p0 = scmp.ge.s32.totalorder %s95_s27, 4  }
0x336a   :  { %94 = sbr.rel (!%p92_p0) target bundleno = 102 (0x66), region = 323 }

</bundles_post_ra>
